<compile_context>
chip_gen: v5e
topology: v5e:2x2
jax: 0.10.0
libtpu: 0.0.40
codegen_flags: <defaults>
</compile_context>

<pallas_src>
import functools

import jax
import jax.numpy as jnp
import numpy as np
from jax import lax
from jax.experimental import pallas as pl
from jax.experimental.pallas import tpu as pltpu

NEG_SLOPE = 0.1  # act = LeakyReLU(0.1)


def _round_up(x, m):
    return (x + m - 1) // m * m


def _leaky(v):
    return jnp.where(v >= 0, v, NEG_SLOPE * v)


# ----------------------------- fused kernel ------------------------------- #
def _conv3x3_vpu(slab_ref, w_ref, b_ref, *, C, H, out_w):
    """3x3 conv from a zero-haloed slab as 9*C*C scalar-weight VPU FMAs.

    slab_ref: (C, SR, SL) VMEM; channel ci's activation row r / col c sits at
              slab_ref[ci, 8 + r, off + c] surrounded by zeros.
    Tap (ky, kx) of the output (which lands at column offset off-1) is the
    windowed read slab_ref[ci, 7+ky : 7+ky+H, kx : kx+out_w].
    w_ref: (C*C*9,) f32 SMEM, index ((co*C+ci)*3+ky)*3+kx  (OIHW order).
    Returns a list of C accumulators of shape (H, out_w) with bias added.
    """
    accs = [None] * C
    for ky in range(3):
        for kx in range(3):
            for ci in range(C):
                tap = slab_ref[ci, 7 + ky:7 + ky + H, kx:kx + out_w]
                for co in range(C):
                    w = w_ref[((co * C + ci) * 3 + ky) * 3 + kx]
                    p = tap * w
                    accs[co] = p if accs[co] is None else accs[co] + p
    return [accs[co] + b_ref[co] for co in range(C)]


def _block_kernel(x_ref, wm_ref, bm_ref, w1_ref, b1_ref, w2_ref, b2_ref,
                  o_ref, slab_a, slab_b, *, C, H, W):
    """One grid step == one image of the batch.

    x_ref:  (2C, H, W+2) input, image columns at lane offset 2 (cols 0..1 zero)
    w*/b*:  flat f32 SMEM scalar arrays
    o_ref:  (C, H, W) NCHW output block
    slab_a/slab_b: (C, SR, SL) f32 VMEM halo slabs for the two intermediates
    """
    C2 = 2 * C
    W2 = W + 2
    SR, SL = slab_a.shape[1], slab_a.shape[2]

    # Interior masks built in-kernel (no mask DMA): valid image columns sit at
    # lane offset 2 after the merge and at lane offset 1 after conv1.
    col = lax.broadcasted_iota(jnp.int32, (H, W2), 1)
    keep_merge = (col >= 2).astype(jnp.float32)
    keep_c1 = ((col >= 1) & (col < 1 + W)).astype(jnp.float32)

    zeros_slab = jnp.zeros((C, SR, SL), jnp.float32)

    # ---- conv_merge (1x1) + act -> slab A (rows 8.., image at lanes 2..) --
    slab_a[...] = zeros_slab
    for co in range(C):
        acc = None
        for ci in range(C2):
            p = x_ref[ci] * wm_ref[co * C2 + ci]
            acc = p if acc is None else acc + p
        y = _leaky(acc + bm_ref[co]) * keep_merge
        slab_a[co, 8:8 + H, 0:W2] = y

    # ---- conv1 (3x3, pad 1) + act -> slab B (rows 8.., image at lanes 1..) -
    slab_b[...] = zeros_slab
    y1 = _conv3x3_vpu(slab_a, w1_ref, b1_ref, C=C, H=H, out_w=W2)
    for co in range(C):
        slab_b[co, 8:8 + H, 0:W2] = _leaky(y1[co]) * keep_c1

    # ---- conv2 (3x3, pad 1), no activation -> NCHW output -----------------
    y2 = _conv3x3_vpu(slab_b, w2_ref, b2_ref, C=C, H=H, out_w=W)
    for co in range(C):
        o_ref[co] = y2[co].astype(o_ref.dtype)


# ------------------------------- wrapper ----------------------------------- #
def block_forward(x_nchw, params):
    """NCHW float32 forward pass of Block via one fused Pallas kernel."""
    N, C2, H, W = x_nchw.shape
    C = params["w_merge"].shape[0]
    assert C2 == 2 * C
    W2 = W + 2

    # Only wrapper-side data op: put the image at lane offset 2 so the two
    # chained 3x3 convs only ever need non-negative window offsets.
    x = jnp.pad(x_nchw, ((0, 0), (0, 0), (0, 0), (2, 0)))

    # Scalar conv weights / biases -> flat f32 arrays for SMEM.
    wm = params["w_merge"][:, :, 0, 0].reshape(-1)     # (C*2C,)
    w1 = params["w1"].reshape(-1)                      # (C*C*9,)  OIHW order
    w2 = params["w2"].reshape(-1)
    bm = params["b_merge"].reshape(-1)
    b1 = params["b1"].reshape(-1)
    b2 = params["b2"].reshape(-1)

    SR = _round_up(H + 9, 8)                 # 8-row top halo + H rows + bottom halo
    SL = max(128, _round_up(W2 + 2, 128))    # >= max window extent, lane aligned

    smem_specs = [pl.BlockSpec(memory_space=pltpu.MemorySpace.SMEM)
                  for _ in range(6)]
    kernel = functools.partial(_block_kernel, C=C, H=H, W=W)

    out = pl.pallas_call(
        kernel,
        out_shape=jax.ShapeDtypeStruct((N, C, H, W), jnp.float32),
        grid_spec=pltpu.PrefetchScalarGridSpec(
            num_scalar_prefetch=0,
            grid=(N,),
            in_specs=[pl.BlockSpec((None, C2, H, W2), lambda n: (n, 0, 0, 0))]
                     + smem_specs,
            out_specs=pl.BlockSpec((None, C, H, W), lambda n: (n, 0, 0, 0)),
            scratch_shapes=[
                pltpu.VMEM((C, SR, SL), jnp.float32),
                pltpu.VMEM((C, SR, SL), jnp.float32),
            ],
        ),
        compiler_params=pltpu.CompilerParams(
            dimension_semantics=("parallel",),
        ),
    )(x, wm, bm, w1, b1, w2, b2)
    return out


# ---------------------------- pure-JAX reference --------------------------- #
def _conv2d_ref(x, w, b, pad):
    y = jax.lax.conv_general_dilated(
        x, w, window_strides=(1, 1), padding=[(pad, pad), (pad, pad)],
        dimension_numbers=("NCHW", "OIHW", "NCHW"),
    )
    return y + b.reshape(1, -1, 1, 1)


def block_ref(x, p):
    lrelu = lambda v: jnp.where(v >= 0, v, NEG_SLOPE * v)
    y = lrelu(_conv2d_ref(x, p["w_merge"], p["b_merge"], 0))
    y = lrelu(_conv2d_ref(y, p["w1"], p["b1"], 1))
    return _conv2d_ref(y, p["w2"], p["b2"], 1)


# ---------------------------------- main ----------------------------------- #
if __name__ == "__main__":
    num_feat = 4
    N, H, W = 2, 16, 16

    key = jax.random.PRNGKey(0)
    ks = jax.random.split(key, 7)
    params = {
        "w_merge": 0.1 * jax.random.normal(ks[0], (num_feat, 2 * num_feat, 1, 1), jnp.float32),
        "b_merge": 0.1 * jax.random.normal(ks[1], (num_feat,), jnp.float32),
        "w1": 0.1 * jax.random.normal(ks[2], (num_feat, num_feat, 3, 3), jnp.float32),
        "b1": 0.1 * jax.random.normal(ks[3], (num_feat,), jnp.float32),
        "w2": 0.1 * jax.random.normal(ks[4], (num_feat, num_feat, 3, 3), jnp.float32),
        "b2": 0.1 * jax.random.normal(ks[5], (num_feat,), jnp.float32),
    }
    x = jax.random.normal(ks[6], (N, 2 * num_feat, H, W), jnp.float32)

    fwd = jax.jit(block_forward)
    out = jax.block_until_ready(fwd(x, params))
    ref = jax.block_until_ready(block_ref(x, params))

    assert out.shape == (N, num_feat, H, W), out.shape
    np.testing.assert_allclose(np.asarray(out), np.asarray(ref), rtol=1e-3, atol=1e-3)

    print("KERNEL_OK")
</pallas_src>

<mosaic_0001>
module attributes {stable_mosaic.version = 11 : i64} {
  func.func @_block_kernel(%arg0: i32, %arg1: memref<1x8x16x18xf32, #tpu.memory_space<vmem>>, %arg2: memref<32xf32, #tpu.memory_space<smem>>, %arg3: memref<4xf32, #tpu.memory_space<smem>>, %arg4: memref<144xf32, #tpu.memory_space<smem>>, %arg5: memref<4xf32, #tpu.memory_space<smem>>, %arg6: memref<144xf32, #tpu.memory_space<smem>>, %arg7: memref<4xf32, #tpu.memory_space<smem>>, %arg8: memref<1x4x16x16xf32, #tpu.memory_space<vmem>>, %arg9: memref<4x32x128xf32, #tpu.memory_space<vmem>>, %arg10: memref<4x32x128xf32, #tpu.memory_space<vmem>>) attributes {dimension_semantics = [#tpu.dimension_semantics<parallel>], iteration_bounds = array<i64: 2>, scalar_prefetch = 0 : i64, scratch_operands = 2 : i64, tpu.core_type = #tpu.core_type<tc>, window_params = [{transform_indices = @transform_0, window_bounds = array<i64: 1, 8, 16, 18>}, {transform_indices = @transform_1, window_bounds = array<i64: 32>}, {transform_indices = @transform_2, window_bounds = array<i64: 4>}, {transform_indices = @transform_3, window_bounds = array<i64: 144>}, {transform_indices = @transform_4, window_bounds = array<i64: 4>}, {transform_indices = @transform_5, window_bounds = array<i64: 144>}, {transform_indices = @transform_6, window_bounds = array<i64: 4>}, {transform_indices = @transform_7, window_bounds = array<i64: 1, 4, 16, 16>}]} {
    %0 = tpu.iota {dimensions = array<i32: 1>} : vector<16x18xi32>
    %c2_i32 = arith.constant 2 : i32
    %1 = vector.broadcast %c2_i32 : i32 to vector<16x18xi32>
    %2 = arith.cmpi sge, %0, %1 : vector<16x18xi32>
    %3 = arith.extui %2 : vector<16x18xi1> to vector<16x18xi32>
    %4 = arith.sitofp %3 : vector<16x18xi32> to vector<16x18xf32>
    %c1_i32 = arith.constant 1 : i32
    %5 = vector.broadcast %c1_i32 : i32 to vector<16x18xi32>
    %6 = arith.cmpi sge, %0, %5 : vector<16x18xi32>
    %c17_i32 = arith.constant 17 : i32
    %7 = vector.broadcast %c17_i32 : i32 to vector<16x18xi32>
    %8 = arith.cmpi slt, %0, %7 : vector<16x18xi32>
    %9 = arith.andi %6, %8 : vector<16x18xi1>
    %10 = arith.extui %9 : vector<16x18xi1> to vector<16x18xi32>
    %11 = arith.sitofp %10 : vector<16x18xi32> to vector<16x18xf32>
    %cst = arith.constant 0.000000e+00 : f32
    %12 = vector.broadcast %cst : f32 to vector<4x32x128xf32>
    %c0 = arith.constant 0 : index
    %c0_0 = arith.constant 0 : index
    %c0_1 = arith.constant 0 : index
    %13 = vector.load %arg9[%c0, %c0_0, %c0_1] : memref<4x32x128xf32, #tpu.memory_space<vmem>>, vector<4x32x128xf32>
    tpu.vector_store %arg9[%c0, %c0_0, %c0_1], %12 {strides = array<i32>} : memref<4x32x128xf32, #tpu.memory_space<vmem>>, vector<4x32x128xf32>,
    %c0_2 = arith.constant 0 : index
    %c0_3 = arith.constant 0 : index
    %c0_4 = arith.constant 0 : index
    %c0_5 = arith.constant 0 : index
    %14 = vector.load %arg1[%c0_2, %c0_3, %c0_4, %c0_5] : memref<1x8x16x18xf32, #tpu.memory_space<vmem>>, vector<1x1x16x18xf32>
    %15 = vector.shape_cast %14 : vector<1x1x16x18xf32> to vector<16x18xf32>
    %c0_6 = arith.constant 0 : index
    %16 = memref.load %arg2[%c0_6] : memref<32xf32, #tpu.memory_space<smem>>
    %17 = vector.broadcast %16 : f32 to vector<16x18xf32>
    %18 = arith.mulf %15, %17 : vector<16x18xf32>
    %c0_7 = arith.constant 0 : index
    %c1 = arith.constant 1 : index
    %c0_8 = arith.constant 0 : index
    %c0_9 = arith.constant 0 : index
    %19 = vector.load %arg1[%c0_7, %c1, %c0_8, %c0_9] : memref<1x8x16x18xf32, #tpu.memory_space<vmem>>, vector<1x1x16x18xf32>
    %20 = vector.shape_cast %19 : vector<1x1x16x18xf32> to vector<16x18xf32>
    %c1_10 = arith.constant 1 : index
    %21 = memref.load %arg2[%c1_10] : memref<32xf32, #tpu.memory_space<smem>>
    %22 = vector.broadcast %21 : f32 to vector<16x18xf32>
    %23 = arith.mulf %20, %22 : vector<16x18xf32>
    %24 = arith.addf %18, %23 : vector<16x18xf32>
    %c0_11 = arith.constant 0 : index
    %c2 = arith.constant 2 : index
    %c0_12 = arith.constant 0 : index
    %c0_13 = arith.constant 0 : index
    %25 = vector.load %arg1[%c0_11, %c2, %c0_12, %c0_13] : memref<1x8x16x18xf32, #tpu.memory_space<vmem>>, vector<1x1x16x18xf32>
    %26 = vector.shape_cast %25 : vector<1x1x16x18xf32> to vector<16x18xf32>
    %c2_14 = arith.constant 2 : index
    %27 = memref.load %arg2[%c2_14] : memref<32xf32, #tpu.memory_space<smem>>
    %28 = vector.broadcast %27 : f32 to vector<16x18xf32>
    %29 = arith.mulf %26, %28 : vector<16x18xf32>
    %30 = arith.addf %24, %29 : vector<16x18xf32>
    %c0_15 = arith.constant 0 : index
    %c3 = arith.constant 3 : index
    %c0_16 = arith.constant 0 : index
    %c0_17 = arith.constant 0 : index
    %31 = vector.load %arg1[%c0_15, %c3, %c0_16, %c0_17] : memref<1x8x16x18xf32, #tpu.memory_space<vmem>>, vector<1x1x16x18xf32>
    %32 = vector.shape_cast %31 : vector<1x1x16x18xf32> to vector<16x18xf32>
    %c3_18 = arith.constant 3 : index
    %33 = memref.load %arg2[%c3_18] : memref<32xf32, #tpu.memory_space<smem>>
    %34 = vector.broadcast %33 : f32 to vector<16x18xf32>
    %35 = arith.mulf %32, %34 : vector<16x18xf32>
    %36 = arith.addf %30, %35 : vector<16x18xf32>
    %c0_19 = arith.constant 0 : index
    %c4 = arith.constant 4 : index
    %c0_20 = arith.constant 0 : index
    %c0_21 = arith.constant 0 : index
    %37 = vector.load %arg1[%c0_19, %c4, %c0_20, %c0_21] : memref<1x8x16x18xf32, #tpu.memory_space<vmem>>, vector<1x1x16x18xf32>
    %38 = vector.shape_cast %37 : vector<1x1x16x18xf32> to vector<16x18xf32>
    %c4_22 = arith.constant 4 : index
    %39 = memref.load %arg2[%c4_22] : memref<32xf32, #tpu.memory_space<smem>>
    %40 = vector.broadcast %39 : f32 to vector<16x18xf32>
    %41 = arith.mulf %38, %40 : vector<16x18xf32>
    %42 = arith.addf %36, %41 : vector<16x18xf32>
    %c0_23 = arith.constant 0 : index
    %c5 = arith.constant 5 : index
    %c0_24 = arith.constant 0 : index
    %c0_25 = arith.constant 0 : index
    %43 = vector.load %arg1[%c0_23, %c5, %c0_24, %c0_25] : memref<1x8x16x18xf32, #tpu.memory_space<vmem>>, vector<1x1x16x18xf32>
    %44 = vector.shape_cast %43 : vector<1x1x16x18xf32> to vector<16x18xf32>
    %c5_26 = arith.constant 5 : index
    %45 = memref.load %arg2[%c5_26] : memref<32xf32, #tpu.memory_space<smem>>
    %46 = vector.broadcast %45 : f32 to vector<16x18xf32>
    %47 = arith.mulf %44, %46 : vector<16x18xf32>
    %48 = arith.addf %42, %47 : vector<16x18xf32>
    %c0_27 = arith.constant 0 : index
    %c6 = arith.constant 6 : index
    %c0_28 = arith.constant 0 : index
    %c0_29 = arith.constant 0 : index
    %49 = vector.load %arg1[%c0_27, %c6, %c0_28, %c0_29] : memref<1x8x16x18xf32, #tpu.memory_space<vmem>>, vector<1x1x16x18xf32>
    %50 = vector.shape_cast %49 : vector<1x1x16x18xf32> to vector<16x18xf32>
    %c6_30 = arith.constant 6 : index
    %51 = memref.load %arg2[%c6_30] : memref<32xf32, #tpu.memory_space<smem>>
    %52 = vector.broadcast %51 : f32 to vector<16x18xf32>
    %53 = arith.mulf %50, %52 : vector<16x18xf32>
    %54 = arith.addf %48, %53 : vector<16x18xf32>
    %c0_31 = arith.constant 0 : index
    %c7 = arith.constant 7 : index
    %c0_32 = arith.constant 0 : index
    %c0_33 = arith.constant 0 : index
    %55 = vector.load %arg1[%c0_31, %c7, %c0_32, %c0_33] : memref<1x8x16x18xf32, #tpu.memory_space<vmem>>, vector<1x1x16x18xf32>
    %56 = vector.shape_cast %55 : vector<1x1x16x18xf32> to vector<16x18xf32>
    %c7_34 = arith.constant 7 : index
    %57 = memref.load %arg2[%c7_34] : memref<32xf32, #tpu.memory_space<smem>>
    %58 = vector.broadcast %57 : f32 to vector<16x18xf32>
    %59 = arith.mulf %56, %58 : vector<16x18xf32>
    %60 = arith.addf %54, %59 : vector<16x18xf32>
    %c0_35 = arith.constant 0 : index
    %61 = memref.load %arg3[%c0_35] : memref<4xf32, #tpu.memory_space<smem>>
    %62 = vector.broadcast %61 : f32 to vector<16x18xf32>
    %63 = arith.addf %60, %62 : vector<16x18xf32>
    %cst_36 = arith.constant 0.000000e+00 : f32
    %64 = vector.broadcast %cst_36 : f32 to vector<16x18xf32>
    %65 = arith.cmpf oge, %63, %64 : vector<16x18xf32>
    %cst_37 = arith.constant 1.000000e-01 : f32
    %66 = vector.broadcast %cst_37 : f32 to vector<16x18xf32>
    %67 = arith.mulf %66, %63 : vector<16x18xf32>
    %68 = arith.select %65, %63, %67 : vector<16x18xi1>, vector<16x18xf32>
    %69 = arith.mulf %68, %4 : vector<16x18xf32>
    %c0_38 = arith.constant 0 : index
    %c8 = arith.constant 8 : index
    %c0_39 = arith.constant 0 : index
    %70 = vector.load %arg9[%c0_38, %c8, %c0_39] : memref<4x32x128xf32, #tpu.memory_space<vmem>>, vector<1x16x18xf32>
    %71 = vector.shape_cast %70 : vector<1x16x18xf32> to vector<16x18xf32>
    %72 = vector.shape_cast %69 : vector<16x18xf32> to vector<1x16x18xf32>
    tpu.vector_store %arg9[%c0_38, %c8, %c0_39], %72 {strides = array<i32>} : memref<4x32x128xf32, #tpu.memory_space<vmem>>, vector<1x16x18xf32>,
    %c0_40 = arith.constant 0 : index
    %c0_41 = arith.constant 0 : index
    %c0_42 = arith.constant 0 : index
    %c0_43 = arith.constant 0 : index
    %73 = vector.load %arg1[%c0_40, %c0_41, %c0_42, %c0_43] : memref<1x8x16x18xf32, #tpu.memory_space<vmem>>, vector<1x1x16x18xf32>
    %74 = vector.shape_cast %73 : vector<1x1x16x18xf32> to vector<16x18xf32>
    %c8_44 = arith.constant 8 : index
    %75 = memref.load %arg2[%c8_44] : memref<32xf32, #tpu.memory_space<smem>>
    %76 = vector.broadcast %75 : f32 to vector<16x18xf32>
    %77 = arith.mulf %74, %76 : vector<16x18xf32>
    %c0_45 = arith.constant 0 : index
    %c1_46 = arith.constant 1 : index
    %c0_47 = arith.constant 0 : index
    %c0_48 = arith.constant 0 : index
    %78 = vector.load %arg1[%c0_45, %c1_46, %c0_47, %c0_48] : memref<1x8x16x18xf32, #tpu.memory_space<vmem>>, vector<1x1x16x18xf32>
    %79 = vector.shape_cast %78 : vector<1x1x16x18xf32> to vector<16x18xf32>
    %c9 = arith.constant 9 : index
    %80 = memref.load %arg2[%c9] : memref<32xf32, #tpu.memory_space<smem>>
    %81 = vector.broadcast %80 : f32 to vector<16x18xf32>
    %82 = arith.mulf %79, %81 : vector<16x18xf32>
    %83 = arith.addf %77, %82 : vector<16x18xf32>
    %c0_49 = arith.constant 0 : index
    %c2_50 = arith.constant 2 : index
    %c0_51 = arith.constant 0 : index
    %c0_52 = arith.constant 0 : index
    %84 = vector.load %arg1[%c0_49, %c2_50, %c0_51, %c0_52] : memref<1x8x16x18xf32, #tpu.memory_space<vmem>>, vector<1x1x16x18xf32>
    %85 = vector.shape_cast %84 : vector<1x1x16x18xf32> to vector<16x18xf32>
    %c10 = arith.constant 10 : index
    %86 = memref.load %arg2[%c10] : memref<32xf32, #tpu.memory_space<smem>>
    %87 = vector.broadcast %86 : f32 to vector<16x18xf32>
    %88 = arith.mulf %85, %87 : vector<16x18xf32>
    %89 = arith.addf %83, %88 : vector<16x18xf32>
    %c0_53 = arith.constant 0 : index
    %c3_54 = arith.constant 3 : index
    %c0_55 = arith.constant 0 : index
    %c0_56 = arith.constant 0 : index
    %90 = vector.load %arg1[%c0_53, %c3_54, %c0_55, %c0_56] : memref<1x8x16x18xf32, #tpu.memory_space<vmem>>, vector<1x1x16x18xf32>
    %91 = vector.shape_cast %90 : vector<1x1x16x18xf32> to vector<16x18xf32>
    %c11 = arith.constant 11 : index
    %92 = memref.load %arg2[%c11] : memref<32xf32, #tpu.memory_space<smem>>
    %93 = vector.broadcast %92 : f32 to vector<16x18xf32>
    %94 = arith.mulf %91, %93 : vector<16x18xf32>
    %95 = arith.addf %89, %94 : vector<16x18xf32>
    %c0_57 = arith.constant 0 : index
    %c4_58 = arith.constant 4 : index
    %c0_59 = arith.constant 0 : index
    %c0_60 = arith.constant 0 : index
    %96 = vector.load %arg1[%c0_57, %c4_58, %c0_59, %c0_60] : memref<1x8x16x18xf32, #tpu.memory_space<vmem>>, vector<1x1x16x18xf32>
    %97 = vector.shape_cast %96 : vector<1x1x16x18xf32> to vector<16x18xf32>
    %c12 = arith.constant 12 : index
    %98 = memref.load %arg2[%c12] : memref<32xf32, #tpu.memory_space<smem>>
    %99 = vector.broadcast %98 : f32 to vector<16x18xf32>
    %100 = arith.mulf %97, %99 : vector<16x18xf32>
    %101 = arith.addf %95, %100 : vector<16x18xf32>
    %c0_61 = arith.constant 0 : index
    %c5_62 = arith.constant 5 : index
    %c0_63 = arith.constant 0 : index
    %c0_64 = arith.constant 0 : index
    %102 = vector.load %arg1[%c0_61, %c5_62, %c0_63, %c0_64] : memref<1x8x16x18xf32, #tpu.memory_space<vmem>>, vector<1x1x16x18xf32>
    %103 = vector.shape_cast %102 : vector<1x1x16x18xf32> to vector<16x18xf32>
    %c13 = arith.constant 13 : index
    %104 = memref.load %arg2[%c13] : memref<32xf32, #tpu.memory_space<smem>>
    %105 = vector.broadcast %104 : f32 to vector<16x18xf32>
    %106 = arith.mulf %103, %105 : vector<16x18xf32>
    %107 = arith.addf %101, %106 : vector<16x18xf32>
    %c0_65 = arith.constant 0 : index
    %c6_66 = arith.constant 6 : index
    %c0_67 = arith.constant 0 : index
    %c0_68 = arith.constant 0 : index
    %108 = vector.load %arg1[%c0_65, %c6_66, %c0_67, %c0_68] : memref<1x8x16x18xf32, #tpu.memory_space<vmem>>, vector<1x1x16x18xf32>
    %109 = vector.shape_cast %108 : vector<1x1x16x18xf32> to vector<16x18xf32>
    %c14 = arith.constant 14 : index
    %110 = memref.load %arg2[%c14] : memref<32xf32, #tpu.memory_space<smem>>
    %111 = vector.broadcast %110 : f32 to vector<16x18xf32>
    %112 = arith.mulf %109, %111 : vector<16x18xf32>
    %113 = arith.addf %107, %112 : vector<16x18xf32>
    %c0_69 = arith.constant 0 : index
    %c7_70 = arith.constant 7 : index
    %c0_71 = arith.constant 0 : index
    %c0_72 = arith.constant 0 : index
    %114 = vector.load %arg1[%c0_69, %c7_70, %c0_71, %c0_72] : memref<1x8x16x18xf32, #tpu.memory_space<vmem>>, vector<1x1x16x18xf32>
    %115 = vector.shape_cast %114 : vector<1x1x16x18xf32> to vector<16x18xf32>
    %c15 = arith.constant 15 : index
    %116 = memref.load %arg2[%c15] : memref<32xf32, #tpu.memory_space<smem>>
    %117 = vector.broadcast %116 : f32 to vector<16x18xf32>
    %118 = arith.mulf %115, %117 : vector<16x18xf32>
    %119 = arith.addf %113, %118 : vector<16x18xf32>
    %c1_73 = arith.constant 1 : index
    %120 = memref.load %arg3[%c1_73] : memref<4xf32, #tpu.memory_space<smem>>
    %121 = vector.broadcast %120 : f32 to vector<16x18xf32>
    %122 = arith.addf %119, %121 : vector<16x18xf32>
    %cst_74 = arith.constant 0.000000e+00 : f32
    %123 = vector.broadcast %cst_74 : f32 to vector<16x18xf32>
    %124 = arith.cmpf oge, %122, %123 : vector<16x18xf32>
    %cst_75 = arith.constant 1.000000e-01 : f32
    %125 = vector.broadcast %cst_75 : f32 to vector<16x18xf32>
    %126 = arith.mulf %125, %122 : vector<16x18xf32>
    %127 = arith.select %124, %122, %126 : vector<16x18xi1>, vector<16x18xf32>
    %128 = arith.mulf %127, %4 : vector<16x18xf32>
    %c1_76 = arith.constant 1 : index
    %c8_77 = arith.constant 8 : index
    %c0_78 = arith.constant 0 : index
    %129 = vector.load %arg9[%c1_76, %c8_77, %c0_78] : memref<4x32x128xf32, #tpu.memory_space<vmem>>, vector<1x16x18xf32>
    %130 = vector.shape_cast %129 : vector<1x16x18xf32> to vector<16x18xf32>
    %131 = vector.shape_cast %128 : vector<16x18xf32> to vector<1x16x18xf32>
    tpu.vector_store %arg9[%c1_76, %c8_77, %c0_78], %131 {strides = array<i32>} : memref<4x32x128xf32, #tpu.memory_space<vmem>>, vector<1x16x18xf32>,
    %c0_79 = arith.constant 0 : index
    %c0_80 = arith.constant 0 : index
    %c0_81 = arith.constant 0 : index
    %c0_82 = arith.constant 0 : index
    %132 = vector.load %arg1[%c0_79, %c0_80, %c0_81, %c0_82] : memref<1x8x16x18xf32, #tpu.memory_space<vmem>>, vector<1x1x16x18xf32>
    %133 = vector.shape_cast %132 : vector<1x1x16x18xf32> to vector<16x18xf32>
    %c16 = arith.constant 16 : index
    %134 = memref.load %arg2[%c16] : memref<32xf32, #tpu.memory_space<smem>>
    %135 = vector.broadcast %134 : f32 to vector<16x18xf32>
    %136 = arith.mulf %133, %135 : vector<16x18xf32>
    %c0_83 = arith.constant 0 : index
    %c1_84 = arith.constant 1 : index
    %c0_85 = arith.constant 0 : index
    %c0_86 = arith.constant 0 : index
    %137 = vector.load %arg1[%c0_83, %c1_84, %c0_85, %c0_86] : memref<1x8x16x18xf32, #tpu.memory_space<vmem>>, vector<1x1x16x18xf32>
    %138 = vector.shape_cast %137 : vector<1x1x16x18xf32> to vector<16x18xf32>
    %c17 = arith.constant 17 : index
    %139 = memref.load %arg2[%c17] : memref<32xf32, #tpu.memory_space<smem>>
    %140 = vector.broadcast %139 : f32 to vector<16x18xf32>
    %141 = arith.mulf %138, %140 : vector<16x18xf32>
    %142 = arith.addf %136, %141 : vector<16x18xf32>
    %c0_87 = arith.constant 0 : index
    %c2_88 = arith.constant 2 : index
    %c0_89 = arith.constant 0 : index
    %c0_90 = arith.constant 0 : index
    %143 = vector.load %arg1[%c0_87, %c2_88, %c0_89, %c0_90] : memref<1x8x16x18xf32, #tpu.memory_space<vmem>>, vector<1x1x16x18xf32>
    %144 = vector.shape_cast %143 : vector<1x1x16x18xf32> to vector<16x18xf32>
    %c18 = arith.constant 18 : index
    %145 = memref.load %arg2[%c18] : memref<32xf32, #tpu.memory_space<smem>>
    %146 = vector.broadcast %145 : f32 to vector<16x18xf32>
    %147 = arith.mulf %144, %146 : vector<16x18xf32>
    %148 = arith.addf %142, %147 : vector<16x18xf32>
    %c0_91 = arith.constant 0 : index
    %c3_92 = arith.constant 3 : index
    %c0_93 = arith.constant 0 : index
    %c0_94 = arith.constant 0 : index
    %149 = vector.load %arg1[%c0_91, %c3_92, %c0_93, %c0_94] : memref<1x8x16x18xf32, #tpu.memory_space<vmem>>, vector<1x1x16x18xf32>
    %150 = vector.shape_cast %149 : vector<1x1x16x18xf32> to vector<16x18xf32>
    %c19 = arith.constant 19 : index
    %151 = memref.load %arg2[%c19] : memref<32xf32, #tpu.memory_space<smem>>
    %152 = vector.broadcast %151 : f32 to vector<16x18xf32>
    %153 = arith.mulf %150, %152 : vector<16x18xf32>
    %154 = arith.addf %148, %153 : vector<16x18xf32>
    %c0_95 = arith.constant 0 : index
    %c4_96 = arith.constant 4 : index
    %c0_97 = arith.constant 0 : index
    %c0_98 = arith.constant 0 : index
    %155 = vector.load %arg1[%c0_95, %c4_96, %c0_97, %c0_98] : memref<1x8x16x18xf32, #tpu.memory_space<vmem>>, vector<1x1x16x18xf32>
    %156 = vector.shape_cast %155 : vector<1x1x16x18xf32> to vector<16x18xf32>
    %c20 = arith.constant 20 : index
    %157 = memref.load %arg2[%c20] : memref<32xf32, #tpu.memory_space<smem>>
    %158 = vector.broadcast %157 : f32 to vector<16x18xf32>
    %159 = arith.mulf %156, %158 : vector<16x18xf32>
    %160 = arith.addf %154, %159 : vector<16x18xf32>
    %c0_99 = arith.constant 0 : index
    %c5_100 = arith.constant 5 : index
    %c0_101 = arith.constant 0 : index
    %c0_102 = arith.constant 0 : index
    %161 = vector.load %arg1[%c0_99, %c5_100, %c0_101, %c0_102] : memref<1x8x16x18xf32, #tpu.memory_space<vmem>>, vector<1x1x16x18xf32>
    %162 = vector.shape_cast %161 : vector<1x1x16x18xf32> to vector<16x18xf32>
    %c21 = arith.constant 21 : index
    %163 = memref.load %arg2[%c21] : memref<32xf32, #tpu.memory_space<smem>>
    %164 = vector.broadcast %163 : f32 to vector<16x18xf32>
    %165 = arith.mulf %162, %164 : vector<16x18xf32>
    %166 = arith.addf %160, %165 : vector<16x18xf32>
    %c0_103 = arith.constant 0 : index
    %c6_104 = arith.constant 6 : index
    %c0_105 = arith.constant 0 : index
    %c0_106 = arith.constant 0 : index
    %167 = vector.load %arg1[%c0_103, %c6_104, %c0_105, %c0_106] : memref<1x8x16x18xf32, #tpu.memory_space<vmem>>, vector<1x1x16x18xf32>
    %168 = vector.shape_cast %167 : vector<1x1x16x18xf32> to vector<16x18xf32>
    %c22 = arith.constant 22 : index
    %169 = memref.load %arg2[%c22] : memref<32xf32, #tpu.memory_space<smem>>
    %170 = vector.broadcast %169 : f32 to vector<16x18xf32>
    %171 = arith.mulf %168, %170 : vector<16x18xf32>
    %172 = arith.addf %166, %171 : vector<16x18xf32>
    %c0_107 = arith.constant 0 : index
    %c7_108 = arith.constant 7 : index
    %c0_109 = arith.constant 0 : index
    %c0_110 = arith.constant 0 : index
    %173 = vector.load %arg1[%c0_107, %c7_108, %c0_109, %c0_110] : memref<1x8x16x18xf32, #tpu.memory_space<vmem>>, vector<1x1x16x18xf32>
    %174 = vector.shape_cast %173 : vector<1x1x16x18xf32> to vector<16x18xf32>
    %c23 = arith.constant 23 : index
    %175 = memref.load %arg2[%c23] : memref<32xf32, #tpu.memory_space<smem>>
    %176 = vector.broadcast %175 : f32 to vector<16x18xf32>
    %177 = arith.mulf %174, %176 : vector<16x18xf32>
    %178 = arith.addf %172, %177 : vector<16x18xf32>
    %c2_111 = arith.constant 2 : index
    %179 = memref.load %arg3[%c2_111] : memref<4xf32, #tpu.memory_space<smem>>
    %180 = vector.broadcast %179 : f32 to vector<16x18xf32>
    %181 = arith.addf %178, %180 : vector<16x18xf32>
    %cst_112 = arith.constant 0.000000e+00 : f32
    %182 = vector.broadcast %cst_112 : f32 to vector<16x18xf32>
    %183 = arith.cmpf oge, %181, %182 : vector<16x18xf32>
    %cst_113 = arith.constant 1.000000e-01 : f32
    %184 = vector.broadcast %cst_113 : f32 to vector<16x18xf32>
    %185 = arith.mulf %184, %181 : vector<16x18xf32>
    %186 = arith.select %183, %181, %185 : vector<16x18xi1>, vector<16x18xf32>
    %187 = arith.mulf %186, %4 : vector<16x18xf32>
    %c2_114 = arith.constant 2 : index
    %c8_115 = arith.constant 8 : index
    %c0_116 = arith.constant 0 : index
    %188 = vector.load %arg9[%c2_114, %c8_115, %c0_116] : memref<4x32x128xf32, #tpu.memory_space<vmem>>, vector<1x16x18xf32>
    %189 = vector.shape_cast %188 : vector<1x16x18xf32> to vector<16x18xf32>
    %190 = vector.shape_cast %187 : vector<16x18xf32> to vector<1x16x18xf32>
    tpu.vector_store %arg9[%c2_114, %c8_115, %c0_116], %190 {strides = array<i32>} : memref<4x32x128xf32, #tpu.memory_space<vmem>>, vector<1x16x18xf32>,
    %c0_117 = arith.constant 0 : index
    %c0_118 = arith.constant 0 : index
    %c0_119 = arith.constant 0 : index
    %c0_120 = arith.constant 0 : index
    %191 = vector.load %arg1[%c0_117, %c0_118, %c0_119, %c0_120] : memref<1x8x16x18xf32, #tpu.memory_space<vmem>>, vector<1x1x16x18xf32>
    %192 = vector.shape_cast %191 : vector<1x1x16x18xf32> to vector<16x18xf32>
    %c24 = arith.constant 24 : index
    %193 = memref.load %arg2[%c24] : memref<32xf32, #tpu.memory_space<smem>>
    %194 = vector.broadcast %193 : f32 to vector<16x18xf32>
    %195 = arith.mulf %192, %194 : vector<16x18xf32>
    %c0_121 = arith.constant 0 : index
    %c1_122 = arith.constant 1 : index
    %c0_123 = arith.constant 0 : index
    %c0_124 = arith.constant 0 : index
    %196 = vector.load %arg1[%c0_121, %c1_122, %c0_123, %c0_124] : memref<1x8x16x18xf32, #tpu.memory_space<vmem>>, vector<1x1x16x18xf32>
    %197 = vector.shape_cast %196 : vector<1x1x16x18xf32> to vector<16x18xf32>
    %c25 = arith.constant 25 : index
    %198 = memref.load %arg2[%c25] : memref<32xf32, #tpu.memory_space<smem>>
    %199 = vector.broadcast %198 : f32 to vector<16x18xf32>
    %200 = arith.mulf %197, %199 : vector<16x18xf32>
    %201 = arith.addf %195, %200 : vector<16x18xf32>
    %c0_125 = arith.constant 0 : index
    %c2_126 = arith.constant 2 : index
    %c0_127 = arith.constant 0 : index
    %c0_128 = arith.constant 0 : index
    %202 = vector.load %arg1[%c0_125, %c2_126, %c0_127, %c0_128] : memref<1x8x16x18xf32, #tpu.memory_space<vmem>>, vector<1x1x16x18xf32>
    %203 = vector.shape_cast %202 : vector<1x1x16x18xf32> to vector<16x18xf32>
    %c26 = arith.constant 26 : index
    %204 = memref.load %arg2[%c26] : memref<32xf32, #tpu.memory_space<smem>>
    %205 = vector.broadcast %204 : f32 to vector<16x18xf32>
    %206 = arith.mulf %203, %205 : vector<16x18xf32>
    %207 = arith.addf %201, %206 : vector<16x18xf32>
    %c0_129 = arith.constant 0 : index
    %c3_130 = arith.constant 3 : index
    %c0_131 = arith.constant 0 : index
    %c0_132 = arith.constant 0 : index
    %208 = vector.load %arg1[%c0_129, %c3_130, %c0_131, %c0_132] : memref<1x8x16x18xf32, #tpu.memory_space<vmem>>, vector<1x1x16x18xf32>
    %209 = vector.shape_cast %208 : vector<1x1x16x18xf32> to vector<16x18xf32>
    %c27 = arith.constant 27 : index
    %210 = memref.load %arg2[%c27] : memref<32xf32, #tpu.memory_space<smem>>
    %211 = vector.broadcast %210 : f32 to vector<16x18xf32>
    %212 = arith.mulf %209, %211 : vector<16x18xf32>
    %213 = arith.addf %207, %212 : vector<16x18xf32>
    %c0_133 = arith.constant 0 : index
    %c4_134 = arith.constant 4 : index
    %c0_135 = arith.constant 0 : index
    %c0_136 = arith.constant 0 : index
    %214 = vector.load %arg1[%c0_133, %c4_134, %c0_135, %c0_136] : memref<1x8x16x18xf32, #tpu.memory_space<vmem>>, vector<1x1x16x18xf32>
    %215 = vector.shape_cast %214 : vector<1x1x16x18xf32> to vector<16x18xf32>
    %c28 = arith.constant 28 : index
    %216 = memref.load %arg2[%c28] : memref<32xf32, #tpu.memory_space<smem>>
    %217 = vector.broadcast %216 : f32 to vector<16x18xf32>
    %218 = arith.mulf %215, %217 : vector<16x18xf32>
    %219 = arith.addf %213, %218 : vector<16x18xf32>
    %c0_137 = arith.constant 0 : index
    %c5_138 = arith.constant 5 : index
    %c0_139 = arith.constant 0 : index
    %c0_140 = arith.constant 0 : index
    %220 = vector.load %arg1[%c0_137, %c5_138, %c0_139, %c0_140] : memref<1x8x16x18xf32, #tpu.memory_space<vmem>>, vector<1x1x16x18xf32>
    %221 = vector.shape_cast %220 : vector<1x1x16x18xf32> to vector<16x18xf32>
    %c29 = arith.constant 29 : index
    %222 = memref.load %arg2[%c29] : memref<32xf32, #tpu.memory_space<smem>>
    %223 = vector.broadcast %222 : f32 to vector<16x18xf32>
    %224 = arith.mulf %221, %223 : vector<16x18xf32>
    %225 = arith.addf %219, %224 : vector<16x18xf32>
    %c0_141 = arith.constant 0 : index
    %c6_142 = arith.constant 6 : index
    %c0_143 = arith.constant 0 : index
    %c0_144 = arith.constant 0 : index
    %226 = vector.load %arg1[%c0_141, %c6_142, %c0_143, %c0_144] : memref<1x8x16x18xf32, #tpu.memory_space<vmem>>, vector<1x1x16x18xf32>
    %227 = vector.shape_cast %226 : vector<1x1x16x18xf32> to vector<16x18xf32>
    %c30 = arith.constant 30 : index
    %228 = memref.load %arg2[%c30] : memref<32xf32, #tpu.memory_space<smem>>
    %229 = vector.broadcast %228 : f32 to vector<16x18xf32>
    %230 = arith.mulf %227, %229 : vector<16x18xf32>
    %231 = arith.addf %225, %230 : vector<16x18xf32>
    %c0_145 = arith.constant 0 : index
    %c7_146 = arith.constant 7 : index
    %c0_147 = arith.constant 0 : index
    %c0_148 = arith.constant 0 : index
    %232 = vector.load %arg1[%c0_145, %c7_146, %c0_147, %c0_148] : memref<1x8x16x18xf32, #tpu.memory_space<vmem>>, vector<1x1x16x18xf32>
    %233 = vector.shape_cast %232 : vector<1x1x16x18xf32> to vector<16x18xf32>
    %c31 = arith.constant 31 : index
    %234 = memref.load %arg2[%c31] : memref<32xf32, #tpu.memory_space<smem>>
    %235 = vector.broadcast %234 : f32 to vector<16x18xf32>
    %236 = arith.mulf %233, %235 : vector<16x18xf32>
    %237 = arith.addf %231, %236 : vector<16x18xf32>
    %c3_149 = arith.constant 3 : index
    %238 = memref.load %arg3[%c3_149] : memref<4xf32, #tpu.memory_space<smem>>
    %239 = vector.broadcast %238 : f32 to vector<16x18xf32>
    %240 = arith.addf %237, %239 : vector<16x18xf32>
    %cst_150 = arith.constant 0.000000e+00 : f32
    %241 = vector.broadcast %cst_150 : f32 to vector<16x18xf32>
    %242 = arith.cmpf oge, %240, %241 : vector<16x18xf32>
    %cst_151 = arith.constant 1.000000e-01 : f32
    %243 = vector.broadcast %cst_151 : f32 to vector<16x18xf32>
    %244 = arith.mulf %243, %240 : vector<16x18xf32>
    %245 = arith.select %242, %240, %244 : vector<16x18xi1>, vector<16x18xf32>
    %246 = arith.mulf %245, %4 : vector<16x18xf32>
    %c3_152 = arith.constant 3 : index
    %c8_153 = arith.constant 8 : index
    %c0_154 = arith.constant 0 : index
    %247 = vector.load %arg9[%c3_152, %c8_153, %c0_154] : memref<4x32x128xf32, #tpu.memory_space<vmem>>, vector<1x16x18xf32>
    %248 = vector.shape_cast %247 : vector<1x16x18xf32> to vector<16x18xf32>
    %249 = vector.shape_cast %246 : vector<16x18xf32> to vector<1x16x18xf32>
    tpu.vector_store %arg9[%c3_152, %c8_153, %c0_154], %249 {strides = array<i32>} : memref<4x32x128xf32, #tpu.memory_space<vmem>>, vector<1x16x18xf32>,
    %c0_155 = arith.constant 0 : index
    %c0_156 = arith.constant 0 : index
    %c0_157 = arith.constant 0 : index
    %250 = vector.load %arg10[%c0_155, %c0_156, %c0_157] : memref<4x32x128xf32, #tpu.memory_space<vmem>>, vector<4x32x128xf32>
    tpu.vector_store %arg10[%c0_155, %c0_156, %c0_157], %12 {strides = array<i32>} : memref<4x32x128xf32, #tpu.memory_space<vmem>>, vector<4x32x128xf32>,
    %c0_158 = arith.constant 0 : index
    %c7_159 = arith.constant 7 : index
    %c0_160 = arith.constant 0 : index
    %251 = vector.load %arg9[%c0_158, %c7_159, %c0_160] : memref<4x32x128xf32, #tpu.memory_space<vmem>>, vector<1x16x18xf32>
    %252 = vector.shape_cast %251 : vector<1x16x18xf32> to vector<16x18xf32>
    %c0_161 = arith.constant 0 : index
    %253 = memref.load %arg4[%c0_161] : memref<144xf32, #tpu.memory_space<smem>>
    %254 = vector.broadcast %253 : f32 to vector<16x18xf32>
    %255 = arith.mulf %252, %254 : vector<16x18xf32>
    %c36 = arith.constant 36 : index
    %256 = memref.load %arg4[%c36] : memref<144xf32, #tpu.memory_space<smem>>
    %257 = vector.broadcast %256 : f32 to vector<16x18xf32>
    %258 = arith.mulf %252, %257 : vector<16x18xf32>
    %c72 = arith.constant 72 : index
    %259 = memref.load %arg4[%c72] : memref<144xf32, #tpu.memory_space<smem>>
    %260 = vector.broadcast %259 : f32 to vector<16x18xf32>
    %261 = arith.mulf %252, %260 : vector<16x18xf32>
    %c108 = arith.constant 108 : index
    %262 = memref.load %arg4[%c108] : memref<144xf32, #tpu.memory_space<smem>>
    %263 = vector.broadcast %262 : f32 to vector<16x18xf32>
    %264 = arith.mulf %252, %263 : vector<16x18xf32>
    %c1_162 = arith.constant 1 : index
    %c7_163 = arith.constant 7 : index
    %c0_164 = arith.constant 0 : index
    %265 = vector.load %arg9[%c1_162, %c7_163, %c0_164] : memref<4x32x128xf32, #tpu.memory_space<vmem>>, vector<1x16x18xf32>
    %266 = vector.shape_cast %265 : vector<1x16x18xf32> to vector<16x18xf32>
    %c9_165 = arith.constant 9 : index
    %267 = memref.load %arg4[%c9_165] : memref<144xf32, #tpu.memory_space<smem>>
    %268 = vector.broadcast %267 : f32 to vector<16x18xf32>
    %269 = arith.mulf %266, %268 : vector<16x18xf32>
    %270 = arith.addf %255, %269 : vector<16x18xf32>
    %c45 = arith.constant 45 : index
    %271 = memref.load %arg4[%c45] : memref<144xf32, #tpu.memory_space<smem>>
    %272 = vector.broadcast %271 : f32 to vector<16x18xf32>
    %273 = arith.mulf %266, %272 : vector<16x18xf32>
    %274 = arith.addf %258, %273 : vector<16x18xf32>
    %c81 = arith.constant 81 : index
    %275 = memref.load %arg4[%c81] : memref<144xf32, #tpu.memory_space<smem>>
    %276 = vector.broadcast %275 : f32 to vector<16x18xf32>
    %277 = arith.mulf %266, %276 : vector<16x18xf32>
    %278 = arith.addf %261, %277 : vector<16x18xf32>
    %c117 = arith.constant 117 : index
    %279 = memref.load %arg4[%c117] : memref<144xf32, #tpu.memory_space<smem>>
    %280 = vector.broadcast %279 : f32 to vector<16x18xf32>
    %281 = arith.mulf %266, %280 : vector<16x18xf32>
    %282 = arith.addf %264, %281 : vector<16x18xf32>
    %c2_166 = arith.constant 2 : index
    %c7_167 = arith.constant 7 : index
    %c0_168 = arith.constant 0 : index
    %283 = vector.load %arg9[%c2_166, %c7_167, %c0_168] : memref<4x32x128xf32, #tpu.memory_space<vmem>>, vector<1x16x18xf32>
    %284 = vector.shape_cast %283 : vector<1x16x18xf32> to vector<16x18xf32>
    %c18_169 = arith.constant 18 : index
    %285 = memref.load %arg4[%c18_169] : memref<144xf32, #tpu.memory_space<smem>>
    %286 = vector.broadcast %285 : f32 to vector<16x18xf32>
    %287 = arith.mulf %284, %286 : vector<16x18xf32>
    %288 = arith.addf %270, %287 : vector<16x18xf32>
    %c54 = arith.constant 54 : index
    %289 = memref.load %arg4[%c54] : memref<144xf32, #tpu.memory_space<smem>>
    %290 = vector.broadcast %289 : f32 to vector<16x18xf32>
    %291 = arith.mulf %284, %290 : vector<16x18xf32>
    %292 = arith.addf %274, %291 : vector<16x18xf32>
    %c90 = arith.constant 90 : index
    %293 = memref.load %arg4[%c90] : memref<144xf32, #tpu.memory_space<smem>>
    %294 = vector.broadcast %293 : f32 to vector<16x18xf32>
    %295 = arith.mulf %284, %294 : vector<16x18xf32>
    %296 = arith.addf %278, %295 : vector<16x18xf32>
    %c126 = arith.constant 126 : index
    %297 = memref.load %arg4[%c126] : memref<144xf32, #tpu.memory_space<smem>>
    %298 = vector.broadcast %297 : f32 to vector<16x18xf32>
    %299 = arith.mulf %284, %298 : vector<16x18xf32>
    %300 = arith.addf %282, %299 : vector<16x18xf32>
    %c3_170 = arith.constant 3 : index
    %c7_171 = arith.constant 7 : index
    %c0_172 = arith.constant 0 : index
    %301 = vector.load %arg9[%c3_170, %c7_171, %c0_172] : memref<4x32x128xf32, #tpu.memory_space<vmem>>, vector<1x16x18xf32>
    %302 = vector.shape_cast %301 : vector<1x16x18xf32> to vector<16x18xf32>
    %c27_173 = arith.constant 27 : index
    %303 = memref.load %arg4[%c27_173] : memref<144xf32, #tpu.memory_space<smem>>
    %304 = vector.broadcast %303 : f32 to vector<16x18xf32>
    %305 = arith.mulf %302, %304 : vector<16x18xf32>
    %306 = arith.addf %288, %305 : vector<16x18xf32>
    %c63 = arith.constant 63 : index
    %307 = memref.load %arg4[%c63] : memref<144xf32, #tpu.memory_space<smem>>
    %308 = vector.broadcast %307 : f32 to vector<16x18xf32>
    %309 = arith.mulf %302, %308 : vector<16x18xf32>
    %310 = arith.addf %292, %309 : vector<16x18xf32>
    %c99 = arith.constant 99 : index
    %311 = memref.load %arg4[%c99] : memref<144xf32, #tpu.memory_space<smem>>
    %312 = vector.broadcast %311 : f32 to vector<16x18xf32>
    %313 = arith.mulf %302, %312 : vector<16x18xf32>
    %314 = arith.addf %296, %313 : vector<16x18xf32>
    %c135 = arith.constant 135 : index
    %315 = memref.load %arg4[%c135] : memref<144xf32, #tpu.memory_space<smem>>
    %316 = vector.broadcast %315 : f32 to vector<16x18xf32>
    %317 = arith.mulf %302, %316 : vector<16x18xf32>
    %318 = arith.addf %300, %317 : vector<16x18xf32>
    %c0_174 = arith.constant 0 : index
    %c7_175 = arith.constant 7 : index
    %c1_176 = arith.constant 1 : index
    %319 = vector.load %arg9[%c0_174, %c7_175, %c1_176] : memref<4x32x128xf32, #tpu.memory_space<vmem>>, vector<1x16x18xf32>
    %320 = vector.shape_cast %319 : vector<1x16x18xf32> to vector<16x18xf32>
    %c1_177 = arith.constant 1 : index
    %321 = memref.load %arg4[%c1_177] : memref<144xf32, #tpu.memory_space<smem>>
    %322 = vector.broadcast %321 : f32 to vector<16x18xf32>
    %323 = arith.mulf %320, %322 : vector<16x18xf32>
    %324 = arith.addf %306, %323 : vector<16x18xf32>
    %c37 = arith.constant 37 : index
    %325 = memref.load %arg4[%c37] : memref<144xf32, #tpu.memory_space<smem>>
    %326 = vector.broadcast %325 : f32 to vector<16x18xf32>
    %327 = arith.mulf %320, %326 : vector<16x18xf32>
    %328 = arith.addf %310, %327 : vector<16x18xf32>
    %c73 = arith.constant 73 : index
    %329 = memref.load %arg4[%c73] : memref<144xf32, #tpu.memory_space<smem>>
    %330 = vector.broadcast %329 : f32 to vector<16x18xf32>
    %331 = arith.mulf %320, %330 : vector<16x18xf32>
    %332 = arith.addf %314, %331 : vector<16x18xf32>
    %c109 = arith.constant 109 : index
    %333 = memref.load %arg4[%c109] : memref<144xf32, #tpu.memory_space<smem>>
    %334 = vector.broadcast %333 : f32 to vector<16x18xf32>
    %335 = arith.mulf %320, %334 : vector<16x18xf32>
    %336 = arith.addf %318, %335 : vector<16x18xf32>
    %c1_178 = arith.constant 1 : index
    %c7_179 = arith.constant 7 : index
    %c1_180 = arith.constant 1 : index
    %337 = vector.load %arg9[%c1_178, %c7_179, %c1_180] : memref<4x32x128xf32, #tpu.memory_space<vmem>>, vector<1x16x18xf32>
    %338 = vector.shape_cast %337 : vector<1x16x18xf32> to vector<16x18xf32>
    %c10_181 = arith.constant 10 : index
    %339 = memref.load %arg4[%c10_181] : memref<144xf32, #tpu.memory_space<smem>>
    %340 = vector.broadcast %339 : f32 to vector<16x18xf32>
    %341 = arith.mulf %338, %340 : vector<16x18xf32>
    %342 = arith.addf %324, %341 : vector<16x18xf32>
    %c46 = arith.constant 46 : index
    %343 = memref.load %arg4[%c46] : memref<144xf32, #tpu.memory_space<smem>>
    %344 = vector.broadcast %343 : f32 to vector<16x18xf32>
    %345 = arith.mulf %338, %344 : vector<16x18xf32>
    %346 = arith.addf %328, %345 : vector<16x18xf32>
    %c82 = arith.constant 82 : index
    %347 = memref.load %arg4[%c82] : memref<144xf32, #tpu.memory_space<smem>>
    %348 = vector.broadcast %347 : f32 to vector<16x18xf32>
    %349 = arith.mulf %338, %348 : vector<16x18xf32>
    %350 = arith.addf %332, %349 : vector<16x18xf32>
    %c118 = arith.constant 118 : index
    %351 = memref.load %arg4[%c118] : memref<144xf32, #tpu.memory_space<smem>>
    %352 = vector.broadcast %351 : f32 to vector<16x18xf32>
    %353 = arith.mulf %338, %352 : vector<16x18xf32>
    %354 = arith.addf %336, %353 : vector<16x18xf32>
    %c2_182 = arith.constant 2 : index
    %c7_183 = arith.constant 7 : index
    %c1_184 = arith.constant 1 : index
    %355 = vector.load %arg9[%c2_182, %c7_183, %c1_184] : memref<4x32x128xf32, #tpu.memory_space<vmem>>, vector<1x16x18xf32>
    %356 = vector.shape_cast %355 : vector<1x16x18xf32> to vector<16x18xf32>
    %c19_185 = arith.constant 19 : index
    %357 = memref.load %arg4[%c19_185] : memref<144xf32, #tpu.memory_space<smem>>
    %358 = vector.broadcast %357 : f32 to vector<16x18xf32>
    %359 = arith.mulf %356, %358 : vector<16x18xf32>
    %360 = arith.addf %342, %359 : vector<16x18xf32>
    %c55 = arith.constant 55 : index
    %361 = memref.load %arg4[%c55] : memref<144xf32, #tpu.memory_space<smem>>
    %362 = vector.broadcast %361 : f32 to vector<16x18xf32>
    %363 = arith.mulf %356, %362 : vector<16x18xf32>
    %364 = arith.addf %346, %363 : vector<16x18xf32>
    %c91 = arith.constant 91 : index
    %365 = memref.load %arg4[%c91] : memref<144xf32, #tpu.memory_space<smem>>
    %366 = vector.broadcast %365 : f32 to vector<16x18xf32>
    %367 = arith.mulf %356, %366 : vector<16x18xf32>
    %368 = arith.addf %350, %367 : vector<16x18xf32>
    %c127 = arith.constant 127 : index
    %369 = memref.load %arg4[%c127] : memref<144xf32, #tpu.memory_space<smem>>
    %370 = vector.broadcast %369 : f32 to vector<16x18xf32>
    %371 = arith.mulf %356, %370 : vector<16x18xf32>
    %372 = arith.addf %354, %371 : vector<16x18xf32>
    %c3_186 = arith.constant 3 : index
    %c7_187 = arith.constant 7 : index
    %c1_188 = arith.constant 1 : index
    %373 = vector.load %arg9[%c3_186, %c7_187, %c1_188] : memref<4x32x128xf32, #tpu.memory_space<vmem>>, vector<1x16x18xf32>
    %374 = vector.shape_cast %373 : vector<1x16x18xf32> to vector<16x18xf32>
    %c28_189 = arith.constant 28 : index
    %375 = memref.load %arg4[%c28_189] : memref<144xf32, #tpu.memory_space<smem>>
    %376 = vector.broadcast %375 : f32 to vector<16x18xf32>
    %377 = arith.mulf %374, %376 : vector<16x18xf32>
    %378 = arith.addf %360, %377 : vector<16x18xf32>
    %c64 = arith.constant 64 : index
    %379 = memref.load %arg4[%c64] : memref<144xf32, #tpu.memory_space<smem>>
    %380 = vector.broadcast %379 : f32 to vector<16x18xf32>
    %381 = arith.mulf %374, %380 : vector<16x18xf32>
    %382 = arith.addf %364, %381 : vector<16x18xf32>
    %c100 = arith.constant 100 : index
    %383 = memref.load %arg4[%c100] : memref<144xf32, #tpu.memory_space<smem>>
    %384 = vector.broadcast %383 : f32 to vector<16x18xf32>
    %385 = arith.mulf %374, %384 : vector<16x18xf32>
    %386 = arith.addf %368, %385 : vector<16x18xf32>
    %c136 = arith.constant 136 : index
    %387 = memref.load %arg4[%c136] : memref<144xf32, #tpu.memory_space<smem>>
    %388 = vector.broadcast %387 : f32 to vector<16x18xf32>
    %389 = arith.mulf %374, %388 : vector<16x18xf32>
    %390 = arith.addf %372, %389 : vector<16x18xf32>
    %c0_190 = arith.constant 0 : index
    %c7_191 = arith.constant 7 : index
    %c2_192 = arith.constant 2 : index
    %391 = vector.load %arg9[%c0_190, %c7_191, %c2_192] : memref<4x32x128xf32, #tpu.memory_space<vmem>>, vector<1x16x18xf32>
    %392 = vector.shape_cast %391 : vector<1x16x18xf32> to vector<16x18xf32>
    %c2_193 = arith.constant 2 : index
    %393 = memref.load %arg4[%c2_193] : memref<144xf32, #tpu.memory_space<smem>>
    %394 = vector.broadcast %393 : f32 to vector<16x18xf32>
    %395 = arith.mulf %392, %394 : vector<16x18xf32>
    %396 = arith.addf %378, %395 : vector<16x18xf32>
    %c38 = arith.constant 38 : index
    %397 = memref.load %arg4[%c38] : memref<144xf32, #tpu.memory_space<smem>>
    %398 = vector.broadcast %397 : f32 to vector<16x18xf32>
    %399 = arith.mulf %392, %398 : vector<16x18xf32>
    %400 = arith.addf %382, %399 : vector<16x18xf32>
    %c74 = arith.constant 74 : index
    %401 = memref.load %arg4[%c74] : memref<144xf32, #tpu.memory_space<smem>>
    %402 = vector.broadcast %401 : f32 to vector<16x18xf32>
    %403 = arith.mulf %392, %402 : vector<16x18xf32>
    %404 = arith.addf %386, %403 : vector<16x18xf32>
    %c110 = arith.constant 110 : index
    %405 = memref.load %arg4[%c110] : memref<144xf32, #tpu.memory_space<smem>>
    %406 = vector.broadcast %405 : f32 to vector<16x18xf32>
    %407 = arith.mulf %392, %406 : vector<16x18xf32>
    %408 = arith.addf %390, %407 : vector<16x18xf32>
    %c1_194 = arith.constant 1 : index
    %c7_195 = arith.constant 7 : index
    %c2_196 = arith.constant 2 : index
    %409 = vector.load %arg9[%c1_194, %c7_195, %c2_196] : memref<4x32x128xf32, #tpu.memory_space<vmem>>, vector<1x16x18xf32>
    %410 = vector.shape_cast %409 : vector<1x16x18xf32> to vector<16x18xf32>
    %c11_197 = arith.constant 11 : index
    %411 = memref.load %arg4[%c11_197] : memref<144xf32, #tpu.memory_space<smem>>
    %412 = vector.broadcast %411 : f32 to vector<16x18xf32>
    %413 = arith.mulf %410, %412 : vector<16x18xf32>
    %414 = arith.addf %396, %413 : vector<16x18xf32>
    %c47 = arith.constant 47 : index
    %415 = memref.load %arg4[%c47] : memref<144xf32, #tpu.memory_space<smem>>
    %416 = vector.broadcast %415 : f32 to vector<16x18xf32>
    %417 = arith.mulf %410, %416 : vector<16x18xf32>
    %418 = arith.addf %400, %417 : vector<16x18xf32>
    %c83 = arith.constant 83 : index
    %419 = memref.load %arg4[%c83] : memref<144xf32, #tpu.memory_space<smem>>
    %420 = vector.broadcast %419 : f32 to vector<16x18xf32>
    %421 = arith.mulf %410, %420 : vector<16x18xf32>
    %422 = arith.addf %404, %421 : vector<16x18xf32>
    %c119 = arith.constant 119 : index
    %423 = memref.load %arg4[%c119] : memref<144xf32, #tpu.memory_space<smem>>
    %424 = vector.broadcast %423 : f32 to vector<16x18xf32>
    %425 = arith.mulf %410, %424 : vector<16x18xf32>
    %426 = arith.addf %408, %425 : vector<16x18xf32>
    %c2_198 = arith.constant 2 : index
    %c7_199 = arith.constant 7 : index
    %c2_200 = arith.constant 2 : index
    %427 = vector.load %arg9[%c2_198, %c7_199, %c2_200] : memref<4x32x128xf32, #tpu.memory_space<vmem>>, vector<1x16x18xf32>
    %428 = vector.shape_cast %427 : vector<1x16x18xf32> to vector<16x18xf32>
    %c20_201 = arith.constant 20 : index
    %429 = memref.load %arg4[%c20_201] : memref<144xf32, #tpu.memory_space<smem>>
    %430 = vector.broadcast %429 : f32 to vector<16x18xf32>
    %431 = arith.mulf %428, %430 : vector<16x18xf32>
    %432 = arith.addf %414, %431 : vector<16x18xf32>
    %c56 = arith.constant 56 : index
    %433 = memref.load %arg4[%c56] : memref<144xf32, #tpu.memory_space<smem>>
    %434 = vector.broadcast %433 : f32 to vector<16x18xf32>
    %435 = arith.mulf %428, %434 : vector<16x18xf32>
    %436 = arith.addf %418, %435 : vector<16x18xf32>
    %c92 = arith.constant 92 : index
    %437 = memref.load %arg4[%c92] : memref<144xf32, #tpu.memory_space<smem>>
    %438 = vector.broadcast %437 : f32 to vector<16x18xf32>
    %439 = arith.mulf %428, %438 : vector<16x18xf32>
    %440 = arith.addf %422, %439 : vector<16x18xf32>
    %c128 = arith.constant 128 : index
    %441 = memref.load %arg4[%c128] : memref<144xf32, #tpu.memory_space<smem>>
    %442 = vector.broadcast %441 : f32 to vector<16x18xf32>
    %443 = arith.mulf %428, %442 : vector<16x18xf32>
    %444 = arith.addf %426, %443 : vector<16x18xf32>
    %c3_202 = arith.constant 3 : index
    %c7_203 = arith.constant 7 : index
    %c2_204 = arith.constant 2 : index
    %445 = vector.load %arg9[%c3_202, %c7_203, %c2_204] : memref<4x32x128xf32, #tpu.memory_space<vmem>>, vector<1x16x18xf32>
    %446 = vector.shape_cast %445 : vector<1x16x18xf32> to vector<16x18xf32>
    %c29_205 = arith.constant 29 : index
    %447 = memref.load %arg4[%c29_205] : memref<144xf32, #tpu.memory_space<smem>>
    %448 = vector.broadcast %447 : f32 to vector<16x18xf32>
    %449 = arith.mulf %446, %448 : vector<16x18xf32>
    %450 = arith.addf %432, %449 : vector<16x18xf32>
    %c65 = arith.constant 65 : index
    %451 = memref.load %arg4[%c65] : memref<144xf32, #tpu.memory_space<smem>>
    %452 = vector.broadcast %451 : f32 to vector<16x18xf32>
    %453 = arith.mulf %446, %452 : vector<16x18xf32>
    %454 = arith.addf %436, %453 : vector<16x18xf32>
    %c101 = arith.constant 101 : index
    %455 = memref.load %arg4[%c101] : memref<144xf32, #tpu.memory_space<smem>>
    %456 = vector.broadcast %455 : f32 to vector<16x18xf32>
    %457 = arith.mulf %446, %456 : vector<16x18xf32>
    %458 = arith.addf %440, %457 : vector<16x18xf32>
    %c137 = arith.constant 137 : index
    %459 = memref.load %arg4[%c137] : memref<144xf32, #tpu.memory_space<smem>>
    %460 = vector.broadcast %459 : f32 to vector<16x18xf32>
    %461 = arith.mulf %446, %460 : vector<16x18xf32>
    %462 = arith.addf %444, %461 : vector<16x18xf32>
    %c0_206 = arith.constant 0 : index
    %c8_207 = arith.constant 8 : index
    %c0_208 = arith.constant 0 : index
    %463 = vector.load %arg9[%c0_206, %c8_207, %c0_208] : memref<4x32x128xf32, #tpu.memory_space<vmem>>, vector<1x16x18xf32>
    %464 = vector.shape_cast %463 : vector<1x16x18xf32> to vector<16x18xf32>
    %c3_209 = arith.constant 3 : index
    %465 = memref.load %arg4[%c3_209] : memref<144xf32, #tpu.memory_space<smem>>
    %466 = vector.broadcast %465 : f32 to vector<16x18xf32>
    %467 = arith.mulf %464, %466 : vector<16x18xf32>
    %468 = arith.addf %450, %467 : vector<16x18xf32>
    %c39 = arith.constant 39 : index
    %469 = memref.load %arg4[%c39] : memref<144xf32, #tpu.memory_space<smem>>
    %470 = vector.broadcast %469 : f32 to vector<16x18xf32>
    %471 = arith.mulf %464, %470 : vector<16x18xf32>
    %472 = arith.addf %454, %471 : vector<16x18xf32>
    %c75 = arith.constant 75 : index
    %473 = memref.load %arg4[%c75] : memref<144xf32, #tpu.memory_space<smem>>
    %474 = vector.broadcast %473 : f32 to vector<16x18xf32>
    %475 = arith.mulf %464, %474 : vector<16x18xf32>
    %476 = arith.addf %458, %475 : vector<16x18xf32>
    %c111 = arith.constant 111 : index
    %477 = memref.load %arg4[%c111] : memref<144xf32, #tpu.memory_space<smem>>
    %478 = vector.broadcast %477 : f32 to vector<16x18xf32>
    %479 = arith.mulf %464, %478 : vector<16x18xf32>
    %480 = arith.addf %462, %479 : vector<16x18xf32>
    %c1_210 = arith.constant 1 : index
    %c8_211 = arith.constant 8 : index
    %c0_212 = arith.constant 0 : index
    %481 = vector.load %arg9[%c1_210, %c8_211, %c0_212] : memref<4x32x128xf32, #tpu.memory_space<vmem>>, vector<1x16x18xf32>
    %482 = vector.shape_cast %481 : vector<1x16x18xf32> to vector<16x18xf32>
    %c12_213 = arith.constant 12 : index
    %483 = memref.load %arg4[%c12_213] : memref<144xf32, #tpu.memory_space<smem>>
    %484 = vector.broadcast %483 : f32 to vector<16x18xf32>
    %485 = arith.mulf %482, %484 : vector<16x18xf32>
    %486 = arith.addf %468, %485 : vector<16x18xf32>
    %c48 = arith.constant 48 : index
    %487 = memref.load %arg4[%c48] : memref<144xf32, #tpu.memory_space<smem>>
    %488 = vector.broadcast %487 : f32 to vector<16x18xf32>
    %489 = arith.mulf %482, %488 : vector<16x18xf32>
    %490 = arith.addf %472, %489 : vector<16x18xf32>
    %c84 = arith.constant 84 : index
    %491 = memref.load %arg4[%c84] : memref<144xf32, #tpu.memory_space<smem>>
    %492 = vector.broadcast %491 : f32 to vector<16x18xf32>
    %493 = arith.mulf %482, %492 : vector<16x18xf32>
    %494 = arith.addf %476, %493 : vector<16x18xf32>
    %c120 = arith.constant 120 : index
    %495 = memref.load %arg4[%c120] : memref<144xf32, #tpu.memory_space<smem>>
    %496 = vector.broadcast %495 : f32 to vector<16x18xf32>
    %497 = arith.mulf %482, %496 : vector<16x18xf32>
    %498 = arith.addf %480, %497 : vector<16x18xf32>
    %c2_214 = arith.constant 2 : index
    %c8_215 = arith.constant 8 : index
    %c0_216 = arith.constant 0 : index
    %499 = vector.load %arg9[%c2_214, %c8_215, %c0_216] : memref<4x32x128xf32, #tpu.memory_space<vmem>>, vector<1x16x18xf32>
    %500 = vector.shape_cast %499 : vector<1x16x18xf32> to vector<16x18xf32>
    %c21_217 = arith.constant 21 : index
    %501 = memref.load %arg4[%c21_217] : memref<144xf32, #tpu.memory_space<smem>>
    %502 = vector.broadcast %501 : f32 to vector<16x18xf32>
    %503 = arith.mulf %500, %502 : vector<16x18xf32>
    %504 = arith.addf %486, %503 : vector<16x18xf32>
    %c57 = arith.constant 57 : index
    %505 = memref.load %arg4[%c57] : memref<144xf32, #tpu.memory_space<smem>>
    %506 = vector.broadcast %505 : f32 to vector<16x18xf32>
    %507 = arith.mulf %500, %506 : vector<16x18xf32>
    %508 = arith.addf %490, %507 : vector<16x18xf32>
    %c93 = arith.constant 93 : index
    %509 = memref.load %arg4[%c93] : memref<144xf32, #tpu.memory_space<smem>>
    %510 = vector.broadcast %509 : f32 to vector<16x18xf32>
    %511 = arith.mulf %500, %510 : vector<16x18xf32>
    %512 = arith.addf %494, %511 : vector<16x18xf32>
    %c129 = arith.constant 129 : index
    %513 = memref.load %arg4[%c129] : memref<144xf32, #tpu.memory_space<smem>>
    %514 = vector.broadcast %513 : f32 to vector<16x18xf32>
    %515 = arith.mulf %500, %514 : vector<16x18xf32>
    %516 = arith.addf %498, %515 : vector<16x18xf32>
    %c3_218 = arith.constant 3 : index
    %c8_219 = arith.constant 8 : index
    %c0_220 = arith.constant 0 : index
    %517 = vector.load %arg9[%c3_218, %c8_219, %c0_220] : memref<4x32x128xf32, #tpu.memory_space<vmem>>, vector<1x16x18xf32>
    %518 = vector.shape_cast %517 : vector<1x16x18xf32> to vector<16x18xf32>
    %c30_221 = arith.constant 30 : index
    %519 = memref.load %arg4[%c30_221] : memref<144xf32, #tpu.memory_space<smem>>
    %520 = vector.broadcast %519 : f32 to vector<16x18xf32>
    %521 = arith.mulf %518, %520 : vector<16x18xf32>
    %522 = arith.addf %504, %521 : vector<16x18xf32>
    %c66 = arith.constant 66 : index
    %523 = memref.load %arg4[%c66] : memref<144xf32, #tpu.memory_space<smem>>
    %524 = vector.broadcast %523 : f32 to vector<16x18xf32>
    %525 = arith.mulf %518, %524 : vector<16x18xf32>
    %526 = arith.addf %508, %525 : vector<16x18xf32>
    %c102 = arith.constant 102 : index
    %527 = memref.load %arg4[%c102] : memref<144xf32, #tpu.memory_space<smem>>
    %528 = vector.broadcast %527 : f32 to vector<16x18xf32>
    %529 = arith.mulf %518, %528 : vector<16x18xf32>
    %530 = arith.addf %512, %529 : vector<16x18xf32>
    %c138 = arith.constant 138 : index
    %531 = memref.load %arg4[%c138] : memref<144xf32, #tpu.memory_space<smem>>
    %532 = vector.broadcast %531 : f32 to vector<16x18xf32>
    %533 = arith.mulf %518, %532 : vector<16x18xf32>
    %534 = arith.addf %516, %533 : vector<16x18xf32>
    %c0_222 = arith.constant 0 : index
    %c8_223 = arith.constant 8 : index
    %c1_224 = arith.constant 1 : index
    %535 = vector.load %arg9[%c0_222, %c8_223, %c1_224] : memref<4x32x128xf32, #tpu.memory_space<vmem>>, vector<1x16x18xf32>
    %536 = vector.shape_cast %535 : vector<1x16x18xf32> to vector<16x18xf32>
    %c4_225 = arith.constant 4 : index
    %537 = memref.load %arg4[%c4_225] : memref<144xf32, #tpu.memory_space<smem>>
    %538 = vector.broadcast %537 : f32 to vector<16x18xf32>
    %539 = arith.mulf %536, %538 : vector<16x18xf32>
    %540 = arith.addf %522, %539 : vector<16x18xf32>
    %c40 = arith.constant 40 : index
    %541 = memref.load %arg4[%c40] : memref<144xf32, #tpu.memory_space<smem>>
    %542 = vector.broadcast %541 : f32 to vector<16x18xf32>
    %543 = arith.mulf %536, %542 : vector<16x18xf32>
    %544 = arith.addf %526, %543 : vector<16x18xf32>
    %c76 = arith.constant 76 : index
    %545 = memref.load %arg4[%c76] : memref<144xf32, #tpu.memory_space<smem>>
    %546 = vector.broadcast %545 : f32 to vector<16x18xf32>
    %547 = arith.mulf %536, %546 : vector<16x18xf32>
    %548 = arith.addf %530, %547 : vector<16x18xf32>
    %c112 = arith.constant 112 : index
    %549 = memref.load %arg4[%c112] : memref<144xf32, #tpu.memory_space<smem>>
    %550 = vector.broadcast %549 : f32 to vector<16x18xf32>
    %551 = arith.mulf %536, %550 : vector<16x18xf32>
    %552 = arith.addf %534, %551 : vector<16x18xf32>
    %c1_226 = arith.constant 1 : index
    %c8_227 = arith.constant 8 : index
    %c1_228 = arith.constant 1 : index
    %553 = vector.load %arg9[%c1_226, %c8_227, %c1_228] : memref<4x32x128xf32, #tpu.memory_space<vmem>>, vector<1x16x18xf32>
    %554 = vector.shape_cast %553 : vector<1x16x18xf32> to vector<16x18xf32>
    %c13_229 = arith.constant 13 : index
    %555 = memref.load %arg4[%c13_229] : memref<144xf32, #tpu.memory_space<smem>>
    %556 = vector.broadcast %555 : f32 to vector<16x18xf32>
    %557 = arith.mulf %554, %556 : vector<16x18xf32>
    %558 = arith.addf %540, %557 : vector<16x18xf32>
    %c49 = arith.constant 49 : index
    %559 = memref.load %arg4[%c49] : memref<144xf32, #tpu.memory_space<smem>>
    %560 = vector.broadcast %559 : f32 to vector<16x18xf32>
    %561 = arith.mulf %554, %560 : vector<16x18xf32>
    %562 = arith.addf %544, %561 : vector<16x18xf32>
    %c85 = arith.constant 85 : index
    %563 = memref.load %arg4[%c85] : memref<144xf32, #tpu.memory_space<smem>>
    %564 = vector.broadcast %563 : f32 to vector<16x18xf32>
    %565 = arith.mulf %554, %564 : vector<16x18xf32>
    %566 = arith.addf %548, %565 : vector<16x18xf32>
    %c121 = arith.constant 121 : index
    %567 = memref.load %arg4[%c121] : memref<144xf32, #tpu.memory_space<smem>>
    %568 = vector.broadcast %567 : f32 to vector<16x18xf32>
    %569 = arith.mulf %554, %568 : vector<16x18xf32>
    %570 = arith.addf %552, %569 : vector<16x18xf32>
    %c2_230 = arith.constant 2 : index
    %c8_231 = arith.constant 8 : index
    %c1_232 = arith.constant 1 : index
    %571 = vector.load %arg9[%c2_230, %c8_231, %c1_232] : memref<4x32x128xf32, #tpu.memory_space<vmem>>, vector<1x16x18xf32>
    %572 = vector.shape_cast %571 : vector<1x16x18xf32> to vector<16x18xf32>
    %c22_233 = arith.constant 22 : index
    %573 = memref.load %arg4[%c22_233] : memref<144xf32, #tpu.memory_space<smem>>
    %574 = vector.broadcast %573 : f32 to vector<16x18xf32>
    %575 = arith.mulf %572, %574 : vector<16x18xf32>
    %576 = arith.addf %558, %575 : vector<16x18xf32>
    %c58 = arith.constant 58 : index
    %577 = memref.load %arg4[%c58] : memref<144xf32, #tpu.memory_space<smem>>
    %578 = vector.broadcast %577 : f32 to vector<16x18xf32>
    %579 = arith.mulf %572, %578 : vector<16x18xf32>
    %580 = arith.addf %562, %579 : vector<16x18xf32>
    %c94 = arith.constant 94 : index
    %581 = memref.load %arg4[%c94] : memref<144xf32, #tpu.memory_space<smem>>
    %582 = vector.broadcast %581 : f32 to vector<16x18xf32>
    %583 = arith.mulf %572, %582 : vector<16x18xf32>
    %584 = arith.addf %566, %583 : vector<16x18xf32>
    %c130 = arith.constant 130 : index
    %585 = memref.load %arg4[%c130] : memref<144xf32, #tpu.memory_space<smem>>
    %586 = vector.broadcast %585 : f32 to vector<16x18xf32>
    %587 = arith.mulf %572, %586 : vector<16x18xf32>
    %588 = arith.addf %570, %587 : vector<16x18xf32>
    %c3_234 = arith.constant 3 : index
    %c8_235 = arith.constant 8 : index
    %c1_236 = arith.constant 1 : index
    %589 = vector.load %arg9[%c3_234, %c8_235, %c1_236] : memref<4x32x128xf32, #tpu.memory_space<vmem>>, vector<1x16x18xf32>
    %590 = vector.shape_cast %589 : vector<1x16x18xf32> to vector<16x18xf32>
    %c31_237 = arith.constant 31 : index
    %591 = memref.load %arg4[%c31_237] : memref<144xf32, #tpu.memory_space<smem>>
    %592 = vector.broadcast %591 : f32 to vector<16x18xf32>
    %593 = arith.mulf %590, %592 : vector<16x18xf32>
    %594 = arith.addf %576, %593 : vector<16x18xf32>
    %c67 = arith.constant 67 : index
    %595 = memref.load %arg4[%c67] : memref<144xf32, #tpu.memory_space<smem>>
    %596 = vector.broadcast %595 : f32 to vector<16x18xf32>
    %597 = arith.mulf %590, %596 : vector<16x18xf32>
    %598 = arith.addf %580, %597 : vector<16x18xf32>
    %c103 = arith.constant 103 : index
    %599 = memref.load %arg4[%c103] : memref<144xf32, #tpu.memory_space<smem>>
    %600 = vector.broadcast %599 : f32 to vector<16x18xf32>
    %601 = arith.mulf %590, %600 : vector<16x18xf32>
    %602 = arith.addf %584, %601 : vector<16x18xf32>
    %c139 = arith.constant 139 : index
    %603 = memref.load %arg4[%c139] : memref<144xf32, #tpu.memory_space<smem>>
    %604 = vector.broadcast %603 : f32 to vector<16x18xf32>
    %605 = arith.mulf %590, %604 : vector<16x18xf32>
    %606 = arith.addf %588, %605 : vector<16x18xf32>
    %c0_238 = arith.constant 0 : index
    %c8_239 = arith.constant 8 : index
    %c2_240 = arith.constant 2 : index
    %607 = vector.load %arg9[%c0_238, %c8_239, %c2_240] : memref<4x32x128xf32, #tpu.memory_space<vmem>>, vector<1x16x18xf32>
    %608 = vector.shape_cast %607 : vector<1x16x18xf32> to vector<16x18xf32>
    %c5_241 = arith.constant 5 : index
    %609 = memref.load %arg4[%c5_241] : memref<144xf32, #tpu.memory_space<smem>>
    %610 = vector.broadcast %609 : f32 to vector<16x18xf32>
    %611 = arith.mulf %608, %610 : vector<16x18xf32>
    %612 = arith.addf %594, %611 : vector<16x18xf32>
    %c41 = arith.constant 41 : index
    %613 = memref.load %arg4[%c41] : memref<144xf32, #tpu.memory_space<smem>>
    %614 = vector.broadcast %613 : f32 to vector<16x18xf32>
    %615 = arith.mulf %608, %614 : vector<16x18xf32>
    %616 = arith.addf %598, %615 : vector<16x18xf32>
    %c77 = arith.constant 77 : index
    %617 = memref.load %arg4[%c77] : memref<144xf32, #tpu.memory_space<smem>>
    %618 = vector.broadcast %617 : f32 to vector<16x18xf32>
    %619 = arith.mulf %608, %618 : vector<16x18xf32>
    %620 = arith.addf %602, %619 : vector<16x18xf32>
    %c113 = arith.constant 113 : index
    %621 = memref.load %arg4[%c113] : memref<144xf32, #tpu.memory_space<smem>>
    %622 = vector.broadcast %621 : f32 to vector<16x18xf32>
    %623 = arith.mulf %608, %622 : vector<16x18xf32>
    %624 = arith.addf %606, %623 : vector<16x18xf32>
    %c1_242 = arith.constant 1 : index
    %c8_243 = arith.constant 8 : index
    %c2_244 = arith.constant 2 : index
    %625 = vector.load %arg9[%c1_242, %c8_243, %c2_244] : memref<4x32x128xf32, #tpu.memory_space<vmem>>, vector<1x16x18xf32>
    %626 = vector.shape_cast %625 : vector<1x16x18xf32> to vector<16x18xf32>
    %c14_245 = arith.constant 14 : index
    %627 = memref.load %arg4[%c14_245] : memref<144xf32, #tpu.memory_space<smem>>
    %628 = vector.broadcast %627 : f32 to vector<16x18xf32>
    %629 = arith.mulf %626, %628 : vector<16x18xf32>
    %630 = arith.addf %612, %629 : vector<16x18xf32>
    %c50 = arith.constant 50 : index
    %631 = memref.load %arg4[%c50] : memref<144xf32, #tpu.memory_space<smem>>
    %632 = vector.broadcast %631 : f32 to vector<16x18xf32>
    %633 = arith.mulf %626, %632 : vector<16x18xf32>
    %634 = arith.addf %616, %633 : vector<16x18xf32>
    %c86 = arith.constant 86 : index
    %635 = memref.load %arg4[%c86] : memref<144xf32, #tpu.memory_space<smem>>
    %636 = vector.broadcast %635 : f32 to vector<16x18xf32>
    %637 = arith.mulf %626, %636 : vector<16x18xf32>
    %638 = arith.addf %620, %637 : vector<16x18xf32>
    %c122 = arith.constant 122 : index
    %639 = memref.load %arg4[%c122] : memref<144xf32, #tpu.memory_space<smem>>
    %640 = vector.broadcast %639 : f32 to vector<16x18xf32>
    %641 = arith.mulf %626, %640 : vector<16x18xf32>
    %642 = arith.addf %624, %641 : vector<16x18xf32>
    %c2_246 = arith.constant 2 : index
    %c8_247 = arith.constant 8 : index
    %c2_248 = arith.constant 2 : index
    %643 = vector.load %arg9[%c2_246, %c8_247, %c2_248] : memref<4x32x128xf32, #tpu.memory_space<vmem>>, vector<1x16x18xf32>
    %644 = vector.shape_cast %643 : vector<1x16x18xf32> to vector<16x18xf32>
    %c23_249 = arith.constant 23 : index
    %645 = memref.load %arg4[%c23_249] : memref<144xf32, #tpu.memory_space<smem>>
    %646 = vector.broadcast %645 : f32 to vector<16x18xf32>
    %647 = arith.mulf %644, %646 : vector<16x18xf32>
    %648 = arith.addf %630, %647 : vector<16x18xf32>
    %c59 = arith.constant 59 : index
    %649 = memref.load %arg4[%c59] : memref<144xf32, #tpu.memory_space<smem>>
    %650 = vector.broadcast %649 : f32 to vector<16x18xf32>
    %651 = arith.mulf %644, %650 : vector<16x18xf32>
    %652 = arith.addf %634, %651 : vector<16x18xf32>
    %c95 = arith.constant 95 : index
    %653 = memref.load %arg4[%c95] : memref<144xf32, #tpu.memory_space<smem>>
    %654 = vector.broadcast %653 : f32 to vector<16x18xf32>
    %655 = arith.mulf %644, %654 : vector<16x18xf32>
    %656 = arith.addf %638, %655 : vector<16x18xf32>
    %c131 = arith.constant 131 : index
    %657 = memref.load %arg4[%c131] : memref<144xf32, #tpu.memory_space<smem>>
    %658 = vector.broadcast %657 : f32 to vector<16x18xf32>
    %659 = arith.mulf %644, %658 : vector<16x18xf32>
    %660 = arith.addf %642, %659 : vector<16x18xf32>
    %c3_250 = arith.constant 3 : index
    %c8_251 = arith.constant 8 : index
    %c2_252 = arith.constant 2 : index
    %661 = vector.load %arg9[%c3_250, %c8_251, %c2_252] : memref<4x32x128xf32, #tpu.memory_space<vmem>>, vector<1x16x18xf32>
    %662 = vector.shape_cast %661 : vector<1x16x18xf32> to vector<16x18xf32>
    %c32 = arith.constant 32 : index
    %663 = memref.load %arg4[%c32] : memref<144xf32, #tpu.memory_space<smem>>
    %664 = vector.broadcast %663 : f32 to vector<16x18xf32>
    %665 = arith.mulf %662, %664 : vector<16x18xf32>
    %666 = arith.addf %648, %665 : vector<16x18xf32>
    %c68 = arith.constant 68 : index
    %667 = memref.load %arg4[%c68] : memref<144xf32, #tpu.memory_space<smem>>
    %668 = vector.broadcast %667 : f32 to vector<16x18xf32>
    %669 = arith.mulf %662, %668 : vector<16x18xf32>
    %670 = arith.addf %652, %669 : vector<16x18xf32>
    %c104 = arith.constant 104 : index
    %671 = memref.load %arg4[%c104] : memref<144xf32, #tpu.memory_space<smem>>
    %672 = vector.broadcast %671 : f32 to vector<16x18xf32>
    %673 = arith.mulf %662, %672 : vector<16x18xf32>
    %674 = arith.addf %656, %673 : vector<16x18xf32>
    %c140 = arith.constant 140 : index
    %675 = memref.load %arg4[%c140] : memref<144xf32, #tpu.memory_space<smem>>
    %676 = vector.broadcast %675 : f32 to vector<16x18xf32>
    %677 = arith.mulf %662, %676 : vector<16x18xf32>
    %678 = arith.addf %660, %677 : vector<16x18xf32>
    %c0_253 = arith.constant 0 : index
    %c9_254 = arith.constant 9 : index
    %c0_255 = arith.constant 0 : index
    %679 = vector.load %arg9[%c0_253, %c9_254, %c0_255] : memref<4x32x128xf32, #tpu.memory_space<vmem>>, vector<1x16x18xf32>
    %680 = vector.shape_cast %679 : vector<1x16x18xf32> to vector<16x18xf32>
    %c6_256 = arith.constant 6 : index
    %681 = memref.load %arg4[%c6_256] : memref<144xf32, #tpu.memory_space<smem>>
    %682 = vector.broadcast %681 : f32 to vector<16x18xf32>
    %683 = arith.mulf %680, %682 : vector<16x18xf32>
    %684 = arith.addf %666, %683 : vector<16x18xf32>
    %c42 = arith.constant 42 : index
    %685 = memref.load %arg4[%c42] : memref<144xf32, #tpu.memory_space<smem>>
    %686 = vector.broadcast %685 : f32 to vector<16x18xf32>
    %687 = arith.mulf %680, %686 : vector<16x18xf32>
    %688 = arith.addf %670, %687 : vector<16x18xf32>
    %c78 = arith.constant 78 : index
    %689 = memref.load %arg4[%c78] : memref<144xf32, #tpu.memory_space<smem>>
    %690 = vector.broadcast %689 : f32 to vector<16x18xf32>
    %691 = arith.mulf %680, %690 : vector<16x18xf32>
    %692 = arith.addf %674, %691 : vector<16x18xf32>
    %c114 = arith.constant 114 : index
    %693 = memref.load %arg4[%c114] : memref<144xf32, #tpu.memory_space<smem>>
    %694 = vector.broadcast %693 : f32 to vector<16x18xf32>
    %695 = arith.mulf %680, %694 : vector<16x18xf32>
    %696 = arith.addf %678, %695 : vector<16x18xf32>
    %c1_257 = arith.constant 1 : index
    %c9_258 = arith.constant 9 : index
    %c0_259 = arith.constant 0 : index
    %697 = vector.load %arg9[%c1_257, %c9_258, %c0_259] : memref<4x32x128xf32, #tpu.memory_space<vmem>>, vector<1x16x18xf32>
    %698 = vector.shape_cast %697 : vector<1x16x18xf32> to vector<16x18xf32>
    %c15_260 = arith.constant 15 : index
    %699 = memref.load %arg4[%c15_260] : memref<144xf32, #tpu.memory_space<smem>>
    %700 = vector.broadcast %699 : f32 to vector<16x18xf32>
    %701 = arith.mulf %698, %700 : vector<16x18xf32>
    %702 = arith.addf %684, %701 : vector<16x18xf32>
    %c51 = arith.constant 51 : index
    %703 = memref.load %arg4[%c51] : memref<144xf32, #tpu.memory_space<smem>>
    %704 = vector.broadcast %703 : f32 to vector<16x18xf32>
    %705 = arith.mulf %698, %704 : vector<16x18xf32>
    %706 = arith.addf %688, %705 : vector<16x18xf32>
    %c87 = arith.constant 87 : index
    %707 = memref.load %arg4[%c87] : memref<144xf32, #tpu.memory_space<smem>>
    %708 = vector.broadcast %707 : f32 to vector<16x18xf32>
    %709 = arith.mulf %698, %708 : vector<16x18xf32>
    %710 = arith.addf %692, %709 : vector<16x18xf32>
    %c123 = arith.constant 123 : index
    %711 = memref.load %arg4[%c123] : memref<144xf32, #tpu.memory_space<smem>>
    %712 = vector.broadcast %711 : f32 to vector<16x18xf32>
    %713 = arith.mulf %698, %712 : vector<16x18xf32>
    %714 = arith.addf %696, %713 : vector<16x18xf32>
    %c2_261 = arith.constant 2 : index
    %c9_262 = arith.constant 9 : index
    %c0_263 = arith.constant 0 : index
    %715 = vector.load %arg9[%c2_261, %c9_262, %c0_263] : memref<4x32x128xf32, #tpu.memory_space<vmem>>, vector<1x16x18xf32>
    %716 = vector.shape_cast %715 : vector<1x16x18xf32> to vector<16x18xf32>
    %c24_264 = arith.constant 24 : index
    %717 = memref.load %arg4[%c24_264] : memref<144xf32, #tpu.memory_space<smem>>
    %718 = vector.broadcast %717 : f32 to vector<16x18xf32>
    %719 = arith.mulf %716, %718 : vector<16x18xf32>
    %720 = arith.addf %702, %719 : vector<16x18xf32>
    %c60 = arith.constant 60 : index
    %721 = memref.load %arg4[%c60] : memref<144xf32, #tpu.memory_space<smem>>
    %722 = vector.broadcast %721 : f32 to vector<16x18xf32>
    %723 = arith.mulf %716, %722 : vector<16x18xf32>
    %724 = arith.addf %706, %723 : vector<16x18xf32>
    %c96 = arith.constant 96 : index
    %725 = memref.load %arg4[%c96] : memref<144xf32, #tpu.memory_space<smem>>
    %726 = vector.broadcast %725 : f32 to vector<16x18xf32>
    %727 = arith.mulf %716, %726 : vector<16x18xf32>
    %728 = arith.addf %710, %727 : vector<16x18xf32>
    %c132 = arith.constant 132 : index
    %729 = memref.load %arg4[%c132] : memref<144xf32, #tpu.memory_space<smem>>
    %730 = vector.broadcast %729 : f32 to vector<16x18xf32>
    %731 = arith.mulf %716, %730 : vector<16x18xf32>
    %732 = arith.addf %714, %731 : vector<16x18xf32>
    %c3_265 = arith.constant 3 : index
    %c9_266 = arith.constant 9 : index
    %c0_267 = arith.constant 0 : index
    %733 = vector.load %arg9[%c3_265, %c9_266, %c0_267] : memref<4x32x128xf32, #tpu.memory_space<vmem>>, vector<1x16x18xf32>
    %734 = vector.shape_cast %733 : vector<1x16x18xf32> to vector<16x18xf32>
    %c33 = arith.constant 33 : index
    %735 = memref.load %arg4[%c33] : memref<144xf32, #tpu.memory_space<smem>>
    %736 = vector.broadcast %735 : f32 to vector<16x18xf32>
    %737 = arith.mulf %734, %736 : vector<16x18xf32>
    %738 = arith.addf %720, %737 : vector<16x18xf32>
    %c69 = arith.constant 69 : index
    %739 = memref.load %arg4[%c69] : memref<144xf32, #tpu.memory_space<smem>>
    %740 = vector.broadcast %739 : f32 to vector<16x18xf32>
    %741 = arith.mulf %734, %740 : vector<16x18xf32>
    %742 = arith.addf %724, %741 : vector<16x18xf32>
    %c105 = arith.constant 105 : index
    %743 = memref.load %arg4[%c105] : memref<144xf32, #tpu.memory_space<smem>>
    %744 = vector.broadcast %743 : f32 to vector<16x18xf32>
    %745 = arith.mulf %734, %744 : vector<16x18xf32>
    %746 = arith.addf %728, %745 : vector<16x18xf32>
    %c141 = arith.constant 141 : index
    %747 = memref.load %arg4[%c141] : memref<144xf32, #tpu.memory_space<smem>>
    %748 = vector.broadcast %747 : f32 to vector<16x18xf32>
    %749 = arith.mulf %734, %748 : vector<16x18xf32>
    %750 = arith.addf %732, %749 : vector<16x18xf32>
    %c0_268 = arith.constant 0 : index
    %c9_269 = arith.constant 9 : index
    %c1_270 = arith.constant 1 : index
    %751 = vector.load %arg9[%c0_268, %c9_269, %c1_270] : memref<4x32x128xf32, #tpu.memory_space<vmem>>, vector<1x16x18xf32>
    %752 = vector.shape_cast %751 : vector<1x16x18xf32> to vector<16x18xf32>
    %c7_271 = arith.constant 7 : index
    %753 = memref.load %arg4[%c7_271] : memref<144xf32, #tpu.memory_space<smem>>
    %754 = vector.broadcast %753 : f32 to vector<16x18xf32>
    %755 = arith.mulf %752, %754 : vector<16x18xf32>
    %756 = arith.addf %738, %755 : vector<16x18xf32>
    %c43 = arith.constant 43 : index
    %757 = memref.load %arg4[%c43] : memref<144xf32, #tpu.memory_space<smem>>
    %758 = vector.broadcast %757 : f32 to vector<16x18xf32>
    %759 = arith.mulf %752, %758 : vector<16x18xf32>
    %760 = arith.addf %742, %759 : vector<16x18xf32>
    %c79 = arith.constant 79 : index
    %761 = memref.load %arg4[%c79] : memref<144xf32, #tpu.memory_space<smem>>
    %762 = vector.broadcast %761 : f32 to vector<16x18xf32>
    %763 = arith.mulf %752, %762 : vector<16x18xf32>
    %764 = arith.addf %746, %763 : vector<16x18xf32>
    %c115 = arith.constant 115 : index
    %765 = memref.load %arg4[%c115] : memref<144xf32, #tpu.memory_space<smem>>
    %766 = vector.broadcast %765 : f32 to vector<16x18xf32>
    %767 = arith.mulf %752, %766 : vector<16x18xf32>
    %768 = arith.addf %750, %767 : vector<16x18xf32>
    %c1_272 = arith.constant 1 : index
    %c9_273 = arith.constant 9 : index
    %c1_274 = arith.constant 1 : index
    %769 = vector.load %arg9[%c1_272, %c9_273, %c1_274] : memref<4x32x128xf32, #tpu.memory_space<vmem>>, vector<1x16x18xf32>
    %770 = vector.shape_cast %769 : vector<1x16x18xf32> to vector<16x18xf32>
    %c16_275 = arith.constant 16 : index
    %771 = memref.load %arg4[%c16_275] : memref<144xf32, #tpu.memory_space<smem>>
    %772 = vector.broadcast %771 : f32 to vector<16x18xf32>
    %773 = arith.mulf %770, %772 : vector<16x18xf32>
    %774 = arith.addf %756, %773 : vector<16x18xf32>
    %c52 = arith.constant 52 : index
    %775 = memref.load %arg4[%c52] : memref<144xf32, #tpu.memory_space<smem>>
    %776 = vector.broadcast %775 : f32 to vector<16x18xf32>
    %777 = arith.mulf %770, %776 : vector<16x18xf32>
    %778 = arith.addf %760, %777 : vector<16x18xf32>
    %c88 = arith.constant 88 : index
    %779 = memref.load %arg4[%c88] : memref<144xf32, #tpu.memory_space<smem>>
    %780 = vector.broadcast %779 : f32 to vector<16x18xf32>
    %781 = arith.mulf %770, %780 : vector<16x18xf32>
    %782 = arith.addf %764, %781 : vector<16x18xf32>
    %c124 = arith.constant 124 : index
    %783 = memref.load %arg4[%c124] : memref<144xf32, #tpu.memory_space<smem>>
    %784 = vector.broadcast %783 : f32 to vector<16x18xf32>
    %785 = arith.mulf %770, %784 : vector<16x18xf32>
    %786 = arith.addf %768, %785 : vector<16x18xf32>
    %c2_276 = arith.constant 2 : index
    %c9_277 = arith.constant 9 : index
    %c1_278 = arith.constant 1 : index
    %787 = vector.load %arg9[%c2_276, %c9_277, %c1_278] : memref<4x32x128xf32, #tpu.memory_space<vmem>>, vector<1x16x18xf32>
    %788 = vector.shape_cast %787 : vector<1x16x18xf32> to vector<16x18xf32>
    %c25_279 = arith.constant 25 : index
    %789 = memref.load %arg4[%c25_279] : memref<144xf32, #tpu.memory_space<smem>>
    %790 = vector.broadcast %789 : f32 to vector<16x18xf32>
    %791 = arith.mulf %788, %790 : vector<16x18xf32>
    %792 = arith.addf %774, %791 : vector<16x18xf32>
    %c61 = arith.constant 61 : index
    %793 = memref.load %arg4[%c61] : memref<144xf32, #tpu.memory_space<smem>>
    %794 = vector.broadcast %793 : f32 to vector<16x18xf32>
    %795 = arith.mulf %788, %794 : vector<16x18xf32>
    %796 = arith.addf %778, %795 : vector<16x18xf32>
    %c97 = arith.constant 97 : index
    %797 = memref.load %arg4[%c97] : memref<144xf32, #tpu.memory_space<smem>>
    %798 = vector.broadcast %797 : f32 to vector<16x18xf32>
    %799 = arith.mulf %788, %798 : vector<16x18xf32>
    %800 = arith.addf %782, %799 : vector<16x18xf32>
    %c133 = arith.constant 133 : index
    %801 = memref.load %arg4[%c133] : memref<144xf32, #tpu.memory_space<smem>>
    %802 = vector.broadcast %801 : f32 to vector<16x18xf32>
    %803 = arith.mulf %788, %802 : vector<16x18xf32>
    %804 = arith.addf %786, %803 : vector<16x18xf32>
    %c3_280 = arith.constant 3 : index
    %c9_281 = arith.constant 9 : index
    %c1_282 = arith.constant 1 : index
    %805 = vector.load %arg9[%c3_280, %c9_281, %c1_282] : memref<4x32x128xf32, #tpu.memory_space<vmem>>, vector<1x16x18xf32>
    %806 = vector.shape_cast %805 : vector<1x16x18xf32> to vector<16x18xf32>
    %c34 = arith.constant 34 : index
    %807 = memref.load %arg4[%c34] : memref<144xf32, #tpu.memory_space<smem>>
    %808 = vector.broadcast %807 : f32 to vector<16x18xf32>
    %809 = arith.mulf %806, %808 : vector<16x18xf32>
    %810 = arith.addf %792, %809 : vector<16x18xf32>
    %c70 = arith.constant 70 : index
    %811 = memref.load %arg4[%c70] : memref<144xf32, #tpu.memory_space<smem>>
    %812 = vector.broadcast %811 : f32 to vector<16x18xf32>
    %813 = arith.mulf %806, %812 : vector<16x18xf32>
    %814 = arith.addf %796, %813 : vector<16x18xf32>
    %c106 = arith.constant 106 : index
    %815 = memref.load %arg4[%c106] : memref<144xf32, #tpu.memory_space<smem>>
    %816 = vector.broadcast %815 : f32 to vector<16x18xf32>
    %817 = arith.mulf %806, %816 : vector<16x18xf32>
    %818 = arith.addf %800, %817 : vector<16x18xf32>
    %c142 = arith.constant 142 : index
    %819 = memref.load %arg4[%c142] : memref<144xf32, #tpu.memory_space<smem>>
    %820 = vector.broadcast %819 : f32 to vector<16x18xf32>
    %821 = arith.mulf %806, %820 : vector<16x18xf32>
    %822 = arith.addf %804, %821 : vector<16x18xf32>
    %c0_283 = arith.constant 0 : index
    %c9_284 = arith.constant 9 : index
    %c2_285 = arith.constant 2 : index
    %823 = vector.load %arg9[%c0_283, %c9_284, %c2_285] : memref<4x32x128xf32, #tpu.memory_space<vmem>>, vector<1x16x18xf32>
    %824 = vector.shape_cast %823 : vector<1x16x18xf32> to vector<16x18xf32>
    %c8_286 = arith.constant 8 : index
    %825 = memref.load %arg4[%c8_286] : memref<144xf32, #tpu.memory_space<smem>>
    %826 = vector.broadcast %825 : f32 to vector<16x18xf32>
    %827 = arith.mulf %824, %826 : vector<16x18xf32>
    %828 = arith.addf %810, %827 : vector<16x18xf32>
    %c44 = arith.constant 44 : index
    %829 = memref.load %arg4[%c44] : memref<144xf32, #tpu.memory_space<smem>>
    %830 = vector.broadcast %829 : f32 to vector<16x18xf32>
    %831 = arith.mulf %824, %830 : vector<16x18xf32>
    %832 = arith.addf %814, %831 : vector<16x18xf32>
    %c80 = arith.constant 80 : index
    %833 = memref.load %arg4[%c80] : memref<144xf32, #tpu.memory_space<smem>>
    %834 = vector.broadcast %833 : f32 to vector<16x18xf32>
    %835 = arith.mulf %824, %834 : vector<16x18xf32>
    %836 = arith.addf %818, %835 : vector<16x18xf32>
    %c116 = arith.constant 116 : index
    %837 = memref.load %arg4[%c116] : memref<144xf32, #tpu.memory_space<smem>>
    %838 = vector.broadcast %837 : f32 to vector<16x18xf32>
    %839 = arith.mulf %824, %838 : vector<16x18xf32>
    %840 = arith.addf %822, %839 : vector<16x18xf32>
    %c1_287 = arith.constant 1 : index
    %c9_288 = arith.constant 9 : index
    %c2_289 = arith.constant 2 : index
    %841 = vector.load %arg9[%c1_287, %c9_288, %c2_289] : memref<4x32x128xf32, #tpu.memory_space<vmem>>, vector<1x16x18xf32>
    %842 = vector.shape_cast %841 : vector<1x16x18xf32> to vector<16x18xf32>
    %c17_290 = arith.constant 17 : index
    %843 = memref.load %arg4[%c17_290] : memref<144xf32, #tpu.memory_space<smem>>
    %844 = vector.broadcast %843 : f32 to vector<16x18xf32>
    %845 = arith.mulf %842, %844 : vector<16x18xf32>
    %846 = arith.addf %828, %845 : vector<16x18xf32>
    %c53 = arith.constant 53 : index
    %847 = memref.load %arg4[%c53] : memref<144xf32, #tpu.memory_space<smem>>
    %848 = vector.broadcast %847 : f32 to vector<16x18xf32>
    %849 = arith.mulf %842, %848 : vector<16x18xf32>
    %850 = arith.addf %832, %849 : vector<16x18xf32>
    %c89 = arith.constant 89 : index
    %851 = memref.load %arg4[%c89] : memref<144xf32, #tpu.memory_space<smem>>
    %852 = vector.broadcast %851 : f32 to vector<16x18xf32>
    %853 = arith.mulf %842, %852 : vector<16x18xf32>
    %854 = arith.addf %836, %853 : vector<16x18xf32>
    %c125 = arith.constant 125 : index
    %855 = memref.load %arg4[%c125] : memref<144xf32, #tpu.memory_space<smem>>
    %856 = vector.broadcast %855 : f32 to vector<16x18xf32>
    %857 = arith.mulf %842, %856 : vector<16x18xf32>
    %858 = arith.addf %840, %857 : vector<16x18xf32>
    %c2_291 = arith.constant 2 : index
    %c9_292 = arith.constant 9 : index
    %c2_293 = arith.constant 2 : index
    %859 = vector.load %arg9[%c2_291, %c9_292, %c2_293] : memref<4x32x128xf32, #tpu.memory_space<vmem>>, vector<1x16x18xf32>
    %860 = vector.shape_cast %859 : vector<1x16x18xf32> to vector<16x18xf32>
    %c26_294 = arith.constant 26 : index
    %861 = memref.load %arg4[%c26_294] : memref<144xf32, #tpu.memory_space<smem>>
    %862 = vector.broadcast %861 : f32 to vector<16x18xf32>
    %863 = arith.mulf %860, %862 : vector<16x18xf32>
    %864 = arith.addf %846, %863 : vector<16x18xf32>
    %c62 = arith.constant 62 : index
    %865 = memref.load %arg4[%c62] : memref<144xf32, #tpu.memory_space<smem>>
    %866 = vector.broadcast %865 : f32 to vector<16x18xf32>
    %867 = arith.mulf %860, %866 : vector<16x18xf32>
    %868 = arith.addf %850, %867 : vector<16x18xf32>
    %c98 = arith.constant 98 : index
    %869 = memref.load %arg4[%c98] : memref<144xf32, #tpu.memory_space<smem>>
    %870 = vector.broadcast %869 : f32 to vector<16x18xf32>
    %871 = arith.mulf %860, %870 : vector<16x18xf32>
    %872 = arith.addf %854, %871 : vector<16x18xf32>
    %c134 = arith.constant 134 : index
    %873 = memref.load %arg4[%c134] : memref<144xf32, #tpu.memory_space<smem>>
    %874 = vector.broadcast %873 : f32 to vector<16x18xf32>
    %875 = arith.mulf %860, %874 : vector<16x18xf32>
    %876 = arith.addf %858, %875 : vector<16x18xf32>
    %c3_295 = arith.constant 3 : index
    %c9_296 = arith.constant 9 : index
    %c2_297 = arith.constant 2 : index
    %877 = vector.load %arg9[%c3_295, %c9_296, %c2_297] : memref<4x32x128xf32, #tpu.memory_space<vmem>>, vector<1x16x18xf32>
    %878 = vector.shape_cast %877 : vector<1x16x18xf32> to vector<16x18xf32>
    %c35 = arith.constant 35 : index
    %879 = memref.load %arg4[%c35] : memref<144xf32, #tpu.memory_space<smem>>
    %880 = vector.broadcast %879 : f32 to vector<16x18xf32>
    %881 = arith.mulf %878, %880 : vector<16x18xf32>
    %882 = arith.addf %864, %881 : vector<16x18xf32>
    %c71 = arith.constant 71 : index
    %883 = memref.load %arg4[%c71] : memref<144xf32, #tpu.memory_space<smem>>
    %884 = vector.broadcast %883 : f32 to vector<16x18xf32>
    %885 = arith.mulf %878, %884 : vector<16x18xf32>
    %886 = arith.addf %868, %885 : vector<16x18xf32>
    %c107 = arith.constant 107 : index
    %887 = memref.load %arg4[%c107] : memref<144xf32, #tpu.memory_space<smem>>
    %888 = vector.broadcast %887 : f32 to vector<16x18xf32>
    %889 = arith.mulf %878, %888 : vector<16x18xf32>
    %890 = arith.addf %872, %889 : vector<16x18xf32>
    %c143 = arith.constant 143 : index
    %891 = memref.load %arg4[%c143] : memref<144xf32, #tpu.memory_space<smem>>
    %892 = vector.broadcast %891 : f32 to vector<16x18xf32>
    %893 = arith.mulf %878, %892 : vector<16x18xf32>
    %894 = arith.addf %876, %893 : vector<16x18xf32>
    %c0_298 = arith.constant 0 : index
    %895 = memref.load %arg5[%c0_298] : memref<4xf32, #tpu.memory_space<smem>>
    %896 = vector.broadcast %895 : f32 to vector<16x18xf32>
    %897 = arith.addf %882, %896 : vector<16x18xf32>
    %c1_299 = arith.constant 1 : index
    %898 = memref.load %arg5[%c1_299] : memref<4xf32, #tpu.memory_space<smem>>
    %899 = vector.broadcast %898 : f32 to vector<16x18xf32>
    %900 = arith.addf %886, %899 : vector<16x18xf32>
    %c2_300 = arith.constant 2 : index
    %901 = memref.load %arg5[%c2_300] : memref<4xf32, #tpu.memory_space<smem>>
    %902 = vector.broadcast %901 : f32 to vector<16x18xf32>
    %903 = arith.addf %890, %902 : vector<16x18xf32>
    %c3_301 = arith.constant 3 : index
    %904 = memref.load %arg5[%c3_301] : memref<4xf32, #tpu.memory_space<smem>>
    %905 = vector.broadcast %904 : f32 to vector<16x18xf32>
    %906 = arith.addf %894, %905 : vector<16x18xf32>
    %cst_302 = arith.constant 0.000000e+00 : f32
    %907 = vector.broadcast %cst_302 : f32 to vector<16x18xf32>
    %908 = arith.cmpf oge, %897, %907 : vector<16x18xf32>
    %cst_303 = arith.constant 1.000000e-01 : f32
    %909 = vector.broadcast %cst_303 : f32 to vector<16x18xf32>
    %910 = arith.mulf %909, %897 : vector<16x18xf32>
    %911 = arith.select %908, %897, %910 : vector<16x18xi1>, vector<16x18xf32>
    %912 = arith.mulf %911, %11 : vector<16x18xf32>
    %c0_304 = arith.constant 0 : index
    %c8_305 = arith.constant 8 : index
    %c0_306 = arith.constant 0 : index
    %913 = vector.load %arg10[%c0_304, %c8_305, %c0_306] : memref<4x32x128xf32, #tpu.memory_space<vmem>>, vector<1x16x18xf32>
    %914 = vector.shape_cast %913 : vector<1x16x18xf32> to vector<16x18xf32>
    %915 = vector.shape_cast %912 : vector<16x18xf32> to vector<1x16x18xf32>
    tpu.vector_store %arg10[%c0_304, %c8_305, %c0_306], %915 {strides = array<i32>} : memref<4x32x128xf32, #tpu.memory_space<vmem>>, vector<1x16x18xf32>,
    %cst_307 = arith.constant 0.000000e+00 : f32
    %916 = vector.broadcast %cst_307 : f32 to vector<16x18xf32>
    %917 = arith.cmpf oge, %900, %916 : vector<16x18xf32>
    %cst_308 = arith.constant 1.000000e-01 : f32
    %918 = vector.broadcast %cst_308 : f32 to vector<16x18xf32>
    %919 = arith.mulf %918, %900 : vector<16x18xf32>
    %920 = arith.select %917, %900, %919 : vector<16x18xi1>, vector<16x18xf32>
    %921 = arith.mulf %920, %11 : vector<16x18xf32>
    %c1_309 = arith.constant 1 : index
    %c8_310 = arith.constant 8 : index
    %c0_311 = arith.constant 0 : index
    %922 = vector.load %arg10[%c1_309, %c8_310, %c0_311] : memref<4x32x128xf32, #tpu.memory_space<vmem>>, vector<1x16x18xf32>
    %923 = vector.shape_cast %922 : vector<1x16x18xf32> to vector<16x18xf32>
    %924 = vector.shape_cast %921 : vector<16x18xf32> to vector<1x16x18xf32>
    tpu.vector_store %arg10[%c1_309, %c8_310, %c0_311], %924 {strides = array<i32>} : memref<4x32x128xf32, #tpu.memory_space<vmem>>, vector<1x16x18xf32>,
    %cst_312 = arith.constant 0.000000e+00 : f32
    %925 = vector.broadcast %cst_312 : f32 to vector<16x18xf32>
    %926 = arith.cmpf oge, %903, %925 : vector<16x18xf32>
    %cst_313 = arith.constant 1.000000e-01 : f32
    %927 = vector.broadcast %cst_313 : f32 to vector<16x18xf32>
    %928 = arith.mulf %927, %903 : vector<16x18xf32>
    %929 = arith.select %926, %903, %928 : vector<16x18xi1>, vector<16x18xf32>
    %930 = arith.mulf %929, %11 : vector<16x18xf32>
    %c2_314 = arith.constant 2 : index
    %c8_315 = arith.constant 8 : index
    %c0_316 = arith.constant 0 : index
    %931 = vector.load %arg10[%c2_314, %c8_315, %c0_316] : memref<4x32x128xf32, #tpu.memory_space<vmem>>, vector<1x16x18xf32>
    %932 = vector.shape_cast %931 : vector<1x16x18xf32> to vector<16x18xf32>
    %933 = vector.shape_cast %930 : vector<16x18xf32> to vector<1x16x18xf32>
    tpu.vector_store %arg10[%c2_314, %c8_315, %c0_316], %933 {strides = array<i32>} : memref<4x32x128xf32, #tpu.memory_space<vmem>>, vector<1x16x18xf32>,
    %cst_317 = arith.constant 0.000000e+00 : f32
    %934 = vector.broadcast %cst_317 : f32 to vector<16x18xf32>
    %935 = arith.cmpf oge, %906, %934 : vector<16x18xf32>
    %cst_318 = arith.constant 1.000000e-01 : f32
    %936 = vector.broadcast %cst_318 : f32 to vector<16x18xf32>
    %937 = arith.mulf %936, %906 : vector<16x18xf32>
    %938 = arith.select %935, %906, %937 : vector<16x18xi1>, vector<16x18xf32>
    %939 = arith.mulf %938, %11 : vector<16x18xf32>
    %c3_319 = arith.constant 3 : index
    %c8_320 = arith.constant 8 : index
    %c0_321 = arith.constant 0 : index
    %940 = vector.load %arg10[%c3_319, %c8_320, %c0_321] : memref<4x32x128xf32, #tpu.memory_space<vmem>>, vector<1x16x18xf32>
    %941 = vector.shape_cast %940 : vector<1x16x18xf32> to vector<16x18xf32>
    %942 = vector.shape_cast %939 : vector<16x18xf32> to vector<1x16x18xf32>
    tpu.vector_store %arg10[%c3_319, %c8_320, %c0_321], %942 {strides = array<i32>} : memref<4x32x128xf32, #tpu.memory_space<vmem>>, vector<1x16x18xf32>,
    %c0_322 = arith.constant 0 : index
    %c7_323 = arith.constant 7 : index
    %c0_324 = arith.constant 0 : index
    %943 = vector.load %arg10[%c0_322, %c7_323, %c0_324] : memref<4x32x128xf32, #tpu.memory_space<vmem>>, vector<1x16x16xf32>
    %944 = vector.shape_cast %943 : vector<1x16x16xf32> to vector<16x16xf32>
    %c0_325 = arith.constant 0 : index
    %945 = memref.load %arg6[%c0_325] : memref<144xf32, #tpu.memory_space<smem>>
    %946 = vector.broadcast %945 : f32 to vector<16x16xf32>
    %947 = arith.mulf %944, %946 : vector<16x16xf32>
    %c36_326 = arith.constant 36 : index
    %948 = memref.load %arg6[%c36_326] : memref<144xf32, #tpu.memory_space<smem>>
    %949 = vector.broadcast %948 : f32 to vector<16x16xf32>
    %950 = arith.mulf %944, %949 : vector<16x16xf32>
    %c72_327 = arith.constant 72 : index
    %951 = memref.load %arg6[%c72_327] : memref<144xf32, #tpu.memory_space<smem>>
    %952 = vector.broadcast %951 : f32 to vector<16x16xf32>
    %953 = arith.mulf %944, %952 : vector<16x16xf32>
    %c108_328 = arith.constant 108 : index
    %954 = memref.load %arg6[%c108_328] : memref<144xf32, #tpu.memory_space<smem>>
    %955 = vector.broadcast %954 : f32 to vector<16x16xf32>
    %956 = arith.mulf %944, %955 : vector<16x16xf32>
    %c1_329 = arith.constant 1 : index
    %c7_330 = arith.constant 7 : index
    %c0_331 = arith.constant 0 : index
    %957 = vector.load %arg10[%c1_329, %c7_330, %c0_331] : memref<4x32x128xf32, #tpu.memory_space<vmem>>, vector<1x16x16xf32>
    %958 = vector.shape_cast %957 : vector<1x16x16xf32> to vector<16x16xf32>
    %c9_332 = arith.constant 9 : index
    %959 = memref.load %arg6[%c9_332] : memref<144xf32, #tpu.memory_space<smem>>
    %960 = vector.broadcast %959 : f32 to vector<16x16xf32>
    %961 = arith.mulf %958, %960 : vector<16x16xf32>
    %962 = arith.addf %947, %961 : vector<16x16xf32>
    %c45_333 = arith.constant 45 : index
    %963 = memref.load %arg6[%c45_333] : memref<144xf32, #tpu.memory_space<smem>>
    %964 = vector.broadcast %963 : f32 to vector<16x16xf32>
    %965 = arith.mulf %958, %964 : vector<16x16xf32>
    %966 = arith.addf %950, %965 : vector<16x16xf32>
    %c81_334 = arith.constant 81 : index
    %967 = memref.load %arg6[%c81_334] : memref<144xf32, #tpu.memory_space<smem>>
    %968 = vector.broadcast %967 : f32 to vector<16x16xf32>
    %969 = arith.mulf %958, %968 : vector<16x16xf32>
    %970 = arith.addf %953, %969 : vector<16x16xf32>
    %c117_335 = arith.constant 117 : index
    %971 = memref.load %arg6[%c117_335] : memref<144xf32, #tpu.memory_space<smem>>
    %972 = vector.broadcast %971 : f32 to vector<16x16xf32>
    %973 = arith.mulf %958, %972 : vector<16x16xf32>
    %974 = arith.addf %956, %973 : vector<16x16xf32>
    %c2_336 = arith.constant 2 : index
    %c7_337 = arith.constant 7 : index
    %c0_338 = arith.constant 0 : index
    %975 = vector.load %arg10[%c2_336, %c7_337, %c0_338] : memref<4x32x128xf32, #tpu.memory_space<vmem>>, vector<1x16x16xf32>
    %976 = vector.shape_cast %975 : vector<1x16x16xf32> to vector<16x16xf32>
    %c18_339 = arith.constant 18 : index
    %977 = memref.load %arg6[%c18_339] : memref<144xf32, #tpu.memory_space<smem>>
    %978 = vector.broadcast %977 : f32 to vector<16x16xf32>
    %979 = arith.mulf %976, %978 : vector<16x16xf32>
    %980 = arith.addf %962, %979 : vector<16x16xf32>
    %c54_340 = arith.constant 54 : index
    %981 = memref.load %arg6[%c54_340] : memref<144xf32, #tpu.memory_space<smem>>
    %982 = vector.broadcast %981 : f32 to vector<16x16xf32>
    %983 = arith.mulf %976, %982 : vector<16x16xf32>
    %984 = arith.addf %966, %983 : vector<16x16xf32>
    %c90_341 = arith.constant 90 : index
    %985 = memref.load %arg6[%c90_341] : memref<144xf32, #tpu.memory_space<smem>>
    %986 = vector.broadcast %985 : f32 to vector<16x16xf32>
    %987 = arith.mulf %976, %986 : vector<16x16xf32>
    %988 = arith.addf %970, %987 : vector<16x16xf32>
    %c126_342 = arith.constant 126 : index
    %989 = memref.load %arg6[%c126_342] : memref<144xf32, #tpu.memory_space<smem>>
    %990 = vector.broadcast %989 : f32 to vector<16x16xf32>
    %991 = arith.mulf %976, %990 : vector<16x16xf32>
    %992 = arith.addf %974, %991 : vector<16x16xf32>
    %c3_343 = arith.constant 3 : index
    %c7_344 = arith.constant 7 : index
    %c0_345 = arith.constant 0 : index
    %993 = vector.load %arg10[%c3_343, %c7_344, %c0_345] : memref<4x32x128xf32, #tpu.memory_space<vmem>>, vector<1x16x16xf32>
    %994 = vector.shape_cast %993 : vector<1x16x16xf32> to vector<16x16xf32>
    %c27_346 = arith.constant 27 : index
    %995 = memref.load %arg6[%c27_346] : memref<144xf32, #tpu.memory_space<smem>>
    %996 = vector.broadcast %995 : f32 to vector<16x16xf32>
    %997 = arith.mulf %994, %996 : vector<16x16xf32>
    %998 = arith.addf %980, %997 : vector<16x16xf32>
    %c63_347 = arith.constant 63 : index
    %999 = memref.load %arg6[%c63_347] : memref<144xf32, #tpu.memory_space<smem>>
    %1000 = vector.broadcast %999 : f32 to vector<16x16xf32>
    %1001 = arith.mulf %994, %1000 : vector<16x16xf32>
    %1002 = arith.addf %984, %1001 : vector<16x16xf32>
    %c99_348 = arith.constant 99 : index
    %1003 = memref.load %arg6[%c99_348] : memref<144xf32, #tpu.memory_space<smem>>
    %1004 = vector.broadcast %1003 : f32 to vector<16x16xf32>
    %1005 = arith.mulf %994, %1004 : vector<16x16xf32>
    %1006 = arith.addf %988, %1005 : vector<16x16xf32>
    %c135_349 = arith.constant 135 : index
    %1007 = memref.load %arg6[%c135_349] : memref<144xf32, #tpu.memory_space<smem>>
    %1008 = vector.broadcast %1007 : f32 to vector<16x16xf32>
    %1009 = arith.mulf %994, %1008 : vector<16x16xf32>
    %1010 = arith.addf %992, %1009 : vector<16x16xf32>
    %c0_350 = arith.constant 0 : index
    %c7_351 = arith.constant 7 : index
    %c1_352 = arith.constant 1 : index
    %1011 = vector.load %arg10[%c0_350, %c7_351, %c1_352] : memref<4x32x128xf32, #tpu.memory_space<vmem>>, vector<1x16x16xf32>
    %1012 = vector.shape_cast %1011 : vector<1x16x16xf32> to vector<16x16xf32>
    %c1_353 = arith.constant 1 : index
    %1013 = memref.load %arg6[%c1_353] : memref<144xf32, #tpu.memory_space<smem>>
    %1014 = vector.broadcast %1013 : f32 to vector<16x16xf32>
    %1015 = arith.mulf %1012, %1014 : vector<16x16xf32>
    %1016 = arith.addf %998, %1015 : vector<16x16xf32>
    %c37_354 = arith.constant 37 : index
    %1017 = memref.load %arg6[%c37_354] : memref<144xf32, #tpu.memory_space<smem>>
    %1018 = vector.broadcast %1017 : f32 to vector<16x16xf32>
    %1019 = arith.mulf %1012, %1018 : vector<16x16xf32>
    %1020 = arith.addf %1002, %1019 : vector<16x16xf32>
    %c73_355 = arith.constant 73 : index
    %1021 = memref.load %arg6[%c73_355] : memref<144xf32, #tpu.memory_space<smem>>
    %1022 = vector.broadcast %1021 : f32 to vector<16x16xf32>
    %1023 = arith.mulf %1012, %1022 : vector<16x16xf32>
    %1024 = arith.addf %1006, %1023 : vector<16x16xf32>
    %c109_356 = arith.constant 109 : index
    %1025 = memref.load %arg6[%c109_356] : memref<144xf32, #tpu.memory_space<smem>>
    %1026 = vector.broadcast %1025 : f32 to vector<16x16xf32>
    %1027 = arith.mulf %1012, %1026 : vector<16x16xf32>
    %1028 = arith.addf %1010, %1027 : vector<16x16xf32>
    %c1_357 = arith.constant 1 : index
    %c7_358 = arith.constant 7 : index
    %c1_359 = arith.constant 1 : index
    %1029 = vector.load %arg10[%c1_357, %c7_358, %c1_359] : memref<4x32x128xf32, #tpu.memory_space<vmem>>, vector<1x16x16xf32>
    %1030 = vector.shape_cast %1029 : vector<1x16x16xf32> to vector<16x16xf32>
    %c10_360 = arith.constant 10 : index
    %1031 = memref.load %arg6[%c10_360] : memref<144xf32, #tpu.memory_space<smem>>
    %1032 = vector.broadcast %1031 : f32 to vector<16x16xf32>
    %1033 = arith.mulf %1030, %1032 : vector<16x16xf32>
    %1034 = arith.addf %1016, %1033 : vector<16x16xf32>
    %c46_361 = arith.constant 46 : index
    %1035 = memref.load %arg6[%c46_361] : memref<144xf32, #tpu.memory_space<smem>>
    %1036 = vector.broadcast %1035 : f32 to vector<16x16xf32>
    %1037 = arith.mulf %1030, %1036 : vector<16x16xf32>
    %1038 = arith.addf %1020, %1037 : vector<16x16xf32>
    %c82_362 = arith.constant 82 : index
    %1039 = memref.load %arg6[%c82_362] : memref<144xf32, #tpu.memory_space<smem>>
    %1040 = vector.broadcast %1039 : f32 to vector<16x16xf32>
    %1041 = arith.mulf %1030, %1040 : vector<16x16xf32>
    %1042 = arith.addf %1024, %1041 : vector<16x16xf32>
    %c118_363 = arith.constant 118 : index
    %1043 = memref.load %arg6[%c118_363] : memref<144xf32, #tpu.memory_space<smem>>
    %1044 = vector.broadcast %1043 : f32 to vector<16x16xf32>
    %1045 = arith.mulf %1030, %1044 : vector<16x16xf32>
    %1046 = arith.addf %1028, %1045 : vector<16x16xf32>
    %c2_364 = arith.constant 2 : index
    %c7_365 = arith.constant 7 : index
    %c1_366 = arith.constant 1 : index
    %1047 = vector.load %arg10[%c2_364, %c7_365, %c1_366] : memref<4x32x128xf32, #tpu.memory_space<vmem>>, vector<1x16x16xf32>
    %1048 = vector.shape_cast %1047 : vector<1x16x16xf32> to vector<16x16xf32>
    %c19_367 = arith.constant 19 : index
    %1049 = memref.load %arg6[%c19_367] : memref<144xf32, #tpu.memory_space<smem>>
    %1050 = vector.broadcast %1049 : f32 to vector<16x16xf32>
    %1051 = arith.mulf %1048, %1050 : vector<16x16xf32>
    %1052 = arith.addf %1034, %1051 : vector<16x16xf32>
    %c55_368 = arith.constant 55 : index
    %1053 = memref.load %arg6[%c55_368] : memref<144xf32, #tpu.memory_space<smem>>
    %1054 = vector.broadcast %1053 : f32 to vector<16x16xf32>
    %1055 = arith.mulf %1048, %1054 : vector<16x16xf32>
    %1056 = arith.addf %1038, %1055 : vector<16x16xf32>
    %c91_369 = arith.constant 91 : index
    %1057 = memref.load %arg6[%c91_369] : memref<144xf32, #tpu.memory_space<smem>>
    %1058 = vector.broadcast %1057 : f32 to vector<16x16xf32>
    %1059 = arith.mulf %1048, %1058 : vector<16x16xf32>
    %1060 = arith.addf %1042, %1059 : vector<16x16xf32>
    %c127_370 = arith.constant 127 : index
    %1061 = memref.load %arg6[%c127_370] : memref<144xf32, #tpu.memory_space<smem>>
    %1062 = vector.broadcast %1061 : f32 to vector<16x16xf32>
    %1063 = arith.mulf %1048, %1062 : vector<16x16xf32>
    %1064 = arith.addf %1046, %1063 : vector<16x16xf32>
    %c3_371 = arith.constant 3 : index
    %c7_372 = arith.constant 7 : index
    %c1_373 = arith.constant 1 : index
    %1065 = vector.load %arg10[%c3_371, %c7_372, %c1_373] : memref<4x32x128xf32, #tpu.memory_space<vmem>>, vector<1x16x16xf32>
    %1066 = vector.shape_cast %1065 : vector<1x16x16xf32> to vector<16x16xf32>
    %c28_374 = arith.constant 28 : index
    %1067 = memref.load %arg6[%c28_374] : memref<144xf32, #tpu.memory_space<smem>>
    %1068 = vector.broadcast %1067 : f32 to vector<16x16xf32>
    %1069 = arith.mulf %1066, %1068 : vector<16x16xf32>
    %1070 = arith.addf %1052, %1069 : vector<16x16xf32>
    %c64_375 = arith.constant 64 : index
    %1071 = memref.load %arg6[%c64_375] : memref<144xf32, #tpu.memory_space<smem>>
    %1072 = vector.broadcast %1071 : f32 to vector<16x16xf32>
    %1073 = arith.mulf %1066, %1072 : vector<16x16xf32>
    %1074 = arith.addf %1056, %1073 : vector<16x16xf32>
    %c100_376 = arith.constant 100 : index
    %1075 = memref.load %arg6[%c100_376] : memref<144xf32, #tpu.memory_space<smem>>
    %1076 = vector.broadcast %1075 : f32 to vector<16x16xf32>
    %1077 = arith.mulf %1066, %1076 : vector<16x16xf32>
    %1078 = arith.addf %1060, %1077 : vector<16x16xf32>
    %c136_377 = arith.constant 136 : index
    %1079 = memref.load %arg6[%c136_377] : memref<144xf32, #tpu.memory_space<smem>>
    %1080 = vector.broadcast %1079 : f32 to vector<16x16xf32>
    %1081 = arith.mulf %1066, %1080 : vector<16x16xf32>
    %1082 = arith.addf %1064, %1081 : vector<16x16xf32>
    %c0_378 = arith.constant 0 : index
    %c7_379 = arith.constant 7 : index
    %c2_380 = arith.constant 2 : index
    %1083 = vector.load %arg10[%c0_378, %c7_379, %c2_380] : memref<4x32x128xf32, #tpu.memory_space<vmem>>, vector<1x16x16xf32>
    %1084 = vector.shape_cast %1083 : vector<1x16x16xf32> to vector<16x16xf32>
    %c2_381 = arith.constant 2 : index
    %1085 = memref.load %arg6[%c2_381] : memref<144xf32, #tpu.memory_space<smem>>
    %1086 = vector.broadcast %1085 : f32 to vector<16x16xf32>
    %1087 = arith.mulf %1084, %1086 : vector<16x16xf32>
    %1088 = arith.addf %1070, %1087 : vector<16x16xf32>
    %c38_382 = arith.constant 38 : index
    %1089 = memref.load %arg6[%c38_382] : memref<144xf32, #tpu.memory_space<smem>>
    %1090 = vector.broadcast %1089 : f32 to vector<16x16xf32>
    %1091 = arith.mulf %1084, %1090 : vector<16x16xf32>
    %1092 = arith.addf %1074, %1091 : vector<16x16xf32>
    %c74_383 = arith.constant 74 : index
    %1093 = memref.load %arg6[%c74_383] : memref<144xf32, #tpu.memory_space<smem>>
    %1094 = vector.broadcast %1093 : f32 to vector<16x16xf32>
    %1095 = arith.mulf %1084, %1094 : vector<16x16xf32>
    %1096 = arith.addf %1078, %1095 : vector<16x16xf32>
    %c110_384 = arith.constant 110 : index
    %1097 = memref.load %arg6[%c110_384] : memref<144xf32, #tpu.memory_space<smem>>
    %1098 = vector.broadcast %1097 : f32 to vector<16x16xf32>
    %1099 = arith.mulf %1084, %1098 : vector<16x16xf32>
    %1100 = arith.addf %1082, %1099 : vector<16x16xf32>
    %c1_385 = arith.constant 1 : index
    %c7_386 = arith.constant 7 : index
    %c2_387 = arith.constant 2 : index
    %1101 = vector.load %arg10[%c1_385, %c7_386, %c2_387] : memref<4x32x128xf32, #tpu.memory_space<vmem>>, vector<1x16x16xf32>
    %1102 = vector.shape_cast %1101 : vector<1x16x16xf32> to vector<16x16xf32>
    %c11_388 = arith.constant 11 : index
    %1103 = memref.load %arg6[%c11_388] : memref<144xf32, #tpu.memory_space<smem>>
    %1104 = vector.broadcast %1103 : f32 to vector<16x16xf32>
    %1105 = arith.mulf %1102, %1104 : vector<16x16xf32>
    %1106 = arith.addf %1088, %1105 : vector<16x16xf32>
    %c47_389 = arith.constant 47 : index
    %1107 = memref.load %arg6[%c47_389] : memref<144xf32, #tpu.memory_space<smem>>
    %1108 = vector.broadcast %1107 : f32 to vector<16x16xf32>
    %1109 = arith.mulf %1102, %1108 : vector<16x16xf32>
    %1110 = arith.addf %1092, %1109 : vector<16x16xf32>
    %c83_390 = arith.constant 83 : index
    %1111 = memref.load %arg6[%c83_390] : memref<144xf32, #tpu.memory_space<smem>>
    %1112 = vector.broadcast %1111 : f32 to vector<16x16xf32>
    %1113 = arith.mulf %1102, %1112 : vector<16x16xf32>
    %1114 = arith.addf %1096, %1113 : vector<16x16xf32>
    %c119_391 = arith.constant 119 : index
    %1115 = memref.load %arg6[%c119_391] : memref<144xf32, #tpu.memory_space<smem>>
    %1116 = vector.broadcast %1115 : f32 to vector<16x16xf32>
    %1117 = arith.mulf %1102, %1116 : vector<16x16xf32>
    %1118 = arith.addf %1100, %1117 : vector<16x16xf32>
    %c2_392 = arith.constant 2 : index
    %c7_393 = arith.constant 7 : index
    %c2_394 = arith.constant 2 : index
    %1119 = vector.load %arg10[%c2_392, %c7_393, %c2_394] : memref<4x32x128xf32, #tpu.memory_space<vmem>>, vector<1x16x16xf32>
    %1120 = vector.shape_cast %1119 : vector<1x16x16xf32> to vector<16x16xf32>
    %c20_395 = arith.constant 20 : index
    %1121 = memref.load %arg6[%c20_395] : memref<144xf32, #tpu.memory_space<smem>>
    %1122 = vector.broadcast %1121 : f32 to vector<16x16xf32>
    %1123 = arith.mulf %1120, %1122 : vector<16x16xf32>
    %1124 = arith.addf %1106, %1123 : vector<16x16xf32>
    %c56_396 = arith.constant 56 : index
    %1125 = memref.load %arg6[%c56_396] : memref<144xf32, #tpu.memory_space<smem>>
    %1126 = vector.broadcast %1125 : f32 to vector<16x16xf32>
    %1127 = arith.mulf %1120, %1126 : vector<16x16xf32>
    %1128 = arith.addf %1110, %1127 : vector<16x16xf32>
    %c92_397 = arith.constant 92 : index
    %1129 = memref.load %arg6[%c92_397] : memref<144xf32, #tpu.memory_space<smem>>
    %1130 = vector.broadcast %1129 : f32 to vector<16x16xf32>
    %1131 = arith.mulf %1120, %1130 : vector<16x16xf32>
    %1132 = arith.addf %1114, %1131 : vector<16x16xf32>
    %c128_398 = arith.constant 128 : index
    %1133 = memref.load %arg6[%c128_398] : memref<144xf32, #tpu.memory_space<smem>>
    %1134 = vector.broadcast %1133 : f32 to vector<16x16xf32>
    %1135 = arith.mulf %1120, %1134 : vector<16x16xf32>
    %1136 = arith.addf %1118, %1135 : vector<16x16xf32>
    %c3_399 = arith.constant 3 : index
    %c7_400 = arith.constant 7 : index
    %c2_401 = arith.constant 2 : index
    %1137 = vector.load %arg10[%c3_399, %c7_400, %c2_401] : memref<4x32x128xf32, #tpu.memory_space<vmem>>, vector<1x16x16xf32>
    %1138 = vector.shape_cast %1137 : vector<1x16x16xf32> to vector<16x16xf32>
    %c29_402 = arith.constant 29 : index
    %1139 = memref.load %arg6[%c29_402] : memref<144xf32, #tpu.memory_space<smem>>
    %1140 = vector.broadcast %1139 : f32 to vector<16x16xf32>
    %1141 = arith.mulf %1138, %1140 : vector<16x16xf32>
    %1142 = arith.addf %1124, %1141 : vector<16x16xf32>
    %c65_403 = arith.constant 65 : index
    %1143 = memref.load %arg6[%c65_403] : memref<144xf32, #tpu.memory_space<smem>>
    %1144 = vector.broadcast %1143 : f32 to vector<16x16xf32>
    %1145 = arith.mulf %1138, %1144 : vector<16x16xf32>
    %1146 = arith.addf %1128, %1145 : vector<16x16xf32>
    %c101_404 = arith.constant 101 : index
    %1147 = memref.load %arg6[%c101_404] : memref<144xf32, #tpu.memory_space<smem>>
    %1148 = vector.broadcast %1147 : f32 to vector<16x16xf32>
    %1149 = arith.mulf %1138, %1148 : vector<16x16xf32>
    %1150 = arith.addf %1132, %1149 : vector<16x16xf32>
    %c137_405 = arith.constant 137 : index
    %1151 = memref.load %arg6[%c137_405] : memref<144xf32, #tpu.memory_space<smem>>
    %1152 = vector.broadcast %1151 : f32 to vector<16x16xf32>
    %1153 = arith.mulf %1138, %1152 : vector<16x16xf32>
    %1154 = arith.addf %1136, %1153 : vector<16x16xf32>
    %c0_406 = arith.constant 0 : index
    %c8_407 = arith.constant 8 : index
    %c0_408 = arith.constant 0 : index
    %1155 = vector.load %arg10[%c0_406, %c8_407, %c0_408] : memref<4x32x128xf32, #tpu.memory_space<vmem>>, vector<1x16x16xf32>
    %1156 = vector.shape_cast %1155 : vector<1x16x16xf32> to vector<16x16xf32>
    %c3_409 = arith.constant 3 : index
    %1157 = memref.load %arg6[%c3_409] : memref<144xf32, #tpu.memory_space<smem>>
    %1158 = vector.broadcast %1157 : f32 to vector<16x16xf32>
    %1159 = arith.mulf %1156, %1158 : vector<16x16xf32>
    %1160 = arith.addf %1142, %1159 : vector<16x16xf32>
    %c39_410 = arith.constant 39 : index
    %1161 = memref.load %arg6[%c39_410] : memref<144xf32, #tpu.memory_space<smem>>
    %1162 = vector.broadcast %1161 : f32 to vector<16x16xf32>
    %1163 = arith.mulf %1156, %1162 : vector<16x16xf32>
    %1164 = arith.addf %1146, %1163 : vector<16x16xf32>
    %c75_411 = arith.constant 75 : index
    %1165 = memref.load %arg6[%c75_411] : memref<144xf32, #tpu.memory_space<smem>>
    %1166 = vector.broadcast %1165 : f32 to vector<16x16xf32>
    %1167 = arith.mulf %1156, %1166 : vector<16x16xf32>
    %1168 = arith.addf %1150, %1167 : vector<16x16xf32>
    %c111_412 = arith.constant 111 : index
    %1169 = memref.load %arg6[%c111_412] : memref<144xf32, #tpu.memory_space<smem>>
    %1170 = vector.broadcast %1169 : f32 to vector<16x16xf32>
    %1171 = arith.mulf %1156, %1170 : vector<16x16xf32>
    %1172 = arith.addf %1154, %1171 : vector<16x16xf32>
    %c1_413 = arith.constant 1 : index
    %c8_414 = arith.constant 8 : index
    %c0_415 = arith.constant 0 : index
    %1173 = vector.load %arg10[%c1_413, %c8_414, %c0_415] : memref<4x32x128xf32, #tpu.memory_space<vmem>>, vector<1x16x16xf32>
    %1174 = vector.shape_cast %1173 : vector<1x16x16xf32> to vector<16x16xf32>
    %c12_416 = arith.constant 12 : index
    %1175 = memref.load %arg6[%c12_416] : memref<144xf32, #tpu.memory_space<smem>>
    %1176 = vector.broadcast %1175 : f32 to vector<16x16xf32>
    %1177 = arith.mulf %1174, %1176 : vector<16x16xf32>
    %1178 = arith.addf %1160, %1177 : vector<16x16xf32>
    %c48_417 = arith.constant 48 : index
    %1179 = memref.load %arg6[%c48_417] : memref<144xf32, #tpu.memory_space<smem>>
    %1180 = vector.broadcast %1179 : f32 to vector<16x16xf32>
    %1181 = arith.mulf %1174, %1180 : vector<16x16xf32>
    %1182 = arith.addf %1164, %1181 : vector<16x16xf32>
    %c84_418 = arith.constant 84 : index
    %1183 = memref.load %arg6[%c84_418] : memref<144xf32, #tpu.memory_space<smem>>
    %1184 = vector.broadcast %1183 : f32 to vector<16x16xf32>
    %1185 = arith.mulf %1174, %1184 : vector<16x16xf32>
    %1186 = arith.addf %1168, %1185 : vector<16x16xf32>
    %c120_419 = arith.constant 120 : index
    %1187 = memref.load %arg6[%c120_419] : memref<144xf32, #tpu.memory_space<smem>>
    %1188 = vector.broadcast %1187 : f32 to vector<16x16xf32>
    %1189 = arith.mulf %1174, %1188 : vector<16x16xf32>
    %1190 = arith.addf %1172, %1189 : vector<16x16xf32>
    %c2_420 = arith.constant 2 : index
    %c8_421 = arith.constant 8 : index
    %c0_422 = arith.constant 0 : index
    %1191 = vector.load %arg10[%c2_420, %c8_421, %c0_422] : memref<4x32x128xf32, #tpu.memory_space<vmem>>, vector<1x16x16xf32>
    %1192 = vector.shape_cast %1191 : vector<1x16x16xf32> to vector<16x16xf32>
    %c21_423 = arith.constant 21 : index
    %1193 = memref.load %arg6[%c21_423] : memref<144xf32, #tpu.memory_space<smem>>
    %1194 = vector.broadcast %1193 : f32 to vector<16x16xf32>
    %1195 = arith.mulf %1192, %1194 : vector<16x16xf32>
    %1196 = arith.addf %1178, %1195 : vector<16x16xf32>
    %c57_424 = arith.constant 57 : index
    %1197 = memref.load %arg6[%c57_424] : memref<144xf32, #tpu.memory_space<smem>>
    %1198 = vector.broadcast %1197 : f32 to vector<16x16xf32>
    %1199 = arith.mulf %1192, %1198 : vector<16x16xf32>
    %1200 = arith.addf %1182, %1199 : vector<16x16xf32>
    %c93_425 = arith.constant 93 : index
    %1201 = memref.load %arg6[%c93_425] : memref<144xf32, #tpu.memory_space<smem>>
    %1202 = vector.broadcast %1201 : f32 to vector<16x16xf32>
    %1203 = arith.mulf %1192, %1202 : vector<16x16xf32>
    %1204 = arith.addf %1186, %1203 : vector<16x16xf32>
    %c129_426 = arith.constant 129 : index
    %1205 = memref.load %arg6[%c129_426] : memref<144xf32, #tpu.memory_space<smem>>
    %1206 = vector.broadcast %1205 : f32 to vector<16x16xf32>
    %1207 = arith.mulf %1192, %1206 : vector<16x16xf32>
    %1208 = arith.addf %1190, %1207 : vector<16x16xf32>
    %c3_427 = arith.constant 3 : index
    %c8_428 = arith.constant 8 : index
    %c0_429 = arith.constant 0 : index
    %1209 = vector.load %arg10[%c3_427, %c8_428, %c0_429] : memref<4x32x128xf32, #tpu.memory_space<vmem>>, vector<1x16x16xf32>
    %1210 = vector.shape_cast %1209 : vector<1x16x16xf32> to vector<16x16xf32>
    %c30_430 = arith.constant 30 : index
    %1211 = memref.load %arg6[%c30_430] : memref<144xf32, #tpu.memory_space<smem>>
    %1212 = vector.broadcast %1211 : f32 to vector<16x16xf32>
    %1213 = arith.mulf %1210, %1212 : vector<16x16xf32>
    %1214 = arith.addf %1196, %1213 : vector<16x16xf32>
    %c66_431 = arith.constant 66 : index
    %1215 = memref.load %arg6[%c66_431] : memref<144xf32, #tpu.memory_space<smem>>
    %1216 = vector.broadcast %1215 : f32 to vector<16x16xf32>
    %1217 = arith.mulf %1210, %1216 : vector<16x16xf32>
    %1218 = arith.addf %1200, %1217 : vector<16x16xf32>
    %c102_432 = arith.constant 102 : index
    %1219 = memref.load %arg6[%c102_432] : memref<144xf32, #tpu.memory_space<smem>>
    %1220 = vector.broadcast %1219 : f32 to vector<16x16xf32>
    %1221 = arith.mulf %1210, %1220 : vector<16x16xf32>
    %1222 = arith.addf %1204, %1221 : vector<16x16xf32>
    %c138_433 = arith.constant 138 : index
    %1223 = memref.load %arg6[%c138_433] : memref<144xf32, #tpu.memory_space<smem>>
    %1224 = vector.broadcast %1223 : f32 to vector<16x16xf32>
    %1225 = arith.mulf %1210, %1224 : vector<16x16xf32>
    %1226 = arith.addf %1208, %1225 : vector<16x16xf32>
    %c0_434 = arith.constant 0 : index
    %c8_435 = arith.constant 8 : index
    %c1_436 = arith.constant 1 : index
    %1227 = vector.load %arg10[%c0_434, %c8_435, %c1_436] : memref<4x32x128xf32, #tpu.memory_space<vmem>>, vector<1x16x16xf32>
    %1228 = vector.shape_cast %1227 : vector<1x16x16xf32> to vector<16x16xf32>
    %c4_437 = arith.constant 4 : index
    %1229 = memref.load %arg6[%c4_437] : memref<144xf32, #tpu.memory_space<smem>>
    %1230 = vector.broadcast %1229 : f32 to vector<16x16xf32>
    %1231 = arith.mulf %1228, %1230 : vector<16x16xf32>
    %1232 = arith.addf %1214, %1231 : vector<16x16xf32>
    %c40_438 = arith.constant 40 : index
    %1233 = memref.load %arg6[%c40_438] : memref<144xf32, #tpu.memory_space<smem>>
    %1234 = vector.broadcast %1233 : f32 to vector<16x16xf32>
    %1235 = arith.mulf %1228, %1234 : vector<16x16xf32>
    %1236 = arith.addf %1218, %1235 : vector<16x16xf32>
    %c76_439 = arith.constant 76 : index
    %1237 = memref.load %arg6[%c76_439] : memref<144xf32, #tpu.memory_space<smem>>
    %1238 = vector.broadcast %1237 : f32 to vector<16x16xf32>
    %1239 = arith.mulf %1228, %1238 : vector<16x16xf32>
    %1240 = arith.addf %1222, %1239 : vector<16x16xf32>
    %c112_440 = arith.constant 112 : index
    %1241 = memref.load %arg6[%c112_440] : memref<144xf32, #tpu.memory_space<smem>>
    %1242 = vector.broadcast %1241 : f32 to vector<16x16xf32>
    %1243 = arith.mulf %1228, %1242 : vector<16x16xf32>
    %1244 = arith.addf %1226, %1243 : vector<16x16xf32>
    %c1_441 = arith.constant 1 : index
    %c8_442 = arith.constant 8 : index
    %c1_443 = arith.constant 1 : index
    %1245 = vector.load %arg10[%c1_441, %c8_442, %c1_443] : memref<4x32x128xf32, #tpu.memory_space<vmem>>, vector<1x16x16xf32>
    %1246 = vector.shape_cast %1245 : vector<1x16x16xf32> to vector<16x16xf32>
    %c13_444 = arith.constant 13 : index
    %1247 = memref.load %arg6[%c13_444] : memref<144xf32, #tpu.memory_space<smem>>
    %1248 = vector.broadcast %1247 : f32 to vector<16x16xf32>
    %1249 = arith.mulf %1246, %1248 : vector<16x16xf32>
    %1250 = arith.addf %1232, %1249 : vector<16x16xf32>
    %c49_445 = arith.constant 49 : index
    %1251 = memref.load %arg6[%c49_445] : memref<144xf32, #tpu.memory_space<smem>>
    %1252 = vector.broadcast %1251 : f32 to vector<16x16xf32>
    %1253 = arith.mulf %1246, %1252 : vector<16x16xf32>
    %1254 = arith.addf %1236, %1253 : vector<16x16xf32>
    %c85_446 = arith.constant 85 : index
    %1255 = memref.load %arg6[%c85_446] : memref<144xf32, #tpu.memory_space<smem>>
    %1256 = vector.broadcast %1255 : f32 to vector<16x16xf32>
    %1257 = arith.mulf %1246, %1256 : vector<16x16xf32>
    %1258 = arith.addf %1240, %1257 : vector<16x16xf32>
    %c121_447 = arith.constant 121 : index
    %1259 = memref.load %arg6[%c121_447] : memref<144xf32, #tpu.memory_space<smem>>
    %1260 = vector.broadcast %1259 : f32 to vector<16x16xf32>
    %1261 = arith.mulf %1246, %1260 : vector<16x16xf32>
    %1262 = arith.addf %1244, %1261 : vector<16x16xf32>
    %c2_448 = arith.constant 2 : index
    %c8_449 = arith.constant 8 : index
    %c1_450 = arith.constant 1 : index
    %1263 = vector.load %arg10[%c2_448, %c8_449, %c1_450] : memref<4x32x128xf32, #tpu.memory_space<vmem>>, vector<1x16x16xf32>
    %1264 = vector.shape_cast %1263 : vector<1x16x16xf32> to vector<16x16xf32>
    %c22_451 = arith.constant 22 : index
    %1265 = memref.load %arg6[%c22_451] : memref<144xf32, #tpu.memory_space<smem>>
    %1266 = vector.broadcast %1265 : f32 to vector<16x16xf32>
    %1267 = arith.mulf %1264, %1266 : vector<16x16xf32>
    %1268 = arith.addf %1250, %1267 : vector<16x16xf32>
    %c58_452 = arith.constant 58 : index
    %1269 = memref.load %arg6[%c58_452] : memref<144xf32, #tpu.memory_space<smem>>
    %1270 = vector.broadcast %1269 : f32 to vector<16x16xf32>
    %1271 = arith.mulf %1264, %1270 : vector<16x16xf32>
    %1272 = arith.addf %1254, %1271 : vector<16x16xf32>
    %c94_453 = arith.constant 94 : index
    %1273 = memref.load %arg6[%c94_453] : memref<144xf32, #tpu.memory_space<smem>>
    %1274 = vector.broadcast %1273 : f32 to vector<16x16xf32>
    %1275 = arith.mulf %1264, %1274 : vector<16x16xf32>
    %1276 = arith.addf %1258, %1275 : vector<16x16xf32>
    %c130_454 = arith.constant 130 : index
    %1277 = memref.load %arg6[%c130_454] : memref<144xf32, #tpu.memory_space<smem>>
    %1278 = vector.broadcast %1277 : f32 to vector<16x16xf32>
    %1279 = arith.mulf %1264, %1278 : vector<16x16xf32>
    %1280 = arith.addf %1262, %1279 : vector<16x16xf32>
    %c3_455 = arith.constant 3 : index
    %c8_456 = arith.constant 8 : index
    %c1_457 = arith.constant 1 : index
    %1281 = vector.load %arg10[%c3_455, %c8_456, %c1_457] : memref<4x32x128xf32, #tpu.memory_space<vmem>>, vector<1x16x16xf32>
    %1282 = vector.shape_cast %1281 : vector<1x16x16xf32> to vector<16x16xf32>
    %c31_458 = arith.constant 31 : index
    %1283 = memref.load %arg6[%c31_458] : memref<144xf32, #tpu.memory_space<smem>>
    %1284 = vector.broadcast %1283 : f32 to vector<16x16xf32>
    %1285 = arith.mulf %1282, %1284 : vector<16x16xf32>
    %1286 = arith.addf %1268, %1285 : vector<16x16xf32>
    %c67_459 = arith.constant 67 : index
    %1287 = memref.load %arg6[%c67_459] : memref<144xf32, #tpu.memory_space<smem>>
    %1288 = vector.broadcast %1287 : f32 to vector<16x16xf32>
    %1289 = arith.mulf %1282, %1288 : vector<16x16xf32>
    %1290 = arith.addf %1272, %1289 : vector<16x16xf32>
    %c103_460 = arith.constant 103 : index
    %1291 = memref.load %arg6[%c103_460] : memref<144xf32, #tpu.memory_space<smem>>
    %1292 = vector.broadcast %1291 : f32 to vector<16x16xf32>
    %1293 = arith.mulf %1282, %1292 : vector<16x16xf32>
    %1294 = arith.addf %1276, %1293 : vector<16x16xf32>
    %c139_461 = arith.constant 139 : index
    %1295 = memref.load %arg6[%c139_461] : memref<144xf32, #tpu.memory_space<smem>>
    %1296 = vector.broadcast %1295 : f32 to vector<16x16xf32>
    %1297 = arith.mulf %1282, %1296 : vector<16x16xf32>
    %1298 = arith.addf %1280, %1297 : vector<16x16xf32>
    %c0_462 = arith.constant 0 : index
    %c8_463 = arith.constant 8 : index
    %c2_464 = arith.constant 2 : index
    %1299 = vector.load %arg10[%c0_462, %c8_463, %c2_464] : memref<4x32x128xf32, #tpu.memory_space<vmem>>, vector<1x16x16xf32>
    %1300 = vector.shape_cast %1299 : vector<1x16x16xf32> to vector<16x16xf32>
    %c5_465 = arith.constant 5 : index
    %1301 = memref.load %arg6[%c5_465] : memref<144xf32, #tpu.memory_space<smem>>
    %1302 = vector.broadcast %1301 : f32 to vector<16x16xf32>
    %1303 = arith.mulf %1300, %1302 : vector<16x16xf32>
    %1304 = arith.addf %1286, %1303 : vector<16x16xf32>
    %c41_466 = arith.constant 41 : index
    %1305 = memref.load %arg6[%c41_466] : memref<144xf32, #tpu.memory_space<smem>>
    %1306 = vector.broadcast %1305 : f32 to vector<16x16xf32>
    %1307 = arith.mulf %1300, %1306 : vector<16x16xf32>
    %1308 = arith.addf %1290, %1307 : vector<16x16xf32>
    %c77_467 = arith.constant 77 : index
    %1309 = memref.load %arg6[%c77_467] : memref<144xf32, #tpu.memory_space<smem>>
    %1310 = vector.broadcast %1309 : f32 to vector<16x16xf32>
    %1311 = arith.mulf %1300, %1310 : vector<16x16xf32>
    %1312 = arith.addf %1294, %1311 : vector<16x16xf32>
    %c113_468 = arith.constant 113 : index
    %1313 = memref.load %arg6[%c113_468] : memref<144xf32, #tpu.memory_space<smem>>
    %1314 = vector.broadcast %1313 : f32 to vector<16x16xf32>
    %1315 = arith.mulf %1300, %1314 : vector<16x16xf32>
    %1316 = arith.addf %1298, %1315 : vector<16x16xf32>
    %c1_469 = arith.constant 1 : index
    %c8_470 = arith.constant 8 : index
    %c2_471 = arith.constant 2 : index
    %1317 = vector.load %arg10[%c1_469, %c8_470, %c2_471] : memref<4x32x128xf32, #tpu.memory_space<vmem>>, vector<1x16x16xf32>
    %1318 = vector.shape_cast %1317 : vector<1x16x16xf32> to vector<16x16xf32>
    %c14_472 = arith.constant 14 : index
    %1319 = memref.load %arg6[%c14_472] : memref<144xf32, #tpu.memory_space<smem>>
    %1320 = vector.broadcast %1319 : f32 to vector<16x16xf32>
    %1321 = arith.mulf %1318, %1320 : vector<16x16xf32>
    %1322 = arith.addf %1304, %1321 : vector<16x16xf32>
    %c50_473 = arith.constant 50 : index
    %1323 = memref.load %arg6[%c50_473] : memref<144xf32, #tpu.memory_space<smem>>
    %1324 = vector.broadcast %1323 : f32 to vector<16x16xf32>
    %1325 = arith.mulf %1318, %1324 : vector<16x16xf32>
    %1326 = arith.addf %1308, %1325 : vector<16x16xf32>
    %c86_474 = arith.constant 86 : index
    %1327 = memref.load %arg6[%c86_474] : memref<144xf32, #tpu.memory_space<smem>>
    %1328 = vector.broadcast %1327 : f32 to vector<16x16xf32>
    %1329 = arith.mulf %1318, %1328 : vector<16x16xf32>
    %1330 = arith.addf %1312, %1329 : vector<16x16xf32>
    %c122_475 = arith.constant 122 : index
    %1331 = memref.load %arg6[%c122_475] : memref<144xf32, #tpu.memory_space<smem>>
    %1332 = vector.broadcast %1331 : f32 to vector<16x16xf32>
    %1333 = arith.mulf %1318, %1332 : vector<16x16xf32>
    %1334 = arith.addf %1316, %1333 : vector<16x16xf32>
    %c2_476 = arith.constant 2 : index
    %c8_477 = arith.constant 8 : index
    %c2_478 = arith.constant 2 : index
    %1335 = vector.load %arg10[%c2_476, %c8_477, %c2_478] : memref<4x32x128xf32, #tpu.memory_space<vmem>>, vector<1x16x16xf32>
    %1336 = vector.shape_cast %1335 : vector<1x16x16xf32> to vector<16x16xf32>
    %c23_479 = arith.constant 23 : index
    %1337 = memref.load %arg6[%c23_479] : memref<144xf32, #tpu.memory_space<smem>>
    %1338 = vector.broadcast %1337 : f32 to vector<16x16xf32>
    %1339 = arith.mulf %1336, %1338 : vector<16x16xf32>
    %1340 = arith.addf %1322, %1339 : vector<16x16xf32>
    %c59_480 = arith.constant 59 : index
    %1341 = memref.load %arg6[%c59_480] : memref<144xf32, #tpu.memory_space<smem>>
    %1342 = vector.broadcast %1341 : f32 to vector<16x16xf32>
    %1343 = arith.mulf %1336, %1342 : vector<16x16xf32>
    %1344 = arith.addf %1326, %1343 : vector<16x16xf32>
    %c95_481 = arith.constant 95 : index
    %1345 = memref.load %arg6[%c95_481] : memref<144xf32, #tpu.memory_space<smem>>
    %1346 = vector.broadcast %1345 : f32 to vector<16x16xf32>
    %1347 = arith.mulf %1336, %1346 : vector<16x16xf32>
    %1348 = arith.addf %1330, %1347 : vector<16x16xf32>
    %c131_482 = arith.constant 131 : index
    %1349 = memref.load %arg6[%c131_482] : memref<144xf32, #tpu.memory_space<smem>>
    %1350 = vector.broadcast %1349 : f32 to vector<16x16xf32>
    %1351 = arith.mulf %1336, %1350 : vector<16x16xf32>
    %1352 = arith.addf %1334, %1351 : vector<16x16xf32>
    %c3_483 = arith.constant 3 : index
    %c8_484 = arith.constant 8 : index
    %c2_485 = arith.constant 2 : index
    %1353 = vector.load %arg10[%c3_483, %c8_484, %c2_485] : memref<4x32x128xf32, #tpu.memory_space<vmem>>, vector<1x16x16xf32>
    %1354 = vector.shape_cast %1353 : vector<1x16x16xf32> to vector<16x16xf32>
    %c32_486 = arith.constant 32 : index
    %1355 = memref.load %arg6[%c32_486] : memref<144xf32, #tpu.memory_space<smem>>
    %1356 = vector.broadcast %1355 : f32 to vector<16x16xf32>
    %1357 = arith.mulf %1354, %1356 : vector<16x16xf32>
    %1358 = arith.addf %1340, %1357 : vector<16x16xf32>
    %c68_487 = arith.constant 68 : index
    %1359 = memref.load %arg6[%c68_487] : memref<144xf32, #tpu.memory_space<smem>>
    %1360 = vector.broadcast %1359 : f32 to vector<16x16xf32>
    %1361 = arith.mulf %1354, %1360 : vector<16x16xf32>
    %1362 = arith.addf %1344, %1361 : vector<16x16xf32>
    %c104_488 = arith.constant 104 : index
    %1363 = memref.load %arg6[%c104_488] : memref<144xf32, #tpu.memory_space<smem>>
    %1364 = vector.broadcast %1363 : f32 to vector<16x16xf32>
    %1365 = arith.mulf %1354, %1364 : vector<16x16xf32>
    %1366 = arith.addf %1348, %1365 : vector<16x16xf32>
    %c140_489 = arith.constant 140 : index
    %1367 = memref.load %arg6[%c140_489] : memref<144xf32, #tpu.memory_space<smem>>
    %1368 = vector.broadcast %1367 : f32 to vector<16x16xf32>
    %1369 = arith.mulf %1354, %1368 : vector<16x16xf32>
    %1370 = arith.addf %1352, %1369 : vector<16x16xf32>
    %c0_490 = arith.constant 0 : index
    %c9_491 = arith.constant 9 : index
    %c0_492 = arith.constant 0 : index
    %1371 = vector.load %arg10[%c0_490, %c9_491, %c0_492] : memref<4x32x128xf32, #tpu.memory_space<vmem>>, vector<1x16x16xf32>
    %1372 = vector.shape_cast %1371 : vector<1x16x16xf32> to vector<16x16xf32>
    %c6_493 = arith.constant 6 : index
    %1373 = memref.load %arg6[%c6_493] : memref<144xf32, #tpu.memory_space<smem>>
    %1374 = vector.broadcast %1373 : f32 to vector<16x16xf32>
    %1375 = arith.mulf %1372, %1374 : vector<16x16xf32>
    %1376 = arith.addf %1358, %1375 : vector<16x16xf32>
    %c42_494 = arith.constant 42 : index
    %1377 = memref.load %arg6[%c42_494] : memref<144xf32, #tpu.memory_space<smem>>
    %1378 = vector.broadcast %1377 : f32 to vector<16x16xf32>
    %1379 = arith.mulf %1372, %1378 : vector<16x16xf32>
    %1380 = arith.addf %1362, %1379 : vector<16x16xf32>
    %c78_495 = arith.constant 78 : index
    %1381 = memref.load %arg6[%c78_495] : memref<144xf32, #tpu.memory_space<smem>>
    %1382 = vector.broadcast %1381 : f32 to vector<16x16xf32>
    %1383 = arith.mulf %1372, %1382 : vector<16x16xf32>
    %1384 = arith.addf %1366, %1383 : vector<16x16xf32>
    %c114_496 = arith.constant 114 : index
    %1385 = memref.load %arg6[%c114_496] : memref<144xf32, #tpu.memory_space<smem>>
    %1386 = vector.broadcast %1385 : f32 to vector<16x16xf32>
    %1387 = arith.mulf %1372, %1386 : vector<16x16xf32>
    %1388 = arith.addf %1370, %1387 : vector<16x16xf32>
    %c1_497 = arith.constant 1 : index
    %c9_498 = arith.constant 9 : index
    %c0_499 = arith.constant 0 : index
    %1389 = vector.load %arg10[%c1_497, %c9_498, %c0_499] : memref<4x32x128xf32, #tpu.memory_space<vmem>>, vector<1x16x16xf32>
    %1390 = vector.shape_cast %1389 : vector<1x16x16xf32> to vector<16x16xf32>
    %c15_500 = arith.constant 15 : index
    %1391 = memref.load %arg6[%c15_500] : memref<144xf32, #tpu.memory_space<smem>>
    %1392 = vector.broadcast %1391 : f32 to vector<16x16xf32>
    %1393 = arith.mulf %1390, %1392 : vector<16x16xf32>
    %1394 = arith.addf %1376, %1393 : vector<16x16xf32>
    %c51_501 = arith.constant 51 : index
    %1395 = memref.load %arg6[%c51_501] : memref<144xf32, #tpu.memory_space<smem>>
    %1396 = vector.broadcast %1395 : f32 to vector<16x16xf32>
    %1397 = arith.mulf %1390, %1396 : vector<16x16xf32>
    %1398 = arith.addf %1380, %1397 : vector<16x16xf32>
    %c87_502 = arith.constant 87 : index
    %1399 = memref.load %arg6[%c87_502] : memref<144xf32, #tpu.memory_space<smem>>
    %1400 = vector.broadcast %1399 : f32 to vector<16x16xf32>
    %1401 = arith.mulf %1390, %1400 : vector<16x16xf32>
    %1402 = arith.addf %1384, %1401 : vector<16x16xf32>
    %c123_503 = arith.constant 123 : index
    %1403 = memref.load %arg6[%c123_503] : memref<144xf32, #tpu.memory_space<smem>>
    %1404 = vector.broadcast %1403 : f32 to vector<16x16xf32>
    %1405 = arith.mulf %1390, %1404 : vector<16x16xf32>
    %1406 = arith.addf %1388, %1405 : vector<16x16xf32>
    %c2_504 = arith.constant 2 : index
    %c9_505 = arith.constant 9 : index
    %c0_506 = arith.constant 0 : index
    %1407 = vector.load %arg10[%c2_504, %c9_505, %c0_506] : memref<4x32x128xf32, #tpu.memory_space<vmem>>, vector<1x16x16xf32>
    %1408 = vector.shape_cast %1407 : vector<1x16x16xf32> to vector<16x16xf32>
    %c24_507 = arith.constant 24 : index
    %1409 = memref.load %arg6[%c24_507] : memref<144xf32, #tpu.memory_space<smem>>
    %1410 = vector.broadcast %1409 : f32 to vector<16x16xf32>
    %1411 = arith.mulf %1408, %1410 : vector<16x16xf32>
    %1412 = arith.addf %1394, %1411 : vector<16x16xf32>
    %c60_508 = arith.constant 60 : index
    %1413 = memref.load %arg6[%c60_508] : memref<144xf32, #tpu.memory_space<smem>>
    %1414 = vector.broadcast %1413 : f32 to vector<16x16xf32>
    %1415 = arith.mulf %1408, %1414 : vector<16x16xf32>
    %1416 = arith.addf %1398, %1415 : vector<16x16xf32>
    %c96_509 = arith.constant 96 : index
    %1417 = memref.load %arg6[%c96_509] : memref<144xf32, #tpu.memory_space<smem>>
    %1418 = vector.broadcast %1417 : f32 to vector<16x16xf32>
    %1419 = arith.mulf %1408, %1418 : vector<16x16xf32>
    %1420 = arith.addf %1402, %1419 : vector<16x16xf32>
    %c132_510 = arith.constant 132 : index
    %1421 = memref.load %arg6[%c132_510] : memref<144xf32, #tpu.memory_space<smem>>
    %1422 = vector.broadcast %1421 : f32 to vector<16x16xf32>
    %1423 = arith.mulf %1408, %1422 : vector<16x16xf32>
    %1424 = arith.addf %1406, %1423 : vector<16x16xf32>
    %c3_511 = arith.constant 3 : index
    %c9_512 = arith.constant 9 : index
    %c0_513 = arith.constant 0 : index
    %1425 = vector.load %arg10[%c3_511, %c9_512, %c0_513] : memref<4x32x128xf32, #tpu.memory_space<vmem>>, vector<1x16x16xf32>
    %1426 = vector.shape_cast %1425 : vector<1x16x16xf32> to vector<16x16xf32>
    %c33_514 = arith.constant 33 : index
    %1427 = memref.load %arg6[%c33_514] : memref<144xf32, #tpu.memory_space<smem>>
    %1428 = vector.broadcast %1427 : f32 to vector<16x16xf32>
    %1429 = arith.mulf %1426, %1428 : vector<16x16xf32>
    %1430 = arith.addf %1412, %1429 : vector<16x16xf32>
    %c69_515 = arith.constant 69 : index
    %1431 = memref.load %arg6[%c69_515] : memref<144xf32, #tpu.memory_space<smem>>
    %1432 = vector.broadcast %1431 : f32 to vector<16x16xf32>
    %1433 = arith.mulf %1426, %1432 : vector<16x16xf32>
    %1434 = arith.addf %1416, %1433 : vector<16x16xf32>
    %c105_516 = arith.constant 105 : index
    %1435 = memref.load %arg6[%c105_516] : memref<144xf32, #tpu.memory_space<smem>>
    %1436 = vector.broadcast %1435 : f32 to vector<16x16xf32>
    %1437 = arith.mulf %1426, %1436 : vector<16x16xf32>
    %1438 = arith.addf %1420, %1437 : vector<16x16xf32>
    %c141_517 = arith.constant 141 : index
    %1439 = memref.load %arg6[%c141_517] : memref<144xf32, #tpu.memory_space<smem>>
    %1440 = vector.broadcast %1439 : f32 to vector<16x16xf32>
    %1441 = arith.mulf %1426, %1440 : vector<16x16xf32>
    %1442 = arith.addf %1424, %1441 : vector<16x16xf32>
    %c0_518 = arith.constant 0 : index
    %c9_519 = arith.constant 9 : index
    %c1_520 = arith.constant 1 : index
    %1443 = vector.load %arg10[%c0_518, %c9_519, %c1_520] : memref<4x32x128xf32, #tpu.memory_space<vmem>>, vector<1x16x16xf32>
    %1444 = vector.shape_cast %1443 : vector<1x16x16xf32> to vector<16x16xf32>
    %c7_521 = arith.constant 7 : index
    %1445 = memref.load %arg6[%c7_521] : memref<144xf32, #tpu.memory_space<smem>>
    %1446 = vector.broadcast %1445 : f32 to vector<16x16xf32>
    %1447 = arith.mulf %1444, %1446 : vector<16x16xf32>
    %1448 = arith.addf %1430, %1447 : vector<16x16xf32>
    %c43_522 = arith.constant 43 : index
    %1449 = memref.load %arg6[%c43_522] : memref<144xf32, #tpu.memory_space<smem>>
    %1450 = vector.broadcast %1449 : f32 to vector<16x16xf32>
    %1451 = arith.mulf %1444, %1450 : vector<16x16xf32>
    %1452 = arith.addf %1434, %1451 : vector<16x16xf32>
    %c79_523 = arith.constant 79 : index
    %1453 = memref.load %arg6[%c79_523] : memref<144xf32, #tpu.memory_space<smem>>
    %1454 = vector.broadcast %1453 : f32 to vector<16x16xf32>
    %1455 = arith.mulf %1444, %1454 : vector<16x16xf32>
    %1456 = arith.addf %1438, %1455 : vector<16x16xf32>
    %c115_524 = arith.constant 115 : index
    %1457 = memref.load %arg6[%c115_524] : memref<144xf32, #tpu.memory_space<smem>>
    %1458 = vector.broadcast %1457 : f32 to vector<16x16xf32>
    %1459 = arith.mulf %1444, %1458 : vector<16x16xf32>
    %1460 = arith.addf %1442, %1459 : vector<16x16xf32>
    %c1_525 = arith.constant 1 : index
    %c9_526 = arith.constant 9 : index
    %c1_527 = arith.constant 1 : index
    %1461 = vector.load %arg10[%c1_525, %c9_526, %c1_527] : memref<4x32x128xf32, #tpu.memory_space<vmem>>, vector<1x16x16xf32>
    %1462 = vector.shape_cast %1461 : vector<1x16x16xf32> to vector<16x16xf32>
    %c16_528 = arith.constant 16 : index
    %1463 = memref.load %arg6[%c16_528] : memref<144xf32, #tpu.memory_space<smem>>
    %1464 = vector.broadcast %1463 : f32 to vector<16x16xf32>
    %1465 = arith.mulf %1462, %1464 : vector<16x16xf32>
    %1466 = arith.addf %1448, %1465 : vector<16x16xf32>
    %c52_529 = arith.constant 52 : index
    %1467 = memref.load %arg6[%c52_529] : memref<144xf32, #tpu.memory_space<smem>>
    %1468 = vector.broadcast %1467 : f32 to vector<16x16xf32>
    %1469 = arith.mulf %1462, %1468 : vector<16x16xf32>
    %1470 = arith.addf %1452, %1469 : vector<16x16xf32>
    %c88_530 = arith.constant 88 : index
    %1471 = memref.load %arg6[%c88_530] : memref<144xf32, #tpu.memory_space<smem>>
    %1472 = vector.broadcast %1471 : f32 to vector<16x16xf32>
    %1473 = arith.mulf %1462, %1472 : vector<16x16xf32>
    %1474 = arith.addf %1456, %1473 : vector<16x16xf32>
    %c124_531 = arith.constant 124 : index
    %1475 = memref.load %arg6[%c124_531] : memref<144xf32, #tpu.memory_space<smem>>
    %1476 = vector.broadcast %1475 : f32 to vector<16x16xf32>
    %1477 = arith.mulf %1462, %1476 : vector<16x16xf32>
    %1478 = arith.addf %1460, %1477 : vector<16x16xf32>
    %c2_532 = arith.constant 2 : index
    %c9_533 = arith.constant 9 : index
    %c1_534 = arith.constant 1 : index
    %1479 = vector.load %arg10[%c2_532, %c9_533, %c1_534] : memref<4x32x128xf32, #tpu.memory_space<vmem>>, vector<1x16x16xf32>
    %1480 = vector.shape_cast %1479 : vector<1x16x16xf32> to vector<16x16xf32>
    %c25_535 = arith.constant 25 : index
    %1481 = memref.load %arg6[%c25_535] : memref<144xf32, #tpu.memory_space<smem>>
    %1482 = vector.broadcast %1481 : f32 to vector<16x16xf32>
    %1483 = arith.mulf %1480, %1482 : vector<16x16xf32>
    %1484 = arith.addf %1466, %1483 : vector<16x16xf32>
    %c61_536 = arith.constant 61 : index
    %1485 = memref.load %arg6[%c61_536] : memref<144xf32, #tpu.memory_space<smem>>
    %1486 = vector.broadcast %1485 : f32 to vector<16x16xf32>
    %1487 = arith.mulf %1480, %1486 : vector<16x16xf32>
    %1488 = arith.addf %1470, %1487 : vector<16x16xf32>
    %c97_537 = arith.constant 97 : index
    %1489 = memref.load %arg6[%c97_537] : memref<144xf32, #tpu.memory_space<smem>>
    %1490 = vector.broadcast %1489 : f32 to vector<16x16xf32>
    %1491 = arith.mulf %1480, %1490 : vector<16x16xf32>
    %1492 = arith.addf %1474, %1491 : vector<16x16xf32>
    %c133_538 = arith.constant 133 : index
    %1493 = memref.load %arg6[%c133_538] : memref<144xf32, #tpu.memory_space<smem>>
    %1494 = vector.broadcast %1493 : f32 to vector<16x16xf32>
    %1495 = arith.mulf %1480, %1494 : vector<16x16xf32>
    %1496 = arith.addf %1478, %1495 : vector<16x16xf32>
    %c3_539 = arith.constant 3 : index
    %c9_540 = arith.constant 9 : index
    %c1_541 = arith.constant 1 : index
    %1497 = vector.load %arg10[%c3_539, %c9_540, %c1_541] : memref<4x32x128xf32, #tpu.memory_space<vmem>>, vector<1x16x16xf32>
    %1498 = vector.shape_cast %1497 : vector<1x16x16xf32> to vector<16x16xf32>
    %c34_542 = arith.constant 34 : index
    %1499 = memref.load %arg6[%c34_542] : memref<144xf32, #tpu.memory_space<smem>>
    %1500 = vector.broadcast %1499 : f32 to vector<16x16xf32>
    %1501 = arith.mulf %1498, %1500 : vector<16x16xf32>
    %1502 = arith.addf %1484, %1501 : vector<16x16xf32>
    %c70_543 = arith.constant 70 : index
    %1503 = memref.load %arg6[%c70_543] : memref<144xf32, #tpu.memory_space<smem>>
    %1504 = vector.broadcast %1503 : f32 to vector<16x16xf32>
    %1505 = arith.mulf %1498, %1504 : vector<16x16xf32>
    %1506 = arith.addf %1488, %1505 : vector<16x16xf32>
    %c106_544 = arith.constant 106 : index
    %1507 = memref.load %arg6[%c106_544] : memref<144xf32, #tpu.memory_space<smem>>
    %1508 = vector.broadcast %1507 : f32 to vector<16x16xf32>
    %1509 = arith.mulf %1498, %1508 : vector<16x16xf32>
    %1510 = arith.addf %1492, %1509 : vector<16x16xf32>
    %c142_545 = arith.constant 142 : index
    %1511 = memref.load %arg6[%c142_545] : memref<144xf32, #tpu.memory_space<smem>>
    %1512 = vector.broadcast %1511 : f32 to vector<16x16xf32>
    %1513 = arith.mulf %1498, %1512 : vector<16x16xf32>
    %1514 = arith.addf %1496, %1513 : vector<16x16xf32>
    %c0_546 = arith.constant 0 : index
    %c9_547 = arith.constant 9 : index
    %c2_548 = arith.constant 2 : index
    %1515 = vector.load %arg10[%c0_546, %c9_547, %c2_548] : memref<4x32x128xf32, #tpu.memory_space<vmem>>, vector<1x16x16xf32>
    %1516 = vector.shape_cast %1515 : vector<1x16x16xf32> to vector<16x16xf32>
    %c8_549 = arith.constant 8 : index
    %1517 = memref.load %arg6[%c8_549] : memref<144xf32, #tpu.memory_space<smem>>
    %1518 = vector.broadcast %1517 : f32 to vector<16x16xf32>
    %1519 = arith.mulf %1516, %1518 : vector<16x16xf32>
    %1520 = arith.addf %1502, %1519 : vector<16x16xf32>
    %c44_550 = arith.constant 44 : index
    %1521 = memref.load %arg6[%c44_550] : memref<144xf32, #tpu.memory_space<smem>>
    %1522 = vector.broadcast %1521 : f32 to vector<16x16xf32>
    %1523 = arith.mulf %1516, %1522 : vector<16x16xf32>
    %1524 = arith.addf %1506, %1523 : vector<16x16xf32>
    %c80_551 = arith.constant 80 : index
    %1525 = memref.load %arg6[%c80_551] : memref<144xf32, #tpu.memory_space<smem>>
    %1526 = vector.broadcast %1525 : f32 to vector<16x16xf32>
    %1527 = arith.mulf %1516, %1526 : vector<16x16xf32>
    %1528 = arith.addf %1510, %1527 : vector<16x16xf32>
    %c116_552 = arith.constant 116 : index
    %1529 = memref.load %arg6[%c116_552] : memref<144xf32, #tpu.memory_space<smem>>
    %1530 = vector.broadcast %1529 : f32 to vector<16x16xf32>
    %1531 = arith.mulf %1516, %1530 : vector<16x16xf32>
    %1532 = arith.addf %1514, %1531 : vector<16x16xf32>
    %c1_553 = arith.constant 1 : index
    %c9_554 = arith.constant 9 : index
    %c2_555 = arith.constant 2 : index
    %1533 = vector.load %arg10[%c1_553, %c9_554, %c2_555] : memref<4x32x128xf32, #tpu.memory_space<vmem>>, vector<1x16x16xf32>
    %1534 = vector.shape_cast %1533 : vector<1x16x16xf32> to vector<16x16xf32>
    %c17_556 = arith.constant 17 : index
    %1535 = memref.load %arg6[%c17_556] : memref<144xf32, #tpu.memory_space<smem>>
    %1536 = vector.broadcast %1535 : f32 to vector<16x16xf32>
    %1537 = arith.mulf %1534, %1536 : vector<16x16xf32>
    %1538 = arith.addf %1520, %1537 : vector<16x16xf32>
    %c53_557 = arith.constant 53 : index
    %1539 = memref.load %arg6[%c53_557] : memref<144xf32, #tpu.memory_space<smem>>
    %1540 = vector.broadcast %1539 : f32 to vector<16x16xf32>
    %1541 = arith.mulf %1534, %1540 : vector<16x16xf32>
    %1542 = arith.addf %1524, %1541 : vector<16x16xf32>
    %c89_558 = arith.constant 89 : index
    %1543 = memref.load %arg6[%c89_558] : memref<144xf32, #tpu.memory_space<smem>>
    %1544 = vector.broadcast %1543 : f32 to vector<16x16xf32>
    %1545 = arith.mulf %1534, %1544 : vector<16x16xf32>
    %1546 = arith.addf %1528, %1545 : vector<16x16xf32>
    %c125_559 = arith.constant 125 : index
    %1547 = memref.load %arg6[%c125_559] : memref<144xf32, #tpu.memory_space<smem>>
    %1548 = vector.broadcast %1547 : f32 to vector<16x16xf32>
    %1549 = arith.mulf %1534, %1548 : vector<16x16xf32>
    %1550 = arith.addf %1532, %1549 : vector<16x16xf32>
    %c2_560 = arith.constant 2 : index
    %c9_561 = arith.constant 9 : index
    %c2_562 = arith.constant 2 : index
    %1551 = vector.load %arg10[%c2_560, %c9_561, %c2_562] : memref<4x32x128xf32, #tpu.memory_space<vmem>>, vector<1x16x16xf32>
    %1552 = vector.shape_cast %1551 : vector<1x16x16xf32> to vector<16x16xf32>
    %c26_563 = arith.constant 26 : index
    %1553 = memref.load %arg6[%c26_563] : memref<144xf32, #tpu.memory_space<smem>>
    %1554 = vector.broadcast %1553 : f32 to vector<16x16xf32>
    %1555 = arith.mulf %1552, %1554 : vector<16x16xf32>
    %1556 = arith.addf %1538, %1555 : vector<16x16xf32>
    %c62_564 = arith.constant 62 : index
    %1557 = memref.load %arg6[%c62_564] : memref<144xf32, #tpu.memory_space<smem>>
    %1558 = vector.broadcast %1557 : f32 to vector<16x16xf32>
    %1559 = arith.mulf %1552, %1558 : vector<16x16xf32>
    %1560 = arith.addf %1542, %1559 : vector<16x16xf32>
    %c98_565 = arith.constant 98 : index
    %1561 = memref.load %arg6[%c98_565] : memref<144xf32, #tpu.memory_space<smem>>
    %1562 = vector.broadcast %1561 : f32 to vector<16x16xf32>
    %1563 = arith.mulf %1552, %1562 : vector<16x16xf32>
    %1564 = arith.addf %1546, %1563 : vector<16x16xf32>
    %c134_566 = arith.constant 134 : index
    %1565 = memref.load %arg6[%c134_566] : memref<144xf32, #tpu.memory_space<smem>>
    %1566 = vector.broadcast %1565 : f32 to vector<16x16xf32>
    %1567 = arith.mulf %1552, %1566 : vector<16x16xf32>
    %1568 = arith.addf %1550, %1567 : vector<16x16xf32>
    %c3_567 = arith.constant 3 : index
    %c9_568 = arith.constant 9 : index
    %c2_569 = arith.constant 2 : index
    %1569 = vector.load %arg10[%c3_567, %c9_568, %c2_569] : memref<4x32x128xf32, #tpu.memory_space<vmem>>, vector<1x16x16xf32>
    %1570 = vector.shape_cast %1569 : vector<1x16x16xf32> to vector<16x16xf32>
    %c35_570 = arith.constant 35 : index
    %1571 = memref.load %arg6[%c35_570] : memref<144xf32, #tpu.memory_space<smem>>
    %1572 = vector.broadcast %1571 : f32 to vector<16x16xf32>
    %1573 = arith.mulf %1570, %1572 : vector<16x16xf32>
    %1574 = arith.addf %1556, %1573 : vector<16x16xf32>
    %c71_571 = arith.constant 71 : index
    %1575 = memref.load %arg6[%c71_571] : memref<144xf32, #tpu.memory_space<smem>>
    %1576 = vector.broadcast %1575 : f32 to vector<16x16xf32>
    %1577 = arith.mulf %1570, %1576 : vector<16x16xf32>
    %1578 = arith.addf %1560, %1577 : vector<16x16xf32>
    %c107_572 = arith.constant 107 : index
    %1579 = memref.load %arg6[%c107_572] : memref<144xf32, #tpu.memory_space<smem>>
    %1580 = vector.broadcast %1579 : f32 to vector<16x16xf32>
    %1581 = arith.mulf %1570, %1580 : vector<16x16xf32>
    %1582 = arith.addf %1564, %1581 : vector<16x16xf32>
    %c143_573 = arith.constant 143 : index
    %1583 = memref.load %arg6[%c143_573] : memref<144xf32, #tpu.memory_space<smem>>
    %1584 = vector.broadcast %1583 : f32 to vector<16x16xf32>
    %1585 = arith.mulf %1570, %1584 : vector<16x16xf32>
    %1586 = arith.addf %1568, %1585 : vector<16x16xf32>
    %c0_574 = arith.constant 0 : index
    %1587 = memref.load %arg7[%c0_574] : memref<4xf32, #tpu.memory_space<smem>>
    %1588 = vector.broadcast %1587 : f32 to vector<16x16xf32>
    %1589 = arith.addf %1574, %1588 : vector<16x16xf32>
    %c1_575 = arith.constant 1 : index
    %1590 = memref.load %arg7[%c1_575] : memref<4xf32, #tpu.memory_space<smem>>
    %1591 = vector.broadcast %1590 : f32 to vector<16x16xf32>
    %1592 = arith.addf %1578, %1591 : vector<16x16xf32>
    %c2_576 = arith.constant 2 : index
    %1593 = memref.load %arg7[%c2_576] : memref<4xf32, #tpu.memory_space<smem>>
    %1594 = vector.broadcast %1593 : f32 to vector<16x16xf32>
    %1595 = arith.addf %1582, %1594 : vector<16x16xf32>
    %c3_577 = arith.constant 3 : index
    %1596 = memref.load %arg7[%c3_577] : memref<4xf32, #tpu.memory_space<smem>>
    %1597 = vector.broadcast %1596 : f32 to vector<16x16xf32>
    %1598 = arith.addf %1586, %1597 : vector<16x16xf32>
    %c0_578 = arith.constant 0 : index
    %c0_579 = arith.constant 0 : index
    %c0_580 = arith.constant 0 : index
    %c0_581 = arith.constant 0 : index
    %1599 = vector.load %arg8[%c0_578, %c0_579, %c0_580, %c0_581] : memref<1x4x16x16xf32, #tpu.memory_space<vmem>>, vector<1x1x16x16xf32>
    %1600 = vector.shape_cast %1599 : vector<1x1x16x16xf32> to vector<16x16xf32>
    %1601 = vector.shape_cast %1589 : vector<16x16xf32> to vector<1x1x16x16xf32>
    tpu.vector_store %arg8[%c0_578, %c0_579, %c0_580, %c0_581], %1601 {strides = array<i32>} : memref<1x4x16x16xf32, #tpu.memory_space<vmem>>, vector<1x1x16x16xf32>,
    %c0_582 = arith.constant 0 : index
    %c1_583 = arith.constant 1 : index
    %c0_584 = arith.constant 0 : index
    %c0_585 = arith.constant 0 : index
    %1602 = vector.load %arg8[%c0_582, %c1_583, %c0_584, %c0_585] : memref<1x4x16x16xf32, #tpu.memory_space<vmem>>, vector<1x1x16x16xf32>
    %1603 = vector.shape_cast %1602 : vector<1x1x16x16xf32> to vector<16x16xf32>
    %1604 = vector.shape_cast %1592 : vector<16x16xf32> to vector<1x1x16x16xf32>
    tpu.vector_store %arg8[%c0_582, %c1_583, %c0_584, %c0_585], %1604 {strides = array<i32>} : memref<1x4x16x16xf32, #tpu.memory_space<vmem>>, vector<1x1x16x16xf32>,
    %c0_586 = arith.constant 0 : index
    %c2_587 = arith.constant 2 : index
    %c0_588 = arith.constant 0 : index
    %c0_589 = arith.constant 0 : index
    %1605 = vector.load %arg8[%c0_586, %c2_587, %c0_588, %c0_589] : memref<1x4x16x16xf32, #tpu.memory_space<vmem>>, vector<1x1x16x16xf32>
    %1606 = vector.shape_cast %1605 : vector<1x1x16x16xf32> to vector<16x16xf32>
    %1607 = vector.shape_cast %1595 : vector<16x16xf32> to vector<1x1x16x16xf32>
    tpu.vector_store %arg8[%c0_586, %c2_587, %c0_588, %c0_589], %1607 {strides = array<i32>} : memref<1x4x16x16xf32, #tpu.memory_space<vmem>>, vector<1x1x16x16xf32>,
    %c0_590 = arith.constant 0 : index
    %c3_591 = arith.constant 3 : index
    %c0_592 = arith.constant 0 : index
    %c0_593 = arith.constant 0 : index
    %1608 = vector.load %arg8[%c0_590, %c3_591, %c0_592, %c0_593] : memref<1x4x16x16xf32, #tpu.memory_space<vmem>>, vector<1x1x16x16xf32>
    %1609 = vector.shape_cast %1608 : vector<1x1x16x16xf32> to vector<16x16xf32>
    %1610 = vector.shape_cast %1598 : vector<16x16xf32> to vector<1x1x16x16xf32>
    tpu.vector_store %arg8[%c0_590, %c3_591, %c0_592, %c0_593], %1610 {strides = array<i32>} : memref<1x4x16x16xf32, #tpu.memory_space<vmem>>, vector<1x1x16x16xf32>,
    return
  }
  func.func @transform_0(%arg0: i32) -> (i32, i32, i32, i32) {
    %c0_i32 = arith.constant 0 : i32
    %c0_i32_0 = arith.constant 0 : i32
    %c0_i32_1 = arith.constant 0 : i32
    %c0_i32_2 = arith.constant 0 : i32
    return %arg0, %c0_i32, %c0_i32_0, %c0_i32_1 : i32, i32, i32, i32
  }
  func.func @transform_1(%arg0: i32) -> i32 {
    %c0_i32 = arith.constant 0 : i32
    %c0_i32_0 = arith.constant 0 : i32
    return %c0_i32 : i32
  }
  func.func @transform_2(%arg0: i32) -> i32 {
    %c0_i32 = arith.constant 0 : i32
    %c0_i32_0 = arith.constant 0 : i32
    return %c0_i32 : i32
  }
  func.func @transform_3(%arg0: i32) -> i32 {
    %c0_i32 = arith.constant 0 : i32
    %c0_i32_0 = arith.constant 0 : i32
    return %c0_i32 : i32
  }
  func.func @transform_4(%arg0: i32) -> i32 {
    %c0_i32 = arith.constant 0 : i32
    %c0_i32_0 = arith.constant 0 : i32
    return %c0_i32 : i32
  }
  func.func @transform_5(%arg0: i32) -> i32 {
    %c0_i32 = arith.constant 0 : i32
    %c0_i32_0 = arith.constant 0 : i32
    return %c0_i32 : i32
  }
  func.func @transform_6(%arg0: i32) -> i32 {
    %c0_i32 = arith.constant 0 : i32
    %c0_i32_0 = arith.constant 0 : i32
    return %c0_i32 : i32
  }
  func.func @transform_7(%arg0: i32) -> (i32, i32, i32, i32) {
    %c0_i32 = arith.constant 0 : i32
    %c0_i32_0 = arith.constant 0 : i32
    %c0_i32_1 = arith.constant 0 : i32
    %c0_i32_2 = arith.constant 0 : i32
    return %arg0, %c0_i32, %c0_i32_0, %c0_i32_1 : i32, i32, i32, i32
  }
}

</mosaic_0001>

<bundles_post_ra>
// kernel: squeeze.1
= control target key start
LH: loop header
LB: loop body
LE: loop exit
PB: predicated region body
PF: predicated region fallthrough
CT: control target
= control target key end

     0   :  { %s37_s8 = smov 8   ;;  %s38_s9 = smov 16   ;;  %vm7_vm0 = vcmask 64512   ;;  %vm13_vm1 = vcmask 261312   ;;  %vm19_vm2 = vcmask 195712   ;;  %vm25_vm3 = vcmask 130112   ;;  %s55_s0 = inlined_call_operand.vmem [shape: f32[4,8], index: 0, kind: input, shape index: {}]   ;;  %s56_s1 = inlined_call_operand.vmem [shape: f32[32], index: 1, kind: output, shape index: {}]  }
   0x1   :  { %v4_v0 = vld [vmem:[%s55_s0] sm:$0xf]  ;;  %s36_s0 = smov 24  }
   0x2   :  { %5 = vst [vmem:[#allocation1] sm:$0xf] %v4_v0 }
   0x9   :  { %v10_v1 = vld [vmem:[#allocation1 + $0x3] sm:$0x1]   ;;  %v22_v2 = vld [vmem:[#allocation1 + $0x1] sm:$0x1]   ;;  %v16_v3 = vld [vmem:[#allocation1 + $0x2] sm:$0x1]  }
   0xa   :  { %11 = vrot.lane.b32.xlu0 %v10_v1, %s36_s0  ;;  %23 = vrot.lane.b32.xlu1 %v22_v2, %s37_s8  ;;  %v6_v4 = vld [vmem:[#allocation1] sm:$0x1]  }
   0xb   :  { %8 = vst.msk [vmem:[#allocation0] sm:$0x1] %vm7_vm0, %v6_v4  }
  0x12   :  { %17 = vrot.lane.b32.xlu0 %v16_v3, %s38_s9 }
  0x7c   :  { %v12_v5 = vpop.permute.xlu0 %11   ;;  %v24_v6 = vpop.permute.xlu1 %23  }
  0x7d   :  { %14 = vst.msk [vmem:[#allocation0] sm:$0x1] %vm13_vm1, %v12_v5  }
  0x84   :  { %v18_v7 = vpop.permute.xlu0 %17  }
  0x85   :  { %20 = vst.msk [vmem:[#allocation0] sm:$0x1] %vm19_vm2, %v18_v7  }
  0x86   :  { %26 = vst.msk [vmem:[#allocation0] sm:$0x1] %vm25_vm3, %v24_v6  }
  0x8d   :  { %v29_v8 = vld [vmem:[#allocation0] sm:$0x1] }
  0x8e   :  { %32 = vst [vmem:[%s56_s1] sm:$0x1] %v29_v8 }

// kernel: block_forward.1
= control target key start
LH: loop header
LB: loop body
LE: loop exit
PB: predicated region body
PF: predicated region fallthrough
CT: control target
= control target key end

     0   :  { %s8000_s0 = inlined_call_operand.vmem [shape: f32[2,8,16,18], index: 0, kind: input, shape index: {}]   ;;  %s8001_s1 = inlined_call_operand.vmem [shape: f32[32], index: 1, kind: input, shape index: {}]   ;;  %s8002_s2 = inlined_call_operand.vmem [shape: f32[4], index: 2, kind: input, shape index: {}]   ;;  %s8003_s3 = inlined_call_operand.vmem [shape: f32[144], index: 3, kind: input, shape index: {}]   ;;  %s8004_s4 = inlined_call_operand.vmem [shape: f32[4], index: 4, kind: input, shape index: {}]   ;;  %s8005_s5 = inlined_call_operand.vmem [shape: f32[144], index: 5, kind: input, shape index: {}]   ;;  %s8006_s6 = inlined_call_operand.vmem [shape: f32[4], index: 6, kind: input, shape index: {}]   ;;  %s8007_s7 = inlined_call_operand.hbm [shape: f32[2,4,16,16], index: 7, kind: output, shape index: {}]  }
   0x1   :  { %8025 = sst [smem:[#allocation150_spill]] %s8000_s0 }
   0x2   :  { %8026 = sst [smem:[#allocation151_spill]] %s8001_s1 }
   0x3   :  { %8027 = sst [smem:[#allocation152_spill]] %s8002_s2 }
   0x4   :  { %8028 = sst [smem:[#allocation153_spill]] %s8003_s3 }
   0x5   :  { %12 = vsyncpa [#allocation6], 0 }
   0x6   :  { %13 = vsyncpa [#allocation8], 0 }
   0x7   :  { %14 = vsyncpa [#allocation11], 0 }
   0x8   :  { %15 = vsyncpa [#allocation14], 0 }
   0x9   :  { %16 = vsyncpa [#allocation5], 0 }
   0xa   :  { %18 = vsyncpa [#allocation5 + $0x1], 0  ;;  %s4999_s24 = smov 0   ;;  %s5001_s25 = smov 0  }
   0xb   :  { %s5003_s26 = smov 0   ;;  %s5005_s27 = smov 0  }
   0xc LB: > { %s5020_s28 = sadd.s32 4294967295, %s4946_s27   ;;  %s4232_s29 = sadd.s32 4294967294, %s4946_s27   ;;  %s4946_s27 = sphi %s5005_s27, %s8325_s27   ;;  %s4942_s26 = sphi %s5003_s26, %s8324_s26   ;;  %s4938_s25 = sphi %s5001_s25, %s8323_s25   ;;  %s4934_s24 = sphi %s4999_s24, %s8322_s24  }
   0xd   : > { %s5024_s30 = sadd.s32 1, %s4946_s27   ;;  %s183_s8 = sadd.s32 1, %s4942_s26 }
   0xe   : > { %s180_s9 = ssub.s32 %s4946_s27, %s5024_s30  ;;  %p193_p0 = scmp.ne.s32.totalorder %s4942_s26, %s4938_s25 }
   0xf   : > { %p181_p1 = scmp.eq.s32.totalorder %s180_s9, 0  ;;  %p194_p2 = scmp.eq.s32.totalorder %s5020_s28, 1 }
  0x10   : > { %p199_p3 = scmp.ne.s32.totalorder %s4938_s25, %s4934_s24  ;;  %p200_p4 = scmp.eq.s32.totalorder %s4232_s29, 1 }
  0x11   : > { %s5035_s10 = scalar_select %p181_p1, %s4942_s26, %s183_s8  }
  0x12   : > { %p5037_p5 = por %p194_p2, %p193_p0  ;;  %p5041_p6 = por %p200_p4, %p199_p3 }
  0x13   : > { %p4233_p7 = scmp.ge.s32.totalorder %s4946_s27, 1  ;;  %p207_p8 = scmp.lt.s32.totalorder %s4946_s27, 3 }
  0x14   : > { %p4697_p9 = scmp.eq.s32.totalorder %s5020_s28, 0  ;;  %s8032_s2 = sld [smem:[#allocation152_spill]] }
  0x15   : > { %p5048_p10 = pnand %p4233_p7, %p207_p8  ;;  %s249_s19 = sshll.u32 %s8004_s4, 4  ;;  %s250_s19 = int_to_ptr.vmem [resolvable:$true] %s249_s19 }
  0x16   : > { %s8034_s1 = sld [smem:[#allocation151_spill]]  ;;  %s4948_s14 = smov [#allocation7]  }
  0x17   : > { %p4674_p11 = pneg %p5048_p10  ;;  %s8035_s3 = sld [smem:[#allocation153_spill]] }
  0x18   : > { %s4949_s15 = smov [#allocation10]   ;;  %s4950_s17 = smov [#allocation4]  }
  0x19   : > { %p5062_p12 = pnand %p4697_p9, %p4674_p11  ;;  %s4951_s18 = smov [#allocation9]  }
  0x1a   : > { %s229_s16 = sshll.u32 %s8032_s2, 4  ;;  %s269_s2 = sshll.u32 %s8006_s6, 4  ;;  %s230_s16 = int_to_ptr.vmem [resolvable:$true] %s229_s16  ;;  %s270_s2 = int_to_ptr.vmem [resolvable:$true] %s269_s2 }
  0x1b   : > { %4680 = dma.vmem_to_smem (!%p5062_p12), %s230_s16, 16, %s4948_s14, [#allocation8]  }
  0x1c   : > { %s219_s23 = sshll.u32 %s8034_s1, 4  ;;  %s259_s1 = sshll.u32 %s8005_s5, 4  ;;  %s220_s23 = int_to_ptr.vmem [resolvable:$true] %s219_s23  ;;  %s260_s1 = int_to_ptr.vmem [resolvable:$true] %s259_s1 }
  0x1d   : > { %s239_s9 = sshll.u32 %s8035_s3, 4  ;;  %s4952_s16 = smov [#allocation12]   ;;  %s240_s9 = int_to_ptr.vmem [resolvable:$true] %s239_s9 }
  0x1e   : > { %4686 = dma.vmem_to_smem (!%p5062_p12), %s250_s19, 16, %s4949_s15, [#allocation11]  }
  0x1f   : > { %4677 = dma.vmem_to_smem (!%p5062_p12), %s220_s23, 16, %s4950_s17, [#allocation6]  }
  0x20   : > { %4683 = dma.vmem_to_smem (!%p5062_p12), %s240_s9, 32, %s4951_s18, [#allocation8]  }
  0x21   : > { %4689 = dma.vmem_to_smem (!%p5062_p12), %s260_s1, 32, %s4952_s16, [#allocation11]  }
  0x22   : > { %s4953_s19 = smov [#allocation13]   ;;  %290 = sbr.rel (%p5048_p10) target bundleno = 1344 (0x540), region = 48 }
  0x23   : > { %4692 = dma.vmem_to_smem (!%p5062_p12), %s270_s2, 16, %s4953_s19, [#allocation14]  }
  0x27   : > { %4913 = dma.done.wait (%p4697_p9), [#allocation6], 16  }
  0x28   : > { %4915 = vsyncadd (%p4697_p9), [#allocation6], 4294967280 }
  0x29   : > { %4917 = dma.done.wait (%p4697_p9), [#allocation8], 48  }
  0x2a   : > { %4919 = vsyncadd (%p4697_p9), [#allocation8], 4294967248 }
  0x2b   : > { %4921 = dma.done.wait (%p4697_p9), [#allocation11], 48  }
  0x2c   : > { %4923 = vsyncadd (%p4697_p9), [#allocation11], 4294967248 }
  0x2d   : > { %4925 = dma.done.wait (%p4697_p9), [#allocation14], 16  }
  0x2e   : > { %4927 = vsyncadd (%p4697_p9), [#allocation14], 4294967280 }
  0x2f   : > { %322 = sfence }
  0x30   : > { %p349_p13 = scmp.lt.s32.totalorder %s5020_s28, 1  ;;  %s382_s1 = sld [smem:[#allocation4]]  ;;  %v4954_v0 = vmov 0.0   ;;  %v354_v22 = vlaneseq  ;;  %vm461_vm3 = vcmask 146432  }
  0x31   : > { %364 = vst [vmem:[#allocation2] sm:$0xff] %v4954_v0  ;;  %s4255_s2 = sld [smem:[#allocation4 + $0x1]] }
  0x32   : > { %s350_s13 = scalar_select %p349_p13, %s5020_s28, 1  ;;  %365 = vst [vmem:[#allocation2 + $0x8] sm:$0xff] %v4954_v0  ;;  %v5206_v41 = vand.u32 127, %v354_v22 }
  0x33   : > { %366 = vst [vmem:[#allocation2 + $0x10] sm:$0xff] %v4954_v0  ;;  %s5113_s20 = sld [smem:[#allocation4 + $0x2]] }
  0x34   : > { %s4646_s23 = sshll.u32 %s350_s13, 7  ;;  %s5115_s9 = sld [smem:[#allocation4 + $0x3]]  ;;  %367 = vst [vmem:[#allocation2 + $0x18] sm:$0xff] %v4954_v0  ;;  %vm356_vm0 = vcmp.ge.s32.totalorder %v5206_v41, 2 }
  0x35   : > { %s8036_s0 = sld [smem:[#allocation150_spill]]  ;;  %368 = vst [vmem:[#allocation2 + $0x20] sm:$0xff] %v4954_v0 }
  0x36   : > { %s5123_s18 = sld [smem:[#allocation4 + $0x4]]  ;;  %v383_v3 = vstv %s382_s1  ;;  %369 = vst [vmem:[#allocation2 + $0x28] sm:$0xff] %v4954_v0 }
  0x37   : > { %s5135_s21 = sld [smem:[#allocation4 + $0x5]]  ;;  %v390_v8 = vstv %s4255_s2  ;;  %370 = vst [vmem:[#allocation2 + $0x30] sm:$0xff] %v4954_v0 }
  0x38   : > { %s5149_s22 = sld [smem:[#allocation4 + $0x6]]  ;;  %371 = vst [vmem:[#allocation2 + $0x38] sm:$0xff] %v4954_v0 }
  0x39   : > { %s5154_s29 = sld [smem:[#allocation4 + $0x7]]  ;;  %v399_v13 = vstv %s5113_s20  ;;  %372 = vst [vmem:[#allocation2 + $0x40] sm:$0xff] %v4954_v0 }
  0x3a   : > { %373 = vst [vmem:[#allocation2 + $0x48] sm:$0xff] %v4954_v0  ;;  %v408_v23 = vstv %s5115_s9  ;;  %s5185_s8 = sld [smem:[#allocation7]] }
  0x3b   : > { %s5121_s17 = scalar_lea.vmem %s8036_s0, %s4646_s23  ;;  %374 = vst [vmem:[#allocation2 + $0x50] sm:$0xff] %v4954_v0  ;;  %s5198_s16 = sld [smem:[#allocation9 + $0x25]] }
  0x3c   : > { %v5127_v1 = vld [vmem:[%s5121_s17] sm:$0xff]  ;;  %v5130_v2 = vld [vmem:[%s5121_s17 + $0x8] sm:$0xff]  ;;  %v5133_v4 = vld [vmem:[%s5121_s17 + $0x10] sm:$0xff]  ;;  %v417_v24 = vstv %s5123_s18  ;;  %375 = vst [vmem:[#allocation2 + $0x58] sm:$0xff] %v4954_v0  ;;  %s5204_s19 = sld [smem:[#allocation4 + $0x8]] }
  0x3d   : > { %v384_v5 = vmul.f32 %v383_v3, %v5127_v1  ;;  %v385_v6 = vmul.f32 %v383_v3, %v5130_v2  ;;  %v5141_v7 = vld [vmem:[%s5121_s17 + $0x18] sm:$0xff]  ;;  %v5144_v9 = vld [vmem:[%s5121_s17 + $0x20] sm:$0xff]  ;;  %v5147_v10 = vld [vmem:[%s5121_s17 + $0x28] sm:$0xff]  ;;  %v391_v11 = vmul.f32 %v5133_v4, %v390_v8  ;;  %v426_v33 = vstv %s5135_s21  ;;  %376 = vst [vmem:[#allocation2 + $0x60] sm:$0xff] %v4954_v0  ;;  %s5216_s1 = sld [smem:[#allocation4 + $0x9]] }
  0x3e   : > { %v392_v12 = vmul.f32 %v5141_v7, %v390_v8  ;;  %v5159_v14 = vld [vmem:[%s5121_s17 + $0x30] sm:$0xff]  ;;  %v5162_v15 = vld [vmem:[%s5121_s17 + $0x38] sm:$0xff]  ;;  %v400_v18 = vmul.f32 %v5144_v9, %v399_v13  ;;  %v401_v19 = vmul.f32 %v5147_v10, %v399_v13  ;;  %v5168_v20 = vld [vmem:[%s5121_s17 + $0x40] sm:$0xff]  ;;  %v435_v36 = vstv %s5149_s22  ;;  %377 = vst [vmem:[#allocation2 + $0x68] sm:$0xff] %v4954_v0  ;;  %s5221_s2 = sld [smem:[#allocation4 + $0xa]] }
  0x3f   : > { %v393_v16 = vadd.f32 %v391_v11, %v384_v5  ;;  %v5171_v21 = vld [vmem:[%s5121_s17 + $0x48] sm:$0xff]  ;;  %v5177_v25 = vld [vmem:[%s5121_s17 + $0x50] sm:$0xff]  ;;  %v5180_v26 = vld [vmem:[%s5121_s17 + $0x58] sm:$0xff]  ;;  %v409_v29 = vmul.f32 %v5159_v14, %v408_v23  ;;  %v410_v30 = vmul.f32 %v5162_v15, %v408_v23  ;;  %v418_v31 = vmul.f32 %v5168_v20, %v417_v24  ;;  %8037 = vst [vmem:[#allocation21_spill] sm:$0xff] %v5206_v41  ;;  %s5224_s13 = sld [smem:[#allocation4 + $0xb]] }
  0x40   : > { %v394_v17 = vadd.f32 %v392_v12, %v385_v6  ;;  %v419_v32 = vmul.f32 %v5171_v21, %v417_v24  ;;  %v5192_v34 = vld [vmem:[%s5121_s17 + $0x60] sm:$0xff]  ;;  %v5195_v35 = vld [vmem:[%s5121_s17 + $0x68] sm:$0xff]  ;;  %v427_v39 = vmul.f32 %v5177_v25, %v426_v33  ;;  %v428_v40 = vmul.f32 %v5180_v26, %v426_v33  ;;  %v5209_v42 = vld [vmem:[%s5121_s17 + $0x70] sm:$0xff]  ;;  %378 = vst [vmem:[#allocation2 + $0x70] sm:$0xff] %v4954_v0  ;;  %s5229_s20 = sld [smem:[#allocation4 + $0xc]] }
  0x41   : > { %v402_v27 = vadd.f32 %v400_v18, %v393_v16  ;;  %v5212_v43 = vld [vmem:[%s5121_s17 + $0x78] sm:$0xff]  ;;  %v444_v44 = vstv %s5154_s29  ;;  %v436_v47 = vmul.f32 %v5192_v34, %v435_v36  ;;  %v437_v48 = vmul.f32 %v5195_v35, %v435_v36  ;;  %379 = vst [vmem:[#allocation2 + $0x78] sm:$0xff] %v4954_v0  ;;  %s5232_s23 = sld [smem:[#allocation4 + $0xd]] }
  0x42   : > { %v403_v28 = vadd.f32 %v401_v19, %v394_v17  ;;  %695 = vst [vmem:[#allocation3] sm:$0xff] %v4954_v0  ;;  %v445_v51 = vmul.f32 %v5209_v42, %v444_v44  ;;  %v446_v52 = vmul.f32 %v5212_v43, %v444_v44  ;;  %v467_v55 = vstv %s5204_s19  ;;  %s5237_s9 = sld [smem:[#allocation4 + $0xe]] }
  0x43   : > { %v411_v37 = vadd.f32 %v409_v29, %v402_v27  ;;  %696 = vst [vmem:[#allocation3 + $0x8] sm:$0xff] %v4954_v0  ;;  %v450_v56 = vstv %s5185_s8  ;;  %s5241_s14 = sld [smem:[#allocation9 + $0x1]]  ;;  %v468_v57 = vmul.f32 %v467_v55, %v5127_v1  ;;  %v473_v58 = vstv %s5216_s1 }
  0x44   : > { %v412_v38 = vadd.f32 %v410_v30, %v403_v28  ;;  %697 = vst [vmem:[#allocation3 + $0x10] sm:$0xff] %v4954_v0  ;;  %v469_v59 = vmul.f32 %v467_v55, %v5130_v2  ;;  %v474_v62 = vmul.f32 %v5133_v4, %v473_v58  ;;  %v481_v63 = vstv %s5221_s2  ;;  %s5249_s15 = sld [smem:[#allocation4 + $0xf]] }
  0x45   : > { %v420_v45 = vadd.f32 %v418_v31, %v411_v37  ;;  %698 = vst [vmem:[#allocation3 + $0x18] sm:$0xff] %v4954_v0  ;;  %v5254_v3 = vsel %vm356_vm0, 1.0, %v4954_v0  ;;  %s5257_s17 = sld [smem:[#allocation9 + $0x49]]  ;;  %v482_v5 = vmul.f32 %v5144_v9, %v481_v63  ;;  %v489_v6 = vstv %s5224_s13 }
  0x46   : > { %v421_v46 = vadd.f32 %v419_v32, %v412_v38  ;;  %699 = vst [vmem:[#allocation3 + $0x20] sm:$0xff] %v4954_v0  ;;  %v475_v8 = vmul.f32 %v5141_v7, %v473_v58  ;;  %s5263_s18 = sld [smem:[#allocation9 + $0x6d]]  ;;  %v476_v13 = vadd.f32 %v474_v62, %v468_v57  ;;  %v483_v16 = vmul.f32 %v5147_v10, %v481_v63 }
  0x47   : > { %v429_v49 = vadd.f32 %v427_v39, %v420_v45  ;;  %700 = vst [vmem:[#allocation3 + $0x28] sm:$0xff] %v4954_v0  ;;  %v490_v17 = vmul.f32 %v5159_v14, %v489_v6  ;;  %v497_v18 = vstv %s5229_s20  ;;  %v505_v19 = vstv %s5232_s23  ;;  %s5270_s21 = sld [smem:[#allocation7 + $0x1]] }
  0x48   : > { %v430_v50 = vadd.f32 %v428_v40, %v421_v46  ;;  %701 = vst [vmem:[#allocation3 + $0x30] sm:$0xff] %v4954_v0  ;;  %v477_v22 = vadd.f32 %v475_v8, %v469_v59  ;;  %v484_v27 = vadd.f32 %v482_v5, %v476_v13  ;;  %v498_v28 = vmul.f32 %v5168_v20, %v497_v18  ;;  %s5274_s22 = sld [smem:[#allocation4 + $0x10]] }
  0x49   : > { %v438_v53 = vadd.f32 %v436_v47, %v429_v49  ;;  %702 = vst [vmem:[#allocation3 + $0x38] sm:$0xff] %v4954_v0  ;;  %v513_v31 = vstv %s5237_s9  ;;  %v491_v32 = vmul.f32 %v5162_v15, %v489_v6  ;;  %s5279_s29 = sld [smem:[#allocation4 + $0x11]]  ;;  %v506_v38 = vmul.f32 %v5177_v25, %v505_v19  ;;  %s8019_s9 = smov 127  }
  0x4a   : > { %v439_v54 = vadd.f32 %v437_v48, %v430_v50  ;;  %703 = vst [vmem:[#allocation3 + $0x40] sm:$0xff] %v4954_v0  ;;  %v492_v37 = vadd.f32 %v490_v17, %v484_v27  ;;  %s5285_s8 = sld [smem:[#allocation4 + $0x12]]  ;;  %v521_v39 = vstv %s5249_s15  ;;  %v485_v40 = vadd.f32 %v483_v16, %v477_v22 }
  0x4b   : > { %v447_v60 = vadd.f32 %v445_v51, %v438_v53  ;;  %704 = vst [vmem:[#allocation3 + $0x48] sm:$0xff] %v4954_v0  ;;  %v499_v44 = vmul.f32 %v5171_v21, %v497_v18  ;;  %s5290_s19 = sld [smem:[#allocation4 + $0x13]]  ;;  %v822_v45 = vstv %s5198_s16  ;;  %v514_v47 = vmul.f32 %v5192_v34, %v513_v31 }
  0x4c   : > { %v448_v61 = vadd.f32 %v446_v52, %v439_v54  ;;  %705 = vst [vmem:[#allocation3 + $0x50] sm:$0xff] %v4954_v0  ;;  %v500_v46 = vadd.f32 %v498_v28, %v492_v37  ;;  %s5295_s1 = sld [smem:[#allocation4 + $0x14]]  ;;  %v808_v48 = vstv %s5241_s14  ;;  %v836_v49 = vstv %s5257_s17 }
  0x4d   : > { %v451_v11 = vadd.f32 %v450_v56, %v447_v60  ;;  %706 = vst [vmem:[#allocation3 + $0x58] sm:$0xff] %v4954_v0  ;;  %v493_v50 = vadd.f32 %v491_v32, %v485_v40  ;;  %v507_v51 = vmul.f32 %v5180_v26, %v505_v19  ;;  %s5301_s2 = sld [smem:[#allocation4 + $0x15]]  ;;  %v850_v52 = vstv %s5263_s18 }
  0x4e   : > { %v452_v12 = vadd.f32 %v450_v56, %v448_v61  ;;  %707 = vst [vmem:[#allocation3 + $0x60] sm:$0xff] %v4954_v0  ;;  %v508_v53 = vadd.f32 %v506_v38, %v500_v46  ;;  %v522_v54 = vmul.f32 %v5209_v42, %v521_v39  ;;  %v544_v55 = vstv %s5274_s22  ;;  %s5307_s16 = sld [smem:[#allocation4 + $0x16]] }
  0x4f   : > { %vm453_vm1 = vcmp.ge.f32.partialorder %v451_v11, 0.0  ;;  %v455_v23 = vmul.f32 0.1, %v451_v11  ;;  %708 = vst [vmem:[#allocation3 + $0x68] sm:$0xff] %v4954_v0  ;;  %v501_v56 = vadd.f32 %v499_v44, %v493_v50  ;;  %v515_v57 = vmul.f32 %v5195_v35, %v513_v31  ;;  %s5313_s13 = sld [smem:[#allocation4 + $0x17]] }
  0x50   : > { %vm454_vm2 = vcmp.ge.f32.partialorder %v452_v12, 0.0  ;;  %v456_v24 = vmul.f32 0.1, %v452_v12  ;;  %709 = vst [vmem:[#allocation3 + $0x70] sm:$0xff] %v4954_v0  ;;  %v545_v58 = vmul.f32 %v544_v55, %v5127_v1  ;;  %v550_v59 = vstv %s5279_s29  ;;  %s5335_s20 = sld [smem:[#allocation9 + $0x2e]] }
  0x51   : > { %v457_v29 = vsel %vm453_vm1, %v451_v11, %v455_v23  ;;  %710 = vst [vmem:[#allocation3 + $0x78] sm:$0xff] %v4954_v0  ;;  %v516_v60 = vadd.f32 %v514_v47, %v508_v53  ;;  %v523_v61 = vmul.f32 %v5212_v43, %v521_v39  ;;  %v551_v62 = vmul.f32 %v5133_v4, %v550_v59  ;;  %s5344_s23 = sld [smem:[#allocation7 + $0x2]] }
  0x52   : > { %v458_v30 = vsel %vm454_vm2, %v452_v12, %v456_v24  ;;  %v459_v33 = vmul.f32 %v5254_v3, %v457_v29  ;;  %v558_v63 = vstv %s5285_s8  ;;  %v509_v5 = vadd.f32 %v507_v51, %v501_v56  ;;  %s5350_s14 = sld [smem:[#allocation4 + $0x18]] }
  0x53   : > { %v460_v36 = vmul.f32 %v5254_v3, %v458_v30  ;;  %v566_v6 = vstv %s5290_s19  ;;  %v546_v8 = vmul.f32 %v544_v55, %v5130_v2  ;;  %v552_v11 = vmul.f32 %v5141_v7, %v550_v59  ;;  %s5357_s15 = sld [smem:[#allocation4 + $0x19]] }
  0x54   : > { %462 = vst.msk [vmem:[#allocation2 + $0x8] sm:$0xff] %vm461_vm3, %v459_v33  ;;  %v524_v12 = vadd.f32 %v522_v54, %v516_v60  ;;  %v553_v13 = vadd.f32 %v551_v62, %v545_v58  ;;  %v559_v16 = vmul.f32 %v5144_v9, %v558_v63  ;;  %v574_v0 = vstv %s5295_s1  ;;  %s5366_s22 = sld [smem:[#allocation4 + $0x1b]] }
  0x55   : > { %463 = vst.msk [vmem:[#allocation2 + $0x10] sm:$0xff] %vm461_vm3, %v460_v36  ;;  %v527_v18 = vstv %s5270_s21  ;;  %v517_v19 = vadd.f32 %v515_v57, %v509_v5  ;;  %v567_v22 = vmul.f32 %v5159_v14, %v566_v6  ;;  %v582_v29 = vstv %s5301_s2  ;;  %s5359_s21 = sld [smem:[#allocation4 + $0x1a]] }
  0x56   : > { %v575_v31 = vmul.f32 %v5168_v20, %v574_v0  ;;  %v554_v32 = vadd.f32 %v552_v11, %v546_v8  ;;  %v560_v33 = vmul.f32 %v5147_v10, %v558_v63  ;;  %v528_v36 = vadd.f32 %v527_v18, %v524_v12  ;;  %s5368_s29 = sld [smem:[#allocation4 + $0x1c]] }
  0x57   : > { %v525_v37 = vadd.f32 %v523_v61, %v517_v19  ;;  %v561_v38 = vadd.f32 %v559_v16, %v553_v13  ;;  %v590_v39 = vstv %s5307_s16  ;;  %v583_v46 = vmul.f32 %v5177_v25, %v582_v29  ;;  %s5371_s8 = sld [smem:[#allocation9 + $0xa]] }
  0x58   : > { %v598_v47 = vstv %s5313_s13  ;;  %vm530_vm4 = vcmp.ge.f32.partialorder %v528_v36, 0.0  ;;  %v532_v50 = vmul.f32 0.1, %v528_v36  ;;  %v562_v55 = vadd.f32 %v560_v33, %v554_v32  ;;  %s5386_s17 = sld [smem:[#allocation4 + $0x1d]] }
  0x59   : > { %v529_v51 = vadd.f32 %v527_v18, %v525_v37  ;;  %v569_v53 = vadd.f32 %v567_v22, %v561_v38  ;;  %v576_v61 = vmul.f32 %v5171_v21, %v574_v0  ;;  %v584_v5 = vmul.f32 %v5180_v26, %v582_v29  ;;  %s5401_s19 = sld [smem:[#allocation4 + $0x1e]] }
  0x5a   : > { %v534_v56 = vsel %vm530_vm4, %v528_v36, %v532_v50  ;;  %v600_v12 = vmul.f32 %v5212_v43, %v598_v47  ;;  %v621_v13 = vstv %s5350_s14  ;;  %v604_v0 = vstv %s5344_s23  ;;  %s5407_s1 = sld [smem:[#allocation4 + $0x1f]] }
  0x5b   : > { %v5324_v17 = vld [vmem:[#allocation2 + $0x7] sm:$0xff]  ;;  %vm531_vm5 = vcmp.ge.f32.partialorder %v529_v51, 0.0  ;;  %v533_v57 = vmul.f32 0.1, %v529_v51  ;;  %v577_v58 = vadd.f32 %v575_v31, %v569_v53  ;;  %v536_v59 = vmul.f32 %v5254_v3, %v534_v56  ;;  %s5419_s18 = sld [smem:[#allocation9 + $0x52]] }
  0x5c   : > { %v5328_v23 = vld [vmem:[#allocation2 + $0xf] sm:$0xff]  ;;  %v823_v24 = vmul.f32 %v822_v45, %v5324_v17  ;;  %v809_v27 = vmul.f32 %v808_v48, %v5324_v17  ;;  %v837_v28 = vmul.f32 %v836_v49, %v5324_v17  ;;  %v5341_v30 = vmul.f32 %v850_v52, %v5324_v17  ;;  %s5425_s2 = sld [smem:[#allocation7 + $0x3]] }
  0x5d   : > { %v824_v40 = vmul.f32 %v822_v45, %v5328_v23  ;;  %v810_v44 = vmul.f32 %v808_v48, %v5328_v23  ;;  %v838_v54 = vmul.f32 %v836_v49, %v5328_v23  ;;  %v591_v45 = vmul.f32 %v5192_v34, %v590_v39  ;;  %539 = vst.msk [vmem:[#allocation2 + $0x28] sm:$0xff] %vm461_vm3, %v536_v59  ;;  %s5429_s16 = sld [smem:[#allocation9 + $0x76]] }
  0x5e   : > { %827 = vrot.lane.b32.xlu1 %v823_v24, %s8019_s9  ;;  %813 = vrot.lane.b32.xlu0 %v809_v27, %s8019_s9  ;;  %v568_v48 = vmul.f32 %v5162_v15, %v566_v6  ;;  %v599_v49 = vmul.f32 %v5209_v42, %v598_v47  ;;  %v535_v62 = vsel %vm531_vm5, %v529_v51, %v533_v57  ;;  %v627_v24 = vstv %s5357_s15  ;;  %s4366_s13 = sld [smem:[#allocation9 + $0x13]] }
  0x5f   : > { %841 = vrot.lane.b32.xlu2 %v837_v28, %s8019_s9  ;;  %v585_v63 = vadd.f32 %v583_v46, %v577_v58  ;;  %v592_v6 = vmul.f32 %v5195_v35, %v590_v39  ;;  %v537_v8 = vmul.f32 %v5254_v3, %v535_v62  ;;  %v622_v18 = vmul.f32 %v621_v13, %v5127_v1  ;;  %s4368_s23 = sld [smem:[#allocation9 + $0x5b]] }
  0x60   : > { %v570_v60 = vadd.f32 %v568_v48, %v562_v55  ;;  %v623_v19 = vmul.f32 %v621_v13, %v5130_v2  ;;  %v635_v27 = vstv %s5359_s21  ;;  %v643_v28 = vstv %s5366_s22  ;;  %s4369_s14 = sld [smem:[#allocation9 + $0x7f]] }
  0x61   : > { %v593_v16 = vadd.f32 %v591_v45, %v585_v63  ;;  %540 = vst.msk [vmem:[#allocation2 + $0x30] sm:$0xff] %vm461_vm3, %v537_v8  ;;  %v628_v31 = vmul.f32 %v5133_v4, %v627_v24  ;;  %v629_v1 = vmul.f32 %v5141_v7, %v627_v24  ;;  %v636_v2 = vmul.f32 %v5144_v9, %v635_v27  ;;  %s4370_s15 = sld [smem:[#allocation9 + $0x1c]] }
  0x62   : > { %v578_v11 = vadd.f32 %v576_v61, %v570_v60  ;;  %v852_v32 = vmul.f32 %v850_v52, %v5328_v23  ;;  %v637_v36 = vmul.f32 %v5147_v10, %v635_v27  ;;  %v644_v37 = vmul.f32 %v5159_v14, %v643_v28  ;;  %s4371_s21 = sld [smem:[#allocation9 + $0x40]] }
  0x63   : > { %v601_v29 = vadd.f32 %v599_v49, %v593_v16  ;;  %v630_v39 = vadd.f32 %v628_v31, %v622_v18  ;;  %v878_v46 = vstv %s5335_s20  ;;  %v864_v4 = vstv %s5371_s8  ;;  %s4367_s20 = sld [smem:[#allocation9 + $0x37]] }
  0x64   : > { %v586_v22 = vadd.f32 %v584_v5, %v578_v11  ;;  %v645_v7 = vmul.f32 %v5162_v15, %v643_v28  ;;  %v5409_v9 = vld [vmem:[#allocation2 + $0x27] sm:$0xff]  ;;  %v659_v48 = vstv %s5386_s17  ;;  %v667_v60 = vstv %s5401_s19  ;;  %s4372_s22 = sld [smem:[#allocation9 + $0x64]]  ;;  %s8017_s19 = smov 126  }
  0x65   : > { %v605_v38 = vadd.f32 %v604_v0, %v601_v29  ;;  %v638_v52 = vadd.f32 %v636_v2, %v630_v39  ;;  %v865_v50 = vmul.f32 %v864_v4, %v5409_v9  ;;  %v879_v56 = vmul.f32 %v878_v46, %v5409_v9  ;;  %s4374_s8 = sld [smem:[#allocation9 + $0x2]] }
  0x66   : > { %829 = vrot.lane.b32.xlu1 %v824_v40, %s8019_s9  ;;  %815 = vrot.lane.b32.xlu0 %v810_v44, %s8019_s9  ;;  %v594_v33 = vadd.f32 %v592_v6, %v586_v22  ;;  %v631_v40 = vadd.f32 %v629_v1, %v623_v19  ;;  %v651_v44 = vstv %s5368_s29  ;;  %v660_v59 = vmul.f32 %v5177_v25, %v659_v48  ;;  %s4373_s29 = sld [smem:[#allocation9 + $0x88]] }
  0x67   : > { %843 = vrot.lane.b32.xlu2 %v838_v54, %s8019_s9  ;;  %vm607_vm6 = vcmp.ge.f32.partialorder %v605_v38, 0.0  ;;  %v609_v10 = vmul.f32 0.1, %v605_v38  ;;  %v652_v51 = vmul.f32 %v5168_v20, %v651_v44  ;;  %v653_v53 = vmul.f32 %v5171_v21, %v651_v44  ;;  %s4375_s17 = sld [smem:[#allocation9 + $0x26]] }
  0x68   : > { %v602_v47 = vadd.f32 %v600_v12, %v594_v33  ;;  %v639_v14 = vadd.f32 %v637_v36, %v631_v40  ;;  %v5417_v15 = vld [vmem:[#allocation2 + $0x2f] sm:$0xff]  ;;  %v646_v55 = vadd.f32 %v644_v37, %v638_v52  ;;  %v661_v49 = vmul.f32 %v5180_v26, %v659_v48  ;;  %s6808_s0 = sld [smem:[#allocation12 + $0x9]] }
  0x69   : > { %v611_v54 = vsel %vm607_vm6, %v605_v38, %v609_v10  ;;  %v866_v21 = vmul.f32 %v864_v4, %v5417_v15  ;;  %v668_v63 = vmul.f32 %v5192_v34, %v667_v60  ;;  %v669_v5 = vmul.f32 %v5195_v35, %v667_v60  ;;  %s6818_s3 = sld [smem:[#allocation12 + $0x7e]] }
  0x6a   : > { %v606_v45 = vadd.f32 %v604_v0, %v602_v47  ;;  %v613_v20 = vmul.f32 %v5254_v3, %v611_v54  ;;  %v647_v57 = vadd.f32 %v645_v7, %v639_v14  ;;  %v654_v58 = vadd.f32 %v652_v51, %v646_v55 }
  0x6b   : > { %v880_v6 = vmul.f32 %v878_v46, %v5417_v15  ;;  %v675_v12 = vstv %s5407_s1  ;;  %v892_v35 = vstv %s5419_s18  ;;  %v681_v18 = vstv %s5425_s2  ;;  %s4376_s1 = sld [smem:[#allocation9 + $0x4a]] }
  0x6c   : > { %vm608_vm7 = vcmp.ge.f32.partialorder %v606_v45, 0.0  ;;  %616 = vst.msk [vmem:[#allocation2 + $0x48] sm:$0xff] %vm461_vm3, %v613_v20  ;;  %v655_v62 = vadd.f32 %v653_v53, %v647_v57  ;;  %v662_v11 = vadd.f32 %v660_v59, %v654_v58  ;;  %v676_v25 = vmul.f32 %v5209_v42, %v675_v12  ;;  %s4377_s18 = sld [smem:[#allocation9 + $0x6e]] }
  0x6d   : > { %v677_v26 = vmul.f32 %v5212_v43, %v675_v12  ;;  %v906_v22 = vstv %s5429_s16  ;;  %v894_v42 = vmul.f32 %v892_v35, %v5417_v15  ;;  %v893_v43 = vmul.f32 %v892_v35, %v5409_v9  ;;  %s4378_s2 = sld [smem:[#allocation9 + $0xb]] }
  0x6e   : > { %857 = vrot.lane.b32.xlu1 %v852_v32, %s8019_s9  ;;  %855 = vrot.lane.b32.xlu0 %v5341_v30, %s8019_s9  ;;  %v610_v30 = vmul.f32 0.1, %v606_v45  ;;  %v663_v13 = vadd.f32 %v661_v49, %v655_v62  ;;  %v670_v16 = vadd.f32 %v668_v63, %v662_v11  ;;  %v907_v28 = vmul.f32 %v906_v22, %v5409_v9  ;;  %s4379_s16 = sld [smem:[#allocation9 + $0x2f]] }
  0x6f   : > { %869 = vrot.lane.b32.xlu2 %v865_v50, %s8019_s9  ;;  %v920_v32 = vstv %s4366_s13  ;;  %v908_v39 = vmul.f32 %v906_v22, %v5417_v15  ;;  %v934_v46 = vstv %s4367_s20  ;;  %v948_v47 = vstv %s4368_s23  ;;  %s4380_s13 = sld [smem:[#allocation9 + $0x53]] }
  0x70   : > { %v612_v61 = vsel %vm608_vm7, %v606_v45, %v610_v30  ;;  %v671_v34 = vadd.f32 %v669_v5, %v663_v13  ;;  %v678_v0 = vadd.f32 %v676_v25, %v670_v16  ;;  %v962_v10 = vstv %s4369_s14  ;;  %s4381_s20 = sld [smem:[#allocation9 + $0x77]] }
  0x71   : > { %v614_v8 = vmul.f32 %v5254_v3, %v612_v61  ;;  %v976_v53 = vstv %s4370_s15  ;;  %v990_v48 = vstv %s4371_s21  ;;  %v1004_v20 = vstv %s4372_s22  ;;  %s4382_s23 = sld [smem:[#allocation9 + $0x14]] }
  0x72   : > { %v679_v19 = vadd.f32 %v677_v26, %v671_v34  ;;  %v682_v24 = vadd.f32 %v681_v18, %v678_v0  ;;  %v1018_v58 = vstv %s4373_s29  ;;  %v1032_v60 = vstv %s4374_s8  ;;  %s4383_s14 = sld [smem:[#allocation9 + $0x38]] }
  0x73   : > { %617 = vst.msk [vmem:[#allocation2 + $0x50] sm:$0xff] %vm461_vm3, %v614_v8  ;;  %v5453_v2 = vld [vmem:[#allocation2 + $0x47] sm:$0xff]  ;;  %v1033_v61 = vmul.f32 %v1032_v60, %v5324_v17  ;;  %v1046_v62 = vstv %s4375_s17  ;;  %v1034_v5 = vmul.f32 %v1032_v60, %v5328_v23  ;;  %v1060_v8 = vstv %s4376_s1  ;;  %s4384_s15 = sld [smem:[#allocation9 + $0x5c]] }
  0x74   : > { %v683_v27 = vadd.f32 %v681_v18, %v679_v19  ;;  %vm684_vm8 = vcmp.ge.f32.partialorder %v682_v24, 0.0  ;;  %v686_v29 = vmul.f32 0.1, %v682_v24  ;;  %v921_v38 = vmul.f32 %v920_v32, %v5453_v2  ;;  %s4385_s21 = sld [smem:[#allocation9 + $0x80]] }
  0x75   : > { %v935_v4 = vmul.f32 %v934_v46, %v5453_v2  ;;  %v949_v7 = vmul.f32 %v948_v47, %v5453_v2  ;;  %v963_v52 = vmul.f32 %v962_v10, %v5453_v2  ;;  %v1047_v63 = vmul.f32 %v1046_v62, %v5324_v17  ;;  %s4386_s22 = sld [smem:[#allocation9 + $0x1d]] }
  0x76   : > { %883 = vrot.lane.b32.xlu1 %v879_v56, %s8019_s9  ;;  %871 = vrot.lane.b32.xlu0 %v866_v21, %s8019_s9  ;;  %vm685_vm9 = vcmp.ge.f32.partialorder %v683_v27, 0.0  ;;  %v687_v31 = vmul.f32 0.1, %v683_v27  ;;  %v688_v1 = vsel %vm684_vm8, %v682_v24, %v686_v29  ;;  %v1062_v12 = vmul.f32 %v1060_v8, %v5328_v23  ;;  %s4387_s29 = sld [smem:[#allocation9 + $0x41]] }
  0x77   : > { %885 = vrot.lane.b32.xlu2 %v880_v6, %s8019_s9  ;;  %v690_v36 = vmul.f32 %v5254_v3, %v688_v1  ;;  %v1048_v6 = vmul.f32 %v1046_v62, %v5328_v23  ;;  %v1061_v13 = vmul.f32 %v1060_v8, %v5324_v17  ;;  %v1074_v25 = vstv %s4377_s18  ;;  %s4388_s8 = sld [smem:[#allocation9 + $0x65]] }
  0x78   : > { %v689_v33 = vsel %vm685_vm9, %v683_v27, %v687_v31  ;;  %v1075_v26 = vmul.f32 %v1074_v25, %v5324_v17  ;;  %v1088_v16 = vstv %s4378_s2  ;;  %v1076_v0 = vmul.f32 %v1074_v25, %v5328_v23  ;;  %s4389_s17 = sld [smem:[#allocation9 + $0x89]] }
  0x79   : > { %v691_v37 = vmul.f32 %v5254_v3, %v689_v33  ;;  %693 = vst.msk [vmem:[#allocation2 + $0x68] sm:$0xff] %vm461_vm3, %v690_v36  ;;  %v1089_v35 = vmul.f32 %v1088_v16, %v5409_v9  ;;  %v1090_v18 = vmul.f32 %v1088_v16, %v5417_v15  ;;  %v1102_v17 = vstv %s4379_s16  ;;  %s4406_s1 = sld [smem:[#allocation9 + $0x4]] }
  0x7a   : > { %v5461_v40 = vld [vmem:[#allocation2 + $0x4f] sm:$0xff]  ;;  %v1104_v22 = vmul.f32 %v1102_v17, %v5417_v15  ;;  %v1130_v24 = vstv %s4381_s20  ;;  %v1144_v33 = vstv %s4382_s23  ;;  %s4407_s18 = sld [smem:[#allocation9 + $0x28]] }
  0x7b   : > { %694 = vst.msk [vmem:[#allocation2 + $0x70] sm:$0xff] %vm461_vm3, %v691_v37  ;;  %v922_v44 = vmul.f32 %v920_v32, %v5461_v40  ;;  %v936_v3 = vmul.f32 %v934_v46, %v5461_v40  ;;  %v950_v14 = vmul.f32 %v948_v47, %v5461_v40  ;;  %v964_v50 = vmul.f32 %v962_v10, %v5461_v40  ;;  %s4408_s2 = sld [smem:[#allocation9 + $0x4c]] }
  0x7c   : > { %v1131_v31 = vmul.f32 %v1130_v24, %v5409_v9  ;;  %v1132_v32 = vmul.f32 %v1130_v24, %v5417_v15  ;;  %v1172_v46 = vstv %s4384_s15  ;;  %s4409_s16 = sld [smem:[#allocation9 + $0x70]] }
  0x7d   : > { %s4411_s20 = sld [smem:[#allocation9 + $0x31]] }
  0x7e   : > { %899 = vrot.lane.b32.xlu1 %v894_v42, %s8019_s9  ;;  %897 = vrot.lane.b32.xlu0 %v893_v43, %s8019_s9  ;;  %v1103_v42 = vmul.f32 %v1102_v17, %v5409_v9  ;;  %v1116_v43 = vstv %s4380_s13  ;;  %s4410_s13 = sld [smem:[#allocation9 + $0xd]] }
  0x7f   : > { %911 = vrot.lane.b32.xlu2 %v907_v28, %s8019_s9  ;;  %v1117_v23 = vmul.f32 %v1116_v43, %v5409_v9  ;;  %v1118_v1 = vmul.f32 %v1116_v43, %v5417_v15  ;;  %v1146_v9 = vmul.f32 %v1144_v33, %v5461_v40  ;;  %s4412_s23 = sld [smem:[#allocation9 + $0x55]] }
  0x80   : > { %v5481_v54 = vld [vmem:[#allocation2 + $0x67] sm:$0xff]  ;;  %v1374_v17 = vstv %s4407_s18  ;;  %s4414_s15 = sld [smem:[#allocation9 + $0x16]] }
  0x81   : > { %v977_v55 = vmul.f32 %v976_v53, %v5481_v54  ;;  %v991_v56 = vmul.f32 %v990_v48, %v5481_v54  ;;  %v1005_v21 = vmul.f32 %v1004_v20, %v5481_v54  ;;  %v1019_v49 = vmul.f32 %v1018_v58, %v5481_v54  ;;  %s4421_s18 = sld [smem:[#allocation9 + $0x8b]] }
  0x82   : > { %v5479_v51 = vld [vmem:[#allocation2 + $0x6f] sm:$0xff]  ;;  %v1388_v24 = vstv %s4408_s2  ;;  %s4422_s2 = sld [smem:[#allocation9 + $0x5]] }
  0x83   : > { %v978_v45 = vmul.f32 %v976_v53, %v5479_v51  ;;  %v992_v30 = vmul.f32 %v990_v48, %v5479_v51  ;;  %v1006_v57 = vmul.f32 %v1004_v20, %v5479_v51  ;;  %v1020_v59 = vmul.f32 %v1018_v58, %v5479_v51 }
  0x86   : > { %925 = vrot.lane.b32.xlu1 %v921_v38, %s8019_s9  ;;  %913 = vrot.lane.b32.xlu0 %v908_v39, %s8019_s9  ;;  %v1145_v39 = vmul.f32 %v1144_v33, %v5453_v2 }
  0x87   : > { %927 = vrot.lane.b32.xlu2 %v922_v44, %s8019_s9  ;;  %v1158_v44 = vstv %s4383_s14  ;;  %s4413_s14 = sld [smem:[#allocation9 + $0x79]] }
  0x88   : > { %v1159_v15 = vmul.f32 %v1158_v44, %v5453_v2  ;;  %v1160_v10 = vmul.f32 %v1158_v44, %v5461_v40 }
  0x8e   : > { %941 = vrot.lane.b32.xlu1 %v936_v3, %s8019_s9  ;;  %939 = vrot.lane.b32.xlu0 %v935_v4, %s8019_s9 }
  0x8f   : > { %953 = vrot.lane.b32.xlu2 %v949_v7, %s8019_s9  ;;  %v1173_v7 = vmul.f32 %v1172_v46, %v5453_v2 }
  0x96   : > { %967 = vrot.lane.b32.xlu1 %v963_v52, %s8019_s9  ;;  %955 = vrot.lane.b32.xlu0 %v950_v14, %s8019_s9  ;;  %v1174_v52 = vmul.f32 %v1172_v46, %v5461_v40  ;;  %v1186_v14 = vstv %s4385_s21  ;;  %v5643_v46 = vld [vmem:[#allocation2 + $0x30] sm:$0xff]  ;;  %s4415_s21 = sld [smem:[#allocation9 + $0x3a]] }
  0x97   : > { %969 = vrot.lane.b32.xlu2 %v964_v50, %s8019_s9  ;;  %v1187_v48 = vmul.f32 %v1186_v14, %v5453_v2 }
  0x9e   : > { %983 = vrot.lane.b32.xlu1 %v978_v45, %s8019_s9  ;;  %981 = vrot.lane.b32.xlu0 %v977_v55, %s8019_s9  ;;  %v1188_v55 = vmul.f32 %v1186_v14, %v5461_v40 }
  0x9f   : > { %995 = vrot.lane.b32.xlu2 %v991_v56, %s8019_s9  ;;  %v1200_v56 = vstv %s4386_s22  ;;  %s4416_s22 = sld [smem:[#allocation9 + $0x5e]] }
  0xa0   : > { %v1201_v20 = vmul.f32 %v1200_v56, %v5481_v54  ;;  %v1202_v2 = vmul.f32 %v1200_v56, %v5479_v51 }
  0xa6   : > { %1009 = vrot.lane.b32.xlu1 %v1005_v21, %s8019_s9  ;;  %997 = vrot.lane.b32.xlu0 %v992_v30, %s8019_s9  ;;  %v1214_v21 = vstv %s4387_s29  ;;  %s4417_s29 = sld [smem:[#allocation9 + $0x82]] }
  0xa7   : > { %1011 = vrot.lane.b32.xlu2 %v1006_v57, %s8019_s9  ;;  %v1215_v40 = vmul.f32 %v1214_v21, %v5481_v54 }
  0xae   : > { %1025 = vrot.lane.b32.xlu1 %v1020_v59, %s8019_s9  ;;  %1023 = vrot.lane.b32.xlu0 %v1019_v49, %s8019_s9  ;;  %v1216_v59 = vmul.f32 %v1214_v21, %v5479_v51  ;;  %v1228_v49 = vstv %s4388_s8  ;;  %s4418_s8 = sld [smem:[#allocation9 + $0x1f]] }
  0xaf   : > { %1037 = vrot.lane.b32.xlu2 %v1033_v61, %s8017_s19 }
  0xb6   : > { %1051 = vrot.lane.b32.xlu1 %v1047_v63, %s8017_s19  ;;  %1039 = vrot.lane.b32.xlu0 %v1034_v5, %s8017_s19  ;;  %v1230_v63 = vmul.f32 %v1228_v49, %v5479_v51  ;;  %v1229_v5 = vmul.f32 %v1228_v49, %v5481_v54 }
  0xb7   : > { %1053 = vrot.lane.b32.xlu2 %v1048_v6, %s8017_s19  ;;  %v1242_v6 = vstv %s4389_s17  ;;  %s4419_s17 = sld [smem:[#allocation9 + $0x43]] }
  0xb8   : > { %v1243_v8 = vmul.f32 %v1242_v6, %v5481_v54  ;;  %v1244_v54 = vmul.f32 %v1242_v6, %v5479_v51 }
  0xb9   : > { %v5508_v11 = vpop.permute.xlu2 %841 }
  0xbe   : > { %1067 = vrot.lane.b32.xlu1 %v1062_v12, %s8017_s19  ;;  %1065 = vrot.lane.b32.xlu0 %v1061_v13, %s8017_s19  ;;  %v5603_v12 = vld [vmem:[#allocation2 + $0x8] sm:$0xff]  ;;  %v1360_v13 = vstv %s4406_s1  ;;  %s4420_s1 = sld [smem:[#allocation9 + $0x67]] }
  0xbf   : > { %1079 = vrot.lane.b32.xlu2 %v1075_v26, %s8017_s19 }
  0xc1   : > { %v5516_v34 = vpop.permute.xlu2 %843 }
  0xc6   : > { %1093 = vrot.lane.b32.xlu1 %v1089_v35, %s8017_s19  ;;  %1081 = vrot.lane.b32.xlu0 %v1076_v0, %s8017_s19  ;;  %v1361_v35 = vmul.f32 %v1360_v13, %v5603_v12  ;;  %v5614_v0 = vld [vmem:[#allocation2 + $0x10] sm:$0xff] }
  0xc7   : > { %1095 = vrot.lane.b32.xlu2 %v1090_v18, %s8017_s19  ;;  %v1362_v18 = vmul.f32 %v1360_v13, %v5614_v0  ;;  %v1376_v51 = vmul.f32 %v1374_v17, %v5614_v0  ;;  %v1390_v44 = vmul.f32 %v1388_v24, %v5614_v0 }
  0xc9   : > { %v5524_v19 = vpop.permute.xlu2 %869 }
  0xce   : > { %1109 = vrot.lane.b32.xlu1 %v1104_v22, %s8017_s19  ;;  %1107 = vrot.lane.b32.xlu0 %v1103_v42, %s8017_s19 }
  0xcf   : > { %1121 = vrot.lane.b32.xlu2 %v1117_v23, %s8017_s19  ;;  %v1375_v23 = vmul.f32 %v1374_v17, %v5603_v12 }
  0xd0   : > { %v5532_v27 = vpop.permute.xlu1 %827  ;;  %v5534_v28 = vpop.permute.xlu0 %813 }
  0xd1   : > { %v5536_v29 = vpop.permute.xlu2 %885 }
  0xd6   : > { %1135 = vrot.lane.b32.xlu1 %v1131_v31, %s8017_s19  ;;  %1123 = vrot.lane.b32.xlu0 %v1118_v1, %s8017_s19  ;;  %v1389_v31 = vmul.f32 %v1388_v24, %v5603_v12  ;;  %v1402_v1 = vstv %s4409_s16  ;;  %s4423_s16 = sld [smem:[#allocation9 + $0x29]] }
  0xd7   : > { %1137 = vrot.lane.b32.xlu2 %v1132_v32, %s8017_s19 }
  0xd8   : > { %v5544_v36 = vpop.permute.xlu1 %829  ;;  %v5546_v37 = vpop.permute.xlu0 %815 }
  0xd9   : > { %v5548_v38 = vpop.permute.xlu2 %911 }
  0xde   : > { %1151 = vrot.lane.b32.xlu1 %v1146_v9, %s8017_s19  ;;  %1149 = vrot.lane.b32.xlu0 %v1145_v39, %s8017_s19  ;;  %v1403_v39 = vmul.f32 %v1402_v1, %v5603_v12 }
  0xdf   : > { %1163 = vrot.lane.b32.xlu2 %v1159_v15, %s8017_s19  ;;  %v1404_v15 = vmul.f32 %v1402_v1, %v5614_v0  ;;  %v5685_v1 = vld [vmem:[#allocation2 + $0x50] sm:$0xff] }
  0xe0   : > { %v5556_v3 = vpop.permute.xlu1 %857  ;;  %v5558_v4 = vpop.permute.xlu0 %855 }
  0xe1   : > { %v5560_v47 = vpop.permute.xlu2 %927 }
  0xe6   : > { %1177 = vrot.lane.b32.xlu1 %v1173_v7, %s8017_s19  ;;  %1165 = vrot.lane.b32.xlu0 %v1160_v10, %s8017_s19  ;;  %v1416_v7 = vstv %s4410_s13  ;;  %v5645_v10 = vld [vmem:[#allocation2 + $0x28] sm:$0xff]  ;;  %s4424_s13 = sld [smem:[#allocation9 + $0x4d]] }
  0xe7   : > { %1179 = vrot.lane.b32.xlu2 %v1174_v52, %s8017_s19  ;;  %v1417_v56 = vmul.f32 %v1416_v7, %v5645_v10 }
  0xe8   : > { %v5568_v50 = vpop.permute.xlu1 %883  ;;  %v5570_v53 = vpop.permute.xlu0 %871 }
  0xe9   : > { %v5572_v45 = vpop.permute.xlu2 %953 }
  0xee   : > { %1193 = vrot.lane.b32.xlu1 %v1188_v55, %s8017_s19  ;;  %1191 = vrot.lane.b32.xlu0 %v1187_v48, %s8017_s19  ;;  %v1418_v48 = vmul.f32 %v1416_v7, %v5643_v46 }
  0xef   : > { %1205 = vrot.lane.b32.xlu2 %v1201_v20, %s8017_s19  ;;  %v1430_v20 = vstv %s4411_s20  ;;  %s4425_s20 = sld [smem:[#allocation9 + $0x71]] }
  0xf0   : > { %v5580_v30 = vpop.permute.xlu1 %899  ;;  %v5582_v57 = vpop.permute.xlu0 %897  ;;  %v1431_v21 = vmul.f32 %v1430_v20, %v5645_v10 }
  0xf1   : > { %8038 = vst [vmem:[#allocation22_spill] sm:$0xff] %v5580_v30  ;;  %v5584_v58 = vpop.permute.xlu2 %969 }
  0xf2   : > { %8039 = vst [vmem:[#allocation23_spill] sm:$0xff] %v5584_v58 }
  0xf6   : > { %1219 = vrot.lane.b32.xlu1 %v1215_v40, %s8017_s19  ;;  %1207 = vrot.lane.b32.xlu0 %v1202_v2, %s8017_s19  ;;  %v1444_v40 = vstv %s4412_s23  ;;  %s4426_s23 = sld [smem:[#allocation9 + $0xe]] }
  0xf7   : > { %1221 = vrot.lane.b32.xlu2 %v1216_v59, %s8017_s19  ;;  %v1446_v6 = vmul.f32 %v1444_v40, %v5643_v46 }
  0xf8   : > { %v5592_v60 = vpop.permute.xlu1 %925  ;;  %v5594_v61 = vpop.permute.xlu0 %913 }
  0xf9   : > { %8040 = vst [vmem:[#allocation24_spill] sm:$0xff] %v5592_v60  ;;  %v5596_v62 = vpop.permute.xlu2 %995 }
  0xfa   : > { %8041 = vst [vmem:[#allocation25_spill] sm:$0xff] %v5594_v61 }
  0xfb   : > { %8042 = vst [vmem:[#allocation26_spill] sm:$0xff] %v5596_v62 }
  0xfe   : > { %1235 = vrot.lane.b32.xlu1 %v1230_v63, %s8017_s19  ;;  %1233 = vrot.lane.b32.xlu0 %v1229_v5, %s8017_s19  ;;  %v1445_v63 = vmul.f32 %v1444_v40, %v5645_v10  ;;  %v1432_v5 = vmul.f32 %v1430_v20, %v5643_v46  ;;  %v1500_v20 = vstv %s4416_s22  ;;  %s4430_s22 = sld [smem:[#allocation9 + $0x17]] }
  0xff   : > { %1247 = vrot.lane.b32.xlu2 %v1243_v8, %s8017_s19  ;;  %v1458_v8 = vstv %s4413_s14  ;;  %s4427_s14 = sld [smem:[#allocation9 + $0x32]] }
 0x100   : > { %v5606_v25 = vpop.permute.xlu1 %941  ;;  %v5608_v26 = vpop.permute.xlu0 %939  ;;  %v1459_v17 = vmul.f32 %v1458_v8, %v5645_v10 }
 0x101   : > { %8043 = vst [vmem:[#allocation27_spill] sm:$0xff] %v5606_v25  ;;  %v5610_v16 = vpop.permute.xlu2 %1011 }
 0x102   : > { %8044 = vst [vmem:[#allocation28_spill] sm:$0xff] %v5608_v26 }
 0x103   : > { %8045 = vst [vmem:[#allocation29_spill] sm:$0xff] %v5610_v16 }
 0x106   : > { %1365 = vrot.lane.b32.xlu1 %v1361_v35, %s8019_s9  ;;  %1249 = vrot.lane.b32.xlu0 %v1244_v54, %s8017_s19 }
 0x107   : > { %1367 = vrot.lane.b32.xlu2 %v1362_v18, %s8019_s9  ;;  %v1460_v18 = vmul.f32 %v1458_v8, %v5643_v46  ;;  %v1514_v8 = vstv %s4417_s29  ;;  %s4431_s29 = sld [smem:[#allocation9 + $0x3b]] }
 0x108   : > { %v5620_v22 = vpop.permute.xlu1 %967  ;;  %v5622_v42 = vpop.permute.xlu0 %955 }
 0x109   : > { %8046 = vst [vmem:[#allocation30_spill] sm:$0xff] %v5620_v22  ;;  %v5624_v43 = vpop.permute.xlu2 %1037 }
 0x10a   : > { %8047 = vst [vmem:[#allocation31_spill] sm:$0xff] %v5622_v42 }
 0x10b   : > { %8048 = vst [vmem:[#allocation32_spill] sm:$0xff] %v5624_v43 }
 0x10e   : > { %1381 = vrot.lane.b32.xlu1 %v1376_v51, %s8019_s9  ;;  %1379 = vrot.lane.b32.xlu0 %v1375_v23, %s8019_s9  ;;  %v5680_v51 = vld [vmem:[#allocation2 + $0x48] sm:$0xff]  ;;  %v1472_v23 = vstv %s4414_s15  ;;  %s4428_s15 = sld [smem:[#allocation9 + $0x56]] }
 0x10f   : > { %1393 = vrot.lane.b32.xlu2 %v1389_v31, %s8019_s9  ;;  %v1473_v24 = vmul.f32 %v1472_v23, %v5680_v51  ;;  %v1486_v31 = vstv %s4415_s21  ;;  %s4429_s21 = sld [smem:[#allocation9 + $0x7a]] }
 0x110   : > { %v5632_v32 = vpop.permute.xlu1 %983  ;;  %v5634_v33 = vpop.permute.xlu0 %981  ;;  %v1487_v7 = vmul.f32 %v1486_v31, %v5680_v51 }
 0x111   : > { %8049 = vst [vmem:[#allocation33_spill] sm:$0xff] %v5634_v33  ;;  %v5636_v9 = vpop.permute.xlu2 %1053 }
 0x112   : > { %8050 = vst [vmem:[#allocation34_spill] sm:$0xff] %v5636_v9 }
 0x116   : > { %1407 = vrot.lane.b32.xlu1 %v1403_v39, %s8019_s9  ;;  %1395 = vrot.lane.b32.xlu0 %v1390_v44, %s8019_s9 }
 0x117   : > { %1409 = vrot.lane.b32.xlu2 %v1404_v15, %s8019_s9 }
 0x118   : > { %v5648_v52 = vpop.permute.xlu1 %1009  ;;  %v5650_v14 = vpop.permute.xlu0 %997 }
 0x119   : > { %8051 = vst [vmem:[#allocation35_spill] sm:$0xff] %v5648_v52  ;;  %v5652_v55 = vpop.permute.xlu2 %1079 }
 0x11a   : > { %8052 = vst [vmem:[#allocation36_spill] sm:$0xff] %v5650_v14 }
 0x11b   : > { %8053 = vst [vmem:[#allocation37_spill] sm:$0xff] %v5652_v55 }
 0x11e   : > { %1423 = vrot.lane.b32.xlu1 %v1418_v48, %s8019_s9  ;;  %1421 = vrot.lane.b32.xlu0 %v1417_v56, %s8019_s9  ;;  %v1474_v48 = vmul.f32 %v1472_v23, %v5685_v1  ;;  %v1488_v56 = vmul.f32 %v1486_v31, %v5685_v1  ;;  %v1528_v23 = vstv %s4418_s8  ;;  %s4432_s8 = sld [smem:[#allocation9 + $0x5f]] }
 0x11f   : > { %1435 = vrot.lane.b32.xlu2 %v1431_v21, %s8019_s9 }
 0x120   : > { %v5660_v2 = vpop.permute.xlu1 %1025  ;;  %v5662_v59 = vpop.permute.xlu0 %1023 }
 0x121   : > { %8054 = vst [vmem:[#allocation38_spill] sm:$0xff] %v5660_v2  ;;  %v5664_v49 = vpop.permute.xlu2 %1095  ;;  %v6181_v2 = vld [vmem:[#allocation2 + $0x6f] sm:$0xff] }
 0x122   : > { %8055 = vst [vmem:[#allocation39_spill] sm:$0xff] %v5662_v59 }
 0x126   : > { %1449 = vrot.lane.b32.xlu1 %v1445_v63, %s8019_s9  ;;  %1437 = vrot.lane.b32.xlu0 %v1432_v5, %s8019_s9  ;;  %v1502_v5 = vmul.f32 %v1500_v20, %v5685_v1 }
 0x127   : > { %1451 = vrot.lane.b32.xlu2 %v1446_v6, %s8019_s9  ;;  %v1501_v6 = vmul.f32 %v1500_v20, %v5680_v51  ;;  %v5722_v20 = vld [vmem:[#allocation2 + $0x70] sm:$0xff] }
 0x128   : > { %v5672_v13 = vpop.permute.xlu1 %1051  ;;  %v5674_v35 = vpop.permute.xlu0 %1039 }
 0x129   : > { %8056 = vst [vmem:[#allocation40_spill] sm:$0xff] %v5672_v13  ;;  %v5676_v54 = vpop.permute.xlu2 %1121 }
 0x12a   : > { %8057 = vst [vmem:[#allocation41_spill] sm:$0xff] %v5676_v54 }
 0x12e   : > { %1465 = vrot.lane.b32.xlu1 %v1460_v18, %s8019_s9  ;;  %1463 = vrot.lane.b32.xlu0 %v1459_v17, %s8019_s9  ;;  %v1515_v18 = vmul.f32 %v1514_v8, %v5680_v51  ;;  %v5711_v17 = vld [vmem:[#allocation2 + $0x68] sm:$0xff] }
 0x12f   : > { %1477 = vrot.lane.b32.xlu2 %v1473_v24, %s8019_s9 }
 0x130   : > { %v5688_v39 = vpop.permute.xlu1 %1067  ;;  %v5690_v44 = vpop.permute.xlu0 %1065 }
 0x131   : > { %8058 = vst [vmem:[#allocation42_spill] sm:$0xff] %v5688_v39  ;;  %v5692_v15 = vpop.permute.xlu2 %1137 }
 0x132   : > { %8059 = vst [vmem:[#allocation43_spill] sm:$0xff] %v5690_v44 }
 0x133   : > { %8060 = vst [vmem:[#allocation44_spill] sm:$0xff] %v5692_v15  ;;  %v1598_v15 = vstv %s4423_s16  ;;  %s4437_s16 = sld [smem:[#allocation9 + $0x8c]] }
 0x136   : > { %1491 = vrot.lane.b32.xlu1 %v1487_v7, %s8019_s9  ;;  %1479 = vrot.lane.b32.xlu0 %v1474_v48, %s8019_s9  ;;  %v1529_v48 = vmul.f32 %v1528_v23, %v5711_v17 }
 0x137   : > { %1493 = vrot.lane.b32.xlu2 %v1488_v56, %s8019_s9  ;;  %v1516_v56 = vmul.f32 %v1514_v8, %v5685_v1 }
 0x138   : > { %v5700_v21 = vpop.permute.xlu1 %1093  ;;  %v5702_v40 = vpop.permute.xlu0 %1081 }
 0x139   : > { %8061 = vst [vmem:[#allocation45_spill] sm:$0xff] %v5700_v21  ;;  %v5704_v63 = vpop.permute.xlu2 %1163 }
 0x13a   : > { %8062 = vst [vmem:[#allocation46_spill] sm:$0xff] %v5702_v40  ;;  %v4756_v40 = vld [vmem:[#allocation2 + $0x27] sm:$0xff] }
 0x13b   : > { %8063 = vst [vmem:[#allocation47_spill] sm:$0xff] %v5704_v63 }
 0x13e   : > { %1507 = vrot.lane.b32.xlu1 %v1502_v5, %s8019_s9  ;;  %1505 = vrot.lane.b32.xlu0 %v1501_v6, %s8019_s9  ;;  %v1530_v5 = vmul.f32 %v1528_v23, %v5722_v20  ;;  %v1542_v6 = vstv %s4419_s17  ;;  %s4433_s17 = sld [smem:[#allocation9 + $0x83]] }
 0x13f   : > { %1519 = vrot.lane.b32.xlu2 %v1515_v18, %s8019_s9  ;;  %v1544_v8 = vmul.f32 %v1542_v6, %v5722_v20  ;;  %v1543_v63 = vmul.f32 %v1542_v6, %v5711_v17 }
 0x140   : > { %v5714_v24 = vpop.permute.xlu1 %1109  ;;  %v5716_v31 = vpop.permute.xlu0 %1107 }
 0x141   : > { %8064 = vst [vmem:[#allocation48_spill] sm:$0xff] %v5714_v24  ;;  %v5718_v7 = vpop.permute.xlu2 %1179 }
 0x142   : > { %8065 = vst [vmem:[#allocation49_spill] sm:$0xff] %v5716_v31  ;;  %v1556_v31 = vstv %s4420_s1  ;;  %s4434_s1 = sld [smem:[#allocation9 + $0x20]] }
 0x143   : > { %8066 = vst [vmem:[#allocation50_spill] sm:$0xff] %v5718_v7  ;;  %v1557_v23 = vmul.f32 %v1556_v31, %v5711_v17  ;;  %v1558_v6 = vmul.f32 %v1556_v31, %v5722_v20 }
 0x146   : > { %1533 = vrot.lane.b32.xlu1 %v1529_v48, %s8019_s9  ;;  %1521 = vrot.lane.b32.xlu0 %v1516_v56, %s8019_s9  ;;  %v1570_v48 = vstv %s4421_s18  ;;  %s4435_s18 = sld [smem:[#allocation9 + $0x44]] }
 0x147   : > { %1535 = vrot.lane.b32.xlu2 %v1530_v5, %s8019_s9 }
 0x148   : > { %v5728_v18 = vpop.permute.xlu1 %1135  ;;  %v5730_v41 = vpop.permute.xlu0 %1123 }
 0x149   : > { %8067 = vst [vmem:[#allocation51_spill] sm:$0xff] %v5728_v18  ;;  %v5732_v7 = vpop.permute.xlu2 %1205  ;;  %v1572_v18 = vmul.f32 %v1570_v48, %v5722_v20 }
 0x14a   : > { %8068 = vst [vmem:[#allocation52_spill] sm:$0xff] %v5730_v41 }
 0x14b   : > { %8069 = vst [vmem:[#allocation53_spill] sm:$0xff] %v5732_v7  ;;  %v1571_v7 = vmul.f32 %v1570_v48, %v5711_v17  ;;  %v1599_v48 = vmul.f32 %v1598_v15, %v5603_v12 }
 0x14e   : > { %1549 = vrot.lane.b32.xlu1 %v1544_v8, %s8019_s9  ;;  %1547 = vrot.lane.b32.xlu0 %v1543_v63, %s8019_s9  ;;  %v1584_v63 = vstv %s4422_s2  ;;  %s4436_s2 = sld [smem:[#allocation9 + $0x68]] }
 0x14f   : > { %1561 = vrot.lane.b32.xlu2 %v1557_v23, %s8019_s9  ;;  %v1586_v24 = vmul.f32 %v1584_v63, %v5614_v0  ;;  %v1585_v31 = vmul.f32 %v1584_v63, %v5603_v12  ;;  %v1600_v63 = vmul.f32 %v1598_v15, %v5614_v0 }
 0x150   : > { %v5740_v56 = vpop.permute.xlu1 %1151  ;;  %v5742_v5 = vpop.permute.xlu0 %1149 }
 0x151   : > { %8070 = vst [vmem:[#allocation54_spill] sm:$0xff] %v5740_v56  ;;  %v5744_v41 = vpop.permute.xlu2 %1221 }
 0x152   : > { %8071 = vst [vmem:[#allocation55_spill] sm:$0xff] %v5742_v5 }
 0x153   : > { %8072 = vst [vmem:[#allocation56_spill] sm:$0xff] %v5744_v41 }
 0x156   : > { %1575 = vrot.lane.b32.xlu1 %v1571_v7, %s8019_s9  ;;  %1563 = vrot.lane.b32.xlu0 %v1558_v6, %s8019_s9  ;;  %v1612_v7 = vstv %s4424_s13  ;;  %s4454_s13 = sld [smem:[#allocation9 + $0x7]] }
 0x157   : > { %1577 = vrot.lane.b32.xlu2 %v1572_v18, %s8019_s9  ;;  %v1614_v5 = vmul.f32 %v1612_v7, %v5614_v0 }
 0x158   : > { %v5752_v8 = vpop.permute.xlu1 %1177  ;;  %v5754_v23 = vpop.permute.xlu0 %1165 }
 0x159   : > { %8073 = vst [vmem:[#allocation57_spill] sm:$0xff] %v5752_v8  ;;  %v5756_v41 = vpop.permute.xlu2 %1247 }
 0x15a   : > { %8074 = vst [vmem:[#allocation58_spill] sm:$0xff] %v5754_v23  ;;  %v1613_v23 = vmul.f32 %v1612_v7, %v5603_v12 }
 0x15b   : > { %8075 = vst [vmem:[#allocation59_spill] sm:$0xff] %v5756_v41 }
 0x15e   : > { %1591 = vrot.lane.b32.xlu1 %v1586_v24, %s8017_s19  ;;  %1589 = vrot.lane.b32.xlu0 %v1585_v31, %s8017_s19  ;;  %v1626_v24 = vstv %s4425_s20  ;;  %s4455_s20 = sld [smem:[#allocation9 + $0x2b]] }
 0x15f   : > { %1603 = vrot.lane.b32.xlu2 %v1599_v48, %s8017_s19  ;;  %v1627_v15 = vmul.f32 %v1626_v24, %v5603_v12 }
 0x160   : > { %v5764_v18 = vpop.permute.xlu1 %1193  ;;  %v5766_v6 = vpop.permute.xlu0 %1191 }
 0x161   : > { %8076 = vst [vmem:[#allocation60_spill] sm:$0xff] %v5764_v18  ;;  %v5768_v41 = vpop.permute.xlu2 %1367  ;;  %v1640_v18 = vstv %s4426_s23  ;;  %s4456_s23 = sld [smem:[#allocation9 + $0x4f]] }
 0x162   : > { %8077 = vst [vmem:[#allocation61_spill] sm:$0xff] %v5766_v6  ;;  %v1628_v6 = vmul.f32 %v1626_v24, %v5614_v0  ;;  %v1641_v7 = vmul.f32 %v1640_v18, %v5645_v10  ;;  %v1642_v12 = vmul.f32 %v1640_v18, %v5643_v46 }
 0x163   : > { %8078 = vst [vmem:[#allocation62_spill] sm:$0xff] %v5768_v41 }
 0x166   : > { %1617 = vrot.lane.b32.xlu1 %v1613_v23, %s8017_s19  ;;  %1605 = vrot.lane.b32.xlu0 %v1600_v63, %s8017_s19  ;;  %v1654_v23 = vstv %s4427_s14  ;;  %s4457_s14 = sld [smem:[#allocation9 + $0x73]] }
 0x167   : > { %1619 = vrot.lane.b32.xlu2 %v1614_v5, %s8017_s19  ;;  %v1655_v0 = vmul.f32 %v1654_v23, %v5645_v10  ;;  %v1656_v24 = vmul.f32 %v1654_v23, %v5643_v46 }
 0x168   : > { %v5776_v31 = vpop.permute.xlu1 %1219  ;;  %v5778_v48 = vpop.permute.xlu0 %1207 }
 0x169   : > { %8079 = vst [vmem:[#allocation63_spill] sm:$0xff] %v5776_v31  ;;  %v5780_v41 = vpop.permute.xlu2 %1393  ;;  %v1682_v31 = vstv %s4429_s21  ;;  %s4459_s21 = sld [smem:[#allocation9 + $0x34]] }
 0x16a   : > { %8080 = vst [vmem:[#allocation64_spill] sm:$0xff] %v5778_v48  ;;  %v1683_v23 = vmul.f32 %v1682_v31, %v5645_v10 }
 0x16b   : > { %8081 = vst [vmem:[#allocation65_spill] sm:$0xff] %v5780_v41 }
 0x16e   : > { %1633 = vrot.lane.b32.xlu1 %v1628_v6, %s8017_s19  ;;  %1631 = vrot.lane.b32.xlu0 %v1627_v15, %s8017_s19  ;;  %v1668_v6 = vstv %s4428_s15  ;;  %s4458_s15 = sld [smem:[#allocation9 + $0x10]] }
 0x16f   : > { %1645 = vrot.lane.b32.xlu2 %v1641_v7, %s8017_s19  ;;  %v1669_v18 = vmul.f32 %v1668_v6, %v5645_v10 }
 0x170   : > { %v5788_v5 = vpop.permute.xlu1 %1235  ;;  %v5790_v63 = vpop.permute.xlu0 %1233 }
 0x171   : > { %8082 = vst [vmem:[#allocation66_spill] sm:$0xff] %v5788_v5  ;;  %v5792_v41 = vpop.permute.xlu2 %1409  ;;  %v1670_v5 = vmul.f32 %v1668_v6, %v5643_v46  ;;  %v1684_v6 = vmul.f32 %v1682_v31, %v5643_v46  ;;  %v1724_v31 = vstv %s4432_s8  ;;  %s4462_s8 = sld [smem:[#allocation9 + $0x19]] }
 0x172   : > { %8083 = vst [vmem:[#allocation67_spill] sm:$0xff] %v5790_v63 }
 0x173   : > { %8084 = vst [vmem:[#allocation68_spill] sm:$0xff] %v5792_v41 }
 0x176   : > { %1659 = vrot.lane.b32.xlu1 %v1655_v0, %s8017_s19  ;;  %1647 = vrot.lane.b32.xlu0 %v1642_v12, %s8017_s19  ;;  %v1696_v0 = vstv %s4430_s22  ;;  %s4460_s22 = sld [smem:[#allocation9 + $0x58]] }
 0x177   : > { %1661 = vrot.lane.b32.xlu2 %v1656_v24, %s8017_s19  ;;  %v1698_v10 = vmul.f32 %v1696_v0, %v5685_v1 }
 0x178   : > { %v5800_v15 = vpop.permute.xlu1 %1365  ;;  %v5802_v7 = vpop.permute.xlu0 %1249 }
 0x179   : > { %8085 = vst [vmem:[#allocation69_spill] sm:$0xff] %v5800_v15  ;;  %v5804_v41 = vpop.permute.xlu2 %1435  ;;  %v1697_v15 = vmul.f32 %v1696_v0, %v5680_v51  ;;  %v1725_v0 = vmul.f32 %v1724_v31, %v5680_v51 }
 0x17a   : > { %8086 = vst [vmem:[#allocation70_spill] sm:$0xff] %v5802_v7 }
 0x17b   : > { %8087 = vst [vmem:[#allocation71_spill] sm:$0xff] %v5804_v41 }
 0x17e   : > { %1675 = vrot.lane.b32.xlu1 %v1670_v5, %s8017_s19  ;;  %1673 = vrot.lane.b32.xlu0 %v1669_v18, %s8017_s19  ;;  %v1710_v5 = vstv %s4431_s29  ;;  %s4461_s29 = sld [smem:[#allocation9 + $0x7c]] }
 0x17f   : > { %1687 = vrot.lane.b32.xlu2 %v1683_v23, %s8017_s19  ;;  %v1711_v46 = vmul.f32 %v1710_v5, %v5680_v51 }
 0x180   : > { %v5812_v12 = vpop.permute.xlu1 %1381  ;;  %v5814_v24 = vpop.permute.xlu0 %1379 }
 0x181   : > { %8088 = vst [vmem:[#allocation72_spill] sm:$0xff] %v5812_v12  ;;  %v5816_v41 = vpop.permute.xlu2 %1451  ;;  %v1766_v12 = vstv %s4435_s18  ;;  %s4465_s18 = sld [smem:[#allocation9 + $0x85]] }
 0x182   : > { %8089 = vst [vmem:[#allocation73_spill] sm:$0xff] %v5814_v24  ;;  %v1712_v24 = vmul.f32 %v1710_v5, %v5685_v1  ;;  %v1726_v5 = vmul.f32 %v1724_v31, %v5685_v1 }
 0x183   : > { %8090 = vst [vmem:[#allocation74_spill] sm:$0xff] %v5816_v41 }
 0x186   : > { %1701 = vrot.lane.b32.xlu1 %v1697_v15, %s8017_s19  ;;  %1689 = vrot.lane.b32.xlu0 %v1684_v6, %s8017_s19  ;;  %v1738_v15 = vstv %s4433_s17  ;;  %s4463_s17 = sld [smem:[#allocation9 + $0x3d]] }
 0x187   : > { %1703 = vrot.lane.b32.xlu2 %v1698_v10, %s8017_s19 }
 0x188   : > { %v5824_v18 = vpop.permute.xlu1 %1407  ;;  %v5826_v23 = vpop.permute.xlu0 %1395 }
 0x189   : > { %8091 = vst [vmem:[#allocation75_spill] sm:$0xff] %v5824_v18  ;;  %v5828_v41 = vpop.permute.xlu2 %1477  ;;  %v1740_v18 = vmul.f32 %v1738_v15, %v5685_v1  ;;  %v1767_v1 = vmul.f32 %v1766_v12, %v5711_v17 }
 0x18a   : > { %8092 = vst [vmem:[#allocation76_spill] sm:$0xff] %v5826_v23 }
 0x18b   : > { %8093 = vst [vmem:[#allocation77_spill] sm:$0xff] %v5828_v41  ;;  %v1739_v41 = vmul.f32 %v1738_v15, %v5680_v51 }
 0x18e   : > { %1717 = vrot.lane.b32.xlu1 %v1712_v24, %s8017_s19  ;;  %1715 = vrot.lane.b32.xlu0 %v1711_v46, %s8017_s19  ;;  %v1752_v24 = vstv %s4434_s1  ;;  %s4464_s1 = sld [smem:[#allocation9 + $0x61]] }
 0x18f   : > { %1729 = vrot.lane.b32.xlu2 %v1725_v0, %s8017_s19  ;;  %v1754_v51 = vmul.f32 %v1752_v24, %v5722_v20  ;;  %v1753_v31 = vmul.f32 %v1752_v24, %v5711_v17  ;;  %v1768_v24 = vmul.f32 %v1766_v12, %v5722_v20 }
 0x190   : > { %v5836_v6 = vpop.permute.xlu1 %1423  ;;  %v5838_v10 = vpop.permute.xlu0 %1421 }
 0x191   : > { %8094 = vst [vmem:[#allocation78_spill] sm:$0xff] %v5836_v6  ;;  %v5840_v23 = vpop.permute.xlu2 %1493 }
 0x192   : > { %8095 = vst [vmem:[#allocation79_spill] sm:$0xff] %v5838_v10  ;;  %v5880_v10 = vld [vmem:[#allocation2 + $0x9] sm:$0xff] }
 0x193   : > { %8096 = vst [vmem:[#allocation80_spill] sm:$0xff] %v5840_v23 }
 0x194   : > { %v2052_v6 = vstv %s4464_s1  ;;  %s4478_s1 = sld [smem:[#allocation9 + $0x1a]] }
 0x196   : > { %1743 = vrot.lane.b32.xlu1 %v1739_v41, %s8017_s19  ;;  %1731 = vrot.lane.b32.xlu0 %v1726_v5, %s8017_s19  ;;  %v1780_v41 = vstv %s4436_s2  ;;  %s4466_s2 = sld [smem:[#allocation9 + $0x22]] }
 0x197   : > { %1745 = vrot.lane.b32.xlu2 %v1740_v18, %s8017_s19 }
 0x198   : > { %v5848_v46 = vpop.permute.xlu1 %1449  ;;  %v5850_v0 = vpop.permute.xlu0 %1437 }
 0x199   : > { %8097 = vst [vmem:[#allocation81_spill] sm:$0xff] %v5848_v46  ;;  %v5852_v23 = vpop.permute.xlu2 %1519  ;;  %v1954_v46 = vstv %s4457_s14  ;;  %s4471_s14 = sld [smem:[#allocation9 + $0x2c]] }
 0x19a   : > { %8098 = vst [vmem:[#allocation82_spill] sm:$0xff] %v5850_v0  ;;  %v1782_v0 = vmul.f32 %v1780_v41, %v5722_v20 }
 0x19b   : > { %8099 = vst [vmem:[#allocation83_spill] sm:$0xff] %v5852_v23  ;;  %v1781_v23 = vmul.f32 %v1780_v41, %v5711_v17  ;;  %v1912_v41 = vstv %s4454_s13  ;;  %s4468_s13 = sld [smem:[#allocation9 + $0x6a]] }
 0x19e   : > { %1759 = vrot.lane.b32.xlu1 %v1754_v51, %s8017_s19  ;;  %1757 = vrot.lane.b32.xlu0 %v1753_v31, %s8017_s19  ;;  %v1794_v51 = vstv %s4437_s16  ;;  %s4467_s16 = sld [smem:[#allocation9 + $0x46]] }
 0x19f   : > { %1771 = vrot.lane.b32.xlu2 %v1767_v1, %s8017_s19  ;;  %v1795_v12 = vmul.f32 %v1794_v51, %v5711_v17 }
 0x1a0   : > { %v5860_v18 = vpop.permute.xlu1 %1465  ;;  %v5862_v15 = vpop.permute.xlu0 %1463 }
 0x1a1   : > { %8100 = vst [vmem:[#allocation84_spill] sm:$0xff] %v5860_v18  ;;  %v5864_v5 = vpop.permute.xlu2 %1535  ;;  %v1796_v18 = vmul.f32 %v1794_v51, %v5722_v20 }
 0x1a2   : > { %8101 = vst [vmem:[#allocation85_spill] sm:$0xff] %v5862_v15 }
 0x1a3   : > { %8102 = vst [vmem:[#allocation86_spill] sm:$0xff] %v5864_v5  ;;  %v5922_v5 = vld [vmem:[#allocation2 + $0x31] sm:$0xff] }
 0x1a6   : > { %1785 = vrot.lane.b32.xlu1 %v1781_v23, %s8017_s19  ;;  %1773 = vrot.lane.b32.xlu0 %v1768_v24, %s8017_s19  ;;  %v1913_v23 = vmul.f32 %v1912_v41, %v5880_v10  ;;  %v5885_v24 = vld [vmem:[#allocation2 + $0x11] sm:$0xff] }
 0x1a7   : > { %1787 = vrot.lane.b32.xlu2 %v1782_v0, %s8017_s19  ;;  %v1926_v0 = vstv %s4455_s20  ;;  %s4469_s20 = sld [smem:[#allocation9 + $0x8e]] }
 0x1a8   : > { %v5872_v31 = vpop.permute.xlu1 %1491  ;;  %v5874_v1 = vpop.permute.xlu0 %1479  ;;  %v1927_v51 = vmul.f32 %v1926_v0, %v5880_v10 }
 0x1a9   : > { %8103 = vst [vmem:[#allocation87_spill] sm:$0xff] %v5872_v31  ;;  %v5876_v15 = vpop.permute.xlu2 %1561 }
 0x1aa   : > { %8104 = vst [vmem:[#allocation88_spill] sm:$0xff] %v5874_v1  ;;  %v1996_v1 = vstv %s4460_s22  ;;  %s4474_s22 = sld [smem:[#allocation9 + $0x11]] }
 0x1ab   : > { %8105 = vst [vmem:[#allocation89_spill] sm:$0xff] %v5876_v15  ;;  %v1914_v15 = vmul.f32 %v1912_v41, %v5885_v24 }
 0x1ad   : > { %v2122_v13 = vstv %s4469_s20  ;;  %s6105_s20 = sld [smem:[#allocation9 + $0x9]] }
 0x1ae   : > { %1801 = vrot.lane.b32.xlu1 %v1796_v18, %s8017_s19  ;;  %1799 = vrot.lane.b32.xlu0 %v1795_v12, %s8017_s19  ;;  %v1928_v18 = vmul.f32 %v1926_v0, %v5885_v24  ;;  %v1940_v12 = vstv %s4456_s23  ;;  %v1955_v0 = vmul.f32 %v1954_v46, %v5880_v10  ;;  %s4470_s23 = sld [smem:[#allocation9 + $0x8]] }
 0x1af   : > { %1917 = vrot.lane.b32.xlu2 %v1913_v23, %s8019_s9  ;;  %v1941_v41 = vmul.f32 %v1940_v12, %v5880_v10 }
 0x1b0   : > { %v5888_v31 = vpop.permute.xlu1 %1507  ;;  %v5890_v20 = vpop.permute.xlu0 %1505 }
 0x1b1   : > { %8106 = vst [vmem:[#allocation90_spill] sm:$0xff] %v5888_v31  ;;  %v5892_v17 = vpop.permute.xlu2 %1577 }
 0x1b2   : > { %8107 = vst [vmem:[#allocation91_spill] sm:$0xff] %v5890_v20  ;;  %v1942_v20 = vmul.f32 %v1940_v12, %v5885_v24 }
 0x1b3   : > { %8108 = vst [vmem:[#allocation92_spill] sm:$0xff] %v5892_v17 }
 0x1b6   : > { %1931 = vrot.lane.b32.xlu1 %v1927_v51, %s8019_s9  ;;  %1919 = vrot.lane.b32.xlu0 %v1914_v15, %s8019_s9  ;;  %v5911_v15 = vld [vmem:[#allocation2 + $0x29] sm:$0xff]  ;;  %v1968_v51 = vstv %s4458_s15  ;;  %s4472_s15 = sld [smem:[#allocation9 + $0x50]] }
 0x1b7   : > { %1933 = vrot.lane.b32.xlu2 %v1928_v18, %s8019_s9  ;;  %v1969_v12 = vmul.f32 %v1968_v51, %v5911_v15 }
 0x1b8   : > { %v5900_v23 = vpop.permute.xlu1 %1533  ;;  %v5902_v31 = vpop.permute.xlu0 %1521 }
 0x1b9   : > { %8109 = vst [vmem:[#allocation93_spill] sm:$0xff] %v5900_v23  ;;  %v5904_v17 = vpop.permute.xlu2 %1603  ;;  %v1956_v23 = vmul.f32 %v1954_v46, %v5885_v24 }
 0x1ba   : > { %8110 = vst [vmem:[#allocation94_spill] sm:$0xff] %v5902_v31 }
 0x1bb   : > { %8111 = vst [vmem:[#allocation95_spill] sm:$0xff] %v5904_v17 }
 0x1be   : > { %1947 = vrot.lane.b32.xlu1 %v1942_v20, %s8019_s9  ;;  %1945 = vrot.lane.b32.xlu0 %v1941_v41, %s8019_s9  ;;  %v1970_v20 = vmul.f32 %v1968_v51, %v5922_v5  ;;  %v1982_v41 = vstv %s4459_s21  ;;  %v1997_v51 = vmul.f32 %v1996_v1, %v5911_v15  ;;  %s4473_s21 = sld [smem:[#allocation9 + $0x74]] }
 0x1bf   : > { %1959 = vrot.lane.b32.xlu2 %v1955_v0, %s8019_s9  ;;  %v1984_v46 = vmul.f32 %v1982_v41, %v5922_v5 }
 0x1c0   : > { %v5914_v18 = vpop.permute.xlu1 %1549  ;;  %v5916_v17 = vpop.permute.xlu0 %1547 }
 0x1c1   : > { %8112 = vst [vmem:[#allocation96_spill] sm:$0xff] %v5914_v18  ;;  %v5918_v31 = vpop.permute.xlu2 %1619  ;;  %v1983_v18 = vmul.f32 %v1982_v41, %v5911_v15  ;;  %v1998_v41 = vmul.f32 %v1996_v1, %v5922_v5 }
 0x1c2   : > { %8113 = vst [vmem:[#allocation97_spill] sm:$0xff] %v5916_v17 }
 0x1c3   : > { %8114 = vst [vmem:[#allocation98_spill] sm:$0xff] %v5918_v31 }
 0x1c6   : > { %1973 = vrot.lane.b32.xlu1 %v1969_v12, %s8019_s9  ;;  %1961 = vrot.lane.b32.xlu0 %v1956_v23, %s8019_s9  ;;  %v2010_v23 = vstv %s4461_s29  ;;  %s4475_s29 = sld [smem:[#allocation9 + $0x35]] }
 0x1c7   : > { %1975 = vrot.lane.b32.xlu2 %v1970_v20, %s8019_s9 }
 0x1c8   : > { %v5928_v0 = vpop.permute.xlu1 %1575  ;;  %v5930_v31 = vpop.permute.xlu0 %1563 }
 0x1c9   : > { %8115 = vst [vmem:[#allocation99_spill] sm:$0xff] %v5928_v0  ;;  %v5932_v17 = vpop.permute.xlu2 %1645  ;;  %v2011_v0 = vmul.f32 %v2010_v23, %v5911_v15 }
 0x1ca   : > { %8116 = vst [vmem:[#allocation100_spill] sm:$0xff] %v5930_v31 }
 0x1cb   : > { %8117 = vst [vmem:[#allocation101_spill] sm:$0xff] %v5932_v17  ;;  %v2012_v17 = vmul.f32 %v2010_v23, %v5922_v5 }
 0x1ce   : > { %1989 = vrot.lane.b32.xlu1 %v1984_v46, %s8019_s9  ;;  %1987 = vrot.lane.b32.xlu0 %v1983_v18, %s8019_s9  ;;  %v5951_v18 = vld [vmem:[#allocation2 + $0x51] sm:$0xff]  ;;  %v2024_v46 = vstv %s4462_s8  ;;  %s4476_s8 = sld [smem:[#allocation9 + $0x59]] }
 0x1cf   : > { %2001 = vrot.lane.b32.xlu2 %v1997_v51, %s8019_s9  ;;  %v5953_v51 = vld [vmem:[#allocation2 + $0x49] sm:$0xff]  ;;  %v2026_v23 = vmul.f32 %v2024_v46, %v5951_v18  ;;  %v2054_v7 = vmul.f32 %v2052_v6, %v5951_v18 }
 0x1d0   : > { %v5940_v12 = vpop.permute.xlu1 %1591  ;;  %v5942_v20 = vpop.permute.xlu0 %1589 }
 0x1d1   : > { %8118 = vst [vmem:[#allocation102_spill] sm:$0xff] %v5940_v12  ;;  %v5944_v31 = vpop.permute.xlu2 %1661  ;;  %v2038_v12 = vstv %s4463_s17  ;;  %s4477_s17 = sld [smem:[#allocation9 + $0x7d]] }
 0x1d2   : > { %8119 = vst [vmem:[#allocation103_spill] sm:$0xff] %v5942_v20 }
 0x1d3   : > { %8120 = vst [vmem:[#allocation104_spill] sm:$0xff] %v5944_v31 }
 0x1d6   : > { %2015 = vrot.lane.b32.xlu1 %v2011_v0, %s8019_s9  ;;  %2003 = vrot.lane.b32.xlu0 %v1998_v41, %s8019_s9  ;;  %v2025_v0 = vmul.f32 %v2024_v46, %v5953_v51  ;;  %v2039_v41 = vmul.f32 %v2038_v12, %v5953_v51  ;;  %v2040_v46 = vmul.f32 %v2038_v12, %v5951_v18 }
 0x1d7   : > { %2017 = vrot.lane.b32.xlu2 %v2012_v17, %s8019_s9 }
 0x1d8   : > { %v5956_v31 = vpop.permute.xlu1 %1617  ;;  %v5958_v20 = vpop.permute.xlu0 %1605 }
 0x1d9   : > { %8121 = vst [vmem:[#allocation105_spill] sm:$0xff] %v5956_v31  ;;  %v5960_v1 = vpop.permute.xlu2 %1687  ;;  %v2053_v31 = vmul.f32 %v2052_v6, %v5953_v51  ;;  %v2080_v6 = vstv %s4466_s2  ;;  %s4480_s2 = sld [smem:[#allocation9 + $0x62]] }
 0x1da   : > { %8122 = vst [vmem:[#allocation106_spill] sm:$0xff] %v5958_v20 }
 0x1db   : > { %8123 = vst [vmem:[#allocation107_spill] sm:$0xff] %v5960_v1 }
 0x1de   : > { %2031 = vrot.lane.b32.xlu1 %v2026_v23, %s8019_s9  ;;  %2029 = vrot.lane.b32.xlu0 %v2025_v0, %s8019_s9  ;;  %v2066_v23 = vstv %s4465_s18  ;;  %s4479_s18 = sld [smem:[#allocation9 + $0x3e]] }
 0x1df   : > { %2043 = vrot.lane.b32.xlu2 %v2039_v41, %s8019_s9  ;;  %v2067_v12 = vmul.f32 %v2066_v23, %v5953_v51 }
 0x1e0   : > { %v5968_v17 = vpop.permute.xlu1 %1633  ;;  %v5970_v20 = vpop.permute.xlu0 %1631 }
 0x1e1   : > { %8124 = vst [vmem:[#allocation108_spill] sm:$0xff] %v5968_v17  ;;  %v5972_v1 = vpop.permute.xlu2 %1703  ;;  %v2068_v17 = vmul.f32 %v2066_v23, %v5951_v18 }
 0x1e2   : > { %8125 = vst [vmem:[#allocation109_spill] sm:$0xff] %v5970_v20 }
 0x1e3   : > { %8126 = vst [vmem:[#allocation110_spill] sm:$0xff] %v5972_v1  ;;  %v5988_v1 = vld [vmem:[#allocation2 + $0x69] sm:$0xff] }
 0x1e6   : > { %2057 = vrot.lane.b32.xlu1 %v2053_v31, %s8019_s9  ;;  %2045 = vrot.lane.b32.xlu0 %v2040_v46, %s8019_s9  ;;  %v2081_v31 = vmul.f32 %v2080_v6, %v5988_v1  ;;  %v5993_v46 = vld [vmem:[#allocation2 + $0x71] sm:$0xff] }
 0x1e7   : > { %2059 = vrot.lane.b32.xlu2 %v2054_v7, %s8019_s9  ;;  %v2094_v7 = vstv %s4467_s16  ;;  %v2082_v39 = vmul.f32 %v2080_v6, %v5993_v46  ;;  %s6100_s16 = sld [smem:[#allocation9 + $0x86]] }
 0x1e8   : > { %v5980_v0 = vpop.permute.xlu1 %1659  ;;  %v5982_v41 = vpop.permute.xlu0 %1647 }
 0x1e9   : > { %8127 = vst [vmem:[#allocation111_spill] sm:$0xff] %v5980_v0  ;;  %v5984_v20 = vpop.permute.xlu2 %1729 }
 0x1ea   : > { %8128 = vst [vmem:[#allocation112_spill] sm:$0xff] %v5982_v41  ;;  %v2095_v41 = vmul.f32 %v2094_v7, %v5988_v1 }
 0x1eb   : > { %8129 = vst [vmem:[#allocation113_spill] sm:$0xff] %v5984_v20 }
 0x1ee   : > { %2073 = vrot.lane.b32.xlu1 %v2068_v17, %s8019_s9  ;;  %2071 = vrot.lane.b32.xlu0 %v2067_v12, %s8019_s9  ;;  %v2096_v17 = vmul.f32 %v2094_v7, %v5993_v46  ;;  %v2108_v12 = vstv %s4468_s13  ;;  %v2123_v7 = vmul.f32 %v2122_v13, %v5988_v1  ;;  %s6102_s13 = sld [smem:[#allocation9]] }
 0x1ef   : > { %2085 = vrot.lane.b32.xlu2 %v2081_v31, %s8019_s9  ;;  %v2109_v6 = vmul.f32 %v2108_v12, %v5988_v1 }
 0x1f0   : > { %v5996_v0 = vpop.permute.xlu1 %1675  ;;  %v5998_v20 = vpop.permute.xlu0 %1673 }
 0x1f1   : > { %8130 = vst [vmem:[#allocation114_spill] sm:$0xff] %v5996_v0  ;;  %v6000_v23 = vpop.permute.xlu2 %1745 }
 0x1f2   : > { %8131 = vst [vmem:[#allocation115_spill] sm:$0xff] %v5998_v20  ;;  %v2110_v20 = vmul.f32 %v2108_v12, %v5993_v46  ;;  %v2124_v12 = vmul.f32 %v2122_v13, %v5993_v46 }
 0x1f3   : > { %8132 = vst [vmem:[#allocation116_spill] sm:$0xff] %v6000_v23 }
 0x1f6   : > { %2099 = vrot.lane.b32.xlu1 %v2095_v41, %s8019_s9  ;;  %2087 = vrot.lane.b32.xlu0 %v2082_v39, %s8019_s9  ;;  %v2136_v39 = vstv %s4470_s23  ;;  %s6107_s23 = sld [smem:[#allocation9 + $0x48]] }
 0x1f7   : > { %2101 = vrot.lane.b32.xlu2 %v2096_v17, %s8019_s9 }
 0x1f8   : > { %v6008_v31 = vpop.permute.xlu1 %1701  ;;  %v6010_v0 = vpop.permute.xlu0 %1689 }
 0x1f9   : > { %8133 = vst [vmem:[#allocation117_spill] sm:$0xff] %v6008_v31  ;;  %v6012_v23 = vpop.permute.xlu2 %1771  ;;  %v2138_v31 = vmul.f32 %v2136_v39, %v5885_v24 }
 0x1fa   : > { %8134 = vst [vmem:[#allocation118_spill] sm:$0xff] %v6010_v0  ;;  %v2137_v0 = vmul.f32 %v2136_v39, %v5880_v10 }
 0x1fb   : > { %8135 = vst [vmem:[#allocation119_spill] sm:$0xff] %v6012_v23 }
 0x1fe   : > { %2115 = vrot.lane.b32.xlu1 %v2110_v20, %s8019_s9  ;;  %2113 = vrot.lane.b32.xlu0 %v2109_v6, %s8019_s9  ;;  %v2150_v20 = vstv %s4471_s14  ;;  %s6109_s14 = sld [smem:[#allocation9 + $0x51]] }
 0x1ff   : > { %2127 = vrot.lane.b32.xlu2 %v2123_v7, %s8019_s9  ;;  %v2151_v13 = vmul.f32 %v2150_v20, %v5880_v10 }
 0x200   : > { %v6020_v41 = vpop.permute.xlu1 %1717  ;;  %v6022_v17 = vpop.permute.xlu0 %1715 }
 0x201   : > { %8136 = vst [vmem:[#allocation120_spill] sm:$0xff] %v6020_v41  ;;  %v6024_v23 = vpop.permute.xlu2 %1787  ;;  %v2164_v41 = vstv %s4472_s15  ;;  %s6114_s15 = sld [smem:[#allocation9 + $0x23]] }
 0x202   : > { %8137 = vst [vmem:[#allocation121_spill] sm:$0xff] %v6022_v17  ;;  %v2152_v17 = vmul.f32 %v2150_v20, %v5885_v24  ;;  %v2165_v39 = vmul.f32 %v2164_v41, %v5880_v10  ;;  %v2166_v20 = vmul.f32 %v2164_v41, %v5885_v24 }
 0x203   : > { %8138 = vst [vmem:[#allocation122_spill] sm:$0xff] %v6024_v23 }
 0x206   : > { %2141 = vrot.lane.b32.xlu1 %v2137_v0, %s8017_s19  ;;  %2129 = vrot.lane.b32.xlu0 %v2124_v12, %s8019_s9  ;;  %v2178_v0 = vstv %s4473_s21  ;;  %s6116_s21 = sld [smem:[#allocation9 + $0x12]] }
 0x207   : > { %2143 = vrot.lane.b32.xlu2 %v2138_v31, %s8017_s19 }
 0x208   : > { %v6032_v6 = vpop.permute.xlu1 %1743  ;;  %v6034_v7 = vpop.permute.xlu0 %1731 }
 0x209   : > { %8139 = vst [vmem:[#allocation123_spill] sm:$0xff] %v6032_v6  ;;  %v6036_v23 = vpop.permute.xlu2 %1917  ;;  %v2180_v6 = vmul.f32 %v2178_v0, %v5885_v24 }
 0x20a   : > { %8140 = vst [vmem:[#allocation124_spill] sm:$0xff] %v6034_v7  ;;  %v2179_v7 = vmul.f32 %v2178_v0, %v5880_v10 }
 0x20b   : > { %8141 = vst [vmem:[#allocation125_spill] sm:$0xff] %v6036_v23 }
 0x20e   : > { %2157 = vrot.lane.b32.xlu1 %v2152_v17, %s8017_s19  ;;  %2155 = vrot.lane.b32.xlu0 %v2151_v13, %s8017_s19  ;;  %v2192_v17 = vstv %s4474_s22  ;;  %s6124_s22 = sld [smem:[#allocation9 + $0x5a]] }
 0x20f   : > { %2169 = vrot.lane.b32.xlu2 %v2165_v39, %s8017_s19  ;;  %v2194_v10 = vmul.f32 %v2192_v17, %v5922_v5  ;;  %v2193_v41 = vmul.f32 %v2192_v17, %v5911_v15 }
 0x210   : > { %v6044_v31 = vpop.permute.xlu1 %1759  ;;  %v6046_v12 = vpop.permute.xlu0 %1757 }
 0x211   : > { %8142 = vst [vmem:[#allocation126_spill] sm:$0xff] %v6044_v31  ;;  %v6048_v23 = vpop.permute.xlu2 %1933 }
 0x212   : > { %8143 = vst [vmem:[#allocation127_spill] sm:$0xff] %v6046_v12  ;;  %v2206_v12 = vstv %s4475_s29  ;;  %s6129_s29 = sld [smem:[#allocation9 + $0x63]] }
 0x213   : > { %8144 = vst [vmem:[#allocation128_spill] sm:$0xff] %v6048_v23  ;;  %v2207_v24 = vmul.f32 %v2206_v12, %v5911_v15  ;;  %v2208_v17 = vmul.f32 %v2206_v12, %v5922_v5 }
 0x216   : > { %2183 = vrot.lane.b32.xlu1 %v2179_v7, %s8017_s19  ;;  %2171 = vrot.lane.b32.xlu0 %v2166_v20, %s8017_s19  ;;  %v2220_v7 = vstv %s4476_s8  ;;  %s6134_s8 = sld [smem:[#allocation9 + $0x1b]] }
 0x217   : > { %2185 = vrot.lane.b32.xlu2 %v2180_v6, %s8017_s19 }
 0x218   : > { %v6056_v13 = vpop.permute.xlu1 %1785  ;;  %v6058_v39 = vpop.permute.xlu0 %1773  ;;  %v8163_v54 = vstv %s6129_s29 }
 0x219   : > { %8145 = vst [vmem:[#allocation129_spill] sm:$0xff] %v6056_v13  ;;  %v6060_v23 = vpop.permute.xlu2 %1959 }
 0x21a   : > { %8146 = vst [vmem:[#allocation130_spill] sm:$0xff] %v6058_v39  ;;  %v2222_v39 = vmul.f32 %v2220_v7, %v5922_v5 }
 0x21b   : > { %8147 = vst [vmem:[#allocation131_spill] sm:$0xff] %v6060_v23  ;;  %v2221_v23 = vmul.f32 %v2220_v7, %v5911_v15 }
 0x21c   : > { %v784_v16 = vstv %s6134_s8  ;;  %s6279_s8 = sld [smem:[#allocation9 + $0x4b]] }
 0x21e   : > { %2199 = vrot.lane.b32.xlu1 %v2194_v10, %s8017_s19  ;;  %2197 = vrot.lane.b32.xlu0 %v2193_v41, %s8017_s19  ;;  %v2234_v10 = vstv %s4477_s17  ;;  %s6136_s17 = sld [smem:[#allocation9 + $0x2d]] }
 0x21f   : > { %2211 = vrot.lane.b32.xlu2 %v2207_v24, %s8017_s19  ;;  %v2235_v12 = vmul.f32 %v2234_v10, %v5911_v15 }
 0x220   : > { %v6068_v6 = vpop.permute.xlu1 %1801  ;;  %v6070_v0 = vpop.permute.xlu0 %1799 }
 0x221   : > { %8148 = vst [vmem:[#allocation132_spill] sm:$0xff] %v6068_v6  ;;  %v6072_v20 = vpop.permute.xlu2 %1975  ;;  %v2248_v6 = vstv %s4478_s1  ;;  %s6144_s1 = sld [smem:[#allocation9 + $0x24]] }
 0x222   : > { %8149 = vst [vmem:[#allocation133_spill] sm:$0xff] %v6070_v0  ;;  %v2249_v7 = vmul.f32 %v2248_v6, %v5953_v51  ;;  %v2250_v15 = vmul.f32 %v2248_v6, %v5951_v18  ;;  %v2276_v6 = vstv %s4480_s2  ;;  %s6155_s2 = sld [smem:[#allocation9 + $0x6c]] }
 0x223   : > { %8150 = vst [vmem:[#allocation134_spill] sm:$0xff] %v6072_v20  ;;  %v2236_v20 = vmul.f32 %v2234_v10, %v5922_v5 }
 0x226   : > { %2225 = vrot.lane.b32.xlu1 %v2221_v23, %s8017_s19  ;;  %2213 = vrot.lane.b32.xlu0 %v2208_v17, %s8017_s19  ;;  %v2262_v23 = vstv %s4479_s18  ;;  %s6151_s18 = sld [smem:[#allocation9 + $0x47]] }
 0x227   : > { %2227 = vrot.lane.b32.xlu2 %v2222_v39, %s8017_s19  ;;  %v2263_v5 = vmul.f32 %v2262_v23, %v5953_v51 }
 0x228   : > { %v6080_v41 = vpop.permute.xlu1 %1931  ;;  %v6082_v24 = vpop.permute.xlu0 %1919 }
 0x229   : > { %8151 = vst [vmem:[#allocation135_spill] sm:$0xff] %v6080_v41  ;;  %v6084_v0 = vpop.permute.xlu2 %2001 }
 0x22a   : > { %8152 = vst [vmem:[#allocation136_spill] sm:$0xff] %v6082_v24  ;;  %v758_v24 = vstv %s6116_s21  ;;  %s6212_s21 = sld [smem:[#allocation9 + $0x87]] }
 0x22b   : > { %8153 = vst [vmem:[#allocation137_spill] sm:$0xff] %v6084_v0  ;;  %v2304_v0 = vstv %s6114_s15  ;;  %s6199_s15 = sld [smem:[#allocation9 + $0x8f]] }
 0x22c   : > { %v2305_v55 = vmul.f32 %v2304_v0, %v5988_v1  ;;  %v2306_v9 = vmul.f32 %v2304_v0, %v5993_v46  ;;  %v2318_v58 = vstv %s6151_s18  ;;  %s6310_s18 = sld [smem:[#allocation9 + $0x1e]] }
 0x22d   : > { %v2320_v22 = vmul.f32 %v2318_v58, %v5993_v46 }
 0x22e   : > { %2241 = vrot.lane.b32.xlu1 %v2236_v20, %s8017_s19  ;;  %2239 = vrot.lane.b32.xlu0 %v2235_v12, %s8017_s19  ;;  %v2264_v20 = vmul.f32 %v2262_v23, %v5951_v18  ;;  %v2278_v23 = vmul.f32 %v2276_v6, %v5951_v18 }
 0x22f   : > { %2253 = vrot.lane.b32.xlu2 %v2249_v7, %s8017_s19 }
 0x230   : > { %v6092_v39 = vpop.permute.xlu1 %1947  ;;  %v6094_v17 = vpop.permute.xlu0 %1945 }
 0x231   : > { %8154 = vst [vmem:[#allocation138_spill] sm:$0xff] %v6092_v39  ;;  %v6096_v41 = vpop.permute.xlu2 %2017  ;;  %v714_v39 = vstv %s6102_s13  ;;  %s6170_s13 = sld [smem:[#allocation9 + $0x6b]] }
 0x232   : > { %8155 = vst [vmem:[#allocation139_spill] sm:$0xff] %v6094_v17  ;;  %v722_v17 = vstv %s6107_s23  ;;  %s6179_s23 = sld [smem:[#allocation9 + $0x3f]] }
 0x233   : > { %8156 = vst [vmem:[#allocation140_spill] sm:$0xff] %v6096_v41  ;;  %v732_v41 = vstv %s6105_s20  ;;  %s6174_s20 = sld [smem:[#allocation9 + $0x36]] }
 0x234   : > { %v733_v42 = vmul.f32 %v4756_v40, %v732_v41 }
 0x236   : > { %2267 = vrot.lane.b32.xlu1 %v2263_v5, %s8017_s19  ;;  %2255 = vrot.lane.b32.xlu0 %v2250_v15, %s8017_s19  ;;  %v2277_v5 = vmul.f32 %v2276_v6, %v5953_v51  ;;  %v2290_v15 = vstv %s6100_s16  ;;  %s6164_s16 = sld [smem:[#allocation9 + $0x75]] }
 0x237   : > { %2269 = vrot.lane.b32.xlu2 %v2264_v20, %s8017_s19  ;;  %v2291_v20 = vmul.f32 %v2290_v15, %v5953_v51  ;;  %v744_v51 = vstv %s6109_s14  ;;  %v2292_v8 = vmul.f32 %v2290_v15, %v5951_v18  ;;  %v786_v18 = vmul.f32 %v6181_v2, %v784_v16  ;;  %v4759_v15 = vld [vmem:[#allocation2 + $0x47] sm:$0xff]  ;;  %s6191_s14 = sld [smem:[#allocation9 + $0x7e]] }
 0x238   : > { %v6118_v10 = vpop.permute.xlu1 %1973  ;;  %v6120_v12 = vpop.permute.xlu0 %1961  ;;  %v745_v21 = vmul.f32 %v4756_v40, %v744_v51 }
 0x239   : > { %8157 = vst [vmem:[#allocation141_spill] sm:$0xff] %v6118_v10  ;;  %v6122_v7 = vpop.permute.xlu2 %2043  ;;  %v6141_v10 = vld [vmem:[#allocation2 + $0x2f] sm:$0xff] }
 0x23a   : > { %8158 = vst [vmem:[#allocation142_spill] sm:$0xff] %v6120_v12  ;;  %v734_v6 = vmul.f32 %v6141_v10, %v732_v41  ;;  %v2319_v41 = vmul.f32 %v2318_v58, %v5988_v1 }
 0x23b   : > { %8159 = vst [vmem:[#allocation143_spill] sm:$0xff] %v6122_v7  ;;  %v6138_v7 = vld [vmem:[#allocation2 + $0xf] sm:$0xff] }
 0x23c   : > { %v716_v12 = vmul.f32 %v6138_v7, %v714_v39  ;;  %v724_v0 = vmul.f32 %v6138_v7, %v722_v17 }
 0x23d   : > { %v776_v52 = vstv %s6191_s14  ;;  %s6356_s14 = sld [smem:[#allocation9 + $0x66]] }
 0x23e   : > { %2283 = vrot.lane.b32.xlu1 %v2278_v23, %s8017_s19  ;;  %2281 = vrot.lane.b32.xlu0 %v2277_v5, %s8017_s19  ;;  %v736_v63 = vadd.f32 %v734_v6, %v716_v12  ;;  %v6161_v23 = vld [vmem:[#allocation2 + $0x4f] sm:$0xff]  ;;  %v770_v12 = vstv %s6124_s22  ;;  %v6184_v6 = vld [vmem:[#allocation2 + $0x67] sm:$0xff]  ;;  %s6257_s22 = sld [smem:[#allocation9 + $0x3]] }
 0x23f   : > { %2295 = vrot.lane.b32.xlu2 %v2291_v20, %s8017_s19  ;;  %v760_v5 = vmul.f32 %v6161_v23, %v758_v24  ;;  %v771_v43 = vmul.f32 %v4759_v15, %v770_v12  ;;  %v6189_v59 = vmul.f32 %v6184_v6, %v8163_v54  ;;  %v718_v54 = vstv %s6144_s1  ;;  %s6305_s1 = sld [smem:[#allocation9 + $0x54]] }
 0x240   : > { %v6157_v13 = vpop.permute.xlu1 %1989  ;;  %v6159_v31 = vpop.permute.xlu0 %1987 }
 0x241   : > { %8160 = vst [vmem:[#allocation144_spill] sm:$0xff] %v6157_v13  ;;  %v6166_v20 = vpop.permute.xlu2 %2059  ;;  %v762_v62 = vadd.f32 %v760_v5, %v736_v63  ;;  %v746_v5 = vmul.f32 %v6141_v10, %v744_v51  ;;  %v726_v51 = vstv %s6155_s2  ;;  %s6315_s2 = sld [smem:[#allocation9 + $0x27]] }
 0x242   : > { %8161 = vst [vmem:[#allocation145_spill] sm:$0xff] %v6159_v31  ;;  %v4757_v31 = vld [vmem:[#allocation2 + $0x7] sm:$0xff]  ;;  %v728_v60 = vmul.f32 %v6138_v7, %v726_v51 }
 0x243   : > { %8162 = vst [vmem:[#allocation146_spill] sm:$0xff] %v6166_v20  ;;  %v723_v13 = vmul.f32 %v4757_v31, %v722_v17  ;;  %v738_v20 = vstv %s6136_s17  ;;  %v788_v17 = vadd.f32 %v786_v18, %v762_v62  ;;  %v759_v62 = vmul.f32 %v4759_v15, %v758_v24  ;;  %s6289_s17 = sld [smem:[#allocation9 + $0x15]] }
 0x244   : > { %v739_v14 = vmul.f32 %v4756_v40, %v738_v20  ;;  %v748_v56 = vadd.f32 %v746_v5, %v724_v0 }
 0x245   : > { %v747_v63 = vadd.f32 %v745_v21, %v723_v13  ;;  %v720_v21 = vmul.f32 %v6138_v7, %v718_v54  ;;  %v740_v13 = vmul.f32 %v6141_v10, %v738_v20  ;;  %v719_v20 = vmul.f32 %v4757_v31, %v718_v54 }
 0x246   : > { %2309 = vrot.lane.b32.xlu1 %v2305_v55, %s8017_s19  ;;  %2297 = vrot.lane.b32.xlu0 %v2292_v8, %s8017_s19  ;;  %v715_v55 = vmul.f32 %v4757_v31, %v714_v39  ;;  %v2332_v39 = vstv %s6170_s13  ;;  %v820_v61 = vadd.f32 %v5546_v37, %v788_v17  ;;  %v2346_v54 = vstv %s6199_s15  ;;  %s6326_s13 = sld [smem:[#allocation9 + $0x5d]] }
 0x247   : > { %2311 = vrot.lane.b32.xlu2 %v2306_v9, %s8017_s19  ;;  %v750_v9 = vstv %s6164_s16  ;;  %v2333_v44 = vmul.f32 %v2332_v39, %v5988_v1  ;;  %v742_v25 = vadd.f32 %v740_v13, %v720_v21  ;;  %v773_v30 = vadd.f32 %v771_v43, %v747_v63  ;;  %s6318_s16 = sld [smem:[#allocation9 + $0x30]] }
 0x248   : > { %v6202_v26 = vpop.permute.xlu1 %2015  ;;  %v6204_v8 = vpop.permute.xlu0 %2003  ;;  %v751_v48 = vmul.f32 %v4756_v40, %v750_v9  ;;  %v735_v18 = vadd.f32 %v733_v42, %v715_v55  ;;  %v752_v58 = vmul.f32 %v6141_v10, %v750_v9  ;;  %v772_v40 = vmul.f32 %v6161_v23, %v770_v12  ;;  %s6375_s15 = sld [smem:[#allocation9 + $0x39]] }
 0x249   : > { %8164 = vst [vmem:[#allocation147_spill] sm:$0xff] %v6202_v26  ;;  %v6209_v33 = vpop.permute.xlu2 %2085  ;;  %v764_v26 = vstv %s6174_s20  ;;  %v777_v42 = vmul.f32 %v4759_v15, %v776_v52  ;;  %v741_v7 = vadd.f32 %v739_v14, %v719_v20  ;;  %v785_v10 = vmul.f32 %v6184_v6, %v784_v16  ;;  %s6332_s20 = sld [smem:[#allocation9 + $0x6f]] }
 0x24a   : > { %8165 = vst [vmem:[#allocation148_spill] sm:$0xff] %v6204_v8  ;;  %v727_v8 = vmul.f32 %v4757_v31, %v726_v51  ;;  %v790_v31 = vstv %s6179_s23  ;;  %v765_v37 = vmul.f32 %v4759_v15, %v764_v26  ;;  %v754_v5 = vadd.f32 %v752_v58, %v728_v60  ;;  %s6342_s23 = sld [smem:[#allocation9 + $0x78]] }
 0x24b   : > { %8166 = vst [vmem:[#allocation149_spill] sm:$0xff] %v6209_v33  ;;  %v766_v33 = vmul.f32 %v6161_v23, %v764_v26  ;;  %v792_v43 = vmul.f32 %v6181_v2, %v790_v31  ;;  %v876_v55 = vadd.f32 %v5570_v53, %v820_v61  ;;  %v802_v26 = vstv %s6212_s21  ;;  %s6381_s21 = sld [smem:[#allocation9 + $0x81]] }
 0x24c   : > { %v753_v24 = vadd.f32 %v751_v48, %v727_v8  ;;  %v2347_v14 = vmul.f32 %v2346_v54, %v5988_v1  ;;  %v2334_v16 = vmul.f32 %v2332_v39, %v5993_v46  ;;  %v799_v15 = vadd.f32 %v6189_v59, %v773_v30 }
 0x24d   : > { %v768_v0 = vadd.f32 %v766_v33, %v742_v25  ;;  %v803_v8 = vmul.f32 %v6184_v6, %v802_v26  ;;  %v2348_v13 = vmul.f32 %v2346_v54, %v5993_v46  ;;  %v774_v25 = vadd.f32 %v772_v40, %v748_v56  ;;  %v8169_v54 = vld [vmem:[#allocation54_spill] sm:$0xff] }
 0x24e   : > { %2325 = vrot.lane.b32.xlu1 %v2320_v22, %s8017_s19  ;;  %2323 = vrot.lane.b32.xlu0 %v2319_v41, %s8017_s19  ;;  %v761_v22 = vadd.f32 %v759_v62, %v735_v18  ;;  %v779_v21 = vadd.f32 %v777_v42, %v753_v24  ;;  %v8167_v60 = vstv %s6129_s29  ;;  %v791_v61 = vmul.f32 %v6184_v6, %v790_v31  ;;  %s6270_s29 = sld [smem:[#allocation9 + $0xc]]  ;;  %v8168_v24 = vld [vmem:[#allocation35_spill] sm:$0xff] }
 0x24f   : > { %2337 = vrot.lane.b32.xlu2 %v2333_v44, %s8017_s19  ;;  %v778_v44 = vmul.f32 %v6161_v23, %v776_v52  ;;  %v798_v53 = vmul.f32 %v6181_v2, %v8167_v60  ;;  %v767_v33 = vadd.f32 %v765_v37, %v741_v7  ;;  %v932_v23 = vadd.f32 %v5560_v47, %v876_v55  ;;  %v8170_v37 = vld [vmem:[#allocation22_spill] sm:$0xff]  ;;  %v8171_v7 = vld [vmem:[#allocation24_spill] sm:$0xff]  ;;  %v8179_v60 = vld [vmem:[#allocation31_spill] sm:$0xff] }
 0x250   : > { %v6232_v63 = vpop.permute.xlu1 %2031  ;;  %v6234_v12 = vpop.permute.xlu0 %2029  ;;  %v787_v52 = vadd.f32 %v785_v10, %v761_v22  ;;  %v794_v1 = vadd.f32 %v792_v43, %v768_v0  ;;  %v804_v51 = vmul.f32 %v6181_v2, %v802_v26  ;;  %v847_v30 = vadd.f32 %v5508_v11, %v799_v15  ;;  %v8172_v10 = vld [vmem:[#allocation25_spill] sm:$0xff]  ;;  %v8174_v22 = vld [vmem:[#allocation43_spill] sm:$0xff] }
 0x251   : > { %v6237_v48 = vpop.permute.xlu2 %2101  ;;  %v780_v17 = vadd.f32 %v778_v44, %v754_v5  ;;  %v805_v59 = vadd.f32 %v803_v8, %v779_v21  ;;  %v988_v56 = vadd.f32 %v5632_v32, %v932_v23  ;;  %v793_v9 = vadd.f32 %v791_v61, %v767_v33  ;;  %v6297_v5 = vld [vmem:[#allocation2 + $0x10] sm:$0xff]  ;;  %v8175_v44 = vld [vmem:[#allocation64_spill] sm:$0xff]  ;;  %v8177_v8 = vld [vmem:[#allocation33_spill] sm:$0xff] }
 0x252   : > { %v903_v2 = vadd.f32 %v5582_v57, %v847_v30  ;;  %v800_v20 = vadd.f32 %v798_v53, %v774_v25  ;;  %v819_v11 = vadd.f32 %v5534_v28, %v787_v52  ;;  %v834_v32 = vadd.f32 %v5544_v36, %v794_v1  ;;  %v8180_v61 = vld [vmem:[#allocation36_spill] sm:$0xff]  ;;  %v8181_v52 = vld [vmem:[#allocation23_spill] sm:$0xff]  ;;  %v8183_v30 = vld [vmem:[#allocation41_spill] sm:$0xff] }
 0x253   : > { %v1044_v41 = vadd.f32 %v5674_v35, %v988_v56  ;;  %v806_v62 = vadd.f32 %v804_v51, %v780_v17  ;;  %v861_v18 = vadd.f32 %v5558_v4, %v805_v59  ;;  %v833_v58 = vadd.f32 %v5532_v27, %v793_v9  ;;  %v8182_v1 = vld [vmem:[#allocation39_spill] sm:$0xff] }
 0x254   : > { %v959_v40 = vadd.f32 %v5572_v45, %v903_v2  ;;  %v848_v35 = vadd.f32 %v5516_v34, %v800_v20  ;;  %v875_v31 = vadd.f32 %v5524_v19, %v819_v11  ;;  %v890_v28 = vadd.f32 %v5536_v29, %v834_v32  ;;  %v6320_v56 = vld [vmem:[#allocation2 + $0x30] sm:$0xff]  ;;  %v8185_v11 = vld [vmem:[#allocation38_spill] sm:$0xff] }
 0x255   : > { %v1100_v57 = vadd.f32 %v5664_v49, %v1044_v41  ;;  %v862_v36 = vadd.f32 %v5556_v3, %v806_v62  ;;  %v917_v4 = vadd.f32 %v5548_v38, %v861_v18  ;;  %v889_v42 = vadd.f32 %v5568_v50, %v833_v58  ;;  %v8173_v38 = vld [vmem:[#allocation27_spill] sm:$0xff]  ;;  %v8184_v41 = vld [vmem:[#allocation32_spill] sm:$0xff]  ;;  %v8186_v18 = vld [vmem:[#allocation26_spill] sm:$0xff] }
 0x256   : > { %2351 = vrot.lane.b32.xlu1 %v2347_v14, %s8017_s19  ;;  %2339 = vrot.lane.b32.xlu0 %v2334_v16, %s8017_s19  ;;  %v1015_v27 = vadd.f32 %v8168_v24, %v959_v40  ;;  %v904_v49 = vadd.f32 %v8170_v37, %v848_v35  ;;  %v931_v34 = vadd.f32 %v8171_v7, %v875_v31  ;;  %v1258_v43 = vstv %s6257_s22  ;;  %v8176_v16 = vld [vmem:[#allocation30_spill] sm:$0xff]  ;;  %v8187_v40 = vld [vmem:[#allocation29_spill] sm:$0xff]  ;;  %s6404_s22 = sld [smem:[#allocation9 + $0x42]] }
 0x257   : > { %2353 = vrot.lane.b32.xlu2 %v2348_v13, %s8017_s19  ;;  %v1156_v45 = vadd.f32 %v8169_v54, %v1100_v57  ;;  %v918_v19 = vadd.f32 %v8172_v10, %v862_v36  ;;  %v946_v50 = vadd.f32 %v8173_v38, %v890_v28  ;;  %v1260_v55 = vmul.f32 %v6297_v5, %v1258_v43  ;;  %v8178_v13 = vld [vmem:[#allocation28_spill] sm:$0xff]  ;;  %v8188_v35 = vld [vmem:[#allocation34_spill] sm:$0xff]  ;;  %v8189_v28 = vld [vmem:[#allocation57_spill] sm:$0xff]  ;;  %s6804_s19 = sld [smem:[#allocation12 + $0x12]] }
 0x258   : > { %v6259_v6 = vpop.permute.xlu1 %2057  ;;  %v6261_v47 = vpop.permute.xlu0 %2045  ;;  %v1071_v0 = vadd.f32 %v8174_v22, %v1015_v27  ;;  %v973_v15 = vadd.f32 %v8176_v16, %v917_v4  ;;  %v987_v21 = vadd.f32 %v8177_v8, %v931_v34  ;;  %v945_v25 = vadd.f32 %v8178_v13, %v889_v42  ;;  %v8190_v4 = vld [vmem:[#allocation37_spill] sm:$0xff]  ;;  %v8192_v54 = vld [vmem:[#allocation46_spill] sm:$0xff]  ;;  %v6344_v10 = vld [vmem:[#allocation2 + $0x50] sm:$0xff] }
 0x259   : > { %v6265_v39 = vpop.permute.xlu2 %2127  ;;  %v1212_v26 = vadd.f32 %v8175_v44, %v1156_v45  ;;  %v960_v53 = vadd.f32 %v8179_v60, %v904_v49  ;;  %v1002_v33 = vadd.f32 %v8180_v61, %v946_v50  ;;  %v974_v23 = vadd.f32 %v8181_v52, %v918_v19  ;;  %v8191_v24 = vld [vmem:[#allocation45_spill] sm:$0xff]  ;;  %v4764_v38 = vld [vmem:[#allocation2 + $0x8] sm:$0xff]  ;;  %v8193_v22 = vld [vmem:[#allocation67_spill] sm:$0xff] }
 0x25a   : > { %v1029_v17 = vadd.f32 %v8182_v1, %v973_v15  ;;  %v1284_v51 = vstv %s6270_s29  ;;  %v1127_v59 = vadd.f32 %v8183_v30, %v1071_v0  ;;  %v1043_v20 = vadd.f32 %v8184_v41, %v987_v21  ;;  %v8194_v44 = vld [vmem:[#allocation40_spill] sm:$0xff]  ;;  %v8195_v16 = vld [vmem:[#allocation42_spill] sm:$0xff]  ;;  %v8196_v8 = vld [vmem:[#allocation55_spill] sm:$0xff]  ;;  %s6408_s29 = sld [smem:[#allocation9 + $0x8a]] }
 0x25b   : > { %v1286_v9 = vmul.f32 %v6320_v56, %v1284_v51  ;;  %v1262_v2 = vadd.f32 %v1260_v55, %v1212_v26  ;;  %v1030_v32 = vadd.f32 %v8185_v11, %v974_v23  ;;  %v1270_v62 = vstv %s6279_s8  ;;  %v4765_v60 = vld [vmem:[#allocation2 + $0x28] sm:$0xff]  ;;  %v8197_v23 = vld [vmem:[#allocation44_spill] sm:$0xff]  ;;  %v6368_v41 = vld [vmem:[#allocation2 + $0x70] sm:$0xff]  ;;  %s6443_s8 = sld [smem:[#allocation9 + $0x6]] }
 0x25c   : > { %v1001_v58 = vadd.f32 %v8186_v18, %v945_v25  ;;  %v1016_v57 = vadd.f32 %v8187_v40, %v960_v53  ;;  %v1058_v31 = vadd.f32 %v8188_v35, %v1002_v33  ;;  %v1183_v36 = vadd.f32 %v8189_v28, %v1127_v59  ;;  %v6359_v33 = vld [vmem:[#allocation2 + $0x48] sm:$0xff]  ;;  %v8199_v59 = vld [vmem:[#allocation49_spill] sm:$0xff] }
 0x25d   : > { %v1085_v42 = vadd.f32 %v8190_v4, %v1029_v17  ;;  %v1099_v27 = vadd.f32 %v8191_v24, %v1043_v20  ;;  %v1086_v45 = vadd.f32 %v8192_v54, %v1030_v32  ;;  %v1310_v37 = vstv %s6289_s17  ;;  %v8198_v17 = vld [vmem:[#allocation48_spill] sm:$0xff]  ;;  %v8200_v32 = vld [vmem:[#allocation51_spill] sm:$0xff]  ;;  %v8203_v28 = vld [vmem:[#allocation58_spill] sm:$0xff]  ;;  %s6454_s17 = sld [smem:[#allocation9 + $0xf]] }
 0x25e   : > { %v1288_v34 = vadd.f32 %v1286_v9, %v1262_v2  ;;  %v1312_v19 = vmul.f32 %v6344_v10, %v1310_v37  ;;  %v1271_v50 = vmul.f32 %v4764_v38, %v1270_v62  ;;  %v1239_v0 = vadd.f32 %v8193_v22, %v1183_v36  ;;  %v8204_v54 = vld [vmem:[#allocation52_spill] sm:$0xff] }
 0x25f   : > { %v1057_v26 = vadd.f32 %v8194_v44, %v1001_v58  ;;  %v1072_v15 = vadd.f32 %v8195_v16, %v1016_v57  ;;  %v1155_v21 = vadd.f32 %v8196_v8, %v1099_v27  ;;  %v1296_v13 = vstv %s6305_s1  ;;  %v8201_v58 = vld [vmem:[#allocation53_spill] sm:$0xff]  ;;  %v8202_v57 = vld [vmem:[#allocation60_spill] sm:$0xff]  ;;  %v8207_v44 = vld [vmem:[#allocation47_spill] sm:$0xff]  ;;  %s6470_s1 = sld [smem:[#allocation9 + $0x18]] }
 0x260   : > { %v6291_v29 = vpop.permute.xlu1 %2073  ;;  %v6293_v3 = vpop.permute.xlu0 %2071  ;;  %v1259_v25 = vmul.f32 %v4764_v38, %v1258_v43  ;;  %v1285_v53 = vmul.f32 %v4765_v60, %v1284_v51  ;;  %v1336_v61 = vstv %s6310_s18  ;;  %v6362_v52 = vmul.f32 %v6359_v33, %v1310_v37  ;;  %v8205_v37 = vld [vmem:[#allocation61_spill] sm:$0xff]  ;;  %s6476_s18 = sld [smem:[#allocation9 + $0x4e]] }
 0x261   : > { %v6301_v14 = vpop.permute.xlu2 %2143  ;;  %v1142_v1 = vadd.f32 %v8197_v23, %v1086_v45  ;;  %v1114_v30 = vadd.f32 %v8198_v17, %v1058_v31  ;;  %v1113_v9 = vadd.f32 %v8199_v59, %v1057_v26  ;;  %v1264_v2 = vstv %s6315_s2  ;;  %v8208_v59 = vld [vmem:[#allocation56_spill] sm:$0xff]  ;;  %s6481_s2 = sld [smem:[#allocation9 + $0x21]] }
 0x262   : > { %v1338_v43 = vmul.f32 %v6368_v41, %v1336_v61  ;;  %v1314_v51 = vadd.f32 %v1312_v19, %v1288_v34  ;;  %v1297_v20 = vmul.f32 %v4765_v60, %v1296_v13  ;;  %v1273_v11 = vadd.f32 %v1271_v50, %v1239_v0  ;;  %v8206_v19 = vld [vmem:[#allocation70_spill] sm:$0xff] }
 0x263   : > { %v1141_v18 = vadd.f32 %v8200_v32, %v1085_v42  ;;  %v1211_v40 = vadd.f32 %v8201_v58, %v1155_v21  ;;  %v1198_v35 = vadd.f32 %v8202_v57, %v1142_v1  ;;  %v1322_v31 = vstv %s6326_s13  ;;  %s6512_s13 = sld [smem:[#allocation9 + $0x72]] }
 0x264   : > { %v1170_v36 = vadd.f32 %v8203_v28, %v1114_v30  ;;  %v1266_v4 = vmul.f32 %v6297_v5, %v1264_v2  ;;  %v1290_v24 = vstv %s6318_s16  ;;  %v1276_v27 = vstv %s6332_s20  ;;  %s6505_s16 = sld [smem:[#allocation9 + $0x57]] }
 0x265   : > { %v1128_v45 = vadd.f32 %v8204_v54, %v1072_v15  ;;  %v1197_v42 = vadd.f32 %v8205_v37, %v1141_v18  ;;  %v1278_v34 = vmul.f32 %v6297_v5, %v1276_v27  ;;  %v1254_v50 = vadd.f32 %v8206_v19, %v1198_v35  ;;  %v8211_v18 = vld [vmem:[#allocation59_spill] sm:$0xff]  ;;  %v8212_v35 = vld [vmem:[#allocation62_spill] sm:$0xff]  ;;  %s6517_s20 = sld [smem:[#allocation9 + $0x60]] }
 0x266   : > { %v1169_v26 = vadd.f32 %v8207_v44, %v1113_v9  ;;  %v1340_v16 = vadd.f32 %v1338_v43, %v1314_v51  ;;  %v1299_v8 = vadd.f32 %v1297_v20, %v1273_v11  ;;  %v1323_v21 = vmul.f32 %v6359_v33, %v1322_v31  ;;  %v8209_v51 = vld [vmem:[#allocation63_spill] sm:$0xff]  ;;  %v8210_v11 = vld [vmem:[#allocation50_spill] sm:$0xff] }
 0x267   : > { %v1261_v15 = vadd.f32 %v1259_v25, %v1211_v40  ;;  %v1292_v1 = vmul.f32 %v6320_v56, %v1290_v24  ;;  %v1302_v17 = vstv %s6342_s23  ;;  %v1348_v30 = vstv %s6356_s14  ;;  %v4768_v54 = vld [vmem:[#allocation2 + $0x68] sm:$0xff]  ;;  %s6523_s23 = sld [smem:[#allocation9 + $0x2a]] }
 0x268   : > { %v6338_v49 = vpop.permute.xlu1 %2099  ;;  %v6340_v7 = vpop.permute.xlu0 %2087  ;;  %v1226_v32 = vadd.f32 %v8208_v59, %v1170_v36  ;;  %v1277_v9 = vmul.f32 %v4764_v38, %v1276_v27  ;;  %v1265_v43 = vmul.f32 %v4764_v38, %v1264_v2  ;;  %v1225_v20 = vadd.f32 %v8209_v51, %v1169_v26  ;;  %v8213_v19 = vld [vmem:[#allocation66_spill] sm:$0xff]  ;;  %s6535_s14 = sld [smem:[#allocation9 + $0x7b]] }
 0x269   : > { %v6350_v55 = vpop.permute.xlu2 %2169  ;;  %v1184_v25 = vadd.f32 %v8210_v11, %v1128_v45  ;;  %v1253_v58 = vadd.f32 %v8211_v18, %v1197_v42  ;;  %v1304_v40 = vmul.f32 %v6320_v56, %v1302_v17  ;;  %v1280_v57 = vadd.f32 %v1278_v34, %v1254_v50  ;;  %v8214_v34 = vld [vmem:[#allocation78_spill] sm:$0xff] }
 0x26a   : > { %v1372_v28 = vadd.f32 %v8212_v35, %v1340_v16  ;;  %v1349_v37 = vmul.f32 %v4768_v54, %v1348_v30  ;;  %v1325_v36 = vadd.f32 %v1323_v21, %v1299_v8  ;;  %v1316_v27 = vstv %s6375_s15  ;;  %s6545_s15 = sld [smem:[#allocation9 + $0x33]] }
 0x26b   : > { %v1287_v38 = vadd.f32 %v1285_v53, %v1261_v15  ;;  %v1272_v2 = vmul.f32 %v6297_v5, %v1270_v62  ;;  %v1240_v44 = vadd.f32 %v8213_v19, %v1184_v25  ;;  %v1328_v45 = vstv %s6381_s21  ;;  %s6554_s21 = sld [smem:[#allocation9 + $0x69]] }
 0x26c   : > { %v1268_v42 = vadd.f32 %v1266_v4, %v1226_v32  ;;  %v1291_v26 = vmul.f32 %v4765_v60, %v1290_v24  ;;  %v1267_v59 = vadd.f32 %v1265_v43, %v1225_v20  ;;  %v1428_v50 = vadd.f32 %v8214_v34, %v1372_v28  ;;  %v8215_v24 = vld [vmem:[#allocation88_spill] sm:$0xff]  ;;  %v8216_v28 = vld [vmem:[#allocation65_spill] sm:$0xff] }
 0x26d   : > { %v1303_v16 = vmul.f32 %v4765_v60, %v1302_v17  ;;  %v1279_v51 = vadd.f32 %v1277_v9, %v1253_v58  ;;  %v1306_v8 = vadd.f32 %v1304_v40, %v1280_v57  ;;  %v1330_v21 = vmul.f32 %v6344_v10, %v1328_v45 }
 0x26e   : > { %v1351_v5 = vadd.f32 %v1349_v37, %v1325_v36  ;;  %v1337_v62 = vmul.f32 %v4768_v54, %v1336_v61  ;;  %v1318_v4 = vmul.f32 %v6344_v10, %v1316_v27  ;;  %v1484_v32 = vadd.f32 %v8215_v24, %v1428_v50 }
 0x26f   : > { %v1298_v60 = vmul.f32 %v6320_v56, %v1296_v13  ;;  %v1274_v17 = vadd.f32 %v1272_v2, %v1240_v44  ;;  %v1313_v9 = vadd.f32 %v6362_v52, %v1287_v38  ;;  %v1342_v20 = vstv %s6404_s22  ;;  %v8217_v52 = vld [vmem:[#allocation86_spill] sm:$0xff]  ;;  %v8218_v44 = vld [vmem:[#allocation81_spill] sm:$0xff]  ;;  %s6572_s22 = sld [smem:[#allocation9 + $0x84]] }
 0x270   : > { %v6391_v22 = vpop.permute.xlu1 %2115  ;;  %v6393_v0 = vpop.permute.xlu0 %2113  ;;  %v1294_v11 = vadd.f32 %v1292_v1, %v1268_v42  ;;  %v1293_v25 = vadd.f32 %v1291_v26, %v1267_v59  ;;  %v1354_v18 = vstv %s6408_s29  ;;  %v1317_v58 = vmul.f32 %v6359_v33, %v1316_v27  ;;  %v8220_v26 = vld [vmem:[#allocation69_spill] sm:$0xff]  ;;  %s6581_s29 = sld [smem:[#allocation9 + $0x3c]] }
 0x271   : > { %v6399_v23 = vpop.permute.xlu2 %2185  ;;  %v1305_v61 = vadd.f32 %v1303_v16, %v1279_v51  ;;  %v1356_v40 = vmul.f32 %v6368_v41, %v1354_v18  ;;  %v1332_v57 = vadd.f32 %v1330_v21, %v1306_v8  ;;  %v1329_v35 = vmul.f32 %v6359_v33, %v1328_v45  ;;  %v8219_v33 = vld [vmem:[#allocation102_spill] sm:$0xff]  ;;  %v8222_v21 = vld [vmem:[#allocation112_spill] sm:$0xff] }
 0x272   : > { %v1399_v56 = vadd.f32 %v8216_v28, %v1351_v5  ;;  %v1344_v13 = vmul.f32 %v6368_v41, %v1342_v20  ;;  %v1540_v37 = vadd.f32 %v8217_v52, %v1484_v32  ;;  %v1300_v36 = vadd.f32 %v1298_v60, %v1274_v17  ;;  %v8224_v32 = vld [vmem:[#allocation79_spill] sm:$0xff]  ;;  %v8229_v28 = vld [vmem:[#allocation110_spill] sm:$0xff]  ;;  %v8231_v52 = vld [vmem:[#allocation77_spill] sm:$0xff] }
 0x273   : > { %v1339_v1 = vadd.f32 %v1337_v62, %v1313_v9  ;;  %v1343_v38 = vmul.f32 %v4768_v54, %v1342_v20  ;;  %v1324_v27 = vmul.f32 %v6344_v10, %v1322_v31  ;;  %v1320_v2 = vadd.f32 %v1318_v4, %v1294_v11  ;;  %v8221_v10 = vld [vmem:[#allocation91_spill] sm:$0xff]  ;;  %v8225_v9 = vld [vmem:[#allocation68_spill] sm:$0xff] }
 0x274   : > { %v1319_v19 = vadd.f32 %v1317_v58, %v1293_v25  ;;  %v1455_v42 = vadd.f32 %v8218_v44, %v1399_v56  ;;  %v1596_v45 = vadd.f32 %v8219_v33, %v1540_v37  ;;  %v1358_v34 = vadd.f32 %v1356_v40, %v1332_v57  ;;  %v8228_v57 = vld [vmem:[#allocation89_spill] sm:$0xff]  ;;  %v6485_v44 = vld [vmem:[#allocation2 + $0x11] sm:$0xff]  ;;  %v8235_v33 = vld [vmem:[#allocation126_spill] sm:$0xff] }
 0x275   : > { %v1371_v59 = vadd.f32 %v8220_v26, %v1339_v1  ;;  %v1355_v50 = vmul.f32 %v4768_v54, %v1354_v18  ;;  %v1331_v16 = vadd.f32 %v1329_v35, %v1305_v61  ;;  %v1326_v4 = vadd.f32 %v1324_v27, %v1300_v36  ;;  %v8226_v18 = vld [vmem:[#allocation72_spill] sm:$0xff]  ;;  %v8227_v61 = vld [vmem:[#allocation73_spill] sm:$0xff] }
 0x276   : > { %v1511_v31 = vadd.f32 %v8221_v10, %v1455_v42  ;;  %v1652_v5 = vadd.f32 %v8222_v21, %v1596_v45  ;;  %v1350_v24 = vmul.f32 %v6368_v41, %v1348_v30  ;;  %v1346_v54 = vadd.f32 %v1344_v13, %v1320_v2  ;;  %v8230_v30 = vld [vmem:[#allocation75_spill] sm:$0xff]  ;;  %v8232_v36 = vld [vmem:[#allocation84_spill] sm:$0xff]  ;;  %v8234_v2 = vld [vmem:[#allocation105_spill] sm:$0xff] }
 0x277   : > { %v1427_v60 = vadd.f32 %v8224_v32, %v1371_v59  ;;  %v1345_v17 = vadd.f32 %v1343_v38, %v1319_v19  ;;  %v1414_v20 = vadd.f32 %v8225_v9, %v1358_v34  ;;  %v1357_v11 = vadd.f32 %v1355_v50, %v1331_v16  ;;  %v8233_v38 = vld [vmem:[#allocation82_spill] sm:$0xff]  ;;  %v8236_v26 = vld [vmem:[#allocation76_spill] sm:$0xff]  ;;  %v8237_v34 = vld [vmem:[#allocation93_spill] sm:$0xff] }
 0x278   : > { %v6424_v53 = vpop.permute.xlu1 %2141  ;;  %v6426_v15 = vpop.permute.xlu0 %2129  ;;  %v1810_v25 = vstv %s6443_s8  ;;  %v1386_v58 = vadd.f32 %v8226_v18, %v1346_v54  ;;  %v1567_v35 = vadd.f32 %v8228_v57, %v1511_v31  ;;  %v1708_v41 = vadd.f32 %v8229_v28, %v1652_v5  ;;  %v8238_v16 = vld [vmem:[#allocation94_spill] sm:$0xff]  ;;  %v8242_v32 = vld [vmem:[#allocation85_spill] sm:$0xff]  ;;  %v8243_v54 = vld [vmem:[#allocation115_spill] sm:$0xff]  ;;  %s6595_s8 = sld [smem:[#allocation9 + $0x8d]] }
 0x279   : > { %v6432_v43 = vpop.permute.xlu2 %2211  ;;  %v1385_v40 = vadd.f32 %v8227_v61, %v1345_v17  ;;  %v1413_v56 = vadd.f32 %v8230_v30, %v1357_v11  ;;  %v1352_v13 = vadd.f32 %v1350_v24, %v1326_v4  ;;  %v1483_v37 = vadd.f32 %v8231_v52, %v1427_v60  ;;  %v8241_v4 = vld [vmem:[#allocation71_spill] sm:$0xff]  ;;  %v8245_v18 = vld [vmem:[#allocation80_spill] sm:$0xff] }
 0x27a   : > { %v1470_v1 = vadd.f32 %v8232_v36, %v1414_v20  ;;  %v1442_v27 = vadd.f32 %v8233_v38, %v1386_v58  ;;  %v1623_v19 = vadd.f32 %v8234_v2, %v1567_v35  ;;  %v1812_v42 = vmul.f32 %v6485_v44, %v1810_v25  ;;  %v8244_v20 = vld [vmem:[#allocation103_spill] sm:$0xff] }
 0x27b   : > { %v1764_v45 = vadd.f32 %v8235_v33, %v1708_v41  ;;  %v1400_v59 = vadd.f32 %v8236_v26, %v1352_v13  ;;  %v1539_v50 = vadd.f32 %v8237_v34, %v1483_v37  ;;  %v1836_v31 = vstv %s6454_s17  ;;  %v8246_v61 = vld [vmem:[#allocation87_spill] sm:$0xff]  ;;  %v8247_v41 = vld [vmem:[#allocation74_spill] sm:$0xff]  ;;  %v8254_v26 = vld [vmem:[#allocation108_spill] sm:$0xff]  ;;  %s6618_s17 = sld [smem:[#allocation9 + $0x45]] }
 0x27c   : > { %v1526_v10 = vadd.f32 %v8238_v16, %v1470_v1  ;;  %v1441_v24 = vadd.f32 %v8241_v4, %v1385_v40  ;;  %v1469_v60 = vadd.f32 %v8242_v32, %v1413_v56  ;;  %v1679_v17 = vadd.f32 %v8243_v54, %v1623_v19  ;;  %v6509_v35 = vld [vmem:[#allocation2 + $0x31] sm:$0xff]  ;;  %v8252_v19 = vld [vmem:[#allocation113_spill] sm:$0xff] }
 0x27d   : > { %v1595_v11 = vadd.f32 %v8244_v20, %v1539_v50  ;;  %v1498_v58 = vadd.f32 %v8245_v18, %v1442_v27  ;;  %v1838_v40 = vmul.f32 %v6509_v35, %v1836_v31  ;;  %v1814_v28 = vadd.f32 %v1812_v42, %v1764_v45  ;;  %v8248_v56 = vld [vmem:[#allocation92_spill] sm:$0xff]  ;;  %v8249_v37 = vld [vmem:[#allocation83_spill] sm:$0xff]  ;;  %v8251_v27 = vld [vmem:[#allocation97_spill] sm:$0xff] }
 0x27e   : > { %v1497_v57 = vadd.f32 %v8246_v61, %v1441_v24  ;;  %v1456_v30 = vadd.f32 %v8247_v41, %v1400_v59  ;;  %v1582_v13 = vadd.f32 %v8248_v56, %v1526_v10  ;;  %v1862_v52 = vstv %s6470_s1  ;;  %v8250_v1 = vld [vmem:[#allocation96_spill] sm:$0xff]  ;;  %v8253_v42 = vld [vmem:[#allocation101_spill] sm:$0xff]  ;;  %v6529_v10 = vld [vmem:[#allocation2 + $0x9] sm:$0xff]  ;;  %s6653_s1 = sld [smem:[#allocation10]] }
 0x27f   : > { %v1525_v36 = vadd.f32 %v8249_v37, %v1469_v60  ;;  %v1554_v38 = vadd.f32 %v8250_v1, %v1498_v58  ;;  %v1735_v33 = vadd.f32 %v8252_v19, %v1679_v17  ;;  %v1651_v45 = vadd.f32 %v8253_v42, %v1595_v11  ;;  %v8255_v24 = vld [vmem:[#allocation129_spill] sm:$0xff]  ;;  %v6537_v60 = vld [vmem:[#allocation2 + $0x51] sm:$0xff]  ;;  %v8256_v17 = vld [vmem:[#allocation106_spill] sm:$0xff] }
 0x280   : > { %v6456_v51 = vpop.permute.xlu1 %2157  ;;  %v6458_v8 = vpop.permute.xlu0 %2155  ;;  %v1553_v2 = vadd.f32 %v8251_v27, %v1497_v57  ;;  %v1638_v59 = vadd.f32 %v8254_v26, %v1582_v13  ;;  %v8012_v34 = vstv %s6476_s18  ;;  %v8015_v50 = vstv %s6481_s2  ;;  %v8257_v11 = vld [vmem:[#allocation117_spill] sm:$0xff]  ;;  %v8258_v58 = vld [vmem:[#allocation118_spill] sm:$0xff]  ;;  %v8260_v56 = vld [vmem:[#allocation95_spill] sm:$0xff] }
 0x281   : > { %v6462_v62 = vpop.permute.xlu2 %2227  ;;  %v1840_v16 = vadd.f32 %v1838_v40, %v1814_v28  ;;  %v1823_v4 = vmul.f32 %v6529_v10, %v8012_v34  ;;  %v1791_v32 = vadd.f32 %v8255_v24, %v1735_v33  ;;  %v1864_v54 = vmul.f32 %v6537_v60, %v1862_v52  ;;  %v8259_v28 = vld [vmem:[#allocation90_spill] sm:$0xff]  ;;  %v8261_v37 = vld [vmem:[#allocation99_spill] sm:$0xff]  ;;  %v8264_v24 = vld [vmem:[#allocation100_spill] sm:$0xff] }
 0x282   : > { %8223 = vst [vmem:[#allocation35_spill] sm:$0xff] %v6462_v62  ;;  %v1610_v20 = vadd.f32 %v8256_v17, %v1554_v38  ;;  %v1707_v18 = vadd.f32 %v8257_v11, %v1651_v45  ;;  %v1694_v61 = vadd.f32 %v8258_v58, %v1638_v59  ;;  %v1512_v41 = vadd.f32 %v8259_v28, %v1456_v30  ;;  %v8263_v33 = vld [vmem:[#allocation127_spill] sm:$0xff] }
 0x283   : > { %v1609_v13 = vadd.f32 %v8260_v56, %v1553_v2  ;;  %v1581_v1 = vadd.f32 %v8261_v37, %v1525_v36  ;;  %v8011_v27 = vstv %s6505_s16  ;;  %v1811_v19 = vmul.f32 %v6529_v10, %v1810_v25  ;;  %v6566_v30 = vld [vmem:[#allocation2 + $0x29] sm:$0xff]  ;;  %v8265_v25 = vld [vmem:[#allocation104_spill] sm:$0xff] }
 0x284   : > { %v1763_v42 = vadd.f32 %v8263_v33, %v1707_v18  ;;  %v1890_v45 = vmul.f32 %v8015_v50, %v5993_v46  ;;  %v1849_v36 = vmul.f32 %v6566_v30, %v8011_v27  ;;  %v1825_v2 = vadd.f32 %v1823_v4, %v1791_v32  ;;  %v8266_v18 = vld [vmem:[#allocation116_spill] sm:$0xff]  ;;  %v8267_v28 = vld [vmem:[#allocation111_spill] sm:$0xff]  ;;  %v8279_v50 = vld [vmem:[#allocation134_spill] sm:$0xff] }
 0x285   : > { %v8013_v26 = vstv %s6512_s13  ;;  %v1866_v59 = vadd.f32 %v1864_v54, %v1840_v16  ;;  %v1568_v17 = vadd.f32 %v8264_v24, %v1512_v41  ;;  %v1666_v11 = vadd.f32 %v8265_v25, %v1610_v20  ;;  %v6583_v4 = vld [vmem:[#allocation2 + $0x49] sm:$0xff]  ;;  %v8268_v32 = vld [vmem:[#allocation120_spill] sm:$0xff]  ;;  %v8270_v24 = vld [vmem:[#allocation121_spill] sm:$0xff] }
 0x286   : > { %v1750_v58 = vadd.f32 %v8266_v18, %v1694_v61  ;;  %v8010_v46 = vstv %s6517_s20  ;;  %v1665_v56 = vadd.f32 %v8267_v28, %v1609_v13  ;;  %v1816_v37 = vstv %s6523_s23  ;;  %v8269_v61 = vld [vmem:[#allocation132_spill] sm:$0xff]  ;;  %s6751_s23 = sld [smem:[#allocation12 + $0x25]] }
 0x287   : > { %v1837_v33 = vmul.f32 %v6566_v30, %v1836_v31  ;;  %v1875_v16 = vmul.f32 %v6583_v4, %v8010_v46  ;;  %v1722_v54 = vadd.f32 %v8268_v32, %v1666_v11  ;;  %v1813_v41 = vadd.f32 %v1811_v19, %v1763_v42  ;;  %v8271_v46 = vld [vmem:[#allocation98_spill] sm:$0xff]  ;;  %v8272_v11 = vld [vmem:[#allocation109_spill] sm:$0xff] }
 0x288   : > { %v6495_v21 = vpop.permute.xlu1 %2183  ;;  %v6497_v5 = vpop.permute.xlu0 %2171  ;;  %v1830_v20 = vmul.f32 %v6485_v44, %v8013_v26  ;;  %v1806_v13 = vadd.f32 %v8269_v61, %v1750_v58  ;;  %v1721_v25 = vadd.f32 %v8270_v24, %v1665_v56  ;;  %v1851_v31 = vadd.f32 %v1849_v36, %v1825_v2  ;;  %v8273_v42 = vld [vmem:[#allocation130_spill] sm:$0xff]  ;;  %v8274_v61 = vld [vmem:[#allocation136_spill] sm:$0xff] }
 0x289   : > { %8239 = vst [vmem:[#allocation54_spill] sm:$0xff] %v6495_v21  ;;  %v6502_v9 = vpop.permute.xlu2 %2253  ;;  %v8014_v18 = vstv %s6535_s14  ;;  %v1892_v28 = vadd.f32 %v1890_v45, %v1866_v59  ;;  %v1624_v27 = vadd.f32 %v8271_v46, %v1568_v17  ;;  %v1637_v32 = vadd.f32 %v8272_v11, %v1581_v1  ;;  %v8276_v11 = vld [vmem:[#allocation119_spill] sm:$0xff] }
 0x28a   : > { %8240 = vst [vmem:[#allocation22_spill] sm:$0xff] %v6497_v5  ;;  %v1818_v19 = vmul.f32 %v6485_v44, %v1816_v37  ;;  %v1778_v34 = vadd.f32 %v8273_v42, %v1722_v54  ;;  %v1817_v36 = vmul.f32 %v6529_v10, %v1816_v37  ;;  %v1842_v2 = vstv %s6545_s15  ;;  %s6760_s15 = sld [smem:[#allocation12 + $0x6d]] }
 0x28b   : > { %v1924_v24 = vadd.f32 %v8274_v61, %v1892_v28  ;;  %v8016_v45 = vstv %s6554_s21  ;;  %v1839_v1 = vadd.f32 %v1837_v33, %v1813_v41  ;;  %v1863_v17 = vmul.f32 %v6583_v4, %v1862_v52  ;;  %v6621_v28 = vld [vmem:[#allocation2 + $0x69] sm:$0xff] }
 0x28c   : > { %v1856_v46 = vmul.f32 %v6509_v35, %v8014_v18  ;;  %v1832_v54 = vadd.f32 %v1830_v20, %v1806_v13  ;;  %v1777_v42 = vadd.f32 %v8276_v11, %v1721_v25  ;;  %v1901_v33 = vmul.f32 %v6621_v28, %v8016_v45  ;;  %v8277_v18 = vld [vmem:[#allocation107_spill] sm:$0xff]  ;;  %v8278_v13 = vld [vmem:[#allocation114_spill] sm:$0xff] }
 0x28d   : > { %v1877_v41 = vadd.f32 %v1875_v16, %v1851_v31  ;;  %v1843_v52 = vmul.f32 %v6566_v30, %v1842_v2  ;;  %v1844_v61 = vmul.f32 %v6509_v35, %v1842_v2  ;;  %v1820_v26 = vadd.f32 %v1818_v19, %v1778_v34 }
 0x28e   : > { %v1693_v20 = vadd.f32 %v8277_v18, %v1637_v32  ;;  %v1680_v25 = vadd.f32 %v8278_v13, %v1624_v27  ;;  %v1868_v11 = vstv %s6581_s29  ;;  %v1980_v37 = vadd.f32 %v8279_v50, %v1924_v24  ;;  %v8282_v18 = vld [vmem:[#allocation123_spill] sm:$0xff]  ;;  %v8283_v27 = vld [vmem:[#allocation124_spill] sm:$0xff]  ;;  %s6769_s29 = sld [smem:[#allocation12 + $0x2e]] }
 0x28f   : > { %v1865_v5 = vadd.f32 %v1863_v17, %v1839_v1  ;;  %v1858_v21 = vadd.f32 %v1856_v46, %v1832_v54  ;;  %v8281_v45 = vstv %s6572_s22  ;;  %v1819_v31 = vadd.f32 %v1817_v36, %v1777_v42  ;;  %v8286_v54 = vld [vmem:[#allocation133_spill] sm:$0xff] }
 0x290   : > { %v6547_v57 = vpop.permute.xlu1 %2199  ;;  %v6549_v40 = vpop.permute.xlu0 %2197  ;;  %v1882_v16 = vmul.f32 %v6537_v60, %v8281_v45  ;;  %v1903_v2 = vadd.f32 %v1901_v33, %v1877_v41  ;;  %v2036_v34 = vadd.f32 %v6232_v63, %v1980_v37  ;;  %v1749_v32 = vadd.f32 %v8282_v18, %v1693_v20  ;;  %v8285_v45 = vld [vmem:[#allocation139_spill] sm:$0xff]  ;;  %v8288_v18 = vld [vmem:[#allocation122_spill] sm:$0xff] }
 0x291   : > { %v6556_v38 = vpop.permute.xlu2 %2269  ;;  %v1736_v19 = vadd.f32 %v8283_v27, %v1680_v25  ;;  %v1846_v13 = vadd.f32 %v1844_v61, %v1820_v26  ;;  %v1870_v50 = vmul.f32 %v6537_v60, %v1868_v11  ;;  %v8284_v1 = vstv %s6512_s13  ;;  %v4776_v26 = vld [vmem:[#allocation2 + $0x71] sm:$0xff]  ;;  %s6741_s13 = sld [smem:[#allocation12 + $0x36]] }
 0x292   : > { %8262 = vst [vmem:[#allocation24_spill] sm:$0xff] %v6556_v38  ;;  %v1906_v38 = vstv %s6595_s8  ;;  %v1829_v36 = vmul.f32 %v6529_v10, %v8284_v1  ;;  %v1951_v17 = vadd.f32 %v8285_v45, %v1903_v2  ;;  %v2092_v63 = vadd.f32 %v6340_v7, %v2036_v34  ;;  %v8291_v1 = vld [vmem:[#allocation125_spill] sm:$0xff]  ;;  %s6773_s8 = sld [smem:[#allocation12 + $0x2d]] }
 0x293   : > { %v1805_v42 = vadd.f32 %v8286_v54, %v1749_v32  ;;  %v1884_v37 = vadd.f32 %v1882_v16, %v1858_v21  ;;  %v1908_v33 = vmul.f32 %v4776_v26, %v1906_v38  ;;  %v1845_v41 = vadd.f32 %v1843_v52, %v1819_v31  ;;  %v8290_v16 = vld [vmem:[#allocation137_spill] sm:$0xff] }
 0x294   : > { %v1894_v61 = vstv %s6618_s17  ;;  %v1869_v20 = vmul.f32 %v6583_v4, %v1868_v11  ;;  %v8287_v10 = vstv %s6476_s18  ;;  %v1792_v27 = vadd.f32 %v8288_v18, %v1736_v19  ;;  %s6685_s18 = sld [smem:[#allocation10 + $0x2]] }
 0x295   : > { %v1824_v2 = vmul.f32 %v6485_v44, %v8287_v10  ;;  %v1896_v7 = vmul.f32 %v4776_v26, %v1894_v61  ;;  %v2007_v34 = vadd.f32 %v8290_v16, %v1951_v17  ;;  %v2148_v32 = vadd.f32 %v6301_v14, %v2092_v63  ;;  %v8293_v10 = vld [vmem:[#allocation141_spill] sm:$0xff]  ;;  %v8294_v63 = vld [vmem:[#allocation142_spill] sm:$0xff]  ;;  %v8299_v16 = vld [vmem:[#allocation128_spill] sm:$0xff]  ;;  %s6777_s17 = sld [smem:[#allocation12 + $0x48]] }
 0x296   : > { %v8292_v31 = vstv %s6535_s14  ;;  %v1831_v45 = vadd.f32 %v1829_v36, %v1805_v42  ;;  %v1910_v54 = vadd.f32 %v1908_v33, %v1884_v37  ;;  %v1895_v44 = vmul.f32 %v6621_v28, %v1894_v61  ;;  %v8295_v37 = vld [vmem:[#allocation21_spill] sm:$0xff]  ;;  %s6754_s14 = sld [smem:[#allocation12 + $0x49]] }
 0x297   : > { %v1855_v11 = vmul.f32 %v6566_v30, %v8292_v31  ;;  %v1871_v19 = vadd.f32 %v1869_v20, %v1845_v41  ;;  %vm359_vm10 = vcmp.ge.s32.totalorder %v8295_v37, 1  ;;  %vm360_vm11 = vcmp.lt.s32.totalorder %v8295_v37, 17  ;;  %v8301_v31 = vld [vmem:[#allocation149_spill] sm:$0xff] }
 0x298   : > { %v6601_v58 = vpop.permute.xlu1 %2225  ;;  %v6603_v56 = vpop.permute.xlu0 %2213  ;;  %v2360_v61 = vstv %s6653_s1  ;;  %vm361_vm12 = vmand %vm359_vm10, %vm360_vm11  ;;  %s6781_s1 = sld [smem:[#allocation12 + $0x51]] }
 0x299   : > { %v6609_v59 = vpop.permute.xlu2 %2295 }
 0x29a   : > { %8275 = vst [vmem:[#allocation25_spill] sm:$0xff] %v6609_v59  ;;  %v8280_v59 = vstv %s6481_s2  ;;  %s6713_s2 = sld [smem:[#allocation10 + $0x3]] }
 0x29b   : > { %v1889_v62 = vmul.f32 %v6621_v28, %v8280_v59 }
 0x29d   : > { %v1891_v46 = vadd.f32 %v1889_v62, %v1865_v5  ;;  %v1872_v62 = vadd.f32 %v1870_v50, %v1846_v13  ;;  %v8289_v5 = vstv %s6505_s16  ;;  %v2063_v13 = vadd.f32 %v6259_v6, %v2007_v34  ;;  %s6730_s16 = sld [smem:[#allocation10 + $0x1]] }
 0x29e   : > { %v1850_v21 = vmul.f32 %v6509_v35, %v8289_v5  ;;  %v2204_v35 = vadd.f32 %v6547_v57, %v2148_v32  ;;  %v1826_v50 = vadd.f32 %v1824_v2, %v1792_v27  ;;  %v1857_v6 = vadd.f32 %v1855_v11, %v1831_v45 }
 0x29f   : > { %v1923_v52 = vadd.f32 %v8291_v1, %v1891_v46  ;;  %v1898_v17 = vadd.f32 %v1896_v7, %v1872_v62  ;;  %v1966_v46 = vadd.f32 %v8294_v63, %v1910_v54  ;;  %v2119_v36 = vadd.f32 %v6393_v0, %v2063_v13  ;;  %v8298_v62 = vld [vmem:[#allocation140_spill] sm:$0xff]  ;;  %v4777_v54 = vld [vmem:[#allocation2] sm:$0xff] }
 0x2a0   : > { %v6643_v24 = vpop.permute.xlu1 %2241  ;;  %v6645_v59 = vpop.permute.xlu0 %2239  ;;  %v8296_v57 = vstv %s6572_s22  ;;  %v1852_v2 = vadd.f32 %v1850_v21, %v1826_v50  ;;  %v1897_v27 = vadd.f32 %v1895_v44, %v1871_v19  ;;  %v8297_v7 = vstv %s6517_s20  ;;  %v8303_v13 = vld [vmem:[#allocation144_spill] sm:$0xff]  ;;  %v8304_v50 = vld [vmem:[#allocation145_spill] sm:$0xff]  ;;  %s6746_s20 = sld [smem:[#allocation12 + $0x1]] }
 0x2a1   : > { %v2312_v25 = vpop.permute.xlu2 %2311  ;;  %v1979_v14 = vadd.f32 %v8293_v10, %v1923_v52  ;;  %v1881_v33 = vmul.f32 %v6583_v4, %v8296_v57  ;;  %v1876_v0 = vmul.f32 %v6537_v60, %v8297_v7  ;;  %v2022_v5 = vadd.f32 %v8298_v62, %v1966_v46  ;;  %s6767_s22 = sld [smem:[#allocation12 + $0xa]] }
 0x2a2   : > { %v1938_v34 = vadd.f32 %v8299_v16, %v1898_v17  ;;  %v1907_v32 = vmul.f32 %v6621_v28, %v1906_v38  ;;  %v2175_v4 = vadd.f32 %v6350_v55, %v2119_v36  ;;  %v6700_v44 = vsel %vm361_vm12, 1.0, %v4777_v54 }
 0x2a3   : > { %v2035_v41 = vadd.f32 %v6234_v12, %v1979_v14  ;;  %v1883_v52 = vadd.f32 %v1881_v33, %v1857_v6  ;;  %v2078_v60 = vadd.f32 %v6291_v29, %v2022_v5  ;;  %v8302_v28 = vstv %s6554_s21  ;;  %v8305_v33 = vld [vmem:[#allocation143_spill] sm:$0xff]  ;;  %s6762_s21 = sld [smem:[#allocation12 + $0x24]] }
 0x2a4   : > { %v2231_v45 = vadd.f32 %v6601_v58, %v2175_v4  ;;  %v1902_v55 = vmul.f32 %v4776_v26, %v8302_v28  ;;  %v1878_v19 = vadd.f32 %v1876_v0, %v1852_v2  ;;  %v8311_v28 = vld [vmem:[#allocation24_spill] sm:$0xff] }
 0x2a5   : > { %v2091_v11 = vadd.f32 %v8301_v31, %v2035_v41  ;;  %v2134_v58 = vadd.f32 %v6426_v15, %v2078_v60 }
 0x2a6   : > { %v1904_v57 = vadd.f32 %v1902_v55, %v1878_v19 }
 0x2a7   : > { %v2147_v29 = vadd.f32 %v6424_v53, %v2091_v11  ;;  %v2190_v53 = vadd.f32 %v6399_v23, %v2134_v58  ;;  %v8308_v23 = vld [vmem:[#allocation147_spill] sm:$0xff]  ;;  %v2372_v11 = vstv %s6713_s2  ;;  %s6814_s2 = sld [smem:[#allocation12 + $0x75]] }
 0x2a8   : > { %v6675_v18 = vpop.permute.xlu1 %2267  ;;  %v2256_v30 = vpop.permute.xlu0 %2255 }
 0x2a9   : > { %v2260_v42 = vadd.f32 %v2256_v30, %v2204_v35  ;;  %v2338_v1 = vpop.permute.xlu2 %2337  ;;  %v1994_v35 = vadd.f32 %v8303_v13, %v1938_v34  ;;  %v1909_v30 = vadd.f32 %v1907_v32, %v1883_v52  ;;  %v2203_v37 = vadd.f32 %v6549_v40, %v2147_v29  ;;  %v8309_v32 = vld [vmem:[#allocation148_spill] sm:$0xff] }
 0x2aa   : > { %v2246_v62 = vadd.f32 %v6643_v24, %v2190_v53 }
 0x2ab   : > { %v2316_v20 = vadd.f32 %v2312_v25, %v2260_v42  ;;  %v8300_v25 = vld [vmem:[#allocation135_spill] sm:$0xff]  ;;  %v2050_v36 = vadd.f32 %v6261_v47, %v1994_v35  ;;  %v2368_v42 = vstv %s6685_s18  ;;  %v8307_v47 = vld [vmem:[#allocation138_spill] sm:$0xff]  ;;  %v2259_v40 = vadd.f32 %v6502_v9, %v2203_v37  ;;  %s6811_s18 = sld [smem:[#allocation12 + $0x6c]] }
 0x2ac   : > { %v1937_v21 = vadd.f32 %v8300_v25, %v1897_v27  ;;  %v1952_v27 = vadd.f32 %v8307_v47, %v1904_v57  ;;  %v8312_v35 = vld [vmem:[#allocation54_spill] sm:$0xff] }
 0x2ad   : > { %v2362_v12 = vadd.f32 %v2360_v61, %v2316_v20  ;;  %v8306_v20 = vld [vmem:[#allocation131_spill] sm:$0xff]  ;;  %v2106_v7 = vadd.f32 %v6237_v48, %v2050_v36 }
 0x2ae   : > { %v1993_v17 = vadd.f32 %v8304_v50, %v1937_v21  ;;  %v1965_v2 = vadd.f32 %v8306_v20, %v1909_v30  ;;  %v2008_v4 = vadd.f32 %v8309_v32, %v1952_v27  ;;  %v2529_v27 = vstv %s6751_s23  ;;  %s6797_s23 = sld [smem:[#allocation12]] }
 0x2af   : > { %vm2376_vm13 = vcmp.ge.f32.partialorder %v2362_v12, 0.0  ;;  %v2378_v38 = vmul.f32 0.1, %v2362_v12 }
 0x2b0   : > { %v6706_v10 = vpop.permute.xlu1 %2283  ;;  %v2282_v14 = vpop.permute.xlu0 %2281  ;;  %v2049_v41 = vadd.f32 %v8305_v33, %v1993_v17  ;;  %v2021_v34 = vadd.f32 %v8308_v23, %v1965_v2  ;;  %v8313_v17 = vld [vmem:[#allocation22_spill] sm:$0xff] }
 0x2b1   : > { %v2380_v63 = vsel %vm2376_vm13, %v2362_v12, %v2378_v38  ;;  %v2287_v46 = vadd.f32 %v2282_v14, %v2231_v45  ;;  %v2354_v16 = vpop.permute.xlu2 %2353  ;;  %v2162_v12 = vadd.f32 %v6456_v51, %v2106_v7  ;;  %v8310_v45 = vld [vmem:[#allocation146_spill] sm:$0xff] }
 0x2b2   : > { %v2382_v26 = vmul.f32 %v6700_v44, %v2380_v63  ;;  %v2105_v0 = vadd.f32 %v6338_v49, %v2049_v41  ;;  %v2077_v25 = vadd.f32 %v6293_v3, %v2021_v34  ;;  %v2064_v54 = vadd.f32 %v8310_v45, %v2008_v4  ;;  %v8315_v41 = vld [vmem:[#allocation25_spill] sm:$0xff] }
 0x2b3   : > { %v2343_v6 = vadd.f32 %v2338_v1, %v2287_v46  ;;  %v2218_v21 = vadd.f32 %v6603_v56, %v2162_v12 }
 0x2b4   : > { %2384 = vst.msk [vmem:[#allocation3 + $0x10] sm:$0xff] %vm461_vm3, %v2382_v26  ;;  %v2161_v48 = vadd.f32 %v6458_v8, %v2105_v0  ;;  %v2133_v56 = vadd.f32 %v6265_v39, %v2077_v25  ;;  %v2364_v39 = vstv %s6730_s16  ;;  %s6785_s16 = sld [smem:[#allocation12 + $0x5a]] }
 0x2b5   : > { %v2369_v15 = vadd.f32 %v2368_v42, %v2343_v6  ;;  %v2274_v55 = vadd.f32 %v8311_v28, %v2218_v21  ;;  %v8314_v6 = vld [vmem:[#allocation35_spill] sm:$0xff]  ;;  %v2425_v21 = vstv %s6762_s21  ;;  %v2421_v28 = vstv %s6797_s23  ;;  %s8316_s21 = smov 127   ;;  %s8317_s23 = smov 126  }
 0x2b6   : > { %v2217_v8 = vadd.f32 %v6432_v43, %v2161_v48  ;;  %v2189_v50 = vadd.f32 %v8312_v35, %v2133_v56  ;;  %v2557_v56 = vstv %s6760_s15  ;;  %s4515_s15 = sld [smem:[#allocation12 + $0x7f]] }
 0x2b7   : > { %vm2396_vm14 = vcmp.ge.f32.partialorder %v2369_v15, 0.0  ;;  %v2398_v5 = vmul.f32 0.1, %v2369_v15 }
 0x2b8   : > { %v2310_v1 = vpop.permute.xlu1 %2309  ;;  %v2298_v52 = vpop.permute.xlu0 %2297  ;;  %v2273_v19 = vadd.f32 %v6675_v18, %v2217_v8  ;;  %v2245_v18 = vadd.f32 %v6645_v59, %v2189_v50  ;;  %v2445_v8 = vstv %s6773_s8  ;;  %s6848_s8 = sld [smem:[#allocation12 + $0x87]] }
 0x2b9   : > { %v2400_v49 = vsel %vm2396_vm14, %v2369_v15, %v2398_v5  ;;  %v2315_v9 = vadd.f32 %v2310_v1, %v2259_v40  ;;  %v2302_v24 = vadd.f32 %v2298_v52, %v2246_v62  ;;  %v2515_v15 = vstv %s6746_s20  ;;  %s6791_s20 = sld [smem:[#allocation12 + $0x3f]] }
 0x2ba   : > { %v2402_v31 = vmul.f32 %v6700_v44, %v2400_v49  ;;  %v2301_v53 = vadd.f32 %v8315_v41, %v2245_v18 }
 0x2bb   : > { %v2361_v60 = vadd.f32 %v2360_v61, %v2315_v9  ;;  %v2358_v51 = vadd.f32 %v2354_v16, %v2302_v24  ;;  %v2120_v61 = vadd.f32 %v6391_v22, %v2064_v54  ;;  %v2543_v9 = vstv %s6754_s14  ;;  %s6835_s14 = sld [smem:[#allocation12 + $0x1b]] }
 0x2bc   : > { %2405 = vst.msk [vmem:[#allocation3 + $0x48] sm:$0xff] %vm461_vm3, %v2402_v31  ;;  %v2471_v31 = vstv %s6741_s13  ;;  %s4513_s13 = sld [smem:[#allocation12 + $0x37]] }
 0x2bd   : > { %vm2375_vm15 = vcmp.ge.f32.partialorder %v2361_v60, 0.0  ;;  %v2377_v38 = vmul.f32 0.1, %v2361_v60  ;;  %v2374_v3 = vadd.f32 %v2372_v11, %v2358_v51  ;;  %v2176_v14 = vadd.f32 %v8313_v17, %v2120_v61 }
 0x2bf   : > { %v2379_v13 = vsel %vm2375_vm15, %v2361_v60, %v2377_v38  ;;  %vm2408_vm0 = vcmp.ge.f32.partialorder %v2374_v3, 0.0  ;;  %v2410_v43 = vmul.f32 0.1, %v2374_v3  ;;  %v2232_v57 = vadd.f32 %v8314_v6, %v2176_v14 }
 0x2c0   : > { %v2381_v29 = vmul.f32 %v6700_v44, %v2379_v13  ;;  %v2326_v58 = vpop.permute.xlu1 %2325  ;;  %v2324_v22 = vpop.permute.xlu0 %2323  ;;  %v2477_v60 = vstv %s6785_s16  ;;  %v2451_v38 = vstv %s6781_s1  ;;  %v2439_v13 = vstv %s6808_s0  ;;  %s6895_s0 = sld [smem:[#allocation12 + $0x52]] }
 0x2c1   : > { %v2412_v63 = vsel %vm2408_vm0, %v2374_v3, %v2410_v43  ;;  %v2330_v46 = vadd.f32 %v2326_v58, %v2274_v55  ;;  %v2329_v30 = vadd.f32 %v2324_v22, %v2273_v19  ;;  %v2288_v20 = vadd.f32 %v6706_v10, %v2232_v57  ;;  %s4520_s1 = sld [smem:[#allocation12 + $0x2]] }
 0x2c2   : > { %2383 = vst.msk [vmem:[#allocation3 + $0x8] sm:$0xff] %vm461_vm3, %v2381_v29  ;;  %v2414_v36 = vmul.f32 %v6700_v44, %v2412_v63  ;;  %v2465_v55 = vstv %s6804_s19  ;;  %v2571_v19 = vstv %s6767_s22  ;;  %v2585_v14 = vstv %s6769_s29  ;;  %s4514_s19 = sld [smem:[#allocation12 + $0x5b]] }
 0x2c3   : > { %v2366_v26 = vadd.f32 %v2364_v39, %v2330_v46  ;;  %v2365_v37 = vadd.f32 %v2364_v39, %v2329_v30  ;;  %v6840_v61 = vld [vmem:[#allocation3 + $0x47] sm:$0xff]  ;;  %v2497_v18 = vstv %s6791_s20  ;;  %s4516_s22 = sld [smem:[#allocation12 + $0x1c]] }
 0x2c4   : > { %2417 = vst.msk [vmem:[#allocation3 + $0x70] sm:$0xff] %vm461_vm3, %v2414_v36  ;;  %v2472_v29 = vmul.f32 %v2471_v31, %v6840_v61  ;;  %v2433_v36 = vstv %s6811_s18  ;;  %s4517_s29 = sld [smem:[#allocation12 + $0x40]] }
 0x2c5   : > { %vm2386_vm1 = vcmp.ge.f32.partialorder %v2366_v26, 0.0  ;;  %v2388_v33 = vmul.f32 0.1, %v2366_v26  ;;  %vm2385_vm2 = vcmp.ge.f32.partialorder %v2365_v37, 0.0  ;;  %v2387_v59 = vmul.f32 0.1, %v2365_v37 }
 0x2c6   : > { %s4519_s16 = sld [smem:[#allocation12 + $0x88]] }
 0x2c7   : > { %v2390_v2 = vsel %vm2386_vm1, %v2366_v26, %v2388_v33  ;;  %v2389_v47 = vsel %vm2385_vm2, %v2365_v37, %v2387_v59  ;;  %v2457_v26 = vstv %s6814_s2  ;;  %v2483_v37 = vstv %s6818_s3  ;;  %s6900_s3 = sld [smem:[#allocation12 + $0x76]] }
 0x2c8   : > { %v2392_v7 = vmul.f32 %v6700_v44, %v2390_v2  ;;  %v2391_v0 = vmul.f32 %v6700_v44, %v2389_v47  ;;  %v2352_v40 = vpop.permute.xlu1 %2351  ;;  %v2340_v62 = vpop.permute.xlu0 %2339  ;;  %v2491_v47 = vstv %s6835_s14  ;;  %s4521_s20 = sld [smem:[#allocation12 + $0x26]] }
 0x2c9   : > { %v2357_v5 = vadd.f32 %v2352_v40, %v2301_v53  ;;  %v2344_v16 = vadd.f32 %v2340_v62, %v2288_v20  ;;  %v6787_v23 = vld [vmem:[#allocation3 + $0xf] sm:$0xff]  ;;  %v6789_v10 = vld [vmem:[#allocation3 + $0x7] sm:$0xff]  ;;  %v2478_v40 = vmul.f32 %v2477_v60, %v6840_v61  ;;  %s4522_s18 = sld [smem:[#allocation12 + $0x4a]] }
 0x2ca   : > { %2395 = vst.msk [vmem:[#allocation3 + $0x30] sm:$0xff] %vm461_vm3, %v2392_v7  ;;  %v2517_v34 = vmul.f32 %v2515_v15, %v6787_v23  ;;  %v2530_v32 = vmul.f32 %v2529_v27, %v6789_v10  ;;  %v2516_v4 = vmul.f32 %v2515_v15, %v6789_v10  ;;  %v2544_v51 = vmul.f32 %v2543_v9, %v6789_v10  ;;  %s4523_s2 = sld [smem:[#allocation12 + $0x6e]] }
 0x2cb   : > { %2394 = vst.msk [vmem:[#allocation3 + $0x28] sm:$0xff] %vm461_vm3, %v2391_v0  ;;  %v2373_v12 = vadd.f32 %v2372_v11, %v2357_v5  ;;  %v2370_v1 = vadd.f32 %v2368_v42, %v2344_v16  ;;  %v2429_v11 = vstv %s6777_s17  ;;  %v2545_v45 = vmul.f32 %v2543_v9, %v6787_v23  ;;  %s4518_s17 = sld [smem:[#allocation12 + $0x64]] }
 0x2cc   : > { %2522 = vrot.lane.b32.xlu1 %v2517_v34, %s8019_s9  ;;  %2534 = vrot.lane.b32.xlu2 %v2530_v32, %s8019_s9  ;;  %v2531_v3 = vmul.f32 %v2529_v27, %v6787_v23  ;;  %v2426_v35 = vmul.f32 %v2425_v21, %v6789_v10  ;;  %v2431_v50 = vmul.f32 %v2429_v11, %v6787_v23  ;;  %v2509_v32 = vstv %s6848_s8  ;;  %s4524_s14 = sld [smem:[#allocation12 + $0xb]] }
 0x2cd   : > { %vm2407_vm4 = vcmp.ge.f32.partialorder %v2373_v12, 0.0  ;;  %v2409_v52 = vmul.f32 0.1, %v2373_v12  ;;  %vm2397_vm5 = vcmp.ge.f32.partialorder %v2370_v1, 0.0  ;;  %v2399_v48 = vmul.f32 0.1, %v2370_v1  ;;  %2520 = vrot.lane.b32.xlu0 %v2516_v4, %s8019_s9 }
 0x2ce   : > { %s6824_s9 = sld [smem:[#allocation12 + $0x63]]  ;;  %v2423_v39 = vmul.f32 %v2421_v28, %v6787_v23  ;;  %v2422_v58 = vmul.f32 %v2421_v28, %v6789_v10  ;;  %v2559_v41 = vmul.f32 %v2557_v56, %v6787_v23  ;;  %v2466_v27 = vmul.f32 %v2465_v55, %v6840_v61 }
 0x2cf   : > { %v2411_v42 = vsel %vm2407_vm4, %v2373_v12, %v2409_v52  ;;  %v2401_v49 = vsel %vm2397_vm5, %v2370_v1, %v2399_v48  ;;  %v2558_v7 = vmul.f32 %v2557_v56, %v6789_v10  ;;  %v2430_v62 = vmul.f32 %v2429_v11, %v6789_v10  ;;  %s4525_s8 = sld [smem:[#allocation12 + $0x2f]] }
 0x2d0   : > { %v2413_v24 = vmul.f32 %v6700_v44, %v2411_v42  ;;  %v2403_v25 = vmul.f32 %v6700_v44, %v2401_v49  ;;  %v2427_v5 = vmul.f32 %v2425_v21, %v6787_v23  ;;  %v2435_v34 = vmul.f32 %v2433_v36, %v6787_v23 }
 0x2d2   : > { %2416 = vst.msk [vmem:[#allocation3 + $0x68] sm:$0xff] %vm461_vm3, %v2413_v24  ;;  %v6829_v44 = vld [vmem:[#allocation3 + $0x27] sm:$0xff]  ;;  %v6831_v54 = vld [vmem:[#allocation3 + $0x2f] sm:$0xff] }
 0x2d3   : > { %2406 = vst.msk [vmem:[#allocation3 + $0x50] sm:$0xff] %vm461_vm3, %v2403_v25  ;;  %v2446_v43 = vmul.f32 %v2445_v8, %v6829_v44  ;;  %v2453_v17 = vmul.f32 %v2451_v38, %v6831_v54  ;;  %v2441_v46 = vmul.f32 %v2439_v13, %v6831_v54  ;;  %v2440_v30 = vmul.f32 %v2439_v13, %v6829_v44 }
 0x2d4   : > { %2548 = vrot.lane.b32.xlu1 %v2544_v51, %s8316_s21  ;;  %2550 = vrot.lane.b32.xlu2 %v2545_v45, %s8316_s21  ;;  %v2503_v57 = vstv %s6824_s9  ;;  %v2572_v53 = vmul.f32 %v2571_v19, %v6829_v44  ;;  %v2452_v0 = vmul.f32 %v2451_v38, %v6829_v44  ;;  %v2447_v16 = vmul.f32 %v2445_v8, %v6831_v54  ;;  %s4512_s9 = sld [smem:[#allocation12 + $0x13]] }
 0x2d5   : > { %2536 = vrot.lane.b32.xlu0 %v2531_v3, %s8316_s21  ;;  %v2448_v22 = vadd.f32 %v2446_v43, %v2426_v35  ;;  %v2455_v63 = vadd.f32 %v2453_v17, %v2431_v50  ;;  %v2443_v33 = vadd.f32 %v2441_v46, %v2423_v39  ;;  %v2442_v59 = vadd.f32 %v2440_v30, %v2422_v58 }
 0x2d6   : > { %v2586_v4 = vmul.f32 %v2585_v14, %v6829_v44  ;;  %v2454_v11 = vadd.f32 %v2452_v0, %v2430_v62  ;;  %v2449_v45 = vadd.f32 %v2447_v16, %v2427_v5  ;;  %v2587_v38 = vmul.f32 %v2585_v14, %v6831_v54 }
 0x2d7   : > { %v2474_v6 = vadd.f32 %v2472_v29, %v2448_v22  ;;  %v2468_v9 = vadd.f32 %v2466_v27, %v2442_v59  ;;  %v2459_v43 = vmul.f32 %v2457_v26, %v6831_v54  ;;  %v2573_v50 = vmul.f32 %v2571_v19, %v6831_v54 }
 0x2d8   : > { %v2480_v56 = vadd.f32 %v2478_v40, %v2454_v11  ;;  %v2458_v17 = vmul.f32 %v2457_v26, %v6829_v44  ;;  %v2434_v14 = vmul.f32 %v2433_v36, %v6789_v10  ;;  %v2484_v58 = vmul.f32 %v2483_v37, %v6840_v61 }
 0x2d9   : > { %v6874_v20 = vld [vmem:[#allocation3 + $0x6f] sm:$0xff]  ;;  %v6876_v2 = vld [vmem:[#allocation3 + $0x67] sm:$0xff]  ;;  %v2461_v39 = vadd.f32 %v2459_v43, %v2435_v34  ;;  %v2599_v30 = vstv %s6895_s0  ;;  %v2655_v27 = vstv %s4514_s19  ;;  %v2669_v5 = vstv %s4515_s15  ;;  %s4526_s0 = sld [smem:[#allocation12 + $0x53]] }
 0x2da   : > { %v6872_v15 = vld [vmem:[#allocation3 + $0x4f] sm:$0xff]  ;;  %v2498_v12 = vmul.f32 %v2497_v18, %v6876_v2  ;;  %v2505_v52 = vmul.f32 %v2503_v57, %v6874_v20  ;;  %v2493_v42 = vmul.f32 %v2491_v47, %v6874_v20  ;;  %v2492_v49 = vmul.f32 %v2491_v47, %v6876_v2  ;;  %s4528_s19 = sld [smem:[#allocation12 + $0x14]] }
 0x2db   : > { %v2479_v1 = vmul.f32 %v2477_v60, %v6872_v15  ;;  %v2467_v48 = vmul.f32 %v2465_v55, %v6872_v15  ;;  %v2504_v21 = vmul.f32 %v2503_v57, %v6876_v2  ;;  %v2473_v8 = vmul.f32 %v2471_v31, %v6872_v15  ;;  %s4532_s15 = sld [smem:[#allocation12 + $0x1d]] }
 0x2dc   : > { %2564 = vrot.lane.b32.xlu1 %v2559_v41, %s8316_s21  ;;  %2576 = vrot.lane.b32.xlu2 %v2572_v53, %s8316_s21  ;;  %v6902_v24 = vadd.f32 %v2498_v12, %v2474_v6  ;;  %v6905_v51 = vadd.f32 %v2492_v49, %v2468_v9  ;;  %v2499_v28 = vmul.f32 %v2497_v18, %v6874_v20  ;;  %v2613_v18 = vstv %s6900_s3  ;;  %s4527_s3 = sld [smem:[#allocation12 + $0x77]] }
 0x2dd   : > { %2562 = vrot.lane.b32.xlu0 %v2558_v7, %s8316_s21  ;;  %v2481_v25 = vadd.f32 %v2479_v1, %v2455_v63  ;;  %v2469_v60 = vadd.f32 %v2467_v48, %v2443_v33  ;;  %v2475_v13 = vadd.f32 %v2473_v8, %v2449_v45  ;;  %v2485_v35 = vmul.f32 %v2483_v37, %v6872_v15 }
 0x2de   : > { %v6921_v31 = vadd.f32 %v2504_v21, %v2480_v56  ;;  %v2510_v22 = vmul.f32 %v2509_v32, %v6876_v2  ;;  %v2460_v19 = vadd.f32 %v2458_v17, %v2434_v14  ;;  %v2511_v46 = vmul.f32 %v2509_v32, %v6874_v20 }
 0x2df   : > { %v6911_v3 = vadd.f32 %v2505_v52, %v2481_v25  ;;  %v6914_v55 = vadd.f32 %v2493_v42, %v2469_v60  ;;  %v6927_v29 = vadd.f32 %v2499_v28, %v2475_v13  ;;  %v2487_v63 = vadd.f32 %v2485_v35, %v2461_v39 }
 0x2e0   : > { %v2486_v36 = vadd.f32 %v2484_v58, %v2460_v19  ;;  %v2601_v57 = vmul.f32 %v2599_v30, %v6831_v54  ;;  %v2614_v33 = vmul.f32 %v2613_v18, %v6829_v44  ;;  %v2600_v37 = vmul.f32 %v2599_v30, %v6829_v44 }
 0x2e1   : > { %v6935_v26 = vadd.f32 %v2511_v46, %v2487_v63  ;;  %v2627_v59 = vstv %s4512_s9  ;;  %v2615_v47 = vmul.f32 %v2613_v18, %v6831_v54  ;;  %v2641_v7 = vstv %s4513_s13  ;;  %s4529_s9 = sld [smem:[#allocation12 + $0x38]] }
 0x2e2   : > { %v6937_v6 = vadd.f32 %v2510_v22, %v2486_v36  ;;  %v2628_v41 = vmul.f32 %v2627_v59, %v6840_v61  ;;  %v2629_v53 = vmul.f32 %v2627_v59, %v6872_v15  ;;  %v2643_v0 = vmul.f32 %v2641_v7, %v6872_v15  ;;  %s4530_s13 = sld [smem:[#allocation12 + $0x5c]] }
 0x2e3   : > { %v2656_v40 = vmul.f32 %v2655_v27, %v6840_v61  ;;  %v2642_v62 = vmul.f32 %v2641_v7, %v6840_v61  ;;  %v2670_v16 = vmul.f32 %v2669_v5, %v6840_v61  ;;  %v2671_v34 = vmul.f32 %v2669_v5, %v6872_v15 }
 0x2e4   : > { %2590 = vrot.lane.b32.xlu1 %v2586_v4, %s8316_s21  ;;  %2592 = vrot.lane.b32.xlu2 %v2587_v38, %s8316_s21  ;;  %v2657_v32 = vmul.f32 %v2655_v27, %v6872_v15  ;;  %v2683_v4 = vstv %s4516_s22  ;;  %v2697_v12 = vstv %s4517_s29  ;;  %s4531_s22 = sld [smem:[#allocation12 + $0x80]]  ;;  %vm4082_vm3 = vcmask 130048  }
 0x2e5   : > { %2578 = vrot.lane.b32.xlu0 %v2573_v50, %s8316_s21  ;;  %v2685_v1 = vmul.f32 %v2683_v4, %v6874_v20  ;;  %v2698_v52 = vmul.f32 %v2697_v12, %v6876_v2  ;;  %v2684_v48 = vmul.f32 %v2683_v4, %v6876_v2  ;;  %v2711_v42 = vstv %s4518_s17  ;;  %s4533_s29 = sld [smem:[#allocation12 + $0x41]] }
 0x2e6   : > { %v2712_v49 = vmul.f32 %v2711_v42, %v6876_v2  ;;  %v2713_v9 = vmul.f32 %v2711_v42, %v6874_v20  ;;  %v2699_v25 = vmul.f32 %v2697_v12, %v6874_v20  ;;  %v2725_v21 = vstv %s4519_s16  ;;  %s4534_s17 = sld [smem:[#allocation12 + $0x65]] }
 0x2e7   : > { %v2739_v11 = vstv %s4520_s1  ;;  %v2727_v60 = vmul.f32 %v2725_v21, %v6874_v20  ;;  %v2726_v8 = vmul.f32 %v2725_v21, %v6876_v2  ;;  %v2753_v38 = vstv %s4521_s20  ;;  %s4535_s1 = sld [smem:[#allocation12 + $0x89]] }
 0x2e8   : > { %v2740_v45 = vmul.f32 %v2739_v11, %v6789_v10  ;;  %v2754_v56 = vmul.f32 %v2753_v38, %v6789_v10  ;;  %v2755_v28 = vmul.f32 %v2753_v38, %v6787_v23  ;;  %v2741_v13 = vmul.f32 %v2739_v11, %v6787_v23  ;;  %s4552_s16 = sld [smem:[#allocation12 + $0x4]] }
 0x2e9   : > { %v2767_v35 = vstv %s4522_s18  ;;  %v2781_v50 = vstv %s4523_s2  ;;  %v2795_v22 = vstv %s4524_s14  ;;  %v2809_v30 = vstv %s4525_s8  ;;  %s4553_s20 = sld [smem:[#allocation12 + $0x28]] }
 0x2ea   : > { %v2769_v17 = vmul.f32 %v2767_v35, %v6787_v23  ;;  %v2782_v14 = vmul.f32 %v2781_v50, %v6789_v10  ;;  %v2768_v39 = vmul.f32 %v2767_v35, %v6789_v10  ;;  %v2796_v19 = vmul.f32 %v2795_v22, %v6829_v44  ;;  %s4554_s18 = sld [smem:[#allocation12 + $0x4c]] }
 0x2eb   : > { %v2797_v63 = vmul.f32 %v2795_v22, %v6831_v54  ;;  %v2783_v46 = vmul.f32 %v2781_v50, %v6787_v23  ;;  %v2823_v18 = vstv %s4526_s0  ;;  %v2811_v36 = vmul.f32 %v2809_v30, %v6831_v54  ;;  %s4555_s2 = sld [smem:[#allocation12 + $0x70]] }
 0x2ec   : > { %2606 = vrot.lane.b32.xlu1 %v2601_v57, %s8316_s21  ;;  %2618 = vrot.lane.b32.xlu2 %v2614_v33, %s8316_s21  ;;  %v2824_v57 = vmul.f32 %v2823_v18, %v6829_v44  ;;  %v2810_v33 = vmul.f32 %v2809_v30, %v6829_v44  ;;  %v2825_v27 = vmul.f32 %v2823_v18, %v6831_v54  ;;  %v2851_v5 = vstv %s4528_s19  ;;  %s4556_s14 = sld [smem:[#allocation12 + $0xd]] }
 0x2ed   : > { %2604 = vrot.lane.b32.xlu0 %v2600_v37, %s8316_s21  ;;  %v2879_v12 = vstv %s4530_s13  ;;  %v2893_v21 = vstv %s4531_s22  ;;  %s4557_s8 = sld [smem:[#allocation12 + $0x31]] }
 0x2ee   : > { %v2895_v11 = vmul.f32 %v2893_v21, %v6872_v15  ;;  %s4558_s0 = sld [smem:[#allocation12 + $0x55]] }
 0x2ef   : > { %s4561_s19 = sld [smem:[#allocation12 + $0x3a]] }
 0x2f0   : > { %s7172_s13 = sld [smem:[#allocation12 + $0x82]] }
 0x2f1   : > { %s7189_s22 = sld [smem:[#allocation12 + $0x1f]] }
 0x2f4   : > { %2632 = vrot.lane.b32.xlu1 %v2628_v41, %s8316_s21  ;;  %2634 = vrot.lane.b32.xlu2 %v2629_v53, %s8316_s21  ;;  %v2837_v41 = vstv %s4527_s3  ;;  %s4559_s3 = sld [smem:[#allocation12 + $0x79]] }
 0x2f5   : > { %2620 = vrot.lane.b32.xlu0 %v2615_v47, %s8316_s21  ;;  %v2838_v53 = vmul.f32 %v2837_v41, %v6829_v44  ;;  %v2839_v47 = vmul.f32 %v2837_v41, %v6831_v54  ;;  %v2853_v44 = vmul.f32 %v2851_v5, %v6872_v15  ;;  %v2852_v54 = vmul.f32 %v2851_v5, %v6840_v61 }
 0x2f6   : > { %v3081_v5 = vstv %s4553_s20  ;;  %s7258_s20 = sld [smem:[#allocation12 + $0xc]] }
 0x2fc   : > { %2648 = vrot.lane.b32.xlu1 %v2643_v0, %s8316_s21  ;;  %2660 = vrot.lane.b32.xlu2 %v2656_v40, %s8316_s21 }
 0x2fd   : > { %2646 = vrot.lane.b32.xlu0 %v2642_v62, %s8316_s21  ;;  %v2865_v62 = vstv %s4529_s9  ;;  %s7143_s9 = sld [smem:[#allocation12 + $0x16]] }
 0x304   : > { %2674 = vrot.lane.b32.xlu1 %v2670_v16, %s8316_s21  ;;  %2676 = vrot.lane.b32.xlu2 %v2671_v34, %s8316_s21  ;;  %v2866_v16 = vmul.f32 %v2865_v62, %v6840_v61 }
 0x305   : > { %2662 = vrot.lane.b32.xlu0 %v2657_v32, %s8316_s21 }
 0x30c   : > { %2690 = vrot.lane.b32.xlu1 %v2685_v1, %s8316_s21  ;;  %2702 = vrot.lane.b32.xlu2 %v2698_v52, %s8316_s21  ;;  %v2880_v1 = vmul.f32 %v2879_v12, %v6840_v61  ;;  %v2881_v52 = vmul.f32 %v2879_v12, %v6872_v15 }
 0x30d   : > { %2688 = vrot.lane.b32.xlu0 %v2684_v48, %s8316_s21  ;;  %v2867_v48 = vmul.f32 %v2865_v62, %v6872_v15 }
 0x314   : > { %2716 = vrot.lane.b32.xlu1 %v2712_v49, %s8316_s21  ;;  %2718 = vrot.lane.b32.xlu2 %v2713_v9, %s8316_s21 }
 0x315   : > { %2704 = vrot.lane.b32.xlu0 %v2699_v25, %s8316_s21  ;;  %v2907_v25 = vstv %s4532_s15  ;;  %s4562_s15 = sld [smem:[#allocation12 + $0x5e]] }
 0x31c   : > { %2732 = vrot.lane.b32.xlu1 %v2727_v60, %s8316_s21  ;;  %2744 = vrot.lane.b32.xlu2 %v2740_v45, %s8317_s23  ;;  %v2908_v60 = vmul.f32 %v2907_v25, %v6876_v2  ;;  %v2894_v45 = vmul.f32 %v2893_v21, %v6840_v61  ;;  %v2909_v61 = vmul.f32 %v2907_v25, %v6874_v20 }
 0x31d   : > { %2730 = vrot.lane.b32.xlu0 %v2726_v8, %s8316_s21 }
 0x324   : > { %2758 = vrot.lane.b32.xlu1 %v2754_v56, %s8317_s23  ;;  %2760 = vrot.lane.b32.xlu2 %v2755_v28, %s8317_s23  ;;  %v2921_v28 = vstv %s4533_s29  ;;  %s7218_s29 = sld [smem:[#allocation12 + $0x43]] }
 0x325   : > { %2746 = vrot.lane.b32.xlu0 %v2741_v13, %s8317_s23  ;;  %v2922_v15 = vmul.f32 %v2921_v28, %v6876_v2  ;;  %v2923_v13 = vmul.f32 %v2921_v28, %v6874_v20 }
 0x326   : > { %v6987_v43 = vpop.permute.xlu2 %2534 }
 0x32c   : > { %2774 = vrot.lane.b32.xlu1 %v2769_v17, %s8317_s23  ;;  %2786 = vrot.lane.b32.xlu2 %v2782_v14, %s8317_s23  ;;  %v2935_v14 = vstv %s4534_s17  ;;  %s7226_s17 = sld [smem:[#allocation12 + $0x67]] }
 0x32d   : > { %2772 = vrot.lane.b32.xlu0 %v2768_v39, %s8317_s23  ;;  %v2949_v39 = vstv %s4535_s1  ;;  %v2937_v22 = vmul.f32 %v2935_v14, %v6874_v20  ;;  %s7248_s1 = sld [smem:[#allocation12 + $0x8b]] }
 0x32e   : > { %v6995_v58 = vpop.permute.xlu2 %2550 }
 0x334   : > { %2800 = vrot.lane.b32.xlu1 %v2796_v19, %s8317_s23  ;;  %2802 = vrot.lane.b32.xlu2 %v2797_v63, %s8317_s23  ;;  %v2950_v19 = vmul.f32 %v2949_v39, %v6876_v2  ;;  %v2936_v63 = vmul.f32 %v2935_v14, %v6876_v2  ;;  %v3137_v14 = vstv %s4557_s8  ;;  %s7284_s8 = sld [smem:[#allocation12 + $0x1e]] }
 0x335   : > { %2788 = vrot.lane.b32.xlu0 %v2783_v46, %s8317_s23 }
 0x336   : > { %v7003_v10 = vpop.permute.xlu2 %2576 }
 0x33c   : > { %2816 = vrot.lane.b32.xlu1 %v2811_v36, %s8317_s23  ;;  %2828 = vrot.lane.b32.xlu2 %v2824_v57, %s8317_s23  ;;  %v7089_v36 = vld [vmem:[#allocation3 + $0x8] sm:$0xff]  ;;  %v3067_v57 = vstv %s4552_s16  ;;  %s7253_s16 = sld [smem:[#allocation12 + $0x3]] }
 0x33d   : > { %2814 = vrot.lane.b32.xlu0 %v2810_v33, %s8317_s23  ;;  %v7091_v33 = vld [vmem:[#allocation3 + $0x10] sm:$0xff]  ;;  %v3068_v2 = vmul.f32 %v3067_v57, %v7089_v36 }
 0x33e   : > { %v7011_v23 = vpop.permute.xlu1 %2522  ;;  %v7013_v37 = vpop.permute.xlu2 %2592  ;;  %8318 = vst [vmem:[#allocation27_spill] sm:$0xff] %v7091_v33  ;;  %v3069_v41 = vmul.f32 %v3067_v57, %v7091_v33 }
 0x33f   : > { %v7015_v59 = vpop.permute.xlu0 %2520 }
 0x344   : > { %2842 = vrot.lane.b32.xlu1 %v2838_v53, %s8317_s23  ;;  %2844 = vrot.lane.b32.xlu2 %v2839_v47, %s8317_s23  ;;  %v2951_v53 = vmul.f32 %v2949_v39, %v6874_v20  ;;  %v3082_v20 = vmul.f32 %v3081_v5, %v7089_v36 }
 0x345   : > { %2830 = vrot.lane.b32.xlu0 %v2825_v27, %s8317_s23 }
 0x346   : > { %v7023_v7 = vpop.permute.xlu1 %2548  ;;  %v7025_v0 = vpop.permute.xlu2 %2618 }
 0x347   : > { %v7027_v40 = vpop.permute.xlu0 %2536 }
 0x34c   : > { %2858 = vrot.lane.b32.xlu1 %v2853_v44, %s8317_s23  ;;  %2870 = vrot.lane.b32.xlu2 %v2866_v16, %s8317_s23  ;;  %v3095_v44 = vstv %s4554_s18  ;;  %v3083_v16 = vmul.f32 %v3081_v5, %v7091_v33  ;;  %s7263_s18 = sld [smem:[#allocation12 + $0x15]] }
 0x34d   : > { %2856 = vrot.lane.b32.xlu0 %v2852_v54, %s8317_s23  ;;  %v3096_v54 = vmul.f32 %v3095_v44, %v7089_v36 }
 0x34e   : > { %v7035_v34 = vpop.permute.xlu1 %2564  ;;  %v7037_v32 = vpop.permute.xlu2 %2634 }
 0x34f   : > { %v7039_v4 = vpop.permute.xlu0 %2562 }
 0x354   : > { %2884 = vrot.lane.b32.xlu1 %v2880_v1, %s8317_s23  ;;  %2886 = vrot.lane.b32.xlu2 %v2881_v52, %s8317_s23 }
 0x355   : > { %2872 = vrot.lane.b32.xlu0 %v2867_v48, %s8317_s23  ;;  %v3109_v48 = vstv %s4555_s2  ;;  %s7272_s2 = sld [smem:[#allocation12 + $0x27]] }
 0x356   : > { %v7047_v42 = vpop.permute.xlu1 %2590  ;;  %v7049_v49 = vpop.permute.xlu2 %2660  ;;  %v3110_v25 = vmul.f32 %v3109_v48, %v7089_v36  ;;  %v3111_v21 = vmul.f32 %v3109_v48, %v7091_v33  ;;  %v3165_v48 = vstv %s4559_s3  ;;  %s7291_s3 = sld [smem:[#allocation12 + $0x30]] }
 0x357   : > { %v7051_v9 = vpop.permute.xlu0 %2578 }
 0x35c   : > { %2900 = vrot.lane.b32.xlu1 %v2895_v11, %s8317_s23  ;;  %2912 = vrot.lane.b32.xlu2 %v2908_v60, %s8317_s23  ;;  %v3097_v11 = vmul.f32 %v3095_v44, %v7091_v33 }
 0x35d   : > { %2898 = vrot.lane.b32.xlu0 %v2894_v45, %s8317_s23 }
 0x35e   : > { %v7059_v8 = vpop.permute.xlu1 %2606  ;;  %v7061_v38 = vpop.permute.xlu2 %2676 }
 0x35f   : > { %v7063_v56 = vpop.permute.xlu0 %2604 }
 0x364   : > { %2926 = vrot.lane.b32.xlu1 %v2922_v15, %s8317_s23  ;;  %2928 = vrot.lane.b32.xlu2 %v2923_v13, %s8317_s23  ;;  %v7129_v15 = vld [vmem:[#allocation3 + $0x30] sm:$0xff]  ;;  %v3123_v13 = vstv %s4556_s14  ;;  %s7276_s14 = sld [smem:[#allocation12 + $0x5]] }
 0x365   : > { %2914 = vrot.lane.b32.xlu0 %v2909_v61, %s8317_s23  ;;  %8319 = vst [vmem:[#allocation43_spill] sm:$0xff] %v7129_v15  ;;  %v7131_v61 = vld [vmem:[#allocation3 + $0x28] sm:$0xff]  ;;  %v3125_v39 = vmul.f32 %v3123_v13, %v7129_v15  ;;  %v3139_v44 = vmul.f32 %v3137_v14, %v7129_v15 }
 0x366   : > { %v7071_v35 = vpop.permute.xlu1 %2632  ;;  %v7073_v50 = vpop.permute.xlu2 %2702 }
 0x367   : > { %v7075_v17 = vpop.permute.xlu0 %2620 }
 0x36c   : > { %2942 = vrot.lane.b32.xlu1 %v2937_v22, %s8317_s23  ;;  %2954 = vrot.lane.b32.xlu2 %v2950_v19, %s8317_s23  ;;  %v3138_v22 = vmul.f32 %v3137_v14, %v7131_v61  ;;  %v3124_v19 = vmul.f32 %v3123_v13, %v7131_v61  ;;  %v3166_v14 = vmul.f32 %v3165_v48, %v7131_v61 }
 0x36d   : > { %2940 = vrot.lane.b32.xlu0 %v2936_v63, %s8317_s23 }
 0x36e   : > { %v7083_v46 = vpop.permute.xlu1 %2648  ;;  %v7085_v30 = vpop.permute.xlu2 %2718 }
 0x36f   : > { %v7087_v18 = vpop.permute.xlu0 %2646 }
 0x374   : > { %3072 = vrot.lane.b32.xlu1 %v3068_v2, %s8316_s21  ;;  %3074 = vrot.lane.b32.xlu2 %v3069_v41, %s8316_s21  ;;  %v3151_v41 = vstv %s4558_s0  ;;  %s7287_s0 = sld [smem:[#allocation12 + $0x29]] }
 0x375   : > { %2956 = vrot.lane.b32.xlu0 %v2951_v53, %s8317_s23  ;;  %v3152_v53 = vmul.f32 %v3151_v41, %v7131_v61  ;;  %v3153_v5 = vmul.f32 %v3151_v41, %v7129_v15  ;;  %v3193_v41 = vstv %s4561_s19  ;;  %s7311_s19 = sld [smem:[#allocation12 + $0x42]] }
 0x376   : > { %v7099_v47 = vpop.permute.xlu1 %2674  ;;  %v7101_v27 = vpop.permute.xlu2 %2744 }
 0x377   : > { %v7103_v62 = vpop.permute.xlu0 %2662 }
 0x37c   : > { %3088 = vrot.lane.b32.xlu1 %v3083_v16, %s8316_s21  ;;  %3100 = vrot.lane.b32.xlu2 %v3096_v54, %s8316_s21 }
 0x37d   : > { %3086 = vrot.lane.b32.xlu0 %v3082_v20, %s8316_s21 }
 0x37e   : > { %v7111_v12 = vpop.permute.xlu1 %2690  ;;  %v7113_v1 = vpop.permute.xlu2 %2760 }
 0x37f   : > { %v7115_v52 = vpop.permute.xlu0 %2688 }
 0x384   : > { %3114 = vrot.lane.b32.xlu1 %v3110_v25, %s8316_s21  ;;  %3116 = vrot.lane.b32.xlu2 %v3111_v21, %s8316_s21  ;;  %v7157_v25 = vld [vmem:[#allocation3 + $0x48] sm:$0xff]  ;;  %v3179_v21 = vstv %s7143_s9  ;;  %s7307_s9 = sld [smem:[#allocation12 + $0x39]] }
 0x385   : > { %3102 = vrot.lane.b32.xlu0 %v3097_v11, %s8316_s21  ;;  %v3167_v11 = vmul.f32 %v3165_v48, %v7129_v15  ;;  %v3180_v13 = vmul.f32 %v3179_v21, %v7157_v25  ;;  %v3194_v48 = vmul.f32 %v3193_v41, %v7157_v25  ;;  %v3221_v15 = vstv %s7172_s13  ;;  %s7321_s13 = sld [smem:[#allocation12 + $0x4d]] }
 0x386   : > { %v7123_v60 = vpop.permute.xlu1 %2716  ;;  %v7125_v45 = vpop.permute.xlu2 %2786 }
 0x387   : > { %v7127_v28 = vpop.permute.xlu0 %2704 }
 0x38c   : > { %3130 = vrot.lane.b32.xlu1 %v3125_v39, %s8316_s21  ;;  %3142 = vrot.lane.b32.xlu2 %v3138_v22, %s8316_s21 }
 0x38d   : > { %3128 = vrot.lane.b32.xlu0 %v3124_v19, %s8316_s21 }
 0x38e   : > { %v2733_v63 = vpop.permute.xlu1 %2732  ;;  %v7139_v57 = vpop.permute.xlu2 %2802 }
 0x38f   : > { %v7141_v2 = vpop.permute.xlu0 %2730 }
 0x394   : > { %3156 = vrot.lane.b32.xlu1 %v3152_v53, %s8316_s21  ;;  %3158 = vrot.lane.b32.xlu2 %v3153_v5, %s8316_s21  ;;  %v7170_v53 = vld [vmem:[#allocation3 + $0x50] sm:$0xff]  ;;  %v2569_v5 = vadd.f32 %v7035_v34, %v6935_v26 }
 0x395   : > { %3144 = vrot.lane.b32.xlu0 %v3139_v44, %s8316_s21 }
 0x396   : > { %v7151_v16 = vpop.permute.xlu1 %2758  ;;  %v7153_v54 = vpop.permute.xlu2 %2828  ;;  %v2625_v44 = vadd.f32 %v7075_v17, %v2569_v5 }
 0x397   : > { %v7155_v20 = vpop.permute.xlu0 %2746 }
 0x398   : > { %v2681_v26 = vadd.f32 %v7061_v38, %v2625_v44  ;;  %v2555_v44 = vadd.f32 %v6995_v58, %v6911_v3  ;;  %v2527_v3 = vadd.f32 %v7011_v23, %v6914_v55 }
 0x39c   : > { %3172 = vrot.lane.b32.xlu1 %v3167_v11, %s8316_s21  ;;  %3184 = vrot.lane.b32.xlu2 %v3180_v13, %s8316_s21  ;;  %v3195_v11 = vmul.f32 %v3193_v41, %v7170_v53  ;;  %v3181_v13 = vmul.f32 %v3179_v21, %v7170_v53  ;;  %v2737_v41 = vadd.f32 %v2733_v63, %v2681_v26 }
 0x39d   : > { %3170 = vrot.lane.b32.xlu0 %v3166_v14, %s8316_s21  ;;  %v2540_v14 = vadd.f32 %v6987_v43, %v6902_v24  ;;  %v3222_v43 = vmul.f32 %v3221_v15, %v7157_v25 }
 0x39e   : > { %v7166_v39 = vpop.permute.xlu1 %2774  ;;  %v2845_v22 = vpop.permute.xlu2 %2844 }
 0x39f   : > { %v7168_v19 = vpop.permute.xlu0 %2772  ;;  %v2596_v21 = vadd.f32 %v7047_v42, %v2540_v14 }
 0x3a4   : > { %3198 = vrot.lane.b32.xlu1 %v3194_v48, %s8316_s21  ;;  %3200 = vrot.lane.b32.xlu2 %v3195_v11, %s8316_s21  ;;  %v3207_v48 = vstv %s4562_s15  ;;  %v2568_v11 = vadd.f32 %v7039_v4, %v6937_v6  ;;  %v2611_v6 = vadd.f32 %v7059_v8, %v2555_v44  ;;  %v2526_v8 = vadd.f32 %v7015_v59, %v6905_v51  ;;  %s7324_s15 = sld [smem:[#allocation12 + $0x6f]] }
 0x3a5   : > { %3186 = vrot.lane.b32.xlu0 %v3181_v13, %s8316_s21  ;;  %v2652_v13 = vadd.f32 %v7087_v18, %v2596_v21  ;;  %v3209_v24 = vmul.f32 %v3207_v48, %v7170_v53  ;;  %v3208_v38 = vmul.f32 %v3207_v48, %v7157_v25  ;;  %v7216_v21 = vld [vmem:[#allocation3 + $0x70] sm:$0xff]  ;;  %v3223_v48 = vmul.f32 %v3221_v15, %v7170_v53 }
 0x3a6   : > { %v7186_v34 = vpop.permute.xlu1 %2800  ;;  %v2871_v17 = vpop.permute.xlu2 %2870  ;;  %v2624_v42 = vadd.f32 %v7025_v0, %v2568_v11  ;;  %v3235_v0 = vstv %s7189_s22  ;;  %v2582_v11 = vadd.f32 %v7003_v10, %v2526_v8  ;;  %s7332_s22 = sld [smem:[#allocation12 + $0x78]] }
 0x3a7   : > { %v2789_v5 = vpop.permute.xlu0 %2788  ;;  %v2708_v4 = vadd.f32 %v7073_v50, %v2652_v13  ;;  %v2667_v50 = vadd.f32 %v7103_v62, %v2611_v6 }
 0x3a8   : > { %v2793_v33 = vadd.f32 %v2789_v5, %v2737_v41  ;;  %v2680_v58 = vadd.f32 %v7099_v47, %v2624_v42  ;;  %v7213_v5 = vld [vmem:[#allocation3 + $0x68] sm:$0xff]  ;;  %v3237_v41 = vmul.f32 %v3235_v0, %v7216_v21  ;;  %v2638_v62 = vadd.f32 %v7071_v35, %v2582_v11 }
 0x3a9   : > { %v3236_v47 = vmul.f32 %v3235_v0, %v7213_v5  ;;  %v2723_v51 = vadd.f32 %v7085_v30, %v2667_v50  ;;  %v2554_v30 = vadd.f32 %v7023_v7, %v6921_v31  ;;  %v2541_v35 = vadd.f32 %v7027_v40, %v6927_v29 }
 0x3aa   : > { %v7208_v14 = vadd.f32 %v2845_v22, %v2793_v33  ;;  %v2764_v33 = vadd.f32 %v7151_v16, %v2708_v4  ;;  %v2583_v22 = vadd.f32 %v7051_v9, %v2527_v3  ;;  %v2736_v55 = vadd.f32 %v7141_v2, %v2680_v58 }
 0x3ab   : > { %v2779_v2 = vadd.f32 %v7166_v39, %v2723_v51  ;;  %v3263_v7 = vstv %s7226_s17  ;;  %v2597_v29 = vadd.f32 %v7013_v37, %v2541_v35  ;;  %v3277_v3 = vstv %s7248_s1  ;;  %s7345_s17 = sld [smem:[#allocation12 + $0x71]] }
 0x3ac   : > { %3214 = vrot.lane.b32.xlu1 %v3209_v24, %s8316_s21  ;;  %3226 = vrot.lane.b32.xlu2 %v3222_v43, %s8316_s21  ;;  %v2639_v59 = vadd.f32 %v7037_v32, %v2583_v22  ;;  %v2792_v9 = vadd.f32 %v7125_v45, %v2736_v55  ;;  %v3249_v43 = vstv %s7218_s29  ;;  %v2694_v45 = vadd.f32 %v7115_v52, %v2638_v62  ;;  %s7339_s29 = sld [smem:[#allocation12 + $0x81]] }
 0x3ad   : > { %3212 = vrot.lane.b32.xlu0 %v3208_v38, %s8316_s21  ;;  %v3264_v38 = vmul.f32 %v3263_v7, %v7213_v5  ;;  %v3250_v44 = vmul.f32 %v3249_v43, %v7213_v5  ;;  %v3278_v8 = vmul.f32 %v3277_v3, %v7213_v5  ;;  %v3279_v50 = vmul.f32 %v3277_v3, %v7216_v21  ;;  %s7351_s1 = sld [smem:[#allocation12 + $0xe]] }
 0x3ae   : > { %v7206_v18 = vpop.permute.xlu1 %2816  ;;  %v2887_v63 = vpop.permute.xlu2 %2886  ;;  %v2695_v13 = vadd.f32 %v7111_v12, %v2639_v59  ;;  %v3251_v12 = vmul.f32 %v3249_v43, %v7216_v21  ;;  %v2750_v40 = vadd.f32 %v7101_v27, %v2694_v45  ;;  %v3291_v62 = vstv %s7276_s14  ;;  %s7377_s14 = sld [smem:[#allocation12 + $0x4b]] }
 0x3af   : > { %v2815_v26 = vpop.permute.xlu0 %2814 }
 0x3b0   : > { %v2820_v23 = vadd.f32 %v2815_v26, %v2764_v33  ;;  %v2751_v31 = vadd.f32 %v7155_v20, %v2695_v13  ;;  %v2653_v20 = vadd.f32 %v7083_v46, %v2597_v29  ;;  %v2806_v37 = vadd.f32 %v7186_v34, %v2750_v40 }
 0x3b1   : > { %v2965_v26 = vstv %s7253_s16  ;;  %v3017_v33 = vstv %s7263_s18  ;;  %v3305_v13 = vstv %s7287_s0  ;;  %s7383_s0 = sld [smem:[#allocation12 + $0x54]] }
 0x3b2   : > { %v7240_v16 = vadd.f32 %v2871_v17, %v2820_v23  ;;  %v2610_v17 = vadd.f32 %v7063_v56, %v2554_v30  ;;  %v2807_v52 = vadd.f32 %v7139_v57, %v2751_v31  ;;  %v2709_v46 = vadd.f32 %v7127_v28, %v2653_v20  ;;  %s7414_s16 = sld [smem:[#allocation12 + $0x66]] }
 0x3b3   : > { %v3265_v28 = vmul.f32 %v3263_v7, %v7216_v21  ;;  %v3018_v11 = vmul.f32 %v3017_v33, %v7157_v25  ;;  %v3306_v45 = vmul.f32 %v3305_v13, %v7089_v36  ;;  %v8321_v7 = vld [vmem:[#allocation43_spill] sm:$0xff]  ;;  %s7439_s18 = sld [smem:[#allocation12 + $0x7a]] }
 0x3b4   : > { %3240 = vrot.lane.b32.xlu1 %v3236_v47, %s8316_s21  ;;  %3242 = vrot.lane.b32.xlu2 %v3237_v41, %s8316_s21  ;;  %v2666_v56 = vadd.f32 %v7049_v49, %v2610_v17  ;;  %v2765_v22 = vadd.f32 %v7113_v1, %v2709_v46  ;;  %v3292_v17 = vmul.f32 %v3291_v62, %v7089_v36 }
 0x3b5   : > { %3228 = vrot.lane.b32.xlu0 %v3223_v48, %s8316_s21  ;;  %v2971_v48 = vstv %s7272_s2  ;;  %s7358_s2 = sld [smem:[#allocation12 + $0x8a]] }
 0x3b6   : > { %v2843_v15 = vpop.permute.xlu1 %2842  ;;  %v2913_v10 = vpop.permute.xlu2 %2912  ;;  %v2722_v49 = vadd.f32 %v7123_v60, %v2666_v56  ;;  %v2966_v60 = vmul.f32 %v2965_v26, %v7089_v36  ;;  %v2821_v1 = vadd.f32 %v7206_v18, %v2765_v22  ;;  %v2972_v22 = vmul.f32 %v2971_v48, %v7089_v36 }
 0x3b7   : > { %v7245_v24 = vadd.f32 %v2843_v15, %v2792_v9  ;;  %v2831_v32 = vpop.permute.xlu0 %2830 }
 0x3b8   : > { %v2835_v39 = vadd.f32 %v2831_v32, %v2779_v2  ;;  %v2778_v58 = vadd.f32 %v7168_v19, %v2722_v49  ;;  %v2997_v32 = vstv %s7291_s3  ;;  %s7388_s3 = sld [smem:[#allocation12 + $0x32]] }
 0x3ba   : > { %v7278_v6 = vadd.f32 %v2887_v63, %v2835_v39  ;;  %v2991_v63 = vstv %s7258_s20  ;;  %v2834_v23 = vadd.f32 %v7153_v54, %v2778_v58  ;;  %v3043_v54 = vstv %s7284_s8  ;;  %s7432_s20 = sld [smem:[#allocation12 + $0x56]] }
 0x3bb   : > { %v2992_v55 = vmul.f32 %v2991_v63, %v7131_v61  ;;  %v3044_v18 = vmul.f32 %v3043_v54, %v7213_v5  ;;  %s4576_s8 = sld [smem:[#allocation12 + $0x17]] }
 0x3bc   : > { %3256 = vrot.lane.b32.xlu1 %v3251_v12, %s8316_s21  ;;  %3268 = vrot.lane.b32.xlu2 %v3264_v38, %s8316_s21  ;;  %v2999_v12 = vmul.f32 %v2997_v32, %v8321_v7  ;;  %v3023_v38 = vstv %s7307_s9  ;;  %s7408_s9 = sld [smem:[#allocation12 + $0x5d]] }
 0x3bd   : > { %3254 = vrot.lane.b32.xlu0 %v3250_v44, %s8316_s21  ;;  %v3049_v44 = vstv %s7311_s19  ;;  %v3025_v56 = vmul.f32 %v3023_v38, %v7170_v53  ;;  %s7484_s19 = sld [smem:[#allocation12 + $0x5f]] }
 0x3be   : > { %v2859_v27 = vpop.permute.xlu1 %2858  ;;  %v2929_v42 = vpop.permute.xlu2 %2928 }
 0x3bf   : > { %v7281_v4 = vadd.f32 %v2859_v27, %v2807_v52  ;;  %v2857_v57 = vpop.permute.xlu0 %2856  ;;  %v3319_v27 = vstv %s7321_s13  ;;  %s4577_s13 = sld [smem:[#allocation12 + $0x3b]] }
 0x3c0   : > { %v2862_v34 = vadd.f32 %v2857_v57, %v2806_v37  ;;  %v3051_v57 = vmul.f32 %v3049_v44, %v7216_v21 }
 0x3c2   : > { %v2918_v0 = vadd.f32 %v2913_v10, %v2862_v34  ;;  %v8320_v10 = vld [vmem:[#allocation27_spill] sm:$0xff]  ;;  %v3009_v34 = vstv %s7332_s22  ;;  %s4580_s22 = sld [smem:[#allocation12 + $0x20]] }
 0x3c3   : > { %v2973_v30 = vmul.f32 %v2971_v48, %v8320_v10  ;;  %v3293_v35 = vmul.f32 %v3291_v62, %v8320_v10  ;;  %v2967_v62 = vmul.f32 %v2965_v26, %v8320_v10 }
 0x3c4   : > { %v2968_v19 = vadd.f32 %v2966_v60, %v2918_v0  ;;  %3282 = vrot.lane.b32.xlu1 %v3278_v8, %s8316_s21  ;;  %3284 = vrot.lane.b32.xlu2 %v3279_v50, %s8316_s21  ;;  %v3321_v60 = vmul.f32 %v3319_v27, %v8320_v10  ;;  %v3307_v8 = vmul.f32 %v3305_v13, %v8320_v10  ;;  %v3035_v50 = vstv %s7339_s29  ;;  %s7502_s29 = sld [smem:[#allocation12 + $0x44]] }
 0x3c5   : > { %3270 = vrot.lane.b32.xlu0 %v3265_v28, %s8316_s21  ;;  %v3010_v28 = vmul.f32 %v3009_v34, %v7131_v61 }
 0x3c6   : > { %v2885_v47 = vpop.permute.xlu1 %2884  ;;  %v2955_v41 = vpop.permute.xlu2 %2954  ;;  %v2994_v51 = vadd.f32 %v2992_v55, %v2968_v19 }
 0x3c7   : > { %v7318_v59 = vadd.f32 %v2885_v47, %v2834_v23  ;;  %v2873_v9 = vpop.permute.xlu0 %2872  ;;  %v3036_v23 = vmul.f32 %v3035_v50, %v7157_v25 }
 0x3c8   : > { %v2877_v2 = vadd.f32 %v2873_v9, %v2821_v1  ;;  %v3020_v15 = vadd.f32 %v3018_v11, %v2994_v51  ;;  %v3333_v11 = vstv %s7345_s17  ;;  %v3347_v51 = vstv %s7351_s1  ;;  %s4582_s17 = sld [smem:[#allocation12 + $0x68]] }
 0x3c9   : > { %v3061_v9 = vstv %s7358_s2  ;;  %v3335_v26 = vmul.f32 %v3333_v11, %v8320_v10  ;;  %s4583_s1 = sld [smem:[#allocation12 + $0x8c]] }
 0x3ca   : > { %v2933_v43 = vadd.f32 %v2929_v42, %v2877_v2  ;;  %v7336_v39 = vadd.f32 %v3044_v18, %v3020_v15  ;;  %v2983_v42 = vstv %s7324_s15  ;;  %v3062_v2 = vmul.f32 %v3061_v9, %v7213_v5  ;;  %s4579_s15 = sld [smem:[#allocation12 + $0x83]] }
 0x3cb   : > { %v2984_v46 = vmul.f32 %v2983_v42, %v7089_v36  ;;  %v2998_v15 = vmul.f32 %v2997_v32, %v7131_v61  ;;  %s7521_s2 = sld [smem:[#allocation12 + $0x7]] }
 0x3cc   : > { %v2975_v31 = vadd.f32 %v2973_v30, %v2933_v43  ;;  %3298 = vrot.lane.b32.xlu1 %v3293_v35, %s8317_s23  ;;  %3310 = vrot.lane.b32.xlu2 %v3306_v45, %s8317_s23  ;;  %v3334_v35 = vmul.f32 %v3333_v11, %v7089_v36 }
 0x3cd   : > { %3296 = vrot.lane.b32.xlu0 %v3292_v17, %s8317_s23  ;;  %v2977_v17 = vstv %s7377_s14  ;;  %s4601_s14 = sld [smem:[#allocation12 + $0x2b]] }
 0x3ce   : > { %v2901_v29 = vpop.permute.xlu1 %2900  ;;  %v7349_v40 = vpop.permute.xlu2 %3074  ;;  %v3001_v52 = vadd.f32 %v2999_v12, %v2975_v31  ;;  %v3019_v31 = vmul.f32 %v3017_v33, %v7170_v53  ;;  %v3003_v12 = vstv %s7383_s0  ;;  %v2979_v33 = vmul.f32 %v2977_v17, %v8320_v10  ;;  %s4602_s0 = sld [smem:[#allocation12 + $0x4f]] }
 0x3cf   : > { %v7355_v20 = vadd.f32 %v2901_v29, %v7208_v14  ;;  %v2899_v37 = vpop.permute.xlu0 %2898  ;;  %v3320_v14 = vmul.f32 %v3319_v27, %v7089_v36  ;;  %v3050_v29 = vmul.f32 %v3049_v44, %v7213_v5  ;;  %v3045_v27 = vmul.f32 %v3043_v54, %v7216_v21 }
 0x3d0   : > { %v2904_v49 = vadd.f32 %v2899_v37, %v7245_v24  ;;  %v3027_v3 = vadd.f32 %v3025_v56, %v3001_v52  ;;  %v3004_v54 = vmul.f32 %v3003_v12, %v7131_v61 }
 0x3d2   : > { %v2960_v58 = vadd.f32 %v2955_v41, %v2904_v49  ;;  %v7371_v0 = vadd.f32 %v3051_v57, %v3027_v3 }
 0x3d4   : > { %v2986_v24 = vadd.f32 %v2984_v46, %v2960_v58  ;;  %3324 = vrot.lane.b32.xlu1 %v3320_v14, %s8317_s23  ;;  %3326 = vrot.lane.b32.xlu2 %v3321_v60, %s8317_s23  ;;  %v3005_v46 = vmul.f32 %v3003_v12, %v8321_v7  ;;  %v2978_v58 = vmul.f32 %v2977_v17, %v7089_v36 }
 0x3d5   : > { %3312 = vrot.lane.b32.xlu0 %v3307_v8, %s8317_s23  ;;  %v3349_v36 = vmul.f32 %v3347_v51, %v8321_v7 }
 0x3d6   : > { %v2927_v19 = vpop.permute.xlu1 %2926  ;;  %v7386_v55 = vpop.permute.xlu2 %3100  ;;  %v3012_v1 = vadd.f32 %v3010_v28, %v2986_v24  ;;  %v3029_v28 = vstv %s7408_s9  ;;  %s4604_s9 = sld [smem:[#allocation12 + $0x10]] }
 0x3d7   : > { %v2932_v47 = vadd.f32 %v2927_v19, %v7240_v16  ;;  %v2915_v41 = vpop.permute.xlu0 %2914  ;;  %v2993_v16 = vmul.f32 %v2991_v63, %v8321_v7  ;;  %v3024_v63 = vmul.f32 %v3023_v38, %v7157_v25  ;;  %v3361_v38 = vstv %s7388_s3  ;;  %s7544_s3 = sld [smem:[#allocation12 + $0x73]] }
 0x3d8   : > { %v2919_v48 = vadd.f32 %v2915_v41, %v7281_v4  ;;  %v3038_v18 = vadd.f32 %v3036_v23, %v3012_v1  ;;  %v3348_v4 = vmul.f32 %v3347_v51, %v7131_v61  ;;  %v3362_v24 = vmul.f32 %v3361_v38, %v7131_v61 }
 0x3d9   : > { %v2974_v30 = vadd.f32 %v2972_v22, %v2932_v47  ;;  %v3055_v19 = vstv %s7414_s16  ;;  %v3030_v41 = vmul.f32 %v3029_v28, %v7157_v25  ;;  %s4605_s16 = sld [smem:[#allocation12 + $0x34]] }
 0x3da   : > { %v2969_v13 = vadd.f32 %v2967_v62, %v2919_v48  ;;  %v7412_v43 = vadd.f32 %v3062_v2, %v3038_v18  ;;  %v3057_v11 = vmul.f32 %v3055_v19, %v7216_v21  ;;  %v3056_v51 = vmul.f32 %v3055_v19, %v7213_v5 }
 0x3db   : > { %v3000_v32 = vadd.f32 %v2998_v15, %v2974_v30  ;;  %v3375_v30 = vstv %s7432_s20  ;;  %s7569_s20 = sld [smem:[#allocation12 + $0x58]] }
 0x3dc   : > { %v2995_v45 = vadd.f32 %v2993_v16, %v2969_v13  ;;  %3340 = vrot.lane.b32.xlu1 %v3335_v26, %s8317_s23  ;;  %3352 = vrot.lane.b32.xlu2 %v3348_v4, %s8317_s23  ;;  %v3389_v16 = vstv %s7439_s18  ;;  %v2985_v26 = vmul.f32 %v2983_v42, %v8320_v10  ;;  %v3037_v10 = vmul.f32 %v3035_v50, %v7170_v53  ;;  %s4607_s18 = sld [smem:[#allocation12 + $0x7c]] }
 0x3dd   : > { %3338 = vrot.lane.b32.xlu0 %v3334_v35, %s8317_s23  ;;  %v3026_v56 = vadd.f32 %v3024_v63, %v3000_v32  ;;  %v3011_v35 = vmul.f32 %v3009_v34, %v8321_v7  ;;  %v3063_v34 = vmul.f32 %v3061_v9, %v7216_v21 }
 0x3de   : > { %v2943_v52 = vpop.permute.xlu1 %2942  ;;  %v7429_v37 = vpop.permute.xlu2 %3116  ;;  %v3021_v49 = vadd.f32 %v3019_v31, %v2995_v45  ;;  %v3377_v45 = vmul.f32 %v3375_v30, %v8321_v7  ;;  %v3376_v31 = vmul.f32 %v3375_v30, %v7131_v61 }
 0x3df   : > { %v2947_v57 = vadd.f32 %v2943_v52, %v7278_v6  ;;  %v2941_v3 = vpop.permute.xlu0 %2940  ;;  %v3052_v44 = vadd.f32 %v3050_v29, %v3026_v56  ;;  %v3363_v6 = vmul.f32 %v3361_v38, %v8321_v7 }
 0x3e0   : > { %v2946_v14 = vadd.f32 %v2941_v3, %v7318_v59  ;;  %v3047_v60 = vadd.f32 %v3045_v27, %v3021_v49  ;;  %v3031_v59 = vmul.f32 %v3029_v28, %v7170_v53 }
 0x3e1   : > { %v2981_v8 = vadd.f32 %v2979_v33, %v2947_v57  ;;  %v3391_v33 = vmul.f32 %v3389_v16, %v8321_v7 }
 0x3e2   : > { %v2980_v22 = vadd.f32 %v2978_v58, %v2946_v14  ;;  %v7450_v23 = vadd.f32 %v7349_v40, %v3047_v60  ;;  %v3417_v14 = vstv %s4577_s13  ;;  %s4610_s13 = sld [smem:[#allocation12 + $0x61]] }
 0x3e3   : > { %v3007_v1 = vadd.f32 %v3005_v46, %v2981_v8  ;;  %v3431_v46 = vstv %s7484_s19  ;;  %v3418_v60 = vmul.f32 %v3417_v14, %v7157_v25  ;;  %s7590_s19 = sld [smem:[#allocation12 + $0x3d]] }
 0x3e4   : > { %v3006_v47 = vadd.f32 %v3004_v54, %v2980_v22  ;;  %3366 = vrot.lane.b32.xlu1 %v3362_v24, %s8317_s23  ;;  %3368 = vrot.lane.b32.xlu2 %v3363_v6, %s8317_s23  ;;  %v3432_v7 = vmul.f32 %v3431_v46, %v7157_v25  ;;  %v3445_v22 = vstv %s4579_s15  ;;  %s4611_s15 = sld [smem:[#allocation12 + $0x85]] }
 0x3e5   : > { %3354 = vrot.lane.b32.xlu0 %v3349_v36, %s8317_s23  ;;  %v3033_v40 = vadd.f32 %v3031_v59, %v3007_v1  ;;  %v3446_v19 = vmul.f32 %v3445_v22, %v7157_v25  ;;  %v3447_v1 = vmul.f32 %v3445_v22, %v7170_v53  ;;  %v3433_v36 = vmul.f32 %v3431_v46, %v7170_v53 }
 0x3e6   : > { %v3073_v62 = vpop.permute.xlu1 %3072  ;;  %v3143_v48 = vpop.permute.xlu2 %3142  ;;  %v3032_v2 = vadd.f32 %v3030_v41, %v3006_v47 }
 0x3e7   : > { %v3078_v18 = vadd.f32 %v3073_v62, %v7336_v39  ;;  %v2957_v15 = vpop.permute.xlu0 %2956  ;;  %v3059_v13 = vadd.f32 %v3057_v11, %v3033_v40  ;;  %v3390_v39 = vmul.f32 %v3389_v16, %v7131_v61  ;;  %v3403_v61 = vstv %s4576_s8  ;;  %s4608_s8 = sld [smem:[#allocation12 + $0x19]] }
 0x3e8   : > { %v2961_v4 = vadd.f32 %v2957_v15, %v7355_v20  ;;  %v3058_v32 = vadd.f32 %v3056_v51, %v3032_v2  ;;  %v3404_v50 = vmul.f32 %v3403_v61, %v7157_v25  ;;  %v3405_v27 = vmul.f32 %v3403_v61, %v7170_v53 }
 0x3e9   : > { %v3459_v11 = vstv %s4580_s22  ;;  %v3473_v25 = vstv %s7502_s29  ;;  %s7615_s22 = sld [smem:[#allocation12 + $0x22]] }
 0x3ea   : > { %v2987_v63 = vadd.f32 %v2985_v26, %v2961_v4  ;;  %v3106_v17 = vadd.f32 %v7386_v55, %v3058_v32  ;;  %v3460_v51 = vmul.f32 %v3459_v11, %v7213_v5  ;;  %s4613_s29 = sld [smem:[#allocation12 + $0x46]] }
 0x3ec   : > { %v3013_v12 = vadd.f32 %v3011_v35, %v2987_v63  ;;  %3382 = vrot.lane.b32.xlu1 %v3377_v45, %s8317_s23  ;;  %3394 = vrot.lane.b32.xlu2 %v3390_v39, %s8317_s23  ;;  %v3475_v35 = vmul.f32 %v3473_v25, %v7216_v21 }
 0x3ed   : > { %3380 = vrot.lane.b32.xlu0 %v3376_v31, %s8317_s23 }
 0x3ee   : > { %v3089_v20 = vpop.permute.xlu1 %3088  ;;  %v3159_v42 = vpop.permute.xlu2 %3158  ;;  %v3039_v29 = vadd.f32 %v3037_v10, %v3013_v12  ;;  %v3501_v12 = vstv %s4583_s1  ;;  %v7531_v10 = vld [vmem:[#allocation3 + $0x9] sm:$0xff]  ;;  %s7642_s1 = sld [smem:[#allocation12 + $0x8e]] }
 0x3ef   : > { %v3093_v55 = vadd.f32 %v3089_v20, %v7371_v0  ;;  %v3087_v56 = vpop.permute.xlu0 %3086 }
 0x3f0   : > { %v3092_v52 = vadd.f32 %v3087_v56, %v3052_v44  ;;  %v3065_v38 = vadd.f32 %v3063_v34, %v3039_v29  ;;  %v3503_v34 = vmul.f32 %v3501_v12, %v7216_v21 }
 0x3f2   : > { %v3121_v49 = vadd.f32 %v7429_v37, %v3065_v38  ;;  %v3148_v57 = vadd.f32 %v3143_v48, %v3092_v52  ;;  %v3419_v37 = vmul.f32 %v3417_v14, %v7170_v53  ;;  %v3461_v48 = vmul.f32 %v3459_v11, %v7216_v21 }
 0x3f3   : > { %v3474_v53 = vmul.f32 %v3473_v25, %v7213_v5 }
 0x3f4   : > { %3408 = vrot.lane.b32.xlu1 %v3404_v50, %s8317_s23  ;;  %3410 = vrot.lane.b32.xlu2 %v3405_v27, %s8317_s23  ;;  %v3633_v27 = vstv %s4601_s14  ;;  %s7655_s14 = sld [smem:[#allocation12 + $0x2a]] }
 0x3f5   : > { %3396 = vrot.lane.b32.xlu0 %v3391_v33, %s8317_s23 }
 0x3f6   : > { %v3115_v0 = vpop.permute.xlu1 %3114  ;;  %v3185_v9 = vpop.permute.xlu2 %3184 }
 0x3f7   : > { %v3120_v3 = vadd.f32 %v3115_v0, %v7412_v43  ;;  %v3103_v44 = vpop.permute.xlu0 %3102 }
 0x3f8   : > { %v3107_v58 = vadd.f32 %v3103_v44, %v3059_v13  ;;  %v3487_v13 = vstv %s4582_s17  ;;  %s4614_s17 = sld [smem:[#allocation12 + $0x6a]] }
 0x3f9   : > { %v3488_v4 = vmul.f32 %v3487_v13, %v7213_v5  ;;  %v3489_v32 = vmul.f32 %v3487_v13, %v7216_v21 }
 0x3fa   : > { %v3163_v43 = vadd.f32 %v3159_v42, %v3107_v58  ;;  %v3619_v42 = vstv %s7521_s2  ;;  %v3647_v58 = vstv %s4602_s0  ;;  %s4616_s2 = sld [smem:[#allocation12 + $0x8]] }
 0x3fb   : > { %v3620_v29 = vmul.f32 %v3619_v42, %v7531_v10  ;;  %s7658_s0 = sld [smem:[#allocation12 + $0x33]] }
 0x3fc   : > { %3424 = vrot.lane.b32.xlu1 %v3419_v37, %s8317_s23  ;;  %3436 = vrot.lane.b32.xlu2 %v3432_v7, %s8317_s23  ;;  %v3661_v37 = vstv %s7544_s3  ;;  %s7663_s3 = sld [smem:[#allocation12 + $0x3c]] }
 0x3fd   : > { %3422 = vrot.lane.b32.xlu0 %v3418_v60, %s8317_s23  ;;  %v3662_v60 = vmul.f32 %v3661_v37, %v7531_v10 }
 0x3fe   : > { %v3131_v8 = vpop.permute.xlu1 %3130  ;;  %v3201_v54 = vpop.permute.xlu2 %3200 }
 0x3ff   : > { %v3135_v24 = vadd.f32 %v3131_v8, %v7450_v23  ;;  %v3129_v28 = vpop.permute.xlu0 %3128  ;;  %v3648_v8 = vmul.f32 %v3647_v58, %v7531_v10 }
 0x400   : > { %v3134_v6 = vadd.f32 %v3129_v28, %v3078_v18 }
 0x402   : > { %v7510_v47 = vadd.f32 %v3185_v9, %v3134_v6  ;;  %v7565_v6 = vld [vmem:[#allocation3 + $0x29] sm:$0xff] }
 0x404   : > { %3450 = vrot.lane.b32.xlu1 %v3446_v19, %s8317_s23  ;;  %3452 = vrot.lane.b32.xlu2 %v3447_v1, %s8317_s23  ;;  %v3675_v19 = vstv %s4604_s9  ;;  %v7567_v1 = vld [vmem:[#allocation3 + $0x31] sm:$0xff]  ;;  %s7668_s9 = sld [smem:[#allocation12 + $0x4e]] }
 0x405   : > { %3438 = vrot.lane.b32.xlu0 %v3433_v36, %s8317_s23 }
 0x406   : > { %v3157_v23 = vpop.permute.xlu1 %3156  ;;  %v3227_v59 = vpop.permute.xlu2 %3226 }
 0x407   : > { %v3162_v41 = vadd.f32 %v3157_v23, %v3106_v17  ;;  %v3145_v40 = vpop.permute.xlu0 %3144  ;;  %v3676_v23 = vmul.f32 %v3675_v19, %v7565_v6 }
 0x408   : > { %v3149_v62 = vadd.f32 %v3145_v40, %v3093_v55  ;;  %v3502_v55 = vmul.f32 %v3501_v12, %v7213_v5  ;;  %v3634_v5 = vmul.f32 %v3633_v27, %v7531_v10 }
 0x40a   : > { %v7519_v15 = vadd.f32 %v3201_v54, %v3149_v62 }
 0x40c   : > { %3466 = vrot.lane.b32.xlu1 %v3461_v48, %s8317_s23  ;;  %3478 = vrot.lane.b32.xlu2 %v3474_v53, %s8317_s23  ;;  %v3689_v48 = vstv %s4605_s16  ;;  %v3703_v53 = vstv %s7569_s20  ;;  %s7670_s16 = sld [smem:[#allocation12 + $0x2c]] }
 0x40d   : > { %3464 = vrot.lane.b32.xlu0 %v3460_v51, %s8317_s23  ;;  %s7677_s20 = sld [smem:[#allocation12 + $0x45]] }
 0x40e   : > { %v3173_v2 = vpop.permute.xlu1 %3172  ;;  %v3243_v18 = vpop.permute.xlu2 %3242 }
 0x40f   : > { %v3177_v30 = vadd.f32 %v3173_v2, %v3121_v49  ;;  %v3171_v16 = vpop.permute.xlu0 %3170  ;;  %v7542_v49 = vld [vmem:[#allocation3 + $0x11] sm:$0xff]  ;;  %v3691_v2 = vmul.f32 %v3689_v48, %v7567_v1 }
 0x410   : > { %v3176_v26 = vadd.f32 %v3171_v16, %v3120_v3  ;;  %v3635_v33 = vmul.f32 %v3633_v27, %v7542_v49  ;;  %v3621_v0 = vmul.f32 %v3619_v42, %v7542_v49  ;;  %v3649_v7 = vmul.f32 %v3647_v58, %v7542_v49 }
 0x412   : > { %v7529_v39 = vadd.f32 %v3227_v59, %v3176_v26  ;;  %v3677_v59 = vmul.f32 %v3675_v19, %v7567_v1 }
 0x414   : > { %3492 = vrot.lane.b32.xlu1 %v3488_v4, %s8317_s23  ;;  %3494 = vrot.lane.b32.xlu2 %v3489_v32, %s8317_s23  ;;  %v3717_v32 = vstv %s4607_s18  ;;  %s7679_s18 = sld [smem:[#allocation12 + $0x50]] }
 0x415   : > { %3480 = vrot.lane.b32.xlu0 %v3475_v35, %s8317_s23 }
 0x416   : > { %v3199_v63 = vpop.permute.xlu1 %3198  ;;  %v3269_v45 = vpop.permute.xlu2 %3268 }
 0x417   : > { %v3204_v17 = vadd.f32 %v3199_v63, %v3148_v57  ;;  %v3187_v31 = vpop.permute.xlu0 %3186  ;;  %v3718_v63 = vmul.f32 %v3717_v32, %v7565_v6 }
 0x418   : > { %v3191_v20 = vadd.f32 %v3187_v31, %v3135_v24 }
 0x41a   : > { %v7540_v52 = vadd.f32 %v3243_v18, %v3191_v20  ;;  %v3704_v18 = vmul.f32 %v3703_v53, %v7565_v6 }
 0x41c   : > { %3508 = vrot.lane.b32.xlu1 %v3503_v34, %s8317_s23  ;;  %3624 = vrot.lane.b32.xlu2 %v3620_v29, %s8316_s21  ;;  %v7601_v34 = vld [vmem:[#allocation3 + $0x51] sm:$0xff]  ;;  %v3731_v29 = vstv %s4608_s8  ;;  %s7682_s8 = sld [smem:[#allocation12 + $0x57]] }
 0x41d   : > { %3506 = vrot.lane.b32.xlu0 %v3502_v55, %s8317_s23  ;;  %v7603_v55 = vld [vmem:[#allocation3 + $0x49] sm:$0xff] }
 0x41e   : > { %v3215_v56 = vpop.permute.xlu1 %3214  ;;  %v3285_v61 = vpop.permute.xlu2 %3284 }
 0x41f   : > { %v3219_v38 = vadd.f32 %v3215_v56, %v3163_v43  ;;  %v3213_v50 = vpop.permute.xlu0 %3212  ;;  %v3745_v56 = vstv %s7590_s19  ;;  %s7692_s19 = sld [smem:[#allocation12 + $0x60]] }
 0x420   : > { %v3218_v21 = vadd.f32 %v3213_v50, %v3162_v41  ;;  %v3732_v50 = vmul.f32 %v3731_v29, %v7603_v55 }
 0x422   : > { %v7552_v3 = vadd.f32 %v3269_v45, %v3218_v21  ;;  %v3719_v45 = vmul.f32 %v3717_v32, %v7567_v1 }
 0x424   : > { %3638 = vrot.lane.b32.xlu1 %v3634_v5, %s8316_s21  ;;  %3640 = vrot.lane.b32.xlu2 %v3635_v33, %s8316_s21 }
 0x425   : > { %3626 = vrot.lane.b32.xlu0 %v3621_v0, %s8316_s21 }
 0x426   : > { %v3241_v9 = vpop.permute.xlu1 %3240  ;;  %v3311_v57 = vpop.permute.xlu2 %3310 }
 0x427   : > { %v3246_v44 = vadd.f32 %v3241_v9, %v7510_v47  ;;  %v3229_v46 = vpop.permute.xlu0 %3228  ;;  %v3663_v47 = vmul.f32 %v3661_v37, %v7542_v49  ;;  %v3759_v9 = vstv %s4610_s13  ;;  %s7696_s13 = sld [smem:[#allocation12 + $0x6]] }
 0x428   : > { %v3233_v14 = vadd.f32 %v3229_v46, %v3177_v30  ;;  %v3747_v46 = vmul.f32 %v3745_v56, %v7601_v34 }
 0x42a   : > { %v7562_v24 = vadd.f32 %v3285_v61, %v3233_v14 }
 0x42c   : > { %3654 = vrot.lane.b32.xlu1 %v3649_v7, %s8316_s21  ;;  %3666 = vrot.lane.b32.xlu2 %v3662_v60, %s8316_s21 }
 0x42d   : > { %3652 = vrot.lane.b32.xlu0 %v3648_v8, %s8316_s21  ;;  %v3773_v8 = vstv %s4611_s15  ;;  %s7702_s15 = sld [smem:[#allocation12 + $0x69]] }
 0x42e   : > { %v3257_v54 = vpop.permute.xlu1 %3256  ;;  %v3327_v43 = vpop.permute.xlu2 %3326  ;;  %v3774_v19 = vmul.f32 %v3773_v8, %v7603_v55 }
 0x42f   : > { %v3261_v28 = vadd.f32 %v3257_v54, %v7519_v15  ;;  %v3255_v22 = vpop.permute.xlu0 %3254  ;;  %v3690_v15 = vmul.f32 %v3689_v48, %v7565_v6  ;;  %v7626_v54 = vld [vmem:[#allocation3 + $0x69] sm:$0xff] }
 0x430   : > { %v3260_v36 = vadd.f32 %v3255_v22, %v3204_v17 }
 0x432   : > { %v7577_v11 = vadd.f32 %v3311_v57, %v3260_v36 }
 0x434   : > { %3680 = vrot.lane.b32.xlu1 %v3676_v23, %s8316_s21  ;;  %3682 = vrot.lane.b32.xlu2 %v3677_v59, %s8316_s21 }
 0x435   : > { %3668 = vrot.lane.b32.xlu0 %v3663_v47, %s8316_s21 }
 0x436   : > { %v3283_v41 = vpop.permute.xlu1 %3282  ;;  %v3353_v40 = vpop.permute.xlu2 %3352 }
 0x437   : > { %v3288_v62 = vadd.f32 %v3283_v41, %v7529_v39  ;;  %v3271_v25 = vpop.permute.xlu0 %3270  ;;  %v3705_v39 = vmul.f32 %v3703_v53, %v7567_v1 }
 0x438   : > { %v3275_v51 = vadd.f32 %v3271_v25, %v3219_v38  ;;  %v3746_v38 = vmul.f32 %v3745_v56, %v7603_v55 }
 0x43a   : > { %v7587_v13 = vadd.f32 %v3327_v43, %v3275_v51 }
 0x43c   : > { %3696 = vrot.lane.b32.xlu1 %v3691_v2, %s8316_s21  ;;  %3708 = vrot.lane.b32.xlu2 %v3704_v18, %s8316_s21 }
 0x43d   : > { %3694 = vrot.lane.b32.xlu0 %v3690_v15, %s8316_s21 }
 0x43e   : > { %v3299_v30 = vpop.permute.xlu1 %3298  ;;  %v3369_v16 = vpop.permute.xlu2 %3368 }
 0x43f   : > { %v3303_v26 = vadd.f32 %v3299_v30, %v7540_v52  ;;  %v3297_v4 = vpop.permute.xlu0 %3296  ;;  %v3733_v52 = vmul.f32 %v3731_v29, %v7601_v34  ;;  %v3549_v29 = vstv %s7658_s0  ;;  %s7831_s0 = sld [smem:[#allocation12 + $0x7d]] }
 0x440   : > { %v3302_v35 = vadd.f32 %v3297_v4, %v3246_v44  ;;  %v3761_v44 = vmul.f32 %v3759_v9, %v7601_v34 }
 0x442   : > { %v7598_v12 = vadd.f32 %v3353_v40, %v3302_v35  ;;  %v3801_v40 = vstv %s4613_s29  ;;  %s7723_s29 = sld [smem:[#allocation12 + $0x18]] }
 0x443   : > { %v3802_v25 = vmul.f32 %v3801_v40, %v7626_v54 }
 0x444   : > { %3722 = vrot.lane.b32.xlu1 %v3718_v63, %s8316_s21  ;;  %3724 = vrot.lane.b32.xlu2 %v3719_v45, %s8316_s21 }
 0x445   : > { %3710 = vrot.lane.b32.xlu0 %v3705_v39, %s8316_s21 }
 0x446   : > { %v3325_v17 = vpop.permute.xlu1 %3324  ;;  %v3395_v31 = vpop.permute.xlu2 %3394 }
 0x447   : > { %v3330_v20 = vadd.f32 %v3325_v17, %v7552_v3  ;;  %v3313_v42 = vpop.permute.xlu0 %3312  ;;  %v3760_v3 = vmul.f32 %v3759_v9, %v7603_v55  ;;  %v3529_v9 = vstv %s7668_s9  ;;  %s7800_s9 = sld [smem:[#allocation12 + $0x84]] }
 0x448   : > { %v3317_v61 = vadd.f32 %v3313_v42, %v3261_v28  ;;  %v3775_v28 = vmul.f32 %v3773_v8, %v7601_v34  ;;  %v3523_v42 = vstv %s7655_s14  ;;  %s7813_s14 = sld [smem:[#allocation12 + $0x8d]] }
 0x449   : > { %v3524_v56 = vmul.f32 %v3523_v42, %v7531_v10 }
 0x44a   : > { %v7612_v5 = vadd.f32 %v3369_v16, %v3317_v61  ;;  %v3815_v16 = vstv %s4614_s17  ;;  %s7734_s17 = sld [smem:[#allocation12 + $0x21]] }
 0x44b   : > { %v3816_v35 = vmul.f32 %v3815_v16, %v7626_v54 }
 0x44c   : > { %3738 = vrot.lane.b32.xlu1 %v3733_v52, %s8316_s21  ;;  %3750 = vrot.lane.b32.xlu2 %v3746_v38, %s8316_s21 }
 0x44d   : > { %3736 = vrot.lane.b32.xlu0 %v3732_v50, %s8316_s21 }
 0x44e   : > { %v3341_v27 = vpop.permute.xlu1 %3340  ;;  %v3411_v21 = vpop.permute.xlu2 %3410 }
 0x44f   : > { %v3345_v33 = vadd.f32 %v3341_v27, %v7562_v24  ;;  %v3339_v0 = vpop.permute.xlu0 %3338  ;;  %v3787_v24 = vstv %s7615_s22  ;;  %v3575_v27 = vstv %s7663_s3  ;;  %s7707_s22 = sld [smem:[#allocation12 + $0xf]] }
 0x450   : > { %v3344_v57 = vadd.f32 %v3339_v0, %v3288_v62  ;;  %v3788_v22 = vmul.f32 %v3787_v24, %v7626_v54  ;;  %s7838_s3 = sld [smem:[#allocation12 + $0x1a]] }
 0x452   : > { %v7623_v37 = vadd.f32 %v3395_v31, %v3344_v57  ;;  %v3576_v57 = vmul.f32 %v3575_v27, %v7603_v55 }
 0x454   : > { %3764 = vrot.lane.b32.xlu1 %v3760_v3, %s8316_s21  ;;  %3766 = vrot.lane.b32.xlu2 %v3761_v44, %s8316_s21 }
 0x455   : > { %3752 = vrot.lane.b32.xlu0 %v3747_v46, %s8316_s21 }
 0x456   : > { %v3367_v58 = vpop.permute.xlu1 %3366  ;;  %v3437_v14 = vpop.permute.xlu2 %3436 }
 0x457   : > { %v3372_v7 = vadd.f32 %v3367_v58, %v7577_v11  ;;  %v3355_v60 = vpop.permute.xlu0 %3354  ;;  %v7640_v11 = vld [vmem:[#allocation3 + $0x71] sm:$0xff]  ;;  %v3857_v58 = vstv %s7670_s16  ;;  %s7776_s16 = sld [smem:[#allocation12 + $0x72]] }
 0x458   : > { %v3359_v43 = vadd.f32 %v3355_v60, %v3303_v26  ;;  %v3803_v48 = vmul.f32 %v3801_v40, %v7640_v11  ;;  %v3789_v53 = vmul.f32 %v3787_v24, %v7640_v11  ;;  %v3829_v26 = vstv %s7642_s1  ;;  %s7749_s1 = sld [smem:[#allocation12 + $0x11]] }
 0x459   : > { %v3817_v4 = vmul.f32 %v3815_v16, %v7640_v11  ;;  %v3830_v32 = vmul.f32 %v3829_v26, %v7626_v54  ;;  %v3831_v50 = vmul.f32 %v3829_v26, %v7640_v11  ;;  %v3555_v24 = vstv %s7682_s8  ;;  %s4626_s8 = sld [smem:[#allocation12 + $0x62]] }
 0x45a   : > { %v7635_v59 = vadd.f32 %v3411_v21, %v3359_v43  ;;  %v3871_v43 = vstv %s7679_s18  ;;  %v3517_v40 = vstv %s7696_s13  ;;  %s7780_s18 = sld [smem:[#allocation12 + $0x7b]] }
 0x45b   : > { %v3519_v16 = vmul.f32 %v3517_v40, %v7542_v49  ;;  %v3518_v26 = vmul.f32 %v3517_v40, %v7531_v10  ;;  %s7788_s13 = sld [smem:[#allocation12 + $0x59]] }
 0x45c   : > { %3780 = vrot.lane.b32.xlu1 %v3775_v28, %s8316_s21  ;;  %3792 = vrot.lane.b32.xlu2 %v3788_v22, %s8316_s21  ;;  %v3859_v22 = vmul.f32 %v3857_v58, %v7542_v49 }
 0x45d   : > { %3778 = vrot.lane.b32.xlu0 %v3774_v19, %s8316_s21  ;;  %v3872_v19 = vmul.f32 %v3871_v43, %v7531_v10 }
 0x45e   : > { %v3383_v36 = vpop.permute.xlu1 %3382  ;;  %v3453_v23 = vpop.permute.xlu2 %3452 }
 0x45f   : > { %v7638_v47 = vadd.f32 %v3383_v36, %v7587_v13  ;;  %v3381_v41 = vpop.permute.xlu0 %3380 }
 0x460   : > { %v3386_v62 = vadd.f32 %v3381_v41, %v3330_v20 }
 0x462   : > { %v7650_v18 = vadd.f32 %v3437_v14, %v3386_v62  ;;  %v3601_v14 = vstv %s7677_s20  ;;  %v3557_v62 = vmul.f32 %v3555_v24, %v7567_v1  ;;  %s4625_s20 = sld [smem:[#allocation12 + $0x3e]] }
 0x463   : > { %v3602_v60 = vmul.f32 %v3601_v14, %v7626_v54 }
 0x464   : > { %3806 = vrot.lane.b32.xlu1 %v3802_v25, %s8316_s21  ;;  %3808 = vrot.lane.b32.xlu2 %v3803_v48, %s8316_s21  ;;  %v3607_v25 = vstv %s7702_s15  ;;  %v3543_v48 = vstv %s7707_s22  ;;  %s4628_s15 = sld [smem:[#allocation12 + $0x23]] }
 0x465   : > { %3794 = vrot.lane.b32.xlu0 %v3789_v53, %s8316_s21  ;;  %s4629_s22 = sld [smem:[#allocation12 + $0x47]] }
 0x466   : > { %v3409_v51 = vpop.permute.xlu1 %3408  ;;  %v3479_v2 = vpop.permute.xlu2 %3478 }
 0x467   : > { %v7653_v15 = vadd.f32 %v3409_v51, %v7598_v12  ;;  %v3397_v30 = vpop.permute.xlu0 %3396  ;;  %v3843_v12 = vstv %s4616_s2  ;;  %s7758_s2 = sld [smem:[#allocation12 + $0x35]] }
 0x468   : > { %v3401_v13 = vadd.f32 %v3397_v30, %v3345_v33  ;;  %v3844_v52 = vmul.f32 %v3843_v12, %v7531_v10  ;;  %v3845_v38 = vmul.f32 %v3843_v12, %v7542_v49  ;;  %v3545_v12 = vmul.f32 %v3543_v48, %v7567_v1 }
 0x46a   : > { %v7672_v39 = vadd.f32 %v3453_v23, %v3401_v13  ;;  %v3858_v23 = vmul.f32 %v3857_v58, %v7531_v10  ;;  %v3530_v58 = vmul.f32 %v3529_v9, %v7531_v10 }
 0x46c   : > { %3822 = vrot.lane.b32.xlu1 %v3817_v4, %s8316_s21  ;;  %3834 = vrot.lane.b32.xlu2 %v3830_v32, %s8316_s21 }
 0x46d   : > { %3820 = vrot.lane.b32.xlu0 %v3816_v35, %s8316_s21 }
 0x46e   : > { %v3425_v63 = vpop.permute.xlu1 %3424  ;;  %v3495_v45 = vpop.permute.xlu2 %3494 }
 0x46f   : > { %v7675_v17 = vadd.f32 %v3425_v63, %v7612_v5  ;;  %v3423_v31 = vpop.permute.xlu0 %3422  ;;  %v3550_v5 = vmul.f32 %v3549_v29, %v7565_v6  ;;  %v3569_v63 = vstv %s7723_s29  ;;  %s4631_s29 = sld [smem:[#allocation12 + $0x8f]] }
 0x470   : > { %v3428_v20 = vadd.f32 %v3423_v31, %v3372_v7 }
 0x472   : > { %v3484_v61 = vadd.f32 %v3479_v2, %v3428_v20 }
 0x474   : > { %v3526_v21 = vadd.f32 %v3524_v56, %v3484_v61  ;;  %3848 = vrot.lane.b32.xlu1 %v3844_v52, %s8317_s23  ;;  %3850 = vrot.lane.b32.xlu2 %v3845_v38, %s8317_s23  ;;  %v3544_v56 = vmul.f32 %v3543_v48, %v7565_v6  ;;  %v3595_v38 = vstv %s7734_s17  ;;  %v3551_v48 = vmul.f32 %v3549_v29, %v7567_v1  ;;  %s346_s17 = sand.u32 1, %s4938_s25  }
 0x475   : > { %3836 = vrot.lane.b32.xlu0 %v3831_v50, %s8316_s21  ;;  %s7716_s21 = sld [smem:[#allocation12 + $0x74]] }
 0x476   : > { %v3451_v33 = vpop.permute.xlu1 %3450  ;;  %v7704_v0 = vpop.permute.xlu2 %3624  ;;  %v3552_v3 = vadd.f32 %v3550_v5, %v3526_v21  ;;  %v3873_v21 = vmul.f32 %v3871_v43, %v7542_v49  ;;  %v3571_v5 = vmul.f32 %v3569_v63, %v7601_v34 }
 0x477   : > { %v7713_v44 = vadd.f32 %v3451_v33, %v7623_v37  ;;  %v3439_v46 = vpop.permute.xlu0 %3438  ;;  %v3531_v37 = vmul.f32 %v3529_v9, %v7542_v49  ;;  %v3525_v9 = vmul.f32 %v3523_v42, %v7542_v49 }
 0x478   : > { %v3443_v7 = vadd.f32 %v3439_v46, %v7638_v47  ;;  %v3578_v8 = vadd.f32 %v3576_v57, %v3552_v3  ;;  %v3581_v47 = vstv %s7692_s19  ;;  %v3570_v57 = vmul.f32 %v3569_v63, %v7603_v55  ;;  %s7871_s19 = sld [smem:[#allocation12 + $0x86]] }
 0x479   : > { %v3583_v2 = vmul.f32 %v3581_v47, %v7601_v34  ;;  %v3597_v46 = vmul.f32 %v3595_v38, %v7640_v11 }
 0x47a   : > { %v3499_v28 = vadd.f32 %v3495_v45, %v3443_v7  ;;  %v7732_v36 = vadd.f32 %v3602_v60, %v3578_v8  ;;  %v3609_v45 = vmul.f32 %v3607_v25, %v7640_v11  ;;  %v3596_v8 = vmul.f32 %v3595_v38, %v7626_v54 }
 0x47b   : > { %v3885_v32 = vstv %s7716_s21  ;;  %s7888_s21 = sld [smem:[#allocation12 + $0x6b]] }
 0x47c   : > { %v3533_v41 = vadd.f32 %v3531_v37, %v3499_v28  ;;  %3864 = vrot.lane.b32.xlu1 %v3859_v22, %s8317_s23  ;;  %3876 = vrot.lane.b32.xlu2 %v3872_v19, %s8317_s23  ;;  %v3887_v52 = vmul.f32 %v3885_v32, %v7542_v49  ;;  %v3899_v22 = vstv %s7749_s1  ;;  %v3913_v19 = vstv %s7758_s2  ;;  %s4248_s1 = sshll.u32 %s346_s17, 6  ;;  %s7933_s2 = sld [smem:[#allocation13 + $0x2]] }
 0x47d   : > { %3862 = vrot.lane.b32.xlu0 %v3858_v23, %s8317_s23  ;;  %v3914_v42 = vmul.f32 %v3913_v19, %v7565_v6 }
 0x47e   : > { %v3467_v53 = vpop.permute.xlu1 %3466  ;;  %v7747_v51 = vpop.permute.xlu2 %3640  ;;  %v3559_v30 = vadd.f32 %v3557_v62, %v3533_v41  ;;  %v3556_v62 = vmul.f32 %v3555_v24, %v7565_v6  ;;  %v3900_v24 = vmul.f32 %v3899_v22, %v7565_v6 }
 0x47f   : > { %v3471_v13 = vadd.f32 %v3467_v53, %v7635_v59  ;;  %v3465_v4 = vpop.permute.xlu0 %3464  ;;  %v3886_v59 = vmul.f32 %v3885_v32, %v7531_v10  ;;  %v3561_v32 = vstv %s7780_s18  ;;  %s7939_s18 = sld [smem:[#allocation13 + $0x3]] }
 0x480   : > { %v3470_v35 = vadd.f32 %v3465_v4, %v7653_v15  ;;  %v3585_v31 = vadd.f32 %v3583_v2, %v3559_v30  ;;  %v3901_v2 = vmul.f32 %v3899_v22, %v7567_v1  ;;  %v3563_v38 = vmul.f32 %v3561_v32, %v7567_v1 }
 0x481   : > { %v3521_v20 = vadd.f32 %v3519_v16, %v3471_v13  ;;  %v3582_v16 = vmul.f32 %v3581_v47, %v7603_v55  ;;  %v3535_v13 = vstv %s7776_s16  ;;  %v3927_v47 = vstv %s7788_s13  ;;  %s7935_s16 = scalar_lea.vmem [#allocation15], %s4248_s1  ;;  %s4632_s13 = sld [smem:[#allocation13 + $0x1]] }
 0x482   : > { %v3520_v61 = vadd.f32 %v3518_v26, %v3470_v35  ;;  %v7770_v50 = vadd.f32 %v3609_v45, %v3585_v31  ;;  %v3608_v26 = vmul.f32 %v3607_v25, %v7626_v54  ;;  %v3603_v45 = vmul.f32 %v3601_v14, %v7640_v11 }
 0x483   : > { %v3547_v15 = vadd.f32 %v3545_v12, %v3521_v20  ;;  %v3562_v14 = vmul.f32 %v3561_v32, %v7565_v6  ;;  %v3983_v32 = vstv %s4626_s8  ;;  %s4095_s8 = scalar_lea.sflag [#allocation5], %s346_s17 }
 0x484   : > { %v3546_v33 = vadd.f32 %v3544_v56, %v3520_v61  ;;  %3890 = vrot.lane.b32.xlu1 %v3886_v59, %s8317_s23  ;;  %3892 = vrot.lane.b32.xlu2 %v3887_v52, %s8317_s23  ;;  %v3536_v56 = vmul.f32 %v3535_v13, %v7531_v10  ;;  %v3587_v61 = vstv %s7800_s9  ;;  %v3915_v10 = vmul.f32 %v3913_v19, %v7567_v1  ;;  %s4647_s9 = sshll.u32 %s5020_s28, 6 }
 0x485   : > { %3878 = vrot.lane.b32.xlu0 %v3873_v21, %s8317_s23  ;;  %v3573_v3 = vadd.f32 %v3571_v5, %v3547_v15  ;;  %v3928_v21 = vmul.f32 %v3927_v47, %v7565_v6  ;;  %v3613_v5 = vstv %s7813_s14  ;;  %v3941_v19 = vstv %s7831_s0 }
 0x486   : > { %v3493_v7 = vpop.permute.xlu1 %3492  ;;  %v7786_v60 = vpop.permute.xlu2 %3666  ;;  %v3572_v37 = vadd.f32 %v3570_v57, %v3546_v33 }
 0x487   : > { %v3498_v43 = vadd.f32 %v3493_v7, %v7650_v18  ;;  %v3481_v28 = vpop.permute.xlu0 %3480  ;;  %v7794_v23 = vadd.f32 %v3597_v46, %v3573_v3  ;;  %v3588_v46 = vmul.f32 %v3587_v61, %v7603_v55 }
 0x488   : > { %v3485_v41 = vadd.f32 %v3481_v28, %v7675_v17  ;;  %v3598_v40 = vadd.f32 %v3596_v8, %v3572_v37  ;;  %v3614_v37 = vmul.f32 %v3613_v5, %v7626_v54 }
 0x489   : > { %v3532_v18 = vadd.f32 %v3530_v58, %v3498_v43 }
 0x48a   : > { %v3527_v53 = vadd.f32 %v3525_v9, %v3485_v41  ;;  %v7811_v17 = vadd.f32 %v7704_v0, %v3598_v40  ;;  %v3577_v0 = vmul.f32 %v3575_v27, %v7601_v34  ;;  %v3537_v27 = vmul.f32 %v3535_v13, %v7542_v49 }
 0x48b   : > { %v3558_v30 = vadd.f32 %v3556_v62, %v3532_v18  ;;  %v3955_v9 = vstv %s7838_s3  ;;  %v3943_v18 = vmul.f32 %v3941_v19, %v7567_v1  ;;  %s4106_s3 = scalar_lea.hbm %s8007_s7, %s4647_s9 }
 0x48c   : > { %v3553_v29 = vadd.f32 %v3551_v48, %v3527_v53  ;;  %3906 = vrot.lane.b32.xlu1 %v3901_v2, %s8317_s23  ;;  %3918 = vrot.lane.b32.xlu2 %v3914_v42, %s8317_s23  ;;  %v3956_v48 = vmul.f32 %v3955_v9, %v7603_v55  ;;  %v3942_v2 = vmul.f32 %v3941_v19, %v7565_v6  ;;  %s4109_s28 = sshll.u32 %s4106_s3, 4  ;;  %s4110_s28 = int_to_ptr.hbm [resolvable:$true] %s4109_s28 }
 0x48d   : > { %3904 = vrot.lane.b32.xlu0 %v3900_v24, %s8317_s23  ;;  %v3584_v4 = vadd.f32 %v3582_v16, %v3558_v30 }
 0x48e   : > { %v3509_v35 = vpop.permute.xlu1 %3508  ;;  %v3683_v63 = vpop.permute.xlu2 %3682  ;;  %v3579_v31 = vadd.f32 %v3577_v0, %v3553_v29  ;;  %v3957_v29 = vmul.f32 %v3955_v9, %v7601_v34 }
 0x48f   : > { %v3513_v12 = vadd.f32 %v3509_v35, %v7672_v39  ;;  %v3507_v20 = vpop.permute.xlu0 %3506  ;;  %v3610_v25 = vadd.f32 %v3608_v26, %v3584_v4  ;;  %v3929_v39 = vmul.f32 %v3927_v47, %v7567_v1  ;;  %v3969_v1 = vstv %s4625_s20  ;;  %s4107_s20 = sshll.u32 %s7935_s16, 4  ;;  %s4108_s20 = int_to_ptr.vmem [resolvable:$true] %s4107_s20 }
 0x490   : > { %v3512_v59 = vadd.f32 %v3507_v20, %v7713_v44  ;;  %v3605_v52 = vadd.f32 %v3603_v45, %v3579_v31  ;;  %v3589_v44 = vmul.f32 %v3587_v61, %v7601_v34  ;;  %v3970_v6 = vmul.f32 %v3969_v1, %v7603_v55 }
 0x491   : > { %v3539_v15 = vadd.f32 %v3537_v27, %v3513_v12  ;;  %v3971_v16 = vmul.f32 %v3969_v1, %v7601_v34  ;;  %v3997_v35 = vstv %s7871_s19  ;;  %v3985_v47 = vmul.f32 %v3983_v32, %v7601_v34  ;;  %s4882_s19 = sshra.s32 %s4110_s28, 4  ;;  %s4883_s19 = int_to_ptr.hbm [resolvable:$true] %s4882_s19 }
 0x492   : > { %v3538_v49 = vadd.f32 %v3536_v56, %v3512_v59  ;;  %v7849_v33 = vadd.f32 %v7747_v51, %v3605_v52  ;;  %v3615_v51 = vmul.f32 %v3613_v5, %v7640_v11  ;;  %v3998_v45 = vmul.f32 %v3997_v35, %v7603_v55  ;;  %p4889_p3 = scmp.lt.s32.totalorder %s4883_s19, %s8007_s7 }
 0x493   : > { %v3565_v57 = vadd.f32 %v3563_v38, %v3539_v15  ;;  %v3984_v31 = vmul.f32 %v3983_v32, %v7603_v55  ;;  %v4011_v56 = vstv %s4628_s15  ;;  %v3999_v52 = vmul.f32 %v3997_v35, %v7601_v34  ;;  %s4884_s15 = scalar_lea.hbm %s4883_s19, 64 }
 0x494   : > { %v3564_v3 = vadd.f32 %v3562_v14, %v3538_v49  ;;  %3932 = vrot.lane.b32.xlu1 %v3928_v21, %s8317_s23  ;;  %3934 = vrot.lane.b32.xlu2 %v3929_v39, %s8317_s23  ;;  %v4012_v55 = vmul.f32 %v4011_v56, %v7626_v54  ;;  %v4013_v61 = vmul.f32 %v4011_v56, %v7640_v11  ;;  %v4025_v39 = vstv %s4629_s22  ;;  %p4885_p0 = scmp.ne.s32.totalorder %s4883_s19, %s4884_s15 }
 0x495   : > { %3920 = vrot.lane.b32.xlu0 %v3915_v10, %s8317_s23  ;;  %v3591_v58 = vadd.f32 %v3589_v44, %v3565_v57  ;;  %v4027_v57 = vmul.f32 %v4025_v39, %v7640_v11  ;;  %v4026_v34 = vmul.f32 %v4025_v39, %v7626_v54 }
 0x496   : > { %v3639_v7 = vpop.permute.xlu1 %3638  ;;  %v3709_v8 = vpop.permute.xlu2 %3708  ;;  %v3590_v43 = vadd.f32 %v3588_v46, %v3564_v3  ;;  %p4886_p1 = pnand %p4885_p0, %p5037_p5 }
 0x497   : > { %v3644_v28 = vadd.f32 %v3639_v7, %v7732_v36  ;;  %v3627_v22 = vpop.permute.xlu0 %3626  ;;  %v3617_v41 = vadd.f32 %v3615_v51, %v3591_v58  ;;  %v4053_v7 = vstv %s4631_s29  ;;  %s4888_s29 = scalar_lea.hbm %s8007_s7, 128 }
 0x498   : > { %v3631_v40 = vadd.f32 %v3627_v22, %v7794_v23  ;;  %v3616_v62 = vadd.f32 %v3614_v37, %v3590_v43  ;;  %v4054_v37 = vmul.f32 %v4053_v7, %v7626_v54  ;;  %v4055_v43 = vmul.f32 %v4053_v7, %v7640_v11  ;;  %p4887_p2 = pneg %p4886_p1  ;;  %p4890_p4 = scmp.lt.s32.totalorder %s4888_s29, %s4884_s15 }
 0x49a   : > { %v3672_v53 = vadd.f32 %v7786_v60, %v3616_v62  ;;  %v3687_v30 = vadd.f32 %v3683_v63, %v3631_v40  ;;  %p4891_p7 = por %p4890_p4, %p4889_p3 }
 0x49c   : > { %3948 = vrot.lane.b32.xlu1 %v3943_v18, %s8317_s23  ;;  %3960 = vrot.lane.b32.xlu2 %v3956_v48, %s8317_s23  ;;  %p4892_p8 = pnand %p4891_p7, %p4887_p2 }
 0x49d   : > { %3946 = vrot.lane.b32.xlu0 %v3942_v2, %s8317_s23 }
 0x49e   : > { %v3655_v36 = vpop.permute.xlu1 %3654  ;;  %v3725_v42 = vpop.permute.xlu2 %3724 }
 0x49f   : > { %v3659_v23 = vadd.f32 %v3655_v36, %v7770_v50  ;;  %v3653_v24 = vpop.permute.xlu0 %3652 }
 0x4a0   : > { %v3658_v60 = vadd.f32 %v3653_v24, %v3610_v25 }
 0x4a2   : > { %v3714_v0 = vadd.f32 %v3709_v8, %v3658_v60 }
 0x4a4   : > { %3974 = vrot.lane.b32.xlu1 %v3970_v6, %s8317_s23  ;;  %3976 = vrot.lane.b32.xlu2 %v3971_v16, %s8317_s23 }
 0x4a5   : > { %3962 = vrot.lane.b32.xlu0 %v3957_v29, %s8317_s23 }
 0x4a6   : > { %v3681_v13 = vpop.permute.xlu1 %3680  ;;  %v3751_v50 = vpop.permute.xlu2 %3750 }
 0x4a7   : > { %v3686_v26 = vadd.f32 %v3681_v13, %v7811_v17  ;;  %v3669_v4 = vpop.permute.xlu0 %3668 }
 0x4a8   : > { %v3673_v63 = vadd.f32 %v3669_v4, %v3617_v41 }
 0x4aa   : > { %v3729_v17 = vadd.f32 %v3725_v42, %v3673_v63 }
 0x4ac   : > { %3990 = vrot.lane.b32.xlu1 %v3985_v47, %s8317_s23  ;;  %4002 = vrot.lane.b32.xlu2 %v3998_v45, %s8317_s23 }
 0x4ad   : > { %3988 = vrot.lane.b32.xlu0 %v3984_v31, %s8317_s23 }
 0x4ae   : > { %v3697_v27 = vpop.permute.xlu1 %3696  ;;  %v3767_v12 = vpop.permute.xlu2 %3766 }
 0x4af   : > { %v3701_v20 = vadd.f32 %v3697_v27, %v7849_v33  ;;  %v3695_v25 = vpop.permute.xlu0 %3694  ;;  %v4039_v33 = vstv %s7888_s21 }
 0x4b0   : > { %v3700_v59 = vadd.f32 %v3695_v25, %v3644_v28  ;;  %v4040_v10 = vmul.f32 %v4039_v33, %v7626_v54  ;;  %v4041_v28 = vmul.f32 %v4039_v33, %v7640_v11 }
 0x4b2   : > { %v3756_v14 = vadd.f32 %v3751_v50, %v3700_v59 }
 0x4b4   : > { %4016 = vrot.lane.b32.xlu1 %v4012_v55, %s8317_s23  ;;  %4018 = vrot.lane.b32.xlu2 %v4013_v61, %s8317_s23 }
 0x4b5   : > { %4004 = vrot.lane.b32.xlu0 %v3999_v52, %s8317_s23 }
 0x4b6   : > { %v3723_v38 = vpop.permute.xlu1 %3722  ;;  %v3793_v15 = vpop.permute.xlu2 %3792 }
 0x4b7   : > { %v3728_v21 = vadd.f32 %v3723_v38, %v3672_v53  ;;  %v3711_v49 = vpop.permute.xlu0 %3710 }
 0x4b8   : > { %v3715_v5 = vadd.f32 %v3711_v49, %v3659_v23 }
 0x4ba   : > { %v3771_v46 = vadd.f32 %v3767_v12, %v3715_v5 }
 0x4bc   : > { %4032 = vrot.lane.b32.xlu1 %v4027_v57, %s8317_s23  ;;  %4044 = vrot.lane.b32.xlu2 %v4040_v10, %s8317_s23 }
 0x4bd   : > { %4030 = vrot.lane.b32.xlu0 %v4026_v34, %s8317_s23 }
 0x4be   : > { %v3739_v44 = vpop.permute.xlu1 %3738  ;;  %v3809_v3 = vpop.permute.xlu2 %3808 }
 0x4bf   : > { %v3743_v58 = vadd.f32 %v3739_v44, %v3687_v30  ;;  %v3737_v51 = vpop.permute.xlu0 %3736 }
 0x4c0   : > { %v3742_v8 = vadd.f32 %v3737_v51, %v3686_v26  ;;  %v4075_v51 = vstv %s7933_s2 }
 0x4c2   : > { %v3798_v9 = vadd.f32 %v3793_v15, %v3742_v8 }
 0x4c4   : > { %4058 = vrot.lane.b32.xlu1 %v4054_v37, %s8317_s23  ;;  %4060 = vrot.lane.b32.xlu2 %v4055_v43, %s8317_s23 }
 0x4c5   : > { %4046 = vrot.lane.b32.xlu0 %v4041_v28, %s8317_s23  ;;  %s7927_s23 = sld [smem:[#allocation13]] }
 0x4c6   : > { %v3765_v22 = vpop.permute.xlu1 %3764  ;;  %v3835_v19 = vpop.permute.xlu2 %3834 }
 0x4c7   : > { %v3770_v41 = vadd.f32 %v3765_v22, %v3714_v0  ;;  %v3753_v40 = vpop.permute.xlu0 %3752 }
 0x4c8   : > { %v3757_v62 = vadd.f32 %v3753_v40, %v3701_v20 }
 0x4ca   : > { %v7909_v53 = vadd.f32 %v3809_v3, %v3757_v62 }
 0x4ce   : > { %v3781_v18 = vpop.permute.xlu1 %3780  ;;  %v3851_v48 = vpop.permute.xlu2 %3850 }
 0x4cf   : > { %v3785_v54 = vadd.f32 %v3781_v18, %v3729_v17  ;;  %v3779_v2 = vpop.permute.xlu0 %3778 }
 0x4d0   : > { %v3784_v36 = vadd.f32 %v3779_v2, %v3728_v21  ;;  %v4067_v21 = vstv %s7927_s23  ;;  %v4079_v2 = vstv %s7939_s18 }
 0x4d2   : > { %v7911_v30 = vadd.f32 %v3835_v19, %v3784_v36 }
 0x4d6   : > { %v3807_v11 = vpop.permute.xlu1 %3806  ;;  %v3877_v42 = vpop.permute.xlu2 %3876 }
 0x4d7   : > { %v7913_v23 = vadd.f32 %v3807_v11, %v3756_v14  ;;  %v3795_v24 = vpop.permute.xlu0 %3794 }
 0x4d8   : > { %v3799_v56 = vadd.f32 %v3795_v24, %v3743_v58 }
 0x4da   : > { %v3855_v59 = vadd.f32 %v3851_v48, %v3799_v56 }
 0x4de   : > { %v3823_v1 = vpop.permute.xlu1 %3822  ;;  %v3893_v60 = vpop.permute.xlu2 %3892 }
 0x4df   : > { %v7915_v6 = vadd.f32 %v3823_v1, %v3771_v46  ;;  %v3821_v16 = vpop.permute.xlu0 %3820  ;;  %v4071_v1 = vstv %s4632_s13 }
 0x4e0   : > { %v3826_v15 = vadd.f32 %v3821_v16, %v3770_v41 }
 0x4e2   : > { %v3882_v39 = vadd.f32 %v3877_v42, %v3826_v15 }
 0x4e6   : > { %v3849_v29 = vpop.permute.xlu1 %3848  ;;  %v7917_v13 = vpop.permute.xlu2 %3918 }
 0x4e7   : > { %v3837_v50 = vpop.permute.xlu0 %3836  ;;  %v3854_v10 = vadd.f32 %v3849_v29, %v3798_v9 }
 0x4e8   : > { %v3841_v3 = vadd.f32 %v3837_v50, %v3785_v54 }
 0x4ea   : > { %v3897_v8 = vadd.f32 %v3893_v60, %v3841_v3 }
 0x4ee   : > { %v3865_v0 = vpop.permute.xlu1 %3864  ;;  %v7919_v26 = vpop.permute.xlu2 %3934 }
 0x4ef   : > { %v3863_v4 = vpop.permute.xlu0 %3862  ;;  %v3869_v19 = vadd.f32 %v3865_v0, %v7909_v53 }
 0x4f0   : > { %v3868_v40 = vadd.f32 %v3863_v4, %v7913_v23 }
 0x4f2   : > { %v3924_v11 = vadd.f32 %v7917_v13, %v3868_v40 }
 0x4f6   : > { %v7921_v32 = vpop.permute.xlu1 %3890  ;;  %v3961_v35 = vpop.permute.xlu2 %3960 }
 0x4f7   : > { %v7923_v63 = vpop.permute.xlu0 %3878  ;;  %v3896_v23 = vadd.f32 %v7921_v32, %v7911_v30 }
 0x4f8   : > { %v3883_v50 = vadd.f32 %v7923_v63, %v7915_v6 }
 0x4fe   : > { %v3907_v47 = vpop.permute.xlu1 %3906  ;;  %v3977_v31 = vpop.permute.xlu2 %3976 }
 0x4ff   : > { %v3905_v45 = vpop.permute.xlu0 %3904  ;;  %v3911_v61 = vadd.f32 %v3907_v47, %v3855_v59  ;;  %v3939_v47 = vadd.f32 %v7919_v26, %v3883_v50 }
 0x500   : > { %v3910_v58 = vadd.f32 %v3905_v45, %v3854_v10 }
 0x502   : > { %v3966_v43 = vadd.f32 %v3961_v35, %v3910_v58 }
 0x506   : > { %v3933_v27 = vpop.permute.xlu1 %3932  ;;  %v7925_v17 = vpop.permute.xlu2 %4002 }
 0x507   : > { %v3921_v12 = vpop.permute.xlu0 %3920  ;;  %v3938_v33 = vadd.f32 %v3933_v27, %v3882_v39 }
 0x508   : > { %v3925_v18 = vadd.f32 %v3921_v12, %v3869_v19 }
 0x50a   : > { %v3981_v24 = vadd.f32 %v3977_v31, %v3925_v18 }
 0x50e   : > { %v3949_v20 = vpop.permute.xlu1 %3948  ;;  %v4019_v55 = vpop.permute.xlu2 %4018 }
 0x50f   : > { %v3947_v25 = vpop.permute.xlu0 %3946  ;;  %v3953_v28 = vadd.f32 %v3949_v20, %v3897_v8 }
 0x510   : > { %v3952_v13 = vadd.f32 %v3947_v25, %v3896_v23 }
 0x512   : > { %v4008_v30 = vadd.f32 %v7925_v17, %v3952_v13 }
 0x516   : > { %v3975_v52 = vpop.permute.xlu1 %3974  ;;  %v4045_v34 = vpop.permute.xlu2 %4044 }
 0x517   : > { %v3963_v38 = vpop.permute.xlu0 %3962  ;;  %v3980_v53 = vadd.f32 %v3975_v52, %v3924_v11 }
 0x518   : > { %v3967_v14 = vadd.f32 %v3963_v38, %v3911_v61 }
 0x51a   : > { %v4023_v49 = vadd.f32 %v4019_v55, %v3967_v14 }
 0x51c   : > { %v4069_v5 = vadd.f32 %v4067_v21, %v4023_v49 }
 0x51e   : > { %v3991_v57 = vpop.permute.xlu1 %3990  ;;  %4084 = vst.msk [vmem:[%s7935_s16 + $0x8] sm:$0xff] %vm4082_vm3, %v4069_v5  ;;  %v4061_v48 = vpop.permute.xlu2 %4060 }
 0x51f   : > { %v3989_v44 = vpop.permute.xlu0 %3988  ;;  %v3995_v6 = vadd.f32 %v3991_v57, %v3939_v47 }
 0x520   : > { %v3994_v46 = vadd.f32 %v3989_v44, %v3938_v33 }
 0x522   : > { %v4050_v7 = vadd.f32 %v4045_v34, %v3994_v46 }
 0x524   : > { %v4076_v37 = vadd.f32 %v4075_v51, %v4050_v7 }
 0x526   : > { %v4017_v22 = vpop.permute.xlu1 %4016  ;;  %4637 = vst.msk [vmem:[%s7935_s16 + $0x20] sm:$0xff] %vm4082_vm3, %v4076_v37 }
 0x527   : > { %v4022_v9 = vadd.f32 %v4017_v22, %v3966_v43  ;;  %v4005_v41 = vpop.permute.xlu0 %4004 }
 0x528   : > { %v4009_v62 = vadd.f32 %v4005_v41, %v3953_v28 }
 0x529   : > { %v4068_v54 = vadd.f32 %v4067_v21, %v4022_v9 }
 0x52a   : > { %v4065_v36 = vadd.f32 %v4061_v48, %v4009_v62 }
 0x52b   : > { %4083 = vst.msk [vmem:[%s7935_s16] sm:$0xff] %vm4082_vm3, %v4068_v54 }
 0x52c   : > { %v4081_v42 = vadd.f32 %v4079_v2, %v4065_v36 }
 0x52e   : > { %v4033_v60 = vpop.permute.xlu1 %4032  ;;  %4640 = vst.msk [vmem:[%s7935_s16 + $0x38] sm:$0xff] %vm4082_vm3, %v4081_v42 }
 0x52f   : > { %v4037_v16 = vadd.f32 %v4033_v60, %v3981_v24  ;;  %v4031_v29 = vpop.permute.xlu0 %4030 }
 0x530   : > { %v4036_v0 = vadd.f32 %v4031_v29, %v3980_v53 }
 0x531   : > { %v4073_v4 = vadd.f32 %v4071_v1, %v4037_v16 }
 0x532   : > { %v4072_v35 = vadd.f32 %v4071_v1, %v4036_v0 }
 0x533   : > { %4636 = vst.msk [vmem:[%s7935_s16 + $0x18] sm:$0xff] %vm4082_vm3, %v4073_v4 }
 0x534   : > { %4635 = vst.msk [vmem:[%s7935_s16 + $0x10] sm:$0xff] %vm4082_vm3, %v4072_v35 }
 0x536   : > { %v4059_v32 = vpop.permute.xlu1 %4058 }
 0x537   : > { %v4064_v63 = vadd.f32 %v4059_v32, %v4008_v30  ;;  %v4047_v45 = vpop.permute.xlu0 %4046 }
 0x538   : > { %v4051_v31 = vadd.f32 %v4047_v45, %v3995_v6 }
 0x539   : > { %v4080_v27 = vadd.f32 %v4079_v2, %v4064_v63 }
 0x53a   : > { %v4077_v26 = vadd.f32 %v4075_v51, %v4051_v31 }
 0x53b   : > { %4639 = vst.msk [vmem:[%s7935_s16 + $0x30] sm:$0xff] %vm4082_vm3, %v4080_v27 }
 0x53c   : > { %4638 = vst.msk [vmem:[%s7935_s16 + $0x28] sm:$0xff] %vm4082_vm3, %v4077_v26 }
 0x53d   : > { %4895 = shalt.err (!%p4892_p8)
}
 0x53e   : > { %s4957_s17 = smov 128   ;;  %s4958_s2 = smov 8  }
 0x53f   : > { %4672 = dma.vmem_to_hbm [thread:$0]  (%p5037_p5), %s4108_s20, 1024, %s4110_s28, %s4095_s8, %s4957_s17, %s4957_s17, %s4958_s2  }
 0x540 PF: > { %p4709_p9 = scmp.ge.s32.totalorder %s4946_s27, 2  ;;  %s4124_s16 = sand.u32 1, %s4934_s24  }
 0x541   : > { %s4125_s18 = scalar_lea.sflag [#allocation5], %s4124_s16 }
 0x542   : > { %p4694_p10 = pnand %p4709_p9, %p5041_p6 }
 0x544   : > { %p4695_p11 = pneg %p4694_p10 }
 0x546   : > { %4929 = dma.done.wait (%p4695_p11), %s4125_s18, 1024  }
 0x547   : > { %4931 = vsyncadd (%p4695_p11), %s4125_s18, 4294966272  ;;  %p21_p12 = scmp.ge.s32.totalorder %s5024_s30, 4   ;;  %s8322_s24 = smov %s4938_s25 }
 0x548   : > { %s8323_s25 = smov %s4942_s26  ;;  %s8324_s26 = smov %s5035_s10 }
 0x549   : > { %s8325_s27 = smov %s5024_s30  ;;  %23 = sbr.rel (!%p21_p12) target bundleno = 12 (0xc), region = 124 }
 0x54e   :  { %4131 = vsyncpa [#allocation5], 1 }
 0x54f   :  { %4133 = vsyncpa [#allocation5 + $0x1], 1 }
 0x550   :  { %4134 = vsyncpa [#allocation6], 1 }
 0x551   :  { %4136 = vsyncpa [#allocation6 + $0x1], 1 }
 0x552   :  { %4137 = vsyncpa [#allocation8], 1 }
 0x553   :  { %4138 = vsyncpa [#allocation11], 1 }
 0x554   :  { %4139 = vsyncpa [#allocation14], 1 }

</bundles_post_ra>
